<compile_context>
chip_gen: v5e
topology: v5e:2x2
jax: 0.10.0
libtpu: 0.0.40
codegen_flags: <defaults>
</compile_context>

<pallas_src>
import jax
import jax.numpy as jnp
import numpy as np
from jax.experimental import pallas as pl
from jax.experimental.pallas import tpu as pltpu


# ----------------------------- Pallas kernel ------------------------------ #

def dw_spiral_deblock_kernel(pooled_ref, idx_ref, w_ref, o_ref):
    """One (batch, V-tile) grid step.

    pooled_ref : (V_k, C_in)           pooled features of this batch (VMEM slab)
    idx_ref    : (TV, S) int32         spiral neighbor indices for this V tile
    w_ref      : (S, C_in, C_out_pad)  fused depthwise*pointwise weight
    o_ref      : (TV, C_out_pad)       output tile (ReLU applied)
    """
    tv, c_out_pad = o_ref.shape
    v_k = pooled_ref.shape[0]
    s_len = idx_ref.shape[1]

    pooled = pooled_ref[...]                                   # (V_k, C_in)
    idx = idx_ref[...]                                         # (TV, S) int32
    iota_v = jax.lax.broadcasted_iota(jnp.int32, (tv, v_k), 1)

    acc = jnp.zeros((tv, c_out_pad), jnp.float32)
    for s in range(s_len):                                     # S is small/static (9)
        # One-hot row gather on the MXU: g_s[r, c] = pooled[idx[r, s], c]
        onehot = (iota_v == idx[:, s:s + 1]).astype(pooled.dtype)     # (TV, V_k)
        g_s = jnp.dot(onehot, pooled, preferred_element_type=jnp.float32)
        # Fused depthwise(s) * pointwise contribution (f32 accumulation).
        acc = acc + jnp.dot(g_s.astype(w_ref.dtype), w_ref[s],
                            preferred_element_type=jnp.float32)

    o_ref[...] = jnp.maximum(acc, 0.0).astype(o_ref.dtype)


# ------------------------------- helpers ----------------------------------- #

def _round_up(n, m):
    return ((n + m - 1) // m) * m


def _pick_tile_v(v_out, batch):
    """Largest of {512, 256, 128} that is not absurdly larger than V_out and
    keeps at least 2 total parallel grid steps (feeds both v7x TensorCores)."""
    cap = max(128, _round_up(v_out, 128))
    for t in (512, 256, 128):
        if t > cap:
            continue
        if batch * pl.cdiv(v_out, t) >= 2:
            return t
    return 128


def _vmem_limit_bytes(v_k, c_in, tv, s_len, c_out_pad, cdt, out_dtype):
    """Derive the VMEM budget from the actual block sizes (+ headroom)."""
    cb = jnp.dtype(cdt).itemsize
    ob = jnp.dtype(out_dtype).itemsize
    pooled_blk = v_k * c_in * cb
    idx_blk = tv * s_len * 4
    w_blk = s_len * c_in * c_out_pad * cb
    out_blk = tv * c_out_pad * ob
    dbuf = 2 * (pooled_blk + idx_blk + w_blk + out_blk)        # double-buffered
    temps = tv * v_k * cb + tv * c_in * 4 + 2 * tv * c_out_pad * 4
    need = int(1.5 * (dbuf + temps)) + (4 << 20)
    # Floor 16 MiB; cap 48 MiB so the same choice is safe on v7x (64 MiB VMEM).
    return int(min(max(need, 16 << 20), 48 << 20))


# ------------------------------- wrapper ----------------------------------- #

def dw_spiral_deblock(x, up_transform, row_map, spiral_indices,
                      dw_weight, pw_weight, *, tile_v=None,
                      compute_dtype=jnp.bfloat16, out_dtype=None,
                      interpret=False):
    """Pallas implementation of DWSpiralDeblock.forward.

    x              : (B, V_in, C_in) float32
    up_transform   : (row, col, value) sparse upsample triplet (row unused)
    row_map        : (V_out, 3) int32 indices into the nnz entries
    spiral_indices : (V_out, S) int32 spiral neighborhoods on the fine mesh
    dw_weight      : (C_in, S)   depthwise spiral-conv weight
    pw_weight      : (C_in, C_out) pointwise (1x1) conv weight
    compute_dtype  : MXU operand dtype (default bf16; accumulation is f32).
    out_dtype      : output dtype (default x.dtype; bf16 halves store bytes).
    """
    _, col, value = up_transform
    B, V_in, C_in = x.shape
    V_out, S = spiral_indices.shape
    C_out = pw_weight.shape[1]
    out_dtype = x.dtype if out_dtype is None else out_dtype
    cdt = x.dtype if compute_dtype is None else compute_dtype

    # --- Pool (sparse mesh upsample) composed into ONE dense matmul -------- #
    # A[j, i] = sum_t value[row_map[j, t]] * [col[row_map[j, t]] == i]
    cols3 = col[row_map]                                       # (V_out, 3)
    vals3 = value[row_map].astype(jnp.float32)                 # (V_out, 3)
    rows3 = jnp.broadcast_to(
        jnp.arange(V_out, dtype=jnp.int32)[:, None], row_map.shape)
    pool_mat = jnp.zeros((V_out, V_in), jnp.float32).at[
        rows3.reshape(-1), cols3.reshape(-1)].add(vals3.reshape(-1))
    pooled = jnp.einsum('oi,bic->boc', pool_mat, x,
                        precision=jax.lax.Precision.HIGHEST)   # (B, V_out, C_in)

    # Cast to the compute dtype BEFORE any padding/tiling (halves kernel reads).
    pooled = pooled.astype(cdt)

    # Pad the pooled slab's V dim (the one-hot contraction dim) to 128.
    V_k = _round_up(max(V_out, 128), 128)
    if V_k != V_out:
        pooled = jnp.pad(pooled, ((0, 0), (0, V_k - V_out), (0, 0)))

    # V tiling: pad V_out to a multiple of the tile -> exact-division grid.
    tv = _round_up(tile_v, 8) if tile_v is not None else _pick_tile_v(V_out, B)
    V_pad = _round_up(V_out, tv)
    idx = spiral_indices.astype(jnp.int32)
    if V_pad != V_out:
        idx = jnp.pad(idx, ((0, V_pad - V_out), (0, 0)))       # padded rows gather row 0

    # Fused depthwise*pointwise weight: w[s, c, o] = dw[c, s] * pw[c, o].
    c_out_pad = _round_up(C_out, 128)
    w_fused = jnp.transpose(dw_weight)[:, :, None] * pw_weight[None, :, :]
    if c_out_pad != C_out:
        w_fused = jnp.pad(w_fused, ((0, 0), (0, 0), (0, c_out_pad - C_out)))
    w_fused = w_fused.astype(cdt)

    grid = (B, V_pad // tv)
    vmem_limit = _vmem_limit_bytes(V_k, C_in, tv, S, c_out_pad, cdt, out_dtype)

    out = pl.pallas_call(
        dw_spiral_deblock_kernel,
        out_shape=jax.ShapeDtypeStruct((B, V_pad, c_out_pad), out_dtype),
        grid=grid,
        in_specs=[
            # Pooled slab: resident across all V tiles of a batch (constant
            # block index along the V axis -> re-DMA'd only when b changes).
            pl.BlockSpec((None, V_k, C_in), lambda b, v: (b, 0, 0)),
            # Spiral indices for this V tile.
            pl.BlockSpec((tv, S), lambda b, v: (v, 0)),
            # Fused weight: constant block.
            pl.BlockSpec((S, C_in, c_out_pad), lambda b, v: (0, 0, 0)),
        ],
        out_specs=pl.BlockSpec((None, tv, c_out_pad), lambda b, v: (b, v, 0)),
        compiler_params=pltpu.CompilerParams(
            dimension_semantics=("parallel", "parallel"),
            vmem_limit_bytes=vmem_limit,
        ),
        interpret=interpret,
    )(pooled, idx, w_fused)

    return out[:, :V_out, :C_out]


# ----------------------------- reference ----------------------------------- #

def reference_forward(x, up_transform, row_map, spiral_indices, dw_weight, pw_weight):
    """Pure-JAX transcription of the PyTorch forward (correctness check)."""
    _, col, value = up_transform
    out = x[:, col, :] * value[None, :, None]
    out3 = (out[:, row_map[:, 0], :]
            + out[:, row_map[:, 1], :]
            + out[:, row_map[:, 2], :])                        # Pool -> (B, V_out, C_in)
    g = out3[:, spiral_indices, :]                             # (B, V_out, S, C_in)
    y = jnp.einsum('bvsc,cs->bvc', g, dw_weight,
                   precision=jax.lax.Precision.HIGHEST)        # depthwise spiral conv
    o = jnp.einsum('bvc,co->bvo', y, pw_weight,
                   precision=jax.lax.Precision.HIGHEST)        # pointwise 1x1 conv
    return jnp.maximum(o, 0.0)                                 # ReLU


# -------------------------------- demo ------------------------------------- #

if __name__ == "__main__":
    key = jax.random.PRNGKey(0)
    k_x, k_val, k_col, k_rmap, k_spi, k_dw, k_pw = jax.random.split(key, 7)

    # Small, module-consistent shapes (coarse mesh -> upsampled mesh).
    B, V_in, V_out = 2, 96, 192
    C_in, C_out = 32, 16
    S = 9                               # spiral length
    NNZ = 3 * V_out                     # nonzeros in the sparse up_transform

    x = jax.random.normal(k_x, (B, V_in, C_in), dtype=jnp.float32)

    # Sparse upsample transform (row, col, value); row is unused by Pool math.
    row = jnp.zeros((NNZ,), dtype=jnp.int32)
    col = jax.random.randint(k_col, (NNZ,), 0, V_in, dtype=jnp.int32)
    value = jax.random.uniform(k_val, (NNZ,), dtype=jnp.float32)
    up_transform = (row, col, value)

    row_map = jax.random.randint(k_rmap, (V_out, 3), 0, NNZ, dtype=jnp.int32)
    spiral_indices = jax.random.randint(k_spi, (V_out, S), 0, V_out, dtype=jnp.int32)

    dw_weight = jax.random.uniform(k_dw, (C_in, S), dtype=jnp.float32,
                                   minval=-0.5, maxval=0.5)
    pw_weight = jax.random.uniform(k_pw, (C_in, C_out), dtype=jnp.float32,
                                   minval=-0.5, maxval=0.5)

    ref = jax.block_until_ready(reference_forward(
        x, up_transform, row_map, spiral_indices, dw_weight, pw_weight))

    # Exactness check: f32 operands -> tight tolerance.
    out_f32 = jax.block_until_ready(dw_spiral_deblock(
        x, up_transform, row_map, spiral_indices, dw_weight, pw_weight,
        compute_dtype=jnp.float32))

    # Default fast path: bf16 operands, f32 accumulation -> loose tolerance
    # (expected bf16 quantization, not a bug).
    out_bf16 = jax.block_until_ready(dw_spiral_deblock(
        x, up_transform, row_map, spiral_indices, dw_weight, pw_weight))

    if out_f32.shape != (B, V_out, C_out) or out_bf16.shape != (B, V_out, C_out):
        raise AssertionError(f"bad output shapes {out_f32.shape} / {out_bf16.shape}")
    np.testing.assert_allclose(np.asarray(out_f32), np.asarray(ref),
                               rtol=1e-4, atol=1e-4)
    np.testing.assert_allclose(np.asarray(out_bf16), np.asarray(ref),
                               rtol=5e-2, atol=1e-1)
    print("KERNEL_OK")
</pallas_src>

<mosaic_0001>
module attributes {stable_mosaic.version = 11 : i64} {
  func.func @dw_spiral_deblock_kernel(%arg0: i32, %arg1: i32, %arg2: memref<1x256x32xf32, #tpu.memory_space<vmem>>, %arg3: memref<256x9xi32, #tpu.memory_space<vmem>>, %arg4: memref<9x32x128xf32, #tpu.memory_space<vmem>>, %arg5: memref<1x256x128xf32, #tpu.memory_space<vmem>>) attributes {dimension_semantics = [#tpu.dimension_semantics<parallel>, #tpu.dimension_semantics<parallel>], iteration_bounds = array<i64: 2, 1>, scalar_prefetch = 0 : i64, scratch_operands = 0 : i64, tpu.core_type = #tpu.core_type<tc>, window_params = [{transform_indices = @transform_0, window_bounds = array<i64: 1, 256, 32>}, {transform_indices = @transform_1, window_bounds = array<i64: 256, 9>}, {pipeline_mode = #tpu.pipeline_mode<synchronous>, transform_indices = @transform_2, window_bounds = array<i64: 9, 32, 128>}, {transform_indices = @transform_3, window_bounds = array<i64: 1, 256, 128>}]} {
    %c0 = arith.constant 0 : index
    %c0_0 = arith.constant 0 : index
    %c0_1 = arith.constant 0 : index
    %0 = vector.load %arg2[%c0, %c0_0, %c0_1] : memref<1x256x32xf32, #tpu.memory_space<vmem>>, vector<1x256x32xf32>
    %1 = vector.shape_cast %0 : vector<1x256x32xf32> to vector<256x32xf32>
    %c0_2 = arith.constant 0 : index
    %c0_3 = arith.constant 0 : index
    %2 = vector.load %arg3[%c0_2, %c0_3] : memref<256x9xi32, #tpu.memory_space<vmem>>, vector<256x9xi32>
    %3 = tpu.iota {dimensions = array<i32: 1>} : vector<256x256xi32>
    %cst = arith.constant 0.000000e+00 : f32
    %4 = vector.broadcast %cst : f32 to vector<256x128xf32>
    %5 = vector.extract_strided_slice %2 {offsets = [0, 0], sizes = [256, 1], strides = [1, 1]} : vector<256x9xi32> to vector<256x1xi32>
    %6 = vector.broadcast %5 : vector<256x1xi32> to vector<256x256xi32>
    %7 = arith.cmpi eq, %3, %6 : vector<256x256xi32>
    %8 = arith.extui %7 : vector<256x256xi1> to vector<256x256xi32>
    %9 = arith.sitofp %8 : vector<256x256xi32> to vector<256x256xf32>
    %cst_4 = arith.constant dense<0.000000e+00> : vector<256x32xf32>
    %10 = tpu.matmul %9, %1, %cst_4 {dimension_numbers = #tpu.dot_dimension_numbers<[1], [0], [0], [1], [0, 0, 1, 1], [], []>} : vector<256x256xf32>, vector<256x32xf32>, vector<256x32xf32> -> vector<256x32xf32>
    %c0_5 = arith.constant 0 : index
    %c0_6 = arith.constant 0 : index
    %c0_7 = arith.constant 0 : index
    %11 = vector.load %arg4[%c0_5, %c0_6, %c0_7] : memref<9x32x128xf32, #tpu.memory_space<vmem>>, vector<1x32x128xf32>
    %12 = vector.shape_cast %11 : vector<1x32x128xf32> to vector<32x128xf32>
    %cst_8 = arith.constant dense<0.000000e+00> : vector<256x128xf32>
    %13 = tpu.matmul %10, %12, %cst_8 {dimension_numbers = #tpu.dot_dimension_numbers<[1], [0], [0], [1], [0, 0, 1, 1], [], []>} : vector<256x32xf32>, vector<32x128xf32>, vector<256x128xf32> -> vector<256x128xf32>
    %14 = arith.addf %4, %13 : vector<256x128xf32>
    %15 = vector.extract_strided_slice %2 {offsets = [0, 1], sizes = [256, 1], strides = [1, 1]} : vector<256x9xi32> to vector<256x1xi32>
    %16 = vector.broadcast %15 : vector<256x1xi32> to vector<256x256xi32>
    %17 = arith.cmpi eq, %3, %16 : vector<256x256xi32>
    %18 = arith.extui %17 : vector<256x256xi1> to vector<256x256xi32>
    %19 = arith.sitofp %18 : vector<256x256xi32> to vector<256x256xf32>
    %cst_9 = arith.constant dense<0.000000e+00> : vector<256x32xf32>
    %20 = tpu.matmul %19, %1, %cst_9 {dimension_numbers = #tpu.dot_dimension_numbers<[1], [0], [0], [1], [0, 0, 1, 1], [], []>} : vector<256x256xf32>, vector<256x32xf32>, vector<256x32xf32> -> vector<256x32xf32>
    %c1 = arith.constant 1 : index
    %c0_10 = arith.constant 0 : index
    %c0_11 = arith.constant 0 : index
    %21 = vector.load %arg4[%c1, %c0_10, %c0_11] : memref<9x32x128xf32, #tpu.memory_space<vmem>>, vector<1x32x128xf32>
    %22 = vector.shape_cast %21 : vector<1x32x128xf32> to vector<32x128xf32>
    %cst_12 = arith.constant dense<0.000000e+00> : vector<256x128xf32>
    %23 = tpu.matmul %20, %22, %cst_12 {dimension_numbers = #tpu.dot_dimension_numbers<[1], [0], [0], [1], [0, 0, 1, 1], [], []>} : vector<256x32xf32>, vector<32x128xf32>, vector<256x128xf32> -> vector<256x128xf32>
    %24 = arith.addf %14, %23 : vector<256x128xf32>
    %25 = vector.extract_strided_slice %2 {offsets = [0, 2], sizes = [256, 1], strides = [1, 1]} : vector<256x9xi32> to vector<256x1xi32>
    %26 = vector.broadcast %25 : vector<256x1xi32> to vector<256x256xi32>
    %27 = arith.cmpi eq, %3, %26 : vector<256x256xi32>
    %28 = arith.extui %27 : vector<256x256xi1> to vector<256x256xi32>
    %29 = arith.sitofp %28 : vector<256x256xi32> to vector<256x256xf32>
    %cst_13 = arith.constant dense<0.000000e+00> : vector<256x32xf32>
    %30 = tpu.matmul %29, %1, %cst_13 {dimension_numbers = #tpu.dot_dimension_numbers<[1], [0], [0], [1], [0, 0, 1, 1], [], []>} : vector<256x256xf32>, vector<256x32xf32>, vector<256x32xf32> -> vector<256x32xf32>
    %c2 = arith.constant 2 : index
    %c0_14 = arith.constant 0 : index
    %c0_15 = arith.constant 0 : index
    %31 = vector.load %arg4[%c2, %c0_14, %c0_15] : memref<9x32x128xf32, #tpu.memory_space<vmem>>, vector<1x32x128xf32>
    %32 = vector.shape_cast %31 : vector<1x32x128xf32> to vector<32x128xf32>
    %cst_16 = arith.constant dense<0.000000e+00> : vector<256x128xf32>
    %33 = tpu.matmul %30, %32, %cst_16 {dimension_numbers = #tpu.dot_dimension_numbers<[1], [0], [0], [1], [0, 0, 1, 1], [], []>} : vector<256x32xf32>, vector<32x128xf32>, vector<256x128xf32> -> vector<256x128xf32>
    %34 = arith.addf %24, %33 : vector<256x128xf32>
    %35 = vector.extract_strided_slice %2 {offsets = [0, 3], sizes = [256, 1], strides = [1, 1]} : vector<256x9xi32> to vector<256x1xi32>
    %36 = vector.broadcast %35 : vector<256x1xi32> to vector<256x256xi32>
    %37 = arith.cmpi eq, %3, %36 : vector<256x256xi32>
    %38 = arith.extui %37 : vector<256x256xi1> to vector<256x256xi32>
    %39 = arith.sitofp %38 : vector<256x256xi32> to vector<256x256xf32>
    %cst_17 = arith.constant dense<0.000000e+00> : vector<256x32xf32>
    %40 = tpu.matmul %39, %1, %cst_17 {dimension_numbers = #tpu.dot_dimension_numbers<[1], [0], [0], [1], [0, 0, 1, 1], [], []>} : vector<256x256xf32>, vector<256x32xf32>, vector<256x32xf32> -> vector<256x32xf32>
    %c3 = arith.constant 3 : index
    %c0_18 = arith.constant 0 : index
    %c0_19 = arith.constant 0 : index
    %41 = vector.load %arg4[%c3, %c0_18, %c0_19] : memref<9x32x128xf32, #tpu.memory_space<vmem>>, vector<1x32x128xf32>
    %42 = vector.shape_cast %41 : vector<1x32x128xf32> to vector<32x128xf32>
    %cst_20 = arith.constant dense<0.000000e+00> : vector<256x128xf32>
    %43 = tpu.matmul %40, %42, %cst_20 {dimension_numbers = #tpu.dot_dimension_numbers<[1], [0], [0], [1], [0, 0, 1, 1], [], []>} : vector<256x32xf32>, vector<32x128xf32>, vector<256x128xf32> -> vector<256x128xf32>
    %44 = arith.addf %34, %43 : vector<256x128xf32>
    %45 = vector.extract_strided_slice %2 {offsets = [0, 4], sizes = [256, 1], strides = [1, 1]} : vector<256x9xi32> to vector<256x1xi32>
    %46 = vector.broadcast %45 : vector<256x1xi32> to vector<256x256xi32>
    %47 = arith.cmpi eq, %3, %46 : vector<256x256xi32>
    %48 = arith.extui %47 : vector<256x256xi1> to vector<256x256xi32>
    %49 = arith.sitofp %48 : vector<256x256xi32> to vector<256x256xf32>
    %cst_21 = arith.constant dense<0.000000e+00> : vector<256x32xf32>
    %50 = tpu.matmul %49, %1, %cst_21 {dimension_numbers = #tpu.dot_dimension_numbers<[1], [0], [0], [1], [0, 0, 1, 1], [], []>} : vector<256x256xf32>, vector<256x32xf32>, vector<256x32xf32> -> vector<256x32xf32>
    %c4 = arith.constant 4 : index
    %c0_22 = arith.constant 0 : index
    %c0_23 = arith.constant 0 : index
    %51 = vector.load %arg4[%c4, %c0_22, %c0_23] : memref<9x32x128xf32, #tpu.memory_space<vmem>>, vector<1x32x128xf32>
    %52 = vector.shape_cast %51 : vector<1x32x128xf32> to vector<32x128xf32>
    %cst_24 = arith.constant dense<0.000000e+00> : vector<256x128xf32>
    %53 = tpu.matmul %50, %52, %cst_24 {dimension_numbers = #tpu.dot_dimension_numbers<[1], [0], [0], [1], [0, 0, 1, 1], [], []>} : vector<256x32xf32>, vector<32x128xf32>, vector<256x128xf32> -> vector<256x128xf32>
    %54 = arith.addf %44, %53 : vector<256x128xf32>
    %55 = vector.extract_strided_slice %2 {offsets = [0, 5], sizes = [256, 1], strides = [1, 1]} : vector<256x9xi32> to vector<256x1xi32>
    %56 = vector.broadcast %55 : vector<256x1xi32> to vector<256x256xi32>
    %57 = arith.cmpi eq, %3, %56 : vector<256x256xi32>
    %58 = arith.extui %57 : vector<256x256xi1> to vector<256x256xi32>
    %59 = arith.sitofp %58 : vector<256x256xi32> to vector<256x256xf32>
    %cst_25 = arith.constant dense<0.000000e+00> : vector<256x32xf32>
    %60 = tpu.matmul %59, %1, %cst_25 {dimension_numbers = #tpu.dot_dimension_numbers<[1], [0], [0], [1], [0, 0, 1, 1], [], []>} : vector<256x256xf32>, vector<256x32xf32>, vector<256x32xf32> -> vector<256x32xf32>
    %c5 = arith.constant 5 : index
    %c0_26 = arith.constant 0 : index
    %c0_27 = arith.constant 0 : index
    %61 = vector.load %arg4[%c5, %c0_26, %c0_27] : memref<9x32x128xf32, #tpu.memory_space<vmem>>, vector<1x32x128xf32>
    %62 = vector.shape_cast %61 : vector<1x32x128xf32> to vector<32x128xf32>
    %cst_28 = arith.constant dense<0.000000e+00> : vector<256x128xf32>
    %63 = tpu.matmul %60, %62, %cst_28 {dimension_numbers = #tpu.dot_dimension_numbers<[1], [0], [0], [1], [0, 0, 1, 1], [], []>} : vector<256x32xf32>, vector<32x128xf32>, vector<256x128xf32> -> vector<256x128xf32>
    %64 = arith.addf %54, %63 : vector<256x128xf32>
    %65 = vector.extract_strided_slice %2 {offsets = [0, 6], sizes = [256, 1], strides = [1, 1]} : vector<256x9xi32> to vector<256x1xi32>
    %66 = vector.broadcast %65 : vector<256x1xi32> to vector<256x256xi32>
    %67 = arith.cmpi eq, %3, %66 : vector<256x256xi32>
    %68 = arith.extui %67 : vector<256x256xi1> to vector<256x256xi32>
    %69 = arith.sitofp %68 : vector<256x256xi32> to vector<256x256xf32>
    %cst_29 = arith.constant dense<0.000000e+00> : vector<256x32xf32>
    %70 = tpu.matmul %69, %1, %cst_29 {dimension_numbers = #tpu.dot_dimension_numbers<[1], [0], [0], [1], [0, 0, 1, 1], [], []>} : vector<256x256xf32>, vector<256x32xf32>, vector<256x32xf32> -> vector<256x32xf32>
    %c6 = arith.constant 6 : index
    %c0_30 = arith.constant 0 : index
    %c0_31 = arith.constant 0 : index
    %71 = vector.load %arg4[%c6, %c0_30, %c0_31] : memref<9x32x128xf32, #tpu.memory_space<vmem>>, vector<1x32x128xf32>
    %72 = vector.shape_cast %71 : vector<1x32x128xf32> to vector<32x128xf32>
    %cst_32 = arith.constant dense<0.000000e+00> : vector<256x128xf32>
    %73 = tpu.matmul %70, %72, %cst_32 {dimension_numbers = #tpu.dot_dimension_numbers<[1], [0], [0], [1], [0, 0, 1, 1], [], []>} : vector<256x32xf32>, vector<32x128xf32>, vector<256x128xf32> -> vector<256x128xf32>
    %74 = arith.addf %64, %73 : vector<256x128xf32>
    %75 = vector.extract_strided_slice %2 {offsets = [0, 7], sizes = [256, 1], strides = [1, 1]} : vector<256x9xi32> to vector<256x1xi32>
    %76 = vector.broadcast %75 : vector<256x1xi32> to vector<256x256xi32>
    %77 = arith.cmpi eq, %3, %76 : vector<256x256xi32>
    %78 = arith.extui %77 : vector<256x256xi1> to vector<256x256xi32>
    %79 = arith.sitofp %78 : vector<256x256xi32> to vector<256x256xf32>
    %cst_33 = arith.constant dense<0.000000e+00> : vector<256x32xf32>
    %80 = tpu.matmul %79, %1, %cst_33 {dimension_numbers = #tpu.dot_dimension_numbers<[1], [0], [0], [1], [0, 0, 1, 1], [], []>} : vector<256x256xf32>, vector<256x32xf32>, vector<256x32xf32> -> vector<256x32xf32>
    %c7 = arith.constant 7 : index
    %c0_34 = arith.constant 0 : index
    %c0_35 = arith.constant 0 : index
    %81 = vector.load %arg4[%c7, %c0_34, %c0_35] : memref<9x32x128xf32, #tpu.memory_space<vmem>>, vector<1x32x128xf32>
    %82 = vector.shape_cast %81 : vector<1x32x128xf32> to vector<32x128xf32>
    %cst_36 = arith.constant dense<0.000000e+00> : vector<256x128xf32>
    %83 = tpu.matmul %80, %82, %cst_36 {dimension_numbers = #tpu.dot_dimension_numbers<[1], [0], [0], [1], [0, 0, 1, 1], [], []>} : vector<256x32xf32>, vector<32x128xf32>, vector<256x128xf32> -> vector<256x128xf32>
    %84 = arith.addf %74, %83 : vector<256x128xf32>
    %85 = vector.extract_strided_slice %2 {offsets = [0, 8], sizes = [256, 1], strides = [1, 1]} : vector<256x9xi32> to vector<256x1xi32>
    %86 = vector.broadcast %85 : vector<256x1xi32> to vector<256x256xi32>
    %87 = arith.cmpi eq, %3, %86 : vector<256x256xi32>
    %88 = arith.extui %87 : vector<256x256xi1> to vector<256x256xi32>
    %89 = arith.sitofp %88 : vector<256x256xi32> to vector<256x256xf32>
    %cst_37 = arith.constant dense<0.000000e+00> : vector<256x32xf32>
    %90 = tpu.matmul %89, %1, %cst_37 {dimension_numbers = #tpu.dot_dimension_numbers<[1], [0], [0], [1], [0, 0, 1, 1], [], []>} : vector<256x256xf32>, vector<256x32xf32>, vector<256x32xf32> -> vector<256x32xf32>
    %c8 = arith.constant 8 : index
    %c0_38 = arith.constant 0 : index
    %c0_39 = arith.constant 0 : index
    %91 = vector.load %arg4[%c8, %c0_38, %c0_39] : memref<9x32x128xf32, #tpu.memory_space<vmem>>, vector<1x32x128xf32>
    %92 = vector.shape_cast %91 : vector<1x32x128xf32> to vector<32x128xf32>
    %cst_40 = arith.constant dense<0.000000e+00> : vector<256x128xf32>
    %93 = tpu.matmul %90, %92, %cst_40 {dimension_numbers = #tpu.dot_dimension_numbers<[1], [0], [0], [1], [0, 0, 1, 1], [], []>} : vector<256x32xf32>, vector<32x128xf32>, vector<256x128xf32> -> vector<256x128xf32>
    %94 = arith.addf %84, %93 : vector<256x128xf32>
    %cst_41 = arith.constant 0.000000e+00 : f32
    %95 = vector.broadcast %cst_41 : f32 to vector<256x128xf32>
    %96 = arith.maximumf %94, %95 : vector<256x128xf32>
    %c0_42 = arith.constant 0 : index
    %c0_43 = arith.constant 0 : index
    %c0_44 = arith.constant 0 : index
    %97 = vector.load %arg5[%c0_42, %c0_43, %c0_44] : memref<1x256x128xf32, #tpu.memory_space<vmem>>, vector<1x256x128xf32>
    %98 = vector.shape_cast %97 : vector<1x256x128xf32> to vector<256x128xf32>
    %99 = vector.shape_cast %96 : vector<256x128xf32> to vector<1x256x128xf32>
    tpu.vector_store %arg5[%c0_42, %c0_43, %c0_44], %99 {strides = array<i32>} : memref<1x256x128xf32, #tpu.memory_space<vmem>>, vector<1x256x128xf32>,
    return
  }
  func.func @transform_0(%arg0: i32, %arg1: i32) -> (i32, i32, i32) {
    %c0_i32 = arith.constant 0 : i32
    %c0_i32_0 = arith.constant 0 : i32
    %c0_i32_1 = arith.constant 0 : i32
    return %arg0, %c0_i32, %c0_i32_0 : i32, i32, i32
  }
  func.func @transform_1(%arg0: i32, %arg1: i32) -> (i32, i32) {
    %c0_i32 = arith.constant 0 : i32
    %c0_i32_0 = arith.constant 0 : i32
    return %arg1, %c0_i32 : i32, i32
  }
  func.func @transform_2(%arg0: i32, %arg1: i32) -> (i32, i32, i32) {
    %c0_i32 = arith.constant 0 : i32
    %c0_i32_0 = arith.constant 0 : i32
    %c0_i32_1 = arith.constant 0 : i32
    %c0_i32_2 = arith.constant 0 : i32
    return %c0_i32, %c0_i32_0, %c0_i32_1 : i32, i32, i32
  }
  func.func @transform_3(%arg0: i32, %arg1: i32) -> (i32, i32, i32) {
    %c0_i32 = arith.constant 0 : i32
    %c0_i32_0 = arith.constant 0 : i32
    return %arg0, %arg1, %c0_i32 : i32, i32, i32
  }
}

</mosaic_0001>

<bundles_post_ra>
// kernel: tpu_custom_call.1
= control target key start
LH: loop header
LB: loop body
LE: loop exit
PB: predicated region body
PF: predicated region fallthrough
CT: control target
= control target key end

     0   :  { %8 = vsyncpa [#allocation3], 0  ;;  %s14848_s0 = inlined_call_operand.vmem [shape: f32[2,256,32], index: 0, kind: input, shape index: {}]   ;;  %s14849_s1 = inlined_call_operand.vmem [shape: s32[256,9], index: 1, kind: input, shape index: {}]   ;;  %s14850_s2 = inlined_call_operand.vmem [shape: f32[9,32,128], index: 2, kind: input, shape index: {}]   ;;  %s14851_s3 = inlined_call_operand.hbm [shape: f32[2,256,128], index: 3, kind: output, shape index: {}]  }
   0x1   :  { %10 = vsyncpa [#allocation3 + $0x1], 0  ;;  %s9257_s12 = smov 0   ;;  %s9259_s13 = smov 0  }
   0x2   :  { %s9261_s14 = smov 0   ;;  %s9263_s15 = smov 0  }
   0x3   :  { %s9265_s16 = smov 0   ;;  %s9267_s17 = smov 0  }
   0x4 LB: > { %s7219_s18 = sadd.s32 4294967295, %s9223_s17   ;;  %s7220_s19 = sadd.s32 4294967294, %s9223_s17   ;;  %s9223_s17 = sphi %s9267_s17, %s16_s17   ;;  %s9219_s16 = sphi %s9265_s16, %s15479_s16   ;;  %s9215_s15 = sphi %s9263_s15, %s15478_s15   ;;  %s9211_s14 = sphi %s9261_s14, %s15477_s14   ;;  %s9207_s13 = sphi %s9259_s13, %s15476_s13   ;;  %s9203_s12 = sphi %s9257_s12, %s15475_s12  }
   0x5   : > { %s28_s20 = sadd.s32 1, %s9219_s16  ;;  %s110_s21 = sadd.s32 1, %s9211_s14 }
   0x6   : > { %p30_p0 = scmp.ge.s32.totalorder %s28_s20, 2  ;;  %p120_p1 = scmp.ne.s32.totalorder %s9211_s14, %s9207_s13 }
   0x7   : > { %p121_p2 = scmp.eq.s32.totalorder %s7219_s18, 1  ;;  %p126_p3 = scmp.ne.s32.totalorder %s9207_s13, %s9203_s12 }
   0x8   : > { %s15481_s20 = smov (%p30_p0, %s28_s20), 0  ;;  %p127_p5 = scmp.eq.s32.totalorder %s7220_s19, 1 }
   0x9   : > { %p9297_p4 = por %p121_p2, %p120_p1  ;;  %s105_s23 = ssub.s32 %s9219_s16, %s15481_s20 }
   0xa   : > { %p7224_p6 = scmp.ge.s32.totalorder %s9223_s17, 1  ;;  %p108_p7 = scmp.eq.s32.totalorder %s105_s23, 0 }
   0xb   : > { %p9304_p8 = por %p127_p5, %p126_p3  ;;  %p165_p9 = scmp.lt.s32.totalorder %s9223_s17, 3 }
   0xc   : > { %s9310_s25 = scalar_select %p108_p7, %s9211_s14, %s110_s21  }
   0xd   : > { %p166_p10 = pnand %p7224_p6, %p165_p9 }
   0xf   : > { %169 = sbr.rel (%p166_p10) target bundleno = 2388 (0x954), region = 32 }
  0x14   : > { %v264_v0 = vld [vmem:[%s14849_s1 + $0xd0] sm:$0xff]  ;;  %v262_v1 = vld [vmem:[%s14849_s1 + $0xc0] sm:$0xff]  ;;  %v9225_v2 = vmov 0   ;;  %v265_v4 = vld [vmem:[%s14849_s1 + $0xd8] sm:$0xff]  ;;  %v14852_v9 = vmov 1   ;;  %p194_p11 = scmp.lt.s32.totalorder %s9215_s15, 1  ;;  %v270_v59 = vlaneseq }
  0x15   : > { %8823 = vset.pattern.permute.xlu1 %v9225_v2  ;;  %8822 = vset.pattern.permute.xlu0 %v9225_v2  ;;  %v266_v3 = vld [vmem:[%s14849_s1 + $0xe0] sm:$0xff]  ;;  %v263_v5 = vld [vmem:[%s14849_s1 + $0xc8] sm:$0xff]  ;;  %v269_v7 = vld [vmem:[%s14849_s1 + $0xf8] sm:$0xff]  ;;  %s191_s7 = sand.u32 1, %s9207_s13   ;;  %s9165_s30 = scalar_lea.hbm %s14851_s3, 512 }
  0x16   : > { %352 = vperm.xlu1 %8823, %v264_v0   ;;  %346 = vperm.xlu0 %8822, %v262_v1   ;;  %v267_v6 = vld [vmem:[%s14849_s1 + $0xe8] sm:$0xff]  ;;  %v268_v8 = vld [vmem:[%s14849_s1 + $0xf0] sm:$0xff]  ;;  %v9343_v10 = vld [vmem:[%s14849_s1] sm:$0xff]  ;;  %s195_s8 = scalar_select %p194_p11, %s9215_s15, 1  ;;  %v9645_v61 = vand.u32 127, %v270_v59 }
  0x17   : > { %8824 = vset.pattern.permute.xlu2 %v9225_v2  ;;  %v9350_v11 = vld [vmem:[%s14849_s1 + $0x8] sm:$0xff]  ;;  %v9357_v12 = vld [vmem:[%s14849_s1 + $0x10] sm:$0xff]  ;;  %v9367_v13 = vld [vmem:[%s14849_s1 + $0x18] sm:$0xff] }
  0x18   : > { %358 = vperm.xlu2 %8824, %v266_v3   ;;  %v9372_v14 = vld [vmem:[%s14849_s1 + $0x20] sm:$0xff]  ;;  %s8705_s9 = sshll.u32 %s195_s8, 8  ;;  %v9388_v15 = vld [vmem:[%s14849_s1 + $0x28] sm:$0xff]  ;;  %v9420_v21 = vld [vmem:[%s14849_s1 + $0x30] sm:$0xff]  ;;  %s7225_s8 = sshll.u32 %s191_s7, 8 }
  0x19   : > { %s9381_s18 = scalar_lea.vmem %s14848_s0, %s8705_s9  ;;  %v9413_v20 = vld [vmem:[%s14849_s1 + $0x48] sm:$0xff]  ;;  %v9444_v25 = vld [vmem:[%s14849_s1 + $0x38] sm:$0xff]  ;;  %v9482_v32 = vld [vmem:[%s14849_s1 + $0x40] sm:$0xff]  ;;  %s14681_s9 = scalar_lea.vmem [#allocation2], %s7225_s8 }
  0x1a   : > { %v9391_v16 = vld [vmem:[%s9381_s18 + $0x78] sm:$0xff]  ;;  %v9396_v17 = vld [vmem:[%s9381_s18 + $0x70] sm:$0xff]  ;;  %v9400_v18 = vld [vmem:[%s9381_s18 + $0x68] sm:$0xff]  ;;  %s7128_s21 = sshll.u32 %s14681_s9, 4  ;;  %s7129_s21 = int_to_ptr.vmem [resolvable:$true] %s7128_s21 }
  0x1b   : > { %8707 = vmatpush.msra.mxu3 %v9391_v16  ;;  %561 = vmatpush.msra.mxu0 %v9391_v16  ;;  %v9408_v19 = vld [vmem:[%s9381_s18 + $0x60] sm:$0xff]  ;;  %v9426_v22 = vld [vmem:[%s9381_s18 + $0x58] sm:$0xff]  ;;  %v9429_v23 = vld [vmem:[%s9381_s18 + $0x50] sm:$0xff] }
  0x1c   : > { %1079 = vmatpush.msra.mxu2 %v9391_v16  ;;  %v9436_v24 = vld [vmem:[%s9381_s18 + $0x48] sm:$0xff]  ;;  %v9447_v26 = vld [vmem:[%s9381_s18 + $0x40] sm:$0xff]  ;;  %v9457_v27 = vld [vmem:[%s9381_s18 + $0x38] sm:$0xff] }
  0x1d   : > { %8708 = vmatpush.msra.mxu3 %v9396_v17  ;;  %562 = vmatpush.msra.mxu0 %v9396_v17  ;;  %v9464_v28 = vld [vmem:[%s9381_s18 + $0x30] sm:$0xff]  ;;  %v9467_v29 = vld [vmem:[%s9381_s18 + $0xf8] sm:$0xff]  ;;  %v9475_v31 = vld [vmem:[%s9381_s18 + $0x28] sm:$0xff] }
  0x1e   : > { %355 = vperm.xlu1 %8823, %v265_v4   ;;  %349 = vperm.xlu0 %8822, %v263_v5   ;;  %v9472_v30 = vld [vmem:[%s9381_s18 + $0xf0] sm:$0xff]  ;;  %v9486_v33 = vld [vmem:[%s9381_s18 + $0xe8] sm:$0xff]  ;;  %v9490_v34 = vld [vmem:[%s9381_s18 + $0x20] sm:$0xff] }
  0x1f   : > { %8709 = vmatpush.msra.mxu3 %v9400_v18  ;;  %1080 = vmatpush.msra.mxu2 %v9396_v17  ;;  %v9498_v35 = vld [vmem:[%s9381_s18 + $0x18] sm:$0xff]  ;;  %v9504_v36 = vld [vmem:[%s9381_s18 + $0x10] sm:$0xff]  ;;  %v9511_v37 = vld [vmem:[%s9381_s18 + $0x8] sm:$0xff] }
  0x20   : > { %361 = vperm.xlu2 %8824, %v267_v6   ;;  %563 = vmatpush.msra.mxu0 %v9400_v18  ;;  %v9517_v38 = vld [vmem:[%s9381_s18] sm:$0xff]  ;;  %v9528_v40 = vld [vmem:[%s9381_s18 + $0xd8] sm:$0xff]  ;;  %v9536_v41 = vld [vmem:[%s14849_s1 + $0x50] sm:$0xff] }
  0x21   : > { %8710 = vmatpush.msra.mxu3 %v9408_v19  ;;  %1081 = vmatpush.msra.mxu2 %v9400_v18  ;;  %v9520_v39 = vld [vmem:[%s9381_s18 + $0xe0] sm:$0xff]  ;;  %v9539_v42 = vld [vmem:[%s9381_s18 + $0xd0] sm:$0xff]  ;;  %v9545_v43 = vld [vmem:[%s9381_s18 + $0xc8] sm:$0xff] }
  0x22   : > { %564 = vmatpush.msra.mxu0 %v9408_v19  ;;  %674 = vmatpush.msra.mxu1 %v9467_v29  ;;  %v9554_v44 = vld [vmem:[%s9381_s18 + $0xc0] sm:$0xff]  ;;  %v9562_v46 = vld [vmem:[%s9381_s18 + $0xb8] sm:$0xff]  ;;  %v9572_v48 = vld [vmem:[%s9381_s18 + $0xb0] sm:$0xff] }
  0x23   : > { %8711 = vmatpush.msra.mxu3 %v9426_v22  ;;  %1082 = vmatpush.msra.mxu2 %v9408_v19  ;;  %v9569_v47 = vld [vmem:[%s14849_s1 + $0x58] sm:$0xff]  ;;  %v9578_v49 = vld [vmem:[%s9381_s18 + $0xa8] sm:$0xff]  ;;  %v9587_v50 = vld [vmem:[%s9381_s18 + $0xa0] sm:$0xff] }
  0x24   : > { %565 = vmatpush.msra.mxu0 %v9426_v22  ;;  %675 = vmatpush.msra.mxu1 %v9472_v30  ;;  %v9592_v51 = vld [vmem:[%s14849_s1 + $0x70] sm:$0xff]  ;;  %v9597_v52 = vld [vmem:[%s14849_s1 + $0x60] sm:$0xff]  ;;  %v9605_v54 = vld [vmem:[%s9381_s18 + $0x98] sm:$0xff] }
  0x25   : > { %8712 = vmatpush.msra.mxu3 %v9429_v23  ;;  %1083 = vmatpush.msra.mxu2 %v9426_v22  ;;  %v9610_v55 = vld [vmem:[%s9381_s18 + $0x90] sm:$0xff]  ;;  %v9616_v56 = vld [vmem:[%s9381_s18 + $0x88] sm:$0xff]  ;;  %v9626_v57 = vld [vmem:[%s9381_s18 + $0x80] sm:$0xff] }
  0x26   : > { %367 = vperm.xlu1 %8823, %v269_v7   ;;  %364 = vperm.xlu0 %8822, %v268_v8   ;;  %v9632_v58 = vld [vmem:[%s14849_s1 + $0x68] sm:$0xff] }
  0x27   : > { %566 = vmatpush.msra.mxu0 %v9429_v23  ;;  %8713 = vmatpush.msra.mxu3 %v9436_v24 }
  0x28   : > { %8825 = vset.pattern.permute.xlu2 %v14852_v9  ;;  %1084 = vmatpush.msra.mxu2 %v9429_v23 }
  0x29   : > { %864 = vperm.xlu2 %8825, %v262_v1   ;;  %567 = vmatpush.msra.mxu0 %v9436_v24 }
  0x2a   : > { %8714 = vmatpush.msra.mxu3 %v9447_v26  ;;  %1085 = vmatpush.msra.mxu2 %v9436_v24 }
  0x2b   : > { %568 = vmatpush.msra.mxu0 %v9447_v26  ;;  %676 = vmatpush.msra.mxu1 %v9486_v33 }
  0x2c   : > { %8715 = vmatpush.msra.mxu3 %v9457_v27  ;;  %1086 = vmatpush.msra.mxu2 %v9447_v26 }
  0x2d   : > { %569 = vmatpush.msra.mxu0 %v9457_v27  ;;  %677 = vmatpush.msra.mxu1 %v9520_v39 }
  0x2e   : > { %8826 = vset.pattern.permute.xlu1 %v14852_v9  ;;  %274 = vperm.xlu0 %8822, %v9343_v10  }
  0x2f   : > { %867 = vperm.xlu1 %8826, %v263_v5   ;;  %8716 = vmatpush.msra.mxu3 %v9464_v28 }
  0x30   : > { %570 = vmatpush.msra.mxu0 %v9464_v28  ;;  %1087 = vmatpush.msra.mxu2 %v9457_v27 }
  0x31   : > { %8827 = vset.pattern.permute.xlu2 %v9225_v2  ;;  %8717 = vmatpush.msra.mxu3 %v9475_v31 }
  0x32   : > { %277 = vperm.xlu2 %8827, %v9350_v11   ;;  %571 = vmatpush.msra.mxu0 %v9475_v31 }
  0x33   : > { %8718 = vmatpush.msra.mxu3 %v9490_v34  ;;  %1088 = vmatpush.msra.mxu2 %v9464_v28 }
  0x34   : > { %572 = vmatpush.msra.mxu0 %v9490_v34  ;;  %678 = vmatpush.msra.mxu1 %v9528_v40 }
  0x35   : > { %8719 = vmatpush.msra.mxu3 %v9498_v35  ;;  %1089 = vmatpush.msra.mxu2 %v9475_v31 }
  0x36   : > { %8828 = vset.pattern.permute.xlu0 %v14852_v9  ;;  %573 = vmatpush.msra.mxu0 %v9498_v35 }
  0x37   : > { %8829 = vset.pattern.permute.xlu1 %v9225_v2  ;;  %870 = vperm.xlu0 %8828, %v264_v0   ;;  %v14854_v0 = vmov 1.0  }
  0x38   : > { %280 = vperm.xlu1 %8829, %v9357_v12   ;;  %8720 = vmatpush.msra.mxu3 %v9504_v36 }
  0x39   : > { %574 = vmatpush.msra.mxu0 %v9504_v36  ;;  %679 = vmatpush.msra.mxu1 %v9539_v42 }
  0x3a   : > { %8830 = vset.pattern.permute.xlu2 %v14852_v9  ;;  %8721 = vmatpush.msra.mxu3 %v9511_v37 }
  0x3b   : > { %873 = vperm.xlu2 %8830, %v265_v4   ;;  %575 = vmatpush.msra.mxu0 %v9511_v37 }
  0x3c   : > { %8722 = vmatpush.msra.mxu3 %v9517_v38  ;;  %680 = vmatpush.msra.mxu1 %v9545_v43 }
  0x3d   : > { %576 = vmatpush.msra.mxu0 %v9517_v38  ;;  %1090 = vmatpush.msra.mxu2 %v9490_v34 }
  0x3e   : > { %8723 = vmatpush.msrb.mxu3 %v9467_v29  ;;  %681 = vmatpush.msra.mxu1 %v9554_v44 }
  0x3f   : > { %8831 = vset.pattern.permute.xlu0 %v9225_v2  ;;  %1091 = vmatpush.msra.mxu2 %v9498_v35 }
  0x40   : > { %283 = vperm.xlu1 %8829, %v9367_v13   ;;  %286 = vperm.xlu0 %8831, %v9372_v14  }
  0x41   : > { %8724 = vmatpush.msrb.mxu3 %v9472_v30  ;;  %682 = vmatpush.msra.mxu1 %v9562_v46 }
  0x42   : > { %1092 = vmatpush.msra.mxu2 %v9504_v36 }
  0x43   : > { %876 = vperm.xlu2 %8830, %v266_v3   ;;  %8725 = vmatpush.msrb.mxu3 %v9486_v33  ;;  %v9669_v3 = vld [vmem:[%s14849_s1 + $0x78] sm:$0xff] }
  0x44   : > { %683 = vmatpush.msra.mxu1 %v9572_v48  ;;  %1093 = vmatpush.msra.mxu2 %v9511_v37 }
  0x45   : > { %8726 = vmatpush.msrb.mxu3 %v9520_v39 }
  0x46   : > { %684 = vmatpush.msra.mxu1 %v9578_v49  ;;  %1094 = vmatpush.msra.mxu2 %v9517_v38 }
  0x47   : > { %8727 = vmatpush.msrb.mxu3 %v9528_v40 }
  0x48   : > { %8832 = vset.pattern.permute.xlu1 %v14852_v9  ;;  %8834 = vset.pattern.permute.xlu0 %v14852_v9 }
  0x49   : > { %879 = vperm.xlu1 %8832, %v267_v6   ;;  %885 = vperm.xlu0 %8834, %v269_v7   ;;  %v9693_v7 = vld [vmem:[%s14849_s1 + $0x80] sm:$0xff] }
  0x4a   : > { %8728 = vmatpush.msrb.mxu3 %v9539_v42  ;;  %685 = vmatpush.msra.mxu1 %v9587_v50 }
  0x4b   : > { %8833 = vset.pattern.permute.xlu2 %v9225_v2  ;;  %2017 = vmatpush.msrb.mxu2 %v9391_v16 }
  0x4c   : > { %289 = vperm.xlu2 %8833, %v9388_v15   ;;  %8729 = vmatpush.msrb.mxu3 %v9545_v43 }
  0x4d   : > { %686 = vmatpush.msra.mxu1 %v9605_v54  ;;  %2018 = vmatpush.msrb.mxu2 %v9396_v17 }
  0x4e   : > { %8730 = vmatpush.msrb.mxu3 %v9554_v44 }
  0x4f   : > { %687 = vmatpush.msra.mxu1 %v9610_v55  ;;  %2019 = vmatpush.msrb.mxu2 %v9400_v18 }
  0x50   : > { %8731 = vmatpush.msrb.mxu3 %v9562_v46 }
  0x51   : > { %882 = vperm.xlu1 %8832, %v268_v8   ;;  %8837 = vset.pattern.permute.xlu0 %v9225_v2 }
  0x52   : > { %301 = vperm.xlu0 %8837, %v9413_v20   ;;  %8732 = vmatpush.msrb.mxu3 %v9572_v48 }
  0x53   : > { %688 = vmatpush.msra.mxu1 %v9616_v56  ;;  %2020 = vmatpush.msrb.mxu2 %v9408_v19 }
  0x54   : > { %292 = vperm.xlu2 %8833, %v9420_v21   ;;  %8733 = vmatpush.msrb.mxu3 %v9578_v49 }
  0x55   : > { %689 = vmatpush.msra.mxu1 %v9626_v57  ;;  %2021 = vmatpush.msrb.mxu2 %v9426_v22 }
  0x56   : > { %8734 = vmatpush.msrb.mxu3 %v9587_v50 }
  0x57   : > { %2022 = vmatpush.msrb.mxu2 %v9429_v23 }
  0x58   : > { %8735 = vmatpush.msrb.mxu3 %v9605_v54 }
  0x59   : > { %8835 = vset.pattern.permute.xlu1 %v9225_v2  ;;  %2023 = vmatpush.msrb.mxu2 %v9436_v24 }
  0x5a   : > { %295 = vperm.xlu1 %8835, %v9444_v25   ;;  %8840 = vset.pattern.permute.xlu0 %v14852_v9 }
  0x5b   : > { %804 = vperm.xlu0 %8840, %v9372_v14   ;;  %8736 = vmatpush.msrb.mxu3 %v9610_v55 }
  0x5c   : > { %8836 = vset.pattern.permute.xlu2 %v14852_v9  ;;  %2024 = vmatpush.msrb.mxu2 %v9447_v26 }
  0x5d   : > { %792 = vperm.xlu2 %8836, %v9343_v10   ;;  %8737 = vmatpush.msrb.mxu3 %v9616_v56 }
  0x5e   : > { %2025 = vmatpush.msrb.mxu2 %v9457_v27 }
  0x5f   : > { %8738 = vmatpush.msrb.mxu3 %v9626_v57 }
  0x60   : > { %2026 = vmatpush.msrb.mxu2 %v9464_v28 }
  0x62   : > { %298 = vperm.xlu1 %8835, %v9482_v32   ;;  %2027 = vmatpush.msrb.mxu2 %v9475_v31 }
  0x63   : > { %8843 = vset.pattern.permute.xlu0 %v9225_v2 }
  0x64   : > { %316 = vperm.xlu0 %8843, %v9592_v51   ;;  %2028 = vmatpush.msrb.mxu2 %v9490_v34 }
  0x65   : > { %795 = vperm.xlu2 %8836, %v9350_v11  }
  0x66   : > { %2029 = vmatpush.msrb.mxu2 %v9498_v35 }
  0x68   : > { %2030 = vmatpush.msrb.mxu2 %v9504_v36 }
  0x6a   : > { %8838 = vset.pattern.permute.xlu1 %v14852_v9  ;;  %2031 = vmatpush.msrb.mxu2 %v9511_v37 }
  0x6b   : > { %798 = vperm.xlu1 %8838, %v9357_v12  }
  0x6c   : > { %8846 = vset.pattern.permute.xlu0 %v14852_v9  ;;  %2032 = vmatpush.msrb.mxu2 %v9517_v38 }
  0x6d   : > { %8839 = vset.pattern.permute.xlu2 %v9225_v2  ;;  %819 = vperm.xlu0 %8846, %v9413_v20  }
  0x6e   : > { %304 = vperm.xlu2 %8839, %v9536_v41  }
  0x72   : > { %v9558_v45 = vpop.permute.xlu2 %358 }
  0x73   : > { %801 = vperm.xlu1 %8838, %v9367_v13   ;;  %vm425_vm6 = vcmp.eq.s32.totalorder %v9645_v61, %v9558_v45 }
  0x75   : > { %8849 = vset.pattern.permute.xlu0 %v9225_v2 }
  0x76   : > { %307 = vperm.xlu2 %8839, %v9569_v47  }
  0x7a   : > { %v9601_v53 = vpop.permute.xlu2 %361 }
  0x7b   : > { %8841 = vset.pattern.permute.xlu1 %v9225_v2  ;;  %vm427_vm9 = vcmp.eq.s32.totalorder %v9645_v61, %v9601_v53 }
  0x7c   : > { %310 = vperm.xlu1 %8841, %v9597_v52  }
  0x7e   : > { %8842 = vset.pattern.permute.xlu2 %v14852_v9 }
  0x7f   : > { %807 = vperm.xlu2 %8842, %v9388_v15  }
  0x83   : > { %v9638_v60 = vpop.permute.xlu2 %864 }
  0x84   : > { %313 = vperm.xlu1 %8841, %v9632_v58  }
  0x87   : > { %810 = vperm.xlu2 %8842, %v9420_v21  }
  0x88   : > { %v9649_v62 = vpop.permute.xlu1 %352  ;;  %v9651_v63 = vpop.permute.xlu0 %346 }
  0x89   : > { %vm417_vm0 = vcmp.eq.s32.totalorder %v9645_v61, %v9651_v63  ;;  %vm421_vm2 = vcmp.eq.s32.totalorder %v9645_v61, %v9649_v62 }
  0x8a   : > { %7316 = vmatmul.msk.f32.vlgmr.msra.gmra.mxu3 %vm417_vm0, %v14854_v0 }
  0x8b   : > { %8739 = vmatpush.msra.mxu3 %v9391_v16 }
  0x8c   : > { %8844 = vset.pattern.permute.xlu1 %v14852_v9  ;;  %v9662_v1 = vpop.permute.xlu2 %277 }
  0x8d   : > { %813 = vperm.xlu1 %8844, %v9444_v25   ;;  %8740 = vmatpush.msra.mxu3 %v9396_v17  ;;  %v9712_v17 = vld [vmem:[%s14849_s1 + $0x88] sm:$0xff]  ;;  %vm371_vm0 = vcmp.eq.s32.totalorder %v9645_v61, %v9662_v1 }
  0x8f   : > { %8845 = vset.pattern.permute.xlu2 %v9225_v2  ;;  %8741 = vmatpush.msra.mxu3 %v9400_v18  ;;  %v9717_v18 = vld [vmem:[%s14849_s1 + $0x98] sm:$0xff] }
  0x90   : > { %v9675_v4 = vpop.permute.xlu1 %355  ;;  %v9677_v5 = vpop.permute.xlu0 %349  ;;  %319 = vperm.xlu2 %8845, %v9669_v3   ;;  %331 = vperm.xlu0 %8849, %v9717_v18  }
  0x91   : > { %vm419_vm1 = vcmp.eq.s32.totalorder %v9645_v61, %v9677_v5  ;;  %8742 = vmatpush.msra.mxu3 %v9408_v19  ;;  %vm423_vm4 = vcmp.eq.s32.totalorder %v9645_v61, %v9675_v4 }
  0x92   : > { %7317 = vmatmul.msk.f32.gmra.mxu3 %vm419_vm1, %v14854_v0 }
  0x93   : > { %8743 = vmatpush.msra.mxu3 %v9426_v22  ;;  %v9729_v22 = vadd.s32 128, %v9645_v61 }
  0x95   : > { %816 = vperm.xlu1 %8844, %v9482_v32   ;;  %v9688_v6 = vpop.permute.xlu2 %873  ;;  %8744 = vmatpush.msra.mxu3 %v9429_v23  ;;  %vm372_vm7 = vcmp.eq.s32.totalorder %v9729_v22, %v9662_v1 }
  0x97   : > { %8745 = vmatpush.msra.mxu3 %v9436_v24 }
  0x98   : > { %v9700_v8 = vpop.permute.xlu0 %364  ;;  %322 = vperm.xlu2 %8845, %v9693_v7   ;;  %v9704_v16 = vpop.permute.xlu1 %367  ;;  %8852 = vset.pattern.permute.xlu0 %v14852_v9 }
  0x99   : > { %8746 = vmatpush.msra.mxu3 %v9447_v26  ;;  %v9748_v26 = vld [vmem:[%s14849_s1 + $0x90] sm:$0xff]  ;;  %834 = vperm.xlu0 %8852, %v9592_v51   ;;  %vm429_vm12 = vcmp.eq.s32.totalorder %v9645_v61, %v9700_v8  ;;  %vm431_vm15 = vcmp.eq.s32.totalorder %v9645_v61, %v9704_v16 }
  0x9a   : > { %7318 = vmatmul.msk.f32.gmra.mxu3 %vm421_vm2, %v14854_v0  ;;  %vm418_vm2 = vcmp.eq.s32.totalorder %v9729_v22, %v9651_v63 }
  0x9b   : > { %8747 = vmatpush.msra.mxu3 %v9457_v27 }
  0x9d   : > { %8847 = vset.pattern.permute.xlu1 %v9225_v2  ;;  %v9723_v19 = vpop.permute.xlu2 %876  ;;  %8748 = vmatpush.msra.mxu3 %v9464_v28 }
  0x9e   : > { %325 = vperm.xlu1 %8847, %v9712_v17  }
  0x9f   : > { %8749 = vmatpush.msra.mxu3 %v9475_v31 }
  0xa0   : > { %v275_v23 = vpop.permute.xlu0 %274  ;;  %8848 = vset.pattern.permute.xlu2 %v14852_v9 }
  0xa1   : > { %vm369_vm3 = vcmp.eq.s32.totalorder %v9645_v61, %v275_v23  ;;  %vm370_vm5 = vcmp.eq.s32.totalorder %v9729_v22, %v275_v23  ;;  %v9738_v24 = vpop.permute.xlu1 %867  ;;  %822 = vperm.xlu2 %8848, %v9536_v41   ;;  %8750 = vmatpush.msra.mxu3 %v9490_v34  ;;  %v9814_v23 = vld [vmem:[%s14849_s1 + $0xb0] sm:$0xff] }
  0xa2   : > { %7292 = vmatmul.msk.f32.vlgmr.msra.gmra.mxu0 %vm369_vm3, %v14854_v0  ;;  %7319 = vmatmul.msk.f32.gmra.mxu3 %vm423_vm4, %v14854_v0 }
  0xa3   : > { %7324 = vmatmul.msk.f32.vlgmr.msra.gmra.mxu1 %vm370_vm5, %v14854_v0  ;;  %8751 = vmatpush.msra.mxu3 %v9498_v35  ;;  %vm420_vm5 = vcmp.eq.s32.totalorder %v9729_v22, %v9677_v5 }
  0xa4   : > { %843 = vperm.xlu0 %8852, %v9712_v17  }
  0xa5   : > { %8752 = vmatpush.msra.mxu3 %v9504_v36  ;;  %v9789_v36 = vld [vmem:[%s14849_s1 + $0xa0] sm:$0xff] }
  0xa6   : > { %328 = vperm.xlu1 %8847, %v9748_v26   ;;  %v9756_v27 = vpop.permute.xlu2 %289  ;;  %14937 = vst [vmem:[#allocation5_spill] sm:$0xff] %v9789_v36 }
  0xa7   : > { %8753 = vmatpush.msra.mxu3 %v9511_v37  ;;  %vm380_vm1 = vcmp.eq.s32.totalorder %v9729_v22, %v9756_v27 }
  0xa9   : > { %825 = vperm.xlu2 %8848, %v9569_v47   ;;  %8754 = vmatpush.msra.mxu3 %v9517_v38  ;;  %v9784_v35 = vpop.permute.xlu0 %870 }
  0xaa   : > { %7320 = vmatmul.msk.f32.gmra.mxu3 %vm425_vm6, %v14854_v0  ;;  %v9766_v28 = vpop.permute.xlu1 %280 }
  0xab   : > { %7325 = vmatmul.msk.f32.gmra.mxu1 %vm372_vm7, %v14854_v0  ;;  %vm374_vm8 = vcmp.eq.s32.totalorder %v9729_v22, %v9766_v28  ;;  %vm373_vm3 = vcmp.eq.s32.totalorder %v9645_v61, %v9766_v28 }
  0xac   : > { %852 = vperm.xlu0 %8852, %v9789_v36  }
  0xae   : > { %8850 = vset.pattern.permute.xlu1 %v14852_v9  ;;  %v9772_v31 = vpop.permute.xlu2 %292 }
  0xaf   : > { %828 = vperm.xlu1 %8850, %v9597_v52   ;;  %vm382_vm4 = vcmp.eq.s32.totalorder %v9729_v22, %v9772_v31 }
  0xb1   : > { %8851 = vset.pattern.permute.xlu2 %v9225_v2 }
  0xb2   : > { %7321 = vmatmul.msk.f32.gmra.mxu3 %vm427_vm9, %v14854_v0  ;;  %v9781_v34 = vpop.permute.xlu1 %283  ;;  %334 = vperm.xlu2 %8851, %v9789_v36   ;;  %v9809_v59 = vpop.permute.xlu0 %286  ;;  %v14941_v36 = vmov 1  }
  0xb3   : > { %7326 = vmatmul.msk.f32.gmra.mxu1 %vm374_vm8, %v14854_v0  ;;  %vm376_vm10 = vcmp.eq.s32.totalorder %v9729_v22, %v9781_v34  ;;  %vm378_vm13 = vcmp.eq.s32.totalorder %v9729_v22, %v9809_v59  ;;  %vm375_vm6 = vcmp.eq.s32.totalorder %v9645_v61, %v9781_v34  ;;  %vm422_vm8 = vcmp.eq.s32.totalorder %v9729_v22, %v9649_v62 }
  0xb7   : > { %831 = vperm.xlu1 %8850, %v9632_v58   ;;  %v9794_v37 = vpop.permute.xlu2 %792 }
  0xb8   : > { %14938 = vst [vmem:[#allocation6_spill] sm:$0xff] %v9794_v37  ;;  %vm887_vm11 = vcmp.eq.s32.totalorder %v9645_v61, %v9794_v37  ;;  %v9833_v37 = vld [vmem:[%s14849_s1 + $0xb8] sm:$0xff] }
  0xb9   : > { %7420 = vmatmul.msk.f32.vlgmr.msra.gmra.mxu2 %vm887_vm11, %v14854_v0  ;;  %861 = vperm.xlu0 %8852, %v9833_v37  }
  0xba   : > { %7322 = vmatmul.msk.f32.gmra.mxu3 %vm429_vm12, %v14854_v0  ;;  %2890 = vmatpush.msra.mxu2 %v9467_v29  ;;  %vm424_vm12 = vcmp.eq.s32.totalorder %v9729_v22, %v9675_v4 }
  0xbb   : > { %7327 = vmatmul.msk.f32.gmra.mxu1 %vm376_vm10, %v14854_v0  ;;  %v9806_v38 = vpop.permute.xlu1 %879  ;;  %v9823_v0 = vld [vmem:[%s14849_s1 + $0xa8] sm:$0xff]  ;;  %v9884_v28 = vpop.permute.xlu0 %885  ;;  %vm377_vm10 = vcmp.eq.s32.totalorder %v9645_v61, %v9809_v59 }
  0xbc   : > { %2891 = vmatpush.msra.mxu2 %v9472_v30  ;;  %337 = vperm.xlu2 %8851, %v9823_v0  }
  0xbe   : > { %2892 = vmatpush.msra.mxu2 %v9486_v33 }
  0xbf   : > { %v9817_v9 = vpop.permute.xlu2 %795  ;;  %8853 = vset.pattern.permute.xlu1 %v9225_v2  ;;  %v14940_v2 = vmov 1.0  }
  0xc0   : > { %14939 = vst [vmem:[#allocation7_spill] sm:$0xff] %v9817_v9  ;;  %vm889_vm14 = vcmp.eq.s32.totalorder %v9645_v61, %v9817_v9  ;;  %340 = vperm.xlu1 %8853, %v9814_v23   ;;  %2893 = vmatpush.msra.mxu2 %v9520_v39 }
  0xc1   : > { %7421 = vmatmul.msk.f32.gmra.mxu2 %vm889_vm14, %v14940_v2  ;;  %7293 = vmatmul.msk.f32.gmra.mxu0 %vm371_vm0, %v14940_v2  ;;  %vm379_vm14 = vcmp.eq.s32.totalorder %v9645_v61, %v9756_v27  ;;  %vm426_vm0 = vcmp.eq.s32.totalorder %v9729_v22, %v9558_v45 }
  0xc2   : > { %7323 = vmatmul.msk.f32.gmra.mxu3 %vm431_vm15, %v14940_v2  ;;  %2894 = vmatpush.msra.mxu2 %v9528_v40 }
  0xc3   : > { %7328 = vmatmul.msk.f32.gmra.mxu1 %vm378_vm13, %v14940_v2  ;;  %v9843_v9 = vpop.permute.xlu1 %882 }
  0xc4   : > { %2895 = vmatpush.msra.mxu2 %v9539_v42  ;;  %8854 = vset.pattern.permute.xlu2 %v14941_v36  ;;  %v9912_v62 = vpop.permute.xlu0 %301 }
  0xc5   : > { %837 = vperm.xlu2 %8854, %v9669_v3   ;;  %vm388_vm15 = vcmp.eq.s32.totalorder %v9729_v22, %v9912_v62 }
  0xc6   : > { %2896 = vmatpush.msra.mxu2 %v9545_v43 }
  0xc8   : > { %343 = vperm.xlu1 %8853, %v9833_v37   ;;  %2897 = vmatpush.msra.mxu2 %v9554_v44  ;;  %v9901_v5 = vpop.permute.xlu2 %304 }
  0xc9   : > { %7294 = vmatmul.msk.f32.gmra.mxu0 %vm373_vm3, %v14940_v2  ;;  %vm390_vm3 = vcmp.eq.s32.totalorder %v9729_v22, %v9901_v5 }
  0xca   : > { %7348 = vmatmul.msk.f32.vlgmr.msrb.gmra.mxu3 %vm418_vm2, %v14940_v2  ;;  %2898 = vmatpush.msra.mxu2 %v9562_v46  ;;  %vm381_vm2 = vcmp.eq.s32.totalorder %v9645_v61, %v9772_v31 }
  0xcb   : > { %7329 = vmatmul.msk.f32.gmra.mxu1 %vm380_vm1, %v14940_v2  ;;  %1192 = vmatpush.msrb.mxu3 %v9467_v29 }
  0xcc   : > { %v9861_v1 = vpop.permute.xlu1 %295  ;;  %2899 = vmatpush.msra.mxu2 %v9572_v48 }
  0xcd   : > { %1193 = vmatpush.msrb.mxu3 %v9472_v30  ;;  %840 = vperm.xlu2 %8854, %v9693_v7   ;;  %vm384_vm7 = vcmp.eq.s32.totalorder %v9729_v22, %v9861_v1  ;;  %v9943_v4 = vpop.permute.xlu0 %804 }
  0xce   : > { %2900 = vmatpush.msra.mxu2 %v9578_v49  ;;  %14943 = vst [vmem:[#allocation9_spill] sm:$0xff] %v9943_v4  ;;  %vm895_vm1 = vcmp.eq.s32.totalorder %v9645_v61, %v9943_v4 }
  0xcf   : > { %1194 = vmatpush.msrb.mxu3 %v9486_v33 }
  0xd0   : > { %8855 = vset.pattern.permute.xlu1 %v14941_v36  ;;  %2901 = vmatpush.msra.mxu2 %v9587_v50  ;;  %v9930_v59 = vpop.permute.xlu2 %307 }
  0xd1   : > { %846 = vperm.xlu1 %8855, %v9748_v26   ;;  %1195 = vmatpush.msrb.mxu3 %v9520_v39 }
  0xd2   : > { %7349 = vmatmul.msk.f32.gmra.mxu3 %vm420_vm5, %v14940_v2  ;;  %2902 = vmatpush.msra.mxu2 %v9605_v54 }
  0xd3   : > { %7330 = vmatmul.msk.f32.gmra.mxu1 %vm382_vm4, %v14940_v2  ;;  %1196 = vmatpush.msrb.mxu3 %v9528_v40  ;;  %vm428_vm4 = vcmp.eq.s32.totalorder %v9729_v22, %v9601_v53  ;;  %v9228_v53 = vmov 2  }
  0xd4   : > { %v9881_v63 = vpop.permute.xlu1 %298  ;;  %7295 = vmatmul.msk.f32.gmra.mxu0 %vm375_vm6, %v14940_v2  ;;  %2903 = vmatpush.msra.mxu2 %v9610_v55  ;;  %vm383_vm6 = vcmp.eq.s32.totalorder %v9645_v61, %v9861_v1  ;;  %v8916_v1 = vld [vmem:[%s9381_s18 + $0x78] sm:$0xff] }
  0xd5   : > { %1197 = vmatpush.msrb.mxu3 %v9539_v42  ;;  %849 = vperm.xlu2 %8854, %v9717_v18   ;;  %vm386_vm11 = vcmp.eq.s32.totalorder %v9729_v22, %v9881_v63 }
  0xd6   : > { %2904 = vmatpush.msra.mxu2 %v9616_v56  ;;  %8858 = vset.pattern.permute.xlu0 %v9228_v53 }
  0xd7   : > { %1198 = vmatpush.msrb.mxu3 %v9545_v43  ;;  %1736 = vperm.xlu0 %8858, %v9357_v12  }
  0xd8   : > { %2905 = vmatpush.msra.mxu2 %v9626_v57 }
  0xd9   : > { %855 = vperm.xlu1 %8855, %v9823_v0   ;;  %1199 = vmatpush.msrb.mxu3 %v9554_v44  ;;  %v9956_v45 = vpop.permute.xlu2 %807 }
  0xda   : > { %7350 = vmatmul.msk.f32.gmra.mxu3 %vm422_vm8, %v14940_v2  ;;  %vm897_vm5 = vcmp.eq.s32.totalorder %v9645_v61, %v9956_v45  ;;  %vm430_vm8 = vcmp.eq.s32.totalorder %v9729_v22, %v9700_v8 }
  0xdb   : > { %7331 = vmatmul.msk.f32.gmra.mxu1 %vm384_vm7, %v14940_v2  ;;  %1200 = vmatpush.msrb.mxu3 %v9562_v46  ;;  %vm392_vm7 = vcmp.eq.s32.totalorder %v9729_v22, %v9930_v59 }
  0xdc   : > { %7296 = vmatmul.msk.f32.gmra.mxu0 %vm377_vm10, %v14940_v2 }
  0xdd   : > { %v9905_v34 = vpop.permute.xlu1 %798  ;;  %1201 = vmatpush.msrb.mxu3 %v9572_v48  ;;  %858 = vperm.xlu2 %8854, %v9814_v23  }
  0xde   : > { %vm891_vm9 = vcmp.eq.s32.totalorder %v9645_v61, %v9905_v34 }
  0xdf   : > { %7422 = vmatmul.msk.f32.gmra.mxu2 %vm891_vm9, %v14940_v2  ;;  %1202 = vmatpush.msrb.mxu3 %v9578_v49 }
  0xe0   : > { %1751 = vperm.xlu0 %8858, %v9444_v25  }
  0xe1   : > { %1203 = vmatpush.msrb.mxu3 %v9587_v50  ;;  %8856 = vset.pattern.permute.xlu1 %v9228_v53  ;;  %v9981_v31 = vpop.permute.xlu2 %810 }
  0xe2   : > { %7351 = vmatmul.msk.f32.gmra.mxu3 %vm424_vm12, %v14940_v2  ;;  %1730 = vperm.xlu1 %8856, %v9343_v10   ;;  %vm899_vm9 = vcmp.eq.s32.totalorder %v9645_v61, %v9981_v31  ;;  %vm385_vm12 = vcmp.eq.s32.totalorder %v9645_v61, %v9881_v63 }
  0xe3   : > { %7332 = vmatmul.msk.f32.gmra.mxu1 %vm386_vm11, %v14940_v2  ;;  %1204 = vmatpush.msrb.mxu3 %v9605_v54  ;;  %vm432_vm11 = vcmp.eq.s32.totalorder %v9729_v22, %v9704_v16 }
  0xe4   : > { %7297 = vmatmul.msk.f32.gmra.mxu0 %vm379_vm14, %v14940_v2  ;;  %vm935_vm14 = vcmp.eq.s32.totalorder %v9645_v61, %v9638_v60 }
  0xe5   : > { %v9928_v36 = vpop.permute.xlu1 %801  ;;  %1205 = vmatpush.msrb.mxu3 %v9610_v55  ;;  %8857 = vset.pattern.permute.xlu2 %v9228_v53  ;;  %v8919_v53 = vld [vmem:[%s9381_s18 + $0x68] sm:$0xff] }
  0xe6   : > { %14942 = vst [vmem:[#allocation8_spill] sm:$0xff] %v9928_v36  ;;  %vm893_vm13 = vcmp.eq.s32.totalorder %v9645_v61, %v9928_v36  ;;  %v7487_v36 = vld [vmem:[%s14850_s2 + $0x38] sm:$0xff]  ;;  %1733 = vperm.xlu2 %8857, %v9350_v11   ;;  %v10013_v11 = vpop.permute.xlu0 %316 }
  0xe7   : > { %7423 = vmatmul.msk.f32.gmra.mxu2 %vm893_vm13, %v14940_v2  ;;  %1206 = vmatpush.msrb.mxu3 %v9616_v56 }
  0xe8   : > { %1419 = vmatpush.msrb.mxu0 %v7487_v36  ;;  %1760 = vperm.xlu0 %8858, %v9536_v41  }
  0xe9   : > { %1207 = vmatpush.msrb.mxu3 %v9626_v57 }
  0xea   : > { %7352 = vmatmul.msk.f32.gmra.mxu3 %vm426_vm0, %v14940_v2  ;;  %1739 = vperm.xlu1 %8856, %v9367_v13   ;;  %v10004_v10 = vpop.permute.xlu2 %319  ;;  %vm387_vm0 = vcmp.eq.s32.totalorder %v9645_v61, %v9912_v62  ;;  %v8917_v62 = vld [vmem:[%s14849_s1 + $0xd8] sm:$0xff] }
  0xeb   : > { %7333 = vmatmul.msk.f32.gmra.mxu1 %vm388_vm15, %v14940_v2 }
  0xec   : > { %7298 = vmatmul.msk.f32.gmra.mxu0 %vm381_vm2, %v14940_v2  ;;  %vm937_vm2 = vcmp.eq.s32.totalorder %v9645_v61, %v9738_v24 }
  0xee   : > { %v9953_v27 = vpop.permute.xlu1 %310  ;;  %1742 = vperm.xlu2 %8857, %v9372_v14  }
  0xef   : > { %7424 = vmatmul.msk.f32.gmra.mxu2 %vm895_vm1, %v14940_v2  ;;  %vm394_vm10 = vcmp.eq.s32.totalorder %v9729_v22, %v9953_v27 }
  0xf0   : > { %1769 = vperm.xlu0 %8858, %v9632_v58  }
  0xf2   : > { %7353 = vmatmul.msk.f32.gmra.mxu3 %vm428_vm4, %v14940_v2  ;;  %1745 = vperm.xlu1 %8856, %v9388_v15   ;;  %v10032_v14 = vpop.permute.xlu2 %322  ;;  %vm389_vm4 = vcmp.eq.s32.totalorder %v9645_v61, %v9901_v5  ;;  %v10043_v15 = vpop.permute.xlu0 %819 }
  0xf3   : > { %7334 = vmatmul.msk.f32.gmra.mxu1 %vm390_vm3, %v14940_v2  ;;  %vm398_vm3 = vcmp.eq.s32.totalorder %v9729_v22, %v10013_v11 }
  0xf4   : > { %7299 = vmatmul.msk.f32.gmra.mxu0 %vm383_vm6, %v14940_v2  ;;  %vm939_vm6 = vcmp.eq.s32.totalorder %v9645_v61, %v9784_v35 }
  0xf6   : > { %v9972_v4 = vpop.permute.xlu1 %313  ;;  %1748 = vperm.xlu2 %8857, %v9420_v21  }
  0xf7   : > { %7425 = vmatmul.msk.f32.gmra.mxu2 %vm897_vm5, %v14940_v2  ;;  %vm396_vm15 = vcmp.eq.s32.totalorder %v9729_v22, %v9972_v4  ;;  %vm905_vm5 = vcmp.eq.s32.totalorder %v9645_v61, %v10043_v15 }
  0xf8   : > { %1778 = vperm.xlu0 %8858, %v9693_v7  }
  0xfa   : > { %7354 = vmatmul.msk.f32.gmra.mxu3 %vm430_vm8, %v14940_v2  ;;  %1754 = vperm.xlu1 %8856, %v9482_v32   ;;  %vm391_vm8 = vcmp.eq.s32.totalorder %v9645_v61, %v9930_v59  ;;  %v8918_v59 = vld [vmem:[%s9381_s18 + $0x70] sm:$0xff] }
  0xfb   : > { %7335 = vmatmul.msk.f32.gmra.mxu1 %vm392_vm7, %v14940_v2  ;;  %vm400_vm7 = vcmp.eq.s32.totalorder %v9729_v22, %v10004_v10 }
  0xfc   : > { %7300 = vmatmul.msk.f32.gmra.mxu0 %vm385_vm12, %v14940_v2  ;;  %vm393_vm12 = vcmp.eq.s32.totalorder %v9645_v61, %v9953_v27 }
  0xfe   : > { %1757 = vperm.xlu2 %8857, %v9413_v20  }
  0xff   : > { %7426 = vmatmul.msk.f32.gmra.mxu2 %vm899_vm9, %v14940_v2  ;;  %v9992_v8 = vpop.permute.xlu1 %813 }
 0x100   : > { %vm901_vm13 = vcmp.eq.s32.totalorder %v9645_v61, %v9992_v8  ;;  %1787 = vperm.xlu0 %8858, %v9717_v18  }
 0x102   : > { %7355 = vmatmul.msk.f32.gmra.mxu3 %vm432_vm11, %v14940_v2  ;;  %1763 = vperm.xlu1 %8856, %v9569_v47   ;;  %vm402_vm11 = vcmp.eq.s32.totalorder %v9729_v22, %v10032_v14 }
 0x103   : > { %7336 = vmatmul.msk.f32.gmra.mxu1 %vm394_vm10, %v14940_v2  ;;  %vm941_vm10 = vcmp.eq.s32.totalorder %v9645_v61, %v9688_v6 }
 0x104   : > { %7301 = vmatmul.msk.f32.gmra.mxu0 %vm387_vm0, %v14940_v2  ;;  %vm943_vm0 = vcmp.eq.s32.totalorder %v9645_v61, %v9723_v19 }
 0x106   : > { %1766 = vperm.xlu2 %8857, %v9597_v52  }
 0x107   : > { %7427 = vmatmul.msk.f32.gmra.mxu2 %vm901_vm13, %v14940_v2  ;;  %v10019_v12 = vpop.permute.xlu1 %816 }
 0x108   : > { %vm903_vm1 = vcmp.eq.s32.totalorder %v9645_v61, %v10019_v12  ;;  %1796 = vperm.xlu0 %8858, %v9814_v23   ;;  %v8915_v23 = vld [vmem:[%s14849_s1 + $0xf8] sm:$0xff] }
 0x10a   : > { %7444 = vmatmul.msk.f32.vlgmr.msra.gmra.mxu3 %vm935_vm14, %v14940_v2  ;;  %1772 = vperm.xlu1 %8856, %v9592_v51  }
 0x10b   : > { %7337 = vmatmul.msk.f32.gmra.mxu1 %vm396_vm15, %v14940_v2  ;;  %2130 = vmatpush.msra.mxu3 %v9467_v29  ;;  %v10063_v29 = vpop.permute.xlu2 %822  ;;  %vm395_vm15 = vcmp.eq.s32.totalorder %v9645_v61, %v9972_v4  ;;  %v14945_v4 = vld [vmem:[#allocation6_spill] sm:$0xff] }
 0x10c   : > { %7302 = vmatmul.msk.f32.gmra.mxu0 %vm389_vm4, %v14940_v2  ;;  %vm907_vm9 = vcmp.eq.s32.totalorder %v9645_v61, %v10063_v29  ;;  %vm397_vm4 = vcmp.eq.s32.totalorder %v9645_v61, %v10013_v11  ;;  %v8920_v11 = vld [vmem:[%s14849_s1 + $0xe8] sm:$0xff] }
 0x10d   : > { %v10030_v13 = vpop.f32.mrf.mxu3  ;;  %2131 = vmatpush.msra.mxu3 %v9472_v30 }
 0x10e   : > { %1775 = vperm.xlu2 %8857, %v9669_v3   ;;  %v8913_v3 = vld [vmem:[%s14849_s1 + $0xc0] sm:$0xff] }
 0x10f   : > { %7428 = vmatmul.msk.f32.gmra.mxu2 %vm903_vm1, %v14940_v2  ;;  %2132 = vmatpush.msra.mxu3 %v9486_v33  ;;  %v7486_v33 = vld [vmem:[%s14850_s2 + $0x30] sm:$0xff] }
 0x110   : > { %v10050_v21 = vpop.permute.xlu1 %325  ;;  %1420 = vmatpush.msrb.mxu0 %v7486_v33 }
 0x111   : > { %2133 = vmatpush.msra.mxu3 %v9520_v39  ;;  %vm404_vm14 = vcmp.eq.s32.totalorder %v9729_v22, %v10050_v21 }
 0x112   : > { %7445 = vmatmul.msk.f32.gmra.mxu3 %vm937_vm2, %v14940_v2  ;;  %1781 = vperm.xlu1 %8856, %v9712_v17   ;;  %vm945_vm2 = vcmp.eq.s32.totalorder %v9645_v61, %v9806_v38  ;;  %v788_v17 = vld [vmem:[%s14850_s2 + $0x8] sm:$0xff] }
 0x113   : > { %7338 = vmatmul.msk.f32.gmra.mxu1 %vm398_vm3, %v14940_v2  ;;  %2134 = vmatpush.msra.mxu3 %v9528_v40  ;;  %v10098_v39 = vpop.permute.xlu2 %825 }
 0x114   : > { %7303 = vmatmul.msk.f32.gmra.mxu0 %vm391_vm8, %v14940_v2  ;;  %vm909_vm13 = vcmp.eq.s32.totalorder %v9645_v61, %v10098_v39  ;;  %vm947_vm8 = vcmp.eq.s32.totalorder %v9645_v61, %v9843_v9 }
 0x115   : > { %v10057_v25 = vpop.f32.mrf.mxu3  ;;  %2135 = vmatpush.msra.mxu3 %v9539_v42 }
 0x116   : > { %1784 = vperm.xlu2 %8857, %v9748_v26   ;;  %v787_v26 = vld [vmem:[%s14850_s2] sm:$0xff] }
 0x117   : > { %7429 = vmatmul.msk.f32.gmra.mxu2 %vm905_vm5, %v14940_v2  ;;  %2136 = vmatpush.msra.mxu3 %v9545_v43 }
 0x118   : > { %v10082_v30 = vpop.permute.xlu1 %328 }
 0x119   : > { %2137 = vmatpush.msra.mxu3 %v9554_v44  ;;  %vm406_vm3 = vcmp.eq.s32.totalorder %v9729_v22, %v10082_v30 }
 0x11a   : > { %7446 = vmatmul.msk.f32.gmra.mxu3 %vm939_vm6, %v14940_v2 }
 0x11b   : > { %7339 = vmatmul.msk.f32.gmra.mxu1 %vm400_vm7, %v14940_v2  ;;  %2138 = vmatpush.msra.mxu3 %v9562_v46  ;;  %v10129_v43 = vpop.permute.xlu2 %334  ;;  %v10141_v46 = vpop.permute.xlu0 %331  ;;  %vm399_vm7 = vcmp.eq.s32.totalorder %v9645_v61, %v10004_v10 }
 0x11c   : > { %7304 = vmatmul.msk.f32.gmra.mxu0 %vm393_vm12, %v14940_v2  ;;  %vm408_vm6 = vcmp.eq.s32.totalorder %v9729_v22, %v10141_v46  ;;  %vm401_vm12 = vcmp.eq.s32.totalorder %v9645_v61, %v10032_v14  ;;  %v8921_v14 = vld [vmem:[%s9381_s18 + $0x60] sm:$0xff] }
 0x11d   : > { %v10080_v20 = vpop.f32.mrf.mxu3  ;;  %2139 = vmatpush.msra.mxu3 %v9572_v48 }
 0x11e   : > { %1793 = vperm.xlu2 %8857, %v9823_v0   ;;  %v789_v0 = vld [vmem:[%s14850_s2 + $0x10] sm:$0xff] }
 0x11f   : > { %7430 = vmatmul.msk.f32.gmra.mxu2 %vm907_vm9, %v14940_v2  ;;  %2140 = vmatpush.msra.mxu3 %v9578_v49  ;;  %v14944_v49 = vld [vmem:[#allocation5_spill] sm:$0xff]  ;;  %v10196_v7 = vpop.f32.mrf.mxu0 }
 0x120   : > { %v10089_v32 = vpop.f32.mrf.mxu1  ;;  %1790 = vperm.xlu1 %8856, %v14944_v49   ;;  %v8923_v49 = vld [vmem:[%s14849_s1 + $0xf0] sm:$0xff] }
 0x121   : > { %2141 = vmatpush.msra.mxu3 %v9587_v50  ;;  %v10113_v41 = vpop.permute.xlu1 %828  ;;  %v8911_v50 = vld [vmem:[%s14849_s1 + $0xc8] sm:$0xff] }
 0x122   : > { %7447 = vmatmul.msk.f32.gmra.mxu3 %vm941_vm10, %v14940_v2  ;;  %vm911_vm1 = vcmp.eq.s32.totalorder %v9645_v61, %v10113_v41  ;;  %1805 = vperm.xlu0 %8858, %v8911_v50   ;;  %vm949_vm10 = vcmp.eq.s32.totalorder %v9645_v61, %v9884_v28 }
 0x123   : > { %7340 = vmatmul.msk.f32.gmra.mxu1 %vm402_vm11, %v14940_v2  ;;  %2142 = vmatpush.msra.mxu3 %v9605_v54  ;;  %v10163_v52 = vpop.permute.xlu2 %337  ;;  %vm410_vm11 = vcmp.eq.s32.totalorder %v9729_v22, %v10129_v43 }
 0x124   : > { %7305 = vmatmul.msk.f32.gmra.mxu0 %vm395_vm15, %v14940_v2  ;;  %vm412_vm15 = vcmp.eq.s32.totalorder %v9729_v22, %v10163_v52 }
 0x125   : > { %v10109_v40 = vpop.f32.mrf.mxu3  ;;  %2143 = vmatpush.msra.mxu3 %v9610_v55  ;;  %v10174_v55 = vpop.permute.xlu0 %834 }
 0x126   : > { %vm915_vm9 = vcmp.eq.s32.totalorder %v9645_v61, %v10174_v55  ;;  %1802 = vperm.xlu2 %8857, %v8913_v3  }
 0x127   : > { %7431 = vmatmul.msk.f32.gmra.mxu2 %vm909_vm13, %v14940_v2  ;;  %2144 = vmatpush.msra.mxu3 %v9616_v56  ;;  %v790_v56 = vld [vmem:[%s14850_s2 + $0x18] sm:$0xff] }
 0x128   : > { %v10116_v42 = vpop.f32.mrf.mxu1  ;;  %1799 = vperm.xlu1 %8856, %v9833_v37   ;;  %1628 = vmatpush.msrb.mxu1 %v790_v56  ;;  %v8914_v37 = vld [vmem:[%s14849_s1 + $0xd0] sm:$0xff] }
 0x129   : > { %2145 = vmatpush.msra.mxu3 %v9626_v57  ;;  %v10149_v48 = vpop.permute.xlu1 %831  ;;  %v8912_v57 = vld [vmem:[%s14849_s1 + $0xe0] sm:$0xff] }
 0x12a   : > { %7448 = vmatmul.msk.f32.gmra.mxu3 %vm943_vm0, %v14940_v2  ;;  %vm913_vm5 = vcmp.eq.s32.totalorder %v9645_v61, %v10149_v48  ;;  %1814 = vperm.xlu0 %8858, %v8912_v57   ;;  %vm403_vm0 = vcmp.eq.s32.totalorder %v9645_v61, %v10050_v21  ;;  %v8922_v21 = vld [vmem:[%s9381_s18 + $0x58] sm:$0xff] }
 0x12b   : > { %7341 = vmatmul.msk.f32.gmra.mxu1 %vm404_vm14, %v14940_v2  ;;  %v10201_v16 = vpop.permute.xlu2 %837  ;;  %vm888_vm14 = vcmp.eq.s32.totalorder %v9729_v22, %v14945_v4 }
 0x12c   : > { %7306 = vmatmul.msk.f32.gmra.mxu0 %vm397_vm4, %v14940_v2  ;;  %1629 = vmatpush.msrb.mxu1 %v789_v0  ;;  %vm917_vm13 = vcmp.eq.s32.totalorder %v9645_v61, %v10201_v16  ;;  %v8924_v0 = vld [vmem:[%s9381_s18 + $0x50] sm:$0xff] }
 0x12d   : > { %v10136_v44 = vpop.f32.mrf.mxu3 }
 0x12e   : > { %1630 = vmatpush.msrb.mxu1 %v788_v17  ;;  %1811 = vperm.xlu2 %8857, %v8917_v62  }
 0x12f   : > { %7432 = vmatmul.msk.f32.gmra.mxu2 %vm911_vm1, %v14940_v2 }
 0x130   : > { %v10143_v47 = vpop.f32.mrf.mxu1  ;;  %1808 = vperm.xlu1 %8856, %v8914_v37   ;;  %1631 = vmatpush.msrb.mxu1 %v787_v26  ;;  %v8925_v26 = vld [vmem:[%s9381_s18 + $0x48] sm:$0xff]  ;;  %v14946_v37 = vld [vmem:[#allocation7_spill] sm:$0xff] }
 0x131   : > { %vm890_vm4 = vcmp.eq.s32.totalorder %v9729_v22, %v14946_v37  ;;  %v8933_v37 = vld [vmem:[%s9381_s18 + $0x8] sm:$0xff] }
 0x132   : > { %7449 = vmatmul.msk.f32.gmra.mxu3 %vm945_vm2, %v14940_v2  ;;  %1823 = vperm.xlu0 %8858, %v8915_v23   ;;  %v10229_v5 = vpop.permute.xlu1 %340  ;;  %v10285_v23 = vpop.permute.xlu0 %843 }
 0x133   : > { %7342 = vmatmul.msk.f32.gmra.mxu1 %vm406_vm3, %v14940_v2  ;;  %v10247_v10 = vpop.permute.xlu2 %840  ;;  %vm414_vm2 = vcmp.eq.s32.totalorder %v9729_v22, %v10229_v5  ;;  %vm405_vm3 = vcmp.eq.s32.totalorder %v9645_v61, %v10082_v30  ;;  %v8927_v30 = vld [vmem:[%s9381_s18 + $0x38] sm:$0xff] }
 0x134   : > { %7307 = vmatmul.msk.f32.gmra.mxu0 %vm399_vm7, %v14940_v2  ;;  %2777 = vmatpush.msra.mxu1 %v8916_v1  ;;  %vm919_vm1 = vcmp.eq.s32.totalorder %v9645_v61, %v10247_v10  ;;  %v8926_v1 = vld [vmem:[%s9381_s18 + $0x40] sm:$0xff] }
 0x135   : > { %v10161_v51 = vpop.f32.mrf.mxu3 }
 0x136   : > { %2778 = vmatpush.msra.mxu1 %v8918_v59  ;;  %1820 = vperm.xlu2 %8857, %v8923_v49  }
 0x137   : > { %7433 = vmatmul.msk.f32.gmra.mxu2 %vm913_vm5, %v14940_v2  ;;  %vm921_vm5 = vcmp.eq.s32.totalorder %v9645_v61, %v10285_v23 }
 0x138   : > { %v10166_v54 = vpop.f32.mrf.mxu1  ;;  %2779 = vmatpush.msra.mxu1 %v8919_v53  ;;  %1817 = vperm.xlu1 %8856, %v8920_v11   ;;  %v8928_v53 = vld [vmem:[%s9381_s18 + $0x30] sm:$0xff] }
 0x13a   : > { %7450 = vmatmul.msk.f32.gmra.mxu3 %vm947_vm8, %v14940_v2  ;;  %2780 = vmatpush.msra.mxu1 %v8921_v14  ;;  %v10271_v3 = vpop.permute.xlu1 %343  ;;  %vm407_vm8 = vcmp.eq.s32.totalorder %v9645_v61, %v10141_v46 }
 0x13b   : > { %7343 = vmatmul.msk.f32.gmra.mxu1 %vm408_vm6, %v14940_v2  ;;  %vm892_vm6 = vcmp.eq.s32.totalorder %v9729_v22, %v9905_v34  ;;  %vm416_vm7 = vcmp.eq.s32.totalorder %v9729_v22, %v10271_v3  ;;  %v8931_v34 = vld [vmem:[%s9381_s18 + $0x18] sm:$0xff] }
 0x13c   : > { %7308 = vmatmul.msk.f32.gmra.mxu0 %vm401_vm12, %v14940_v2  ;;  %2781 = vmatpush.msra.mxu1 %v8922_v21  ;;  %v10265_v56 = vpop.f32.mrf.mxu2 }
 0x13d   : > { %v10188_v58 = vpop.f32.mrf.mxu3 }
 0x13e   : > { %v10234_v36 = vpop.f32.mrf.mxu0  ;;  %2782 = vmatpush.msra.mxu1 %v8924_v0 }
 0x13f   : > { %7434 = vmatmul.msk.f32.gmra.mxu2 %vm915_vm9, %v14940_v2 }
 0x140   : > { %v10206_v18 = vpop.f32.mrf.mxu1  ;;  %2783 = vmatpush.msra.mxu1 %v8925_v26 }
 0x142   : > { %7451 = vmatmul.msk.f32.gmra.mxu3 %vm949_vm10, %v14940_v2  ;;  %2784 = vmatpush.msra.mxu1 %v8926_v1  ;;  %vm1310_vm10 = vcmask 261120   ;;  %v14947_v1 = vld [vmem:[#allocation8_spill] sm:$0xff] }
 0x143   : > { %7344 = vmatmul.msk.f32.gmra.mxu1 %vm410_vm11, %v14940_v2  ;;  %v10312_v21 = vpop.permute.xlu1 %846  ;;  %vm409_vm11 = vcmp.eq.s32.totalorder %v9645_v61, %v10129_v43  ;;  %vm894_vm12 = vcmp.eq.s32.totalorder %v9729_v22, %v14947_v1 }
 0x144   : > { %7309 = vmatmul.msk.f32.gmra.mxu0 %vm403_vm0, %v14940_v2  ;;  %2785 = vmatpush.msra.mxu1 %v8927_v30  ;;  %v10307_v14 = vpop.f32.mrf.mxu2  ;;  %vm923_vm9 = vcmp.eq.s32.totalorder %v9645_v61, %v10312_v21  ;;  %v10337_v30 = vpop.permute.xlu2 %849 }
 0x145   : > { %v10227_v63 = vpop.f32.mrf.mxu3 }
 0x146   : > { %v10267_v57 = vpop.f32.mrf.mxu0  ;;  %2786 = vmatpush.msra.mxu1 %v8928_v53  ;;  %v8934_v53 = vld [vmem:[%s9381_s18] sm:$0xff] }
 0x147   : > { %7435 = vmatmul.msk.f32.gmra.mxu2 %vm917_vm13, %v14940_v2  ;;  %vm925_vm13 = vcmp.eq.s32.totalorder %v9645_v61, %v10337_v30 }
 0x148   : > { %v10240_v27 = vpop.f32.mrf.mxu1 }
 0x14a   : > { %7452 = vmatmul.msk.f32.vlgmr.msrb.gmra.mxu3 %vm888_vm14, %v14940_v2 }
 0x14b   : > { %7345 = vmatmul.msk.f32.gmra.mxu1 %vm412_vm15, %v14940_v2  ;;  %vm411_vm15 = vcmp.eq.s32.totalorder %v9645_v61, %v10163_v52  ;;  %v8939_v52 = vld [vmem:[%s9381_s18 + $0xd8] sm:$0xff] }
 0x14c   : > { %7310 = vmatmul.msk.f32.gmra.mxu0 %vm405_vm3, %v14940_v2 }
 0x14d   : > { %v763_v33 = vpop.f32.mrf.mxu3 }
 0x14e   : > { %v10263_v50 = vadd.f32 %v763_v33, %v10030_v13  ;;  %v7485_v13 = vld [vmem:[%s14850_s2 + $0x28] sm:$0xff]  ;;  %v8930_v33 = vld [vmem:[%s9381_s18 + $0x20] sm:$0xff] }
 0x14f   : > { %7436 = vmatmul.msk.f32.gmra.mxu2 %vm919_vm1, %v14940_v2  ;;  %1421 = vmatpush.msrb.mxu0 %v7485_v13  ;;  %v8932_v13 = vld [vmem:[%s9381_s18 + $0x10] sm:$0xff]  ;;  %vm898_vm1 = vcmp.eq.s32.totalorder %v9729_v22, %v9956_v45  ;;  %v8943_v45 = vld [vmem:[%s9381_s18 + $0xb8] sm:$0xff] }
 0x150   : > { %v10273_v17 = vpop.f32.mrf.mxu1 }
 0x151   : > { %v10297_v4 = vpop.f32.mrf.mxu0 }
 0x152   : > { %7453 = vmatmul.msk.f32.gmra.mxu3 %vm890_vm4, %v14940_v2  ;;  %vm415_vm4 = vcmp.eq.s32.totalorder %v9645_v61, %v10271_v3  ;;  %v8947_v3 = vld [vmem:[%s9381_s18 + $0x98] sm:$0xff] }
 0x153   : > { %7346 = vmatmul.msk.f32.gmra.mxu1 %vm414_vm2, %v14940_v2  ;;  %vm413_vm2 = vcmp.eq.s32.totalorder %v9645_v61, %v10229_v5 }
 0x154   : > { %7311 = vmatmul.msk.f32.gmra.mxu0 %vm407_vm8, %v14940_v2 }
 0x155   : > { %v766_v62 = vpop.f32.mrf.mxu3 }
 0x156   : > { %v10295_v59 = vadd.f32 %v766_v62, %v10057_v25  ;;  %v8929_v25 = vld [vmem:[%s9381_s18 + $0x28] sm:$0xff] }
 0x157   : > { %7437 = vmatmul.msk.f32.gmra.mxu2 %vm921_vm5, %v14940_v2  ;;  %2787 = vmatpush.msra.mxu1 %v8929_v25  ;;  %vm900_vm5 = vcmp.eq.s32.totalorder %v9729_v22, %v9981_v31 }
 0x158   : > { %v10303_v11 = vpop.f32.mrf.mxu1 }
 0x159   : > { %2788 = vmatpush.msra.mxu1 %v8930_v33  ;;  %v10324_v0 = vpop.f32.mrf.mxu0  ;;  %v8936_v33 = vld [vmem:[%s9381_s18 + $0xf0] sm:$0xff] }
 0x15a   : > { %7454 = vmatmul.msk.f32.gmra.mxu3 %vm892_vm6, %v14940_v2 }
 0x15b   : > { %7347 = vmatmul.msk.f32.gmra.mxu1 %vm416_vm7, %v14940_v2  ;;  %vm902_vm7 = vcmp.eq.s32.totalorder %v9729_v22, %v9992_v8 }
 0x15c   : > { %2789 = vmatpush.msra.mxu1 %v8931_v34  ;;  %7312 = vmatmul.msk.f32.gmra.mxu0 %vm409_vm11, %v14940_v2  ;;  %v695_v34 = vadd.f32 %v10116_v42, %v10234_v36  ;;  %v8938_v42 = vld [vmem:[%s9381_s18 + $0xe0] sm:$0xff] }
 0x15d   : > { %v769_v49 = vpop.f32.mrf.mxu3 }
 0x15e   : > { %v10322_v46 = vadd.f32 %v769_v49, %v10080_v20  ;;  %2790 = vmatpush.msra.mxu1 %v8932_v13  ;;  %v692_v20 = vadd.f32 %v10089_v32, %v10196_v7  ;;  %v8935_v32 = vld [vmem:[%s9381_s18 + $0xf8] sm:$0xff]  ;;  %v14948_v49 = vld [vmem:[#allocation9_spill] sm:$0xff] }
 0x15f   : > { %7438 = vmatmul.msk.f32.gmra.mxu2 %vm923_vm9, %v14940_v2  ;;  %vm896_vm14 = vcmp.eq.s32.totalorder %v9729_v22, %v14948_v49  ;;  %vm904_vm9 = vcmp.eq.s32.totalorder %v9729_v22, %v10019_v12 }
 0x160   : > { %v10328_v26 = vpop.f32.mrf.mxu1  ;;  %2791 = vmatpush.msra.mxu1 %v8933_v37  ;;  %v10364_v37 = vpop.permute.xlu0 %852 }
 0x161   : > { %v10351_v25 = vpop.f32.mrf.mxu0  ;;  %vm927_vm0 = vcmp.eq.s32.totalorder %v9645_v61, %v10364_v37 }
 0x162   : > { %v10339_v62 = vpop.f32.mrf.mxu2  ;;  %7455 = vmatmul.msk.f32.gmra.mxu3 %vm894_vm12, %v14940_v2  ;;  %2792 = vmatpush.msra.mxu1 %v8934_v53  ;;  %vm906_vm12 = vcmp.eq.s32.totalorder %v9729_v22, %v10043_v15 }
 0x163   : > { %7520 = vmatmul.msk.f32.vlgmr.msrb.gmra.mxu1 %vm1310_vm10, %v692_v20 }
 0x164   : > { %3650 = vmatpush.msrb.mxu1 %v8935_v32  ;;  %7313 = vmatmul.msk.f32.gmra.mxu0 %vm411_vm15, %v14940_v2  ;;  %v8940_v32 = vld [vmem:[%s9381_s18 + $0xd0] sm:$0xff] }
 0x165   : > { %v772_v43 = vpop.f32.mrf.mxu3 }
 0x166   : > { %v10349_v7 = vadd.f32 %v772_v43, %v10109_v40  ;;  %3651 = vmatpush.msrb.mxu1 %v8936_v33  ;;  %v8937_v40 = vld [vmem:[%s9381_s18 + $0xe8] sm:$0xff]  ;;  %v698_v43 = vadd.f32 %v10143_v47, %v10267_v57  ;;  %v8942_v47 = vld [vmem:[%s9381_s18 + $0xc0] sm:$0xff] }
 0x167   : > { %7439 = vmatmul.msk.f32.gmra.mxu2 %vm925_vm13, %v14940_v2 }
 0x168   : > { %v10359_v13 = vpop.f32.mrf.mxu1  ;;  %3652 = vmatpush.msrb.mxu1 %v8937_v40 }
 0x169   : > { %v10378_v53 = vpop.f32.mrf.mxu0 }
 0x16a   : > { %v10366_v20 = vpop.f32.mrf.mxu2  ;;  %7456 = vmatmul.msk.f32.gmra.mxu3 %vm896_vm14, %v14940_v2  ;;  %3653 = vmatpush.msrb.mxu1 %v8938_v42  ;;  %v8944_v42 = vld [vmem:[%s9381_s18 + $0xb0] sm:$0xff]  ;;  %vm908_vm14 = vcmp.eq.s32.totalorder %v9729_v22, %v10063_v29 }
 0x16b   : > { %7521 = vmatmul.msk.f32.gmra.mxu1 %vm1310_vm10, %v695_v34  ;;  %v10391_v34 = vpop.permute.xlu1 %855 }
 0x16c   : > { %3654 = vmatpush.msrb.mxu1 %v8939_v52  ;;  %7314 = vmatmul.msk.f32.gmra.mxu0 %vm413_vm2, %v14940_v2  ;;  %vm929_vm3 = vcmp.eq.s32.totalorder %v9645_v61, %v10391_v34  ;;  %v701_v52 = vadd.f32 %v10166_v54, %v10297_v4  ;;  %v8946_v54 = vld [vmem:[%s9381_s18 + $0xa0] sm:$0xff]  ;;  %vm912_vm2 = vcmp.eq.s32.totalorder %v9729_v22, %v10113_v41 }
 0x16d   : > { %v775_v36 = vpop.f32.mrf.mxu3 }
 0x16e   : > { %v10376_v1 = vadd.f32 %v775_v36, %v10136_v44  ;;  %3655 = vmatpush.msrb.mxu1 %v8940_v32  ;;  %v8941_v44 = vld [vmem:[%s9381_s18 + $0xc8] sm:$0xff] }
 0x16f   : > { %7440 = vmatmul.msk.f32.gmra.mxu2 %vm927_vm0, %v14940_v2  ;;  %v8945_v32 = vld [vmem:[%s9381_s18 + $0xa8] sm:$0xff]  ;;  %vm910_vm0 = vcmp.eq.s32.totalorder %v9729_v22, %v10098_v39 }
 0x170   : > { %v10386_v33 = vpop.f32.mrf.mxu1  ;;  %3656 = vmatpush.msrb.mxu1 %v8941_v44  ;;  %v8948_v44 = vld [vmem:[%s9381_s18 + $0x90] sm:$0xff] }
 0x171   : > { %v10405_v40 = vpop.f32.mrf.mxu0 }
 0x172   : > { %v10393_v49 = vpop.f32.mrf.mxu2  ;;  %7457 = vmatmul.msk.f32.gmra.mxu3 %vm898_vm1, %v14940_v2  ;;  %3657 = vmatpush.msrb.mxu1 %v8942_v47  ;;  %v704_v47 = vadd.f32 %v10206_v18, %v10324_v0  ;;  %v8950_v18 = vld [vmem:[%s9381_s18 + $0x80] sm:$0xff] }
 0x173   : > { %7522 = vmatmul.msk.f32.gmra.mxu1 %vm1310_vm10, %v698_v43 }
 0x174   : > { %3658 = vmatpush.msrb.mxu1 %v8943_v45  ;;  %7315 = vmatmul.msk.f32.gmra.mxu0 %vm415_vm4, %v14940_v2  ;;  %vm914_vm4 = vcmp.eq.s32.totalorder %v9729_v22, %v10149_v48 }
 0x175   : > { %v778_v5 = vpop.f32.mrf.mxu3 }
 0x176   : > { %v10403_v57 = vadd.f32 %v778_v5, %v10161_v51  ;;  %3659 = vmatpush.msrb.mxu1 %v8944_v42  ;;  %v10418_v51 = vpop.permute.xlu2 %858  ;;  %v7484_v42 = vld [vmem:[%s14850_s2 + $0x20] sm:$0xff] }
 0x177   : > { %7441 = vmatmul.msk.f32.gmra.mxu2 %vm929_vm3, %v14940_v2  ;;  %vm931_vm6 = vcmp.eq.s32.totalorder %v9645_v61, %v10418_v51  ;;  %1422 = vmatpush.msrb.mxu0 %v7484_v42 }
 0x178   : > { %v10411_v36 = vpop.f32.mrf.mxu1  ;;  %3660 = vmatpush.msrb.mxu1 %v8945_v32 }
 0x179   : > { %v602_v45 = vpop.f32.mrf.mxu0 }
 0x17a   : > { %v10420_v43 = vpop.f32.mrf.mxu2  ;;  %7458 = vmatmul.msk.f32.gmra.mxu3 %vm900_vm5, %v14940_v2  ;;  %3661 = vmatpush.msrb.mxu1 %v8946_v54  ;;  %v707_v54 = vadd.f32 %v10240_v27, %v10351_v25  ;;  %v710_v27 = vadd.f32 %v10273_v17, %v10378_v53  ;;  %v713_v53 = vadd.f32 %v10303_v11, %v10405_v40 }
 0x17b   : > { %7523 = vmatmul.msk.f32.gmra.mxu1 %vm1310_vm10, %v701_v52  ;;  %v8949_v52 = vld [vmem:[%s9381_s18 + $0x88] sm:$0xff]  ;;  %v716_v40 = vadd.f32 %v10328_v26, %v602_v45 }
 0x17c   : > { %3662 = vmatpush.msrb.mxu1 %v8947_v3 }
 0x17d   : > { %v781_v4 = vpop.f32.mrf.mxu3 }
 0x17e   : > { %v10430_v31 = vadd.f32 %v781_v4, %v10188_v58  ;;  %3663 = vmatpush.msrb.mxu1 %v8948_v44  ;;  %v10444_v58 = vpop.permute.xlu0 %861  ;;  %v10463_v44 = vpop.permute.xlu1 %1730 }
 0x17f   : > { %7442 = vmatmul.msk.f32.gmra.mxu2 %vm931_vm6, %v14940_v2  ;;  %vm933_vm8 = vcmp.eq.s32.totalorder %v9645_v61, %v10444_v58  ;;  %vm1825_vm11 = vcmp.eq.s32.totalorder %v9645_v61, %v10463_v44  ;;  %v10480_v25 = vpop.permute.xlu2 %1733  ;;  %vm916_vm6 = vcmp.eq.s32.totalorder %v9729_v22, %v10174_v55 }
 0x180   : > { %v10438_v5 = vpop.f32.mrf.mxu1  ;;  %3664 = vmatpush.msrb.mxu1 %v8949_v52  ;;  %vm1827_vm13 = vcmp.eq.s32.totalorder %v9645_v61, %v10480_v25 }
 0x181   : > { %v605_v4 = vpop.f32.mrf.mxu0 }
 0x182   : > { %v10446_v32 = vpop.f32.mrf.mxu2  ;;  %7459 = vmatmul.msk.f32.gmra.mxu3 %vm902_vm7, %v14940_v2  ;;  %3665 = vmatpush.msrb.mxu1 %v8950_v18  ;;  %v719_v45 = vadd.f32 %v10359_v13, %v605_v4 }
 0x183   : > { %7524 = vmatmul.msk.f32.gmra.mxu1 %vm1310_vm10, %v704_v47 }
 0x185   : > { %v784_v8 = vpop.f32.mrf.mxu3 }
 0x186   : > { %v10454_v0 = vadd.f32 %v784_v8, %v10227_v63  ;;  %v10497_v18 = vpop.permute.xlu0 %1736 }
 0x187   : > { %7443 = vmatmul.msk.f32.gmra.mxu2 %vm933_vm8, %v14940_v2  ;;  %vm1829_vm15 = vcmp.eq.s32.totalorder %v9645_v61, %v10497_v18  ;;  %vm918_vm8 = vcmp.eq.s32.totalorder %v9729_v22, %v10201_v16 }
 0x188   : > { %v10459_v3 = vpop.f32.mrf.mxu1 }
 0x189   : > { %v608_v52 = vpop.f32.mrf.mxu0 }
 0x18a   : > { %v10465_v47 = vpop.f32.mrf.mxu2  ;;  %7460 = vmatmul.msk.f32.gmra.mxu3 %vm904_vm9, %v14940_v2  ;;  %v722_v13 = vadd.f32 %v10386_v33, %v608_v52 }
 0x18b   : > { %7525 = vmatmul.msk.f32.gmra.mxu1 %vm1310_vm10, %v707_v54 }
 0x18d   : > { %v10471_v63 = vpop.f32.mrf.mxu3 }
 0x18e   : > { %14949 = vst [vmem:[#allocation5_spill] sm:$0xff] %v10471_v63 }
 0x18f   : > { %7616 = vmatmul.msk.f32.vlgmr.msrb.gmra.mxu2 %vm1825_vm11, %v14940_v2  ;;  %vm920_vm11 = vcmp.eq.s32.totalorder %v9729_v22, %v10247_v10  ;;  %v10609_v10 = vld [vmem:[%s14849_s1] sm:$0xff] }
 0x190   : > { %v10478_v12 = vpop.f32.mrf.mxu1  ;;  %14962 = vst [vmem:[#allocation18_spill] sm:$0xff] %v10609_v10 }
 0x191   : > { %v611_v54 = vpop.f32.mrf.mxu0 }
 0x192   : > { %v10482_v42 = vpop.f32.mrf.mxu2  ;;  %7461 = vmatmul.msk.f32.gmra.mxu3 %vm906_vm12, %v14940_v2  ;;  %v725_v52 = vadd.f32 %v10411_v36, %v611_v54 }
 0x193   : > { %7526 = vmatmul.msk.f32.gmra.mxu1 %vm1310_vm10, %v710_v27  ;;  %v10513_v27 = vpop.permute.xlu1 %1739 }
 0x194   : > { %vm1831_vm1 = vcmp.eq.s32.totalorder %v9645_v61, %v10513_v27 }
 0x195   : > { %v10488_v17 = vpop.f32.mrf.mxu3 }
 0x196   : > { %14950 = vst [vmem:[#allocation6_spill] sm:$0xff] %v10488_v17 }
 0x197   : > { %7617 = vmatmul.msk.f32.gmra.mxu2 %vm1827_vm13, %v14940_v2  ;;  %vm922_vm13 = vcmp.eq.s32.totalorder %v9729_v22, %v10285_v23  ;;  %v10650_v23 = vld [vmem:[%s14849_s1 + $0x38] sm:$0xff] }
 0x198   : > { %v10495_v15 = vpop.f32.mrf.mxu1  ;;  %14964 = vst [vmem:[#allocation20_spill] sm:$0xff] %v10650_v23 }
 0x199   : > { %v614_v26 = vpop.f32.mrf.mxu0 }
 0x19a   : > { %v10499_v8 = vpop.f32.mrf.mxu2  ;;  %7462 = vmatmul.msk.f32.gmra.mxu3 %vm908_vm14, %v14940_v2  ;;  %v728_v54 = vadd.f32 %v10438_v5, %v614_v26 }
 0x19b   : > { %7527 = vmatmul.msk.f32.gmra.mxu1 %vm1310_vm10, %v713_v53 }
 0x19d   : > { %v10505_v11 = vpop.f32.mrf.mxu3 }
 0x19e   : > { %14951 = vst [vmem:[#allocation7_spill] sm:$0xff] %v10505_v11  ;;  %v10529_v11 = vpop.permute.xlu2 %1742 }
 0x19f   : > { %7618 = vmatmul.msk.f32.gmra.mxu2 %vm1829_vm15, %v14940_v2  ;;  %14953 = vst [vmem:[#allocation9_spill] sm:$0xff] %v10529_v11  ;;  %vm1833_vm3 = vcmp.eq.s32.totalorder %v9645_v61, %v10529_v11  ;;  %vm924_vm15 = vcmp.eq.s32.totalorder %v9729_v22, %v10312_v21 }
 0x1a0   : > { %v10509_v29 = vpop.f32.mrf.mxu1 }
 0x1a1   : > { %v617_v4 = vpop.f32.mrf.mxu0 }
 0x1a2   : > { %v10515_v17 = vpop.f32.mrf.mxu2  ;;  %7463 = vmatmul.msk.f32.gmra.mxu3 %vm910_vm0, %v14940_v2  ;;  %v731_v26 = vadd.f32 %v10459_v3, %v617_v4  ;;  %v10615_v4 = vld [vmem:[%s14849_s1 + $0x10] sm:$0xff] }
 0x1a3   : > { %7528 = vmatmul.msk.f32.gmra.mxu1 %vm1310_vm10, %v716_v40 }
 0x1a5   : > { %v10521_v53 = vpop.f32.mrf.mxu3 }
 0x1a6   : > { %14952 = vst [vmem:[#allocation8_spill] sm:$0xff] %v10521_v53  ;;  %v7683_v53 = vld [vmem:[%s14850_s2 + $0x58] sm:$0xff] }
 0x1a7   : > { %7619 = vmatmul.msk.f32.gmra.mxu2 %vm1831_vm1, %v14940_v2  ;;  %2356 = vmatpush.msra.mxu0 %v7683_v53  ;;  %v10564_v53 = vpop.permute.xlu2 %1748  ;;  %vm926_vm1 = vcmp.eq.s32.totalorder %v9729_v22, %v10337_v30  ;;  %v10718_v30 = vld [vmem:[%s14849_s1 + $0x68] sm:$0xff] }
 0x1a8   : > { %v10527_v39 = vpop.f32.mrf.mxu1  ;;  %14957 = vst [vmem:[#allocation13_spill] sm:$0xff] %v10564_v53  ;;  %vm1837_vm7 = vcmp.eq.s32.totalorder %v9645_v61, %v10564_v53 }
 0x1a9   : > { %14970 = vst [vmem:[#allocation26_spill] sm:$0xff] %v10718_v30 }
 0x1aa   : > { %v10531_v63 = vpop.f32.mrf.mxu2  ;;  %7464 = vmatmul.msk.f32.gmra.mxu3 %vm912_vm2, %v14940_v2 }
 0x1ab   : > { %7529 = vmatmul.msk.f32.gmra.mxu1 %vm1310_vm10, %v719_v45  ;;  %v10548_v45 = vpop.permute.xlu1 %1745 }
 0x1ac   : > { %14955 = vst [vmem:[#allocation11_spill] sm:$0xff] %v10548_v45  ;;  %vm1835_vm5 = vcmp.eq.s32.totalorder %v9645_v61, %v10548_v45 }
 0x1ad   : > { %v10537_v40 = vpop.f32.mrf.mxu3 }
 0x1ae   : > { %14954 = vst [vmem:[#allocation10_spill] sm:$0xff] %v10537_v40 }
 0x1af   : > { %7620 = vmatmul.msk.f32.gmra.mxu2 %vm1833_vm3, %v14940_v2  ;;  %vm928_vm3 = vcmp.eq.s32.totalorder %v9729_v22, %v10364_v37  ;;  %v10752_v37 = vld [vmem:[%s14849_s1 + $0x80] sm:$0xff] }
 0x1b0   : > { %v10541_v41 = vpop.f32.mrf.mxu1  ;;  %14973 = vst [vmem:[#allocation29_spill] sm:$0xff] %v10752_v37 }
 0x1b2   : > { %v10550_v11 = vpop.f32.mrf.mxu2  ;;  %7465 = vmatmul.msk.f32.gmra.mxu3 %vm914_vm4, %v14940_v2 }
 0x1b3   : > { %7530 = vmatmul.msk.f32.gmra.mxu1 %vm1310_vm10, %v722_v13  ;;  %v620_v13 = vpop.f32.mrf.mxu0 }
 0x1b5   : > { %v10556_v33 = vpop.f32.mrf.mxu3 }
 0x1b6   : > { %14956 = vst [vmem:[#allocation12_spill] sm:$0xff] %v10556_v33  ;;  %v10580_v33 = vpop.permute.xlu0 %1751 }
 0x1b7   : > { %7621 = vmatmul.msk.f32.gmra.mxu2 %vm1835_vm5, %v14940_v2  ;;  %14959 = vst [vmem:[#allocation15_spill] sm:$0xff] %v10580_v33  ;;  %vm1839_vm9 = vcmp.eq.s32.totalorder %v9645_v61, %v10580_v33  ;;  %v10625_v33 = vld [vmem:[%s14849_s1 + $0x8] sm:$0xff]  ;;  %vm930_vm5 = vcmp.eq.s32.totalorder %v9729_v22, %v10391_v34  ;;  %v10789_v34 = vld [vmem:[%s14849_s1 + $0x90] sm:$0xff] }
 0x1b8   : > { %v10562_v48 = vpop.f32.mrf.mxu1 }
 0x1ba   : > { %v10566_v40 = vpop.f32.mrf.mxu2  ;;  %7466 = vmatmul.msk.f32.gmra.mxu3 %vm916_vm6, %v14940_v2 }
 0x1bb   : > { %7531 = vmatmul.msk.f32.gmra.mxu1 %vm1310_vm10, %v725_v52  ;;  %v623_v52 = vpop.f32.mrf.mxu0 }
 0x1bd   : > { %v10572_v36 = vpop.f32.mrf.mxu3 }
 0x1be   : > { %14958 = vst [vmem:[#allocation14_spill] sm:$0xff] %v10572_v36  ;;  %v10596_v36 = vpop.permute.xlu1 %1754 }
 0x1bf   : > { %7622 = vmatmul.msk.f32.gmra.mxu2 %vm1837_vm7, %v14940_v2  ;;  %14961 = vst [vmem:[#allocation17_spill] sm:$0xff] %v10596_v36  ;;  %vm1841_vm12 = vcmp.eq.s32.totalorder %v9645_v61, %v10596_v36  ;;  %v734_v36 = vadd.f32 %v10478_v12, %v620_v13  ;;  %v10644_v13 = vld [vmem:[%s14849_s1 + $0x18] sm:$0xff]  ;;  %vm932_vm7 = vcmp.eq.s32.totalorder %v9729_v22, %v10418_v51 }
 0x1c0   : > { %v10578_v55 = vpop.f32.mrf.mxu1 }
 0x1c2   : > { %v10582_v45 = vpop.f32.mrf.mxu2  ;;  %7467 = vmatmul.msk.f32.gmra.mxu3 %vm918_vm8, %v14940_v2 }
 0x1c3   : > { %7532 = vmatmul.msk.f32.gmra.mxu1 %vm1310_vm10, %v728_v54  ;;  %v14867_v54 = vmov 3  }
 0x1c4   : > { %8859 = vset.pattern.permute.xlu1 %v14867_v54  ;;  %8861 = vset.pattern.permute.xlu0 %v14867_v54 }
 0x1c5   : > { %v10588_v5 = vpop.f32.mrf.mxu3  ;;  %2490 = vperm.xlu1 %8859, %v10609_v10   ;;  %2496 = vperm.xlu0 %8861, %v10615_v4  }
 0x1c6   : > { %14960 = vst [vmem:[#allocation16_spill] sm:$0xff] %v10588_v5  ;;  %v626_v5 = vpop.f32.mrf.mxu0  ;;  %8860 = vset.pattern.permute.xlu2 %v14867_v54  ;;  %v10661_v54 = vld [vmem:[%s14849_s1 + $0x20] sm:$0xff] }
 0x1c7   : > { %7623 = vmatmul.msk.f32.gmra.mxu2 %vm1839_vm9, %v14940_v2  ;;  %2493 = vperm.xlu2 %8860, %v10625_v33   ;;  %14965 = vst [vmem:[#allocation21_spill] sm:$0xff] %v10661_v54  ;;  %vm934_vm9 = vcmp.eq.s32.totalorder %v9729_v22, %v10444_v58 }
 0x1c8   : > { %v10592_v16 = vpop.f32.mrf.mxu1 }
 0x1ca   : > { %v10598_v53 = vpop.f32.mrf.mxu2  ;;  %7468 = vmatmul.msk.f32.gmra.mxu3 %vm920_vm11, %v14940_v2 }
 0x1cb   : > { %7533 = vmatmul.msk.f32.gmra.mxu1 %vm1310_vm10, %v731_v26 }
 0x1cd   : > { %v1209_v3 = vpop.f32.mrf.mxu3  ;;  %2499 = vperm.xlu1 %8859, %v10644_v13   ;;  %2511 = vperm.xlu0 %8861, %v10650_v23  }
 0x1ce   : > { %v1210_v26 = vadd.f32 %v1209_v3, %v10265_v56  ;;  %v10633_v56 = vpop.permute.xlu2 %1757  ;;  %v629_v23 = vpop.f32.mrf.mxu0 }
 0x1cf   : > { %7624 = vmatmul.msk.f32.gmra.mxu2 %vm1841_vm12, %v14940_v2  ;;  %14963 = vst [vmem:[#allocation19_spill] sm:$0xff] %v10633_v56  ;;  %vm1843_vm14 = vcmp.eq.s32.totalorder %v9645_v61, %v10633_v56  ;;  %2502 = vperm.xlu2 %8860, %v10661_v54   ;;  %vm936_vm12 = vcmp.eq.s32.totalorder %v9729_v22, %v9638_v60 }
 0x1d0   : > { %v10628_v10 = vpop.f32.mrf.mxu1  ;;  %7488 = vmatmul.msk.f32.vlgmr.msrb.gmra.mxu0 %vm1310_vm10, %v1210_v26  ;;  %v737_v26 = vadd.f32 %v10495_v15, %v623_v52  ;;  %v10678_v52 = vld [vmem:[%s14849_s1 + $0x28] sm:$0xff] }
 0x1d2   : > { %v10635_v3 = vpop.f32.mrf.mxu2  ;;  %7469 = vmatmul.msk.f32.gmra.mxu3 %vm922_vm13, %v14940_v2 }
 0x1d3   : > { %7534 = vmatmul.msk.f32.gmra.mxu1 %vm1310_vm10, %v734_v36 }
 0x1d5   : > { %v1212_v12 = vpop.f32.mrf.mxu3  ;;  %2505 = vperm.xlu1 %8859, %v10678_v52  }
 0x1d6   : > { %v1213_v36 = vadd.f32 %v1212_v12, %v10307_v14  ;;  %v10667_v14 = vpop.permute.xlu0 %1760  ;;  %v10684_v12 = vld [vmem:[%s14849_s1 + $0x50] sm:$0xff] }
 0x1d7   : > { %7625 = vmatmul.msk.f32.gmra.mxu2 %vm1843_vm14, %v14940_v2  ;;  %14966 = vst [vmem:[#allocation22_spill] sm:$0xff] %v10667_v14  ;;  %vm1845_vm0 = vcmp.eq.s32.totalorder %v9645_v61, %v10667_v14  ;;  %2520 = vperm.xlu0 %8861, %v10684_v12   ;;  %v10693_v14 = vld [vmem:[%s14849_s1 + $0x30] sm:$0xff]  ;;  %vm938_vm14 = vcmp.eq.s32.totalorder %v9729_v22, %v9738_v24 }
 0x1d8   : > { %v10664_v56 = vpop.f32.mrf.mxu1  ;;  %7489 = vmatmul.msk.f32.gmra.mxu0 %vm1310_vm10, %v1213_v36  ;;  %14967 = vst [vmem:[#allocation23_spill] sm:$0xff] %v10684_v12  ;;  %2508 = vperm.xlu2 %8860, %v10693_v14   ;;  %v10701_v12 = vpop.permute.xlu1 %1763 }
 0x1d9   : > { %14969 = vst [vmem:[#allocation25_spill] sm:$0xff] %v10701_v12  ;;  %vm1847_vm2 = vcmp.eq.s32.totalorder %v9645_v61, %v10701_v12 }
 0x1da   : > { %v10669_v15 = vpop.f32.mrf.mxu2  ;;  %7470 = vmatmul.msk.f32.gmra.mxu3 %vm924_vm15, %v14940_v2 }
 0x1db   : > { %7535 = vmatmul.msk.f32.gmra.mxu1 %vm1310_vm10, %v737_v26  ;;  %v740_v26 = vadd.f32 %v10509_v29, %v626_v5  ;;  %v632_v29 = vpop.f32.mrf.mxu0 }
 0x1dd   : > { %v1215_v21 = vpop.f32.mrf.mxu3 }
 0x1de   : > { %v1216_v36 = vadd.f32 %v1215_v21, %v10339_v62  ;;  %v10712_v21 = vld [vmem:[%s14849_s1 + $0x40] sm:$0xff] }
 0x1df   : > { %7626 = vmatmul.msk.f32.gmra.mxu2 %vm1845_vm0, %v14940_v2  ;;  %2514 = vperm.xlu1 %8859, %v10712_v21   ;;  %vm940_vm0 = vcmp.eq.s32.totalorder %v9729_v22, %v9784_v35 }
 0x1e0   : > { %v10696_v54 = vpop.f32.mrf.mxu1  ;;  %7490 = vmatmul.msk.f32.gmra.mxu0 %vm1310_vm10, %v1216_v36  ;;  %2529 = vperm.xlu0 %8861, %v10718_v30   ;;  %v10735_v30 = vpop.permute.xlu2 %1766 }
 0x1e1   : > { %14968 = vst [vmem:[#allocation24_spill] sm:$0xff] %v10696_v54  ;;  %v10727_v54 = vld [vmem:[%s14849_s1 + $0x48] sm:$0xff]  ;;  %vm1849_vm4 = vcmp.eq.s32.totalorder %v9645_v61, %v10735_v30 }
 0x1e2   : > { %v10703_v62 = vpop.f32.mrf.mxu2  ;;  %7471 = vmatmul.msk.f32.gmra.mxu3 %vm926_vm1, %v14940_v2  ;;  %2517 = vperm.xlu2 %8860, %v10727_v54  }
 0x1e3   : > { %7536 = vmatmul.msk.f32.gmra.mxu1 %vm1310_vm10, %v740_v26  ;;  %v743_v26 = vadd.f32 %v10527_v39, %v629_v23  ;;  %v635_v39 = vpop.f32.mrf.mxu0 }
 0x1e5   : > { %v1218_v5 = vpop.f32.mrf.mxu3 }
 0x1e6   : > { %v1219_v36 = vadd.f32 %v1218_v5, %v10366_v20  ;;  %v10746_v5 = vld [vmem:[%s14849_s1 + $0x58] sm:$0xff] }
 0x1e7   : > { %7627 = vmatmul.msk.f32.gmra.mxu2 %vm1847_vm2, %v14940_v2  ;;  %14972 = vst [vmem:[#allocation28_spill] sm:$0xff] %v10746_v5  ;;  %2523 = vperm.xlu1 %8859, %v10746_v5   ;;  %vm942_vm2 = vcmp.eq.s32.totalorder %v9729_v22, %v9688_v6 }
 0x1e8   : > { %v10730_v12 = vpop.f32.mrf.mxu1  ;;  %7491 = vmatmul.msk.f32.gmra.mxu0 %vm1310_vm10, %v1219_v36  ;;  %2538 = vperm.xlu0 %8861, %v10752_v37   ;;  %v7682_v37 = vld [vmem:[%s14850_s2 + $0x50] sm:$0xff] }
 0x1e9   : > { %14971 = vst [vmem:[#allocation27_spill] sm:$0xff] %v10730_v12  ;;  %v10761_v12 = vld [vmem:[%s14849_s1 + $0x60] sm:$0xff]  ;;  %2357 = vmatpush.msra.mxu0 %v7682_v37 }
 0x1ea   : > { %v10737_v20 = vpop.f32.mrf.mxu2  ;;  %7472 = vmatmul.msk.f32.gmra.mxu3 %vm928_vm3, %v14940_v2  ;;  %2526 = vperm.xlu2 %8860, %v10761_v12  }
 0x1eb   : > { %7537 = vmatmul.msk.f32.gmra.mxu1 %vm1310_vm10, %v743_v26  ;;  %v746_v26 = vadd.f32 %v10541_v41, %v632_v29 }
 0x1ed   : > { %v1221_v23 = vpop.f32.mrf.mxu3 }
 0x1ee   : > { %v1222_v36 = vadd.f32 %v1221_v23, %v10393_v49  ;;  %v10772_v49 = vpop.permute.xlu0 %1769  ;;  %v10783_v23 = vld [vmem:[%s14849_s1 + $0x70] sm:$0xff] }
 0x1ef   : > { %7628 = vmatmul.msk.f32.gmra.mxu2 %vm1849_vm4, %v14940_v2  ;;  %14975 = vst [vmem:[#allocation31_spill] sm:$0xff] %v10772_v49  ;;  %vm1851_vm6 = vcmp.eq.s32.totalorder %v9645_v61, %v10772_v49  ;;  %2532 = vperm.xlu1 %8859, %v10783_v23   ;;  %vm944_vm4 = vcmp.eq.s32.totalorder %v9729_v22, %v9723_v19  ;;  %v7681_v19 = vld [vmem:[%s14850_s2 + $0x48] sm:$0xff] }
 0x1f0   : > { %v10764_v5 = vpop.f32.mrf.mxu1  ;;  %7492 = vmatmul.msk.f32.gmra.mxu0 %vm1310_vm10, %v1222_v36  ;;  %14976 = vst [vmem:[#allocation32_spill] sm:$0xff] %v10783_v23  ;;  %2544 = vperm.xlu0 %8861, %v10789_v34   ;;  %v638_v36 = vpop.f32.mrf.mxu0 }
 0x1f1   : > { %14974 = vst [vmem:[#allocation30_spill] sm:$0xff] %v10764_v5  ;;  %v10798_v5 = vld [vmem:[%s14849_s1 + $0x78] sm:$0xff]  ;;  %2358 = vmatpush.msra.mxu0 %v7681_v19 }
 0x1f2   : > { %v10774_v41 = vpop.f32.mrf.mxu2  ;;  %7473 = vmatmul.msk.f32.gmra.mxu3 %vm930_vm5, %v14940_v2  ;;  %2535 = vperm.xlu2 %8860, %v10798_v5  }
 0x1f3   : > { %7538 = vmatmul.msk.f32.gmra.mxu1 %vm1310_vm10, %v746_v26  ;;  %v749_v26 = vadd.f32 %v10562_v48, %v635_v39  ;;  %v10817_v39 = vld [vmem:[%s14849_s1 + $0x88] sm:$0xff] }
 0x1f5   : > { %v1224_v29 = vpop.f32.mrf.mxu3 }
 0x1f6   : > { %v1225_v37 = vadd.f32 %v1224_v29, %v10420_v43  ;;  %v10806_v43 = vpop.permute.xlu1 %1772  ;;  %v10844_v58 = vpop.permute.xlu0 %1778 }
 0x1f7   : > { %7629 = vmatmul.msk.f32.gmra.mxu2 %vm1851_vm6, %v14940_v2  ;;  %14978 = vst [vmem:[#allocation34_spill] sm:$0xff] %v10806_v43  ;;  %vm1853_vm8 = vcmp.eq.s32.totalorder %v9645_v61, %v10806_v43  ;;  %2541 = vperm.xlu1 %8859, %v10817_v39   ;;  %v10828_v43 = vpop.permute.xlu2 %1775  ;;  %vm1857_vm13 = vcmp.eq.s32.totalorder %v9645_v61, %v10844_v58 }
 0x1f8   : > { %v10801_v23 = vpop.f32.mrf.mxu1  ;;  %7493 = vmatmul.msk.f32.gmra.mxu0 %vm1310_vm10, %v1225_v37  ;;  %v752_v37 = vadd.f32 %v10578_v55, %v638_v36  ;;  %vm1855_vm11 = vcmp.eq.s32.totalorder %v9645_v61, %v10828_v43  ;;  %vm946_vm6 = vcmp.eq.s32.totalorder %v9729_v22, %v9806_v38 }
 0x1f9   : > { %14977 = vst [vmem:[#allocation33_spill] sm:$0xff] %v10801_v23 }
 0x1fa   : > { %v10808_v29 = vpop.f32.mrf.mxu2  ;;  %7474 = vmatmul.msk.f32.gmra.mxu3 %vm932_vm7, %v14940_v2 }
 0x1fb   : > { %7539 = vmatmul.msk.f32.gmra.mxu1 %vm1310_vm10, %v749_v26  ;;  %v641_v26 = vpop.f32.mrf.mxu0 }
 0x1fc   : > { %v755_v36 = vadd.f32 %v10592_v16, %v641_v26 }
 0x1fd   : > { %v1227_v48 = vpop.f32.mrf.mxu3 }
 0x1fe   : > { %v1228_v51 = vadd.f32 %v1227_v48, %v10446_v32  ;;  %v10891_v35 = vpop.permute.xlu0 %1787 }
 0x1ff   : > { %7630 = vmatmul.msk.f32.gmra.mxu2 %vm1853_vm8, %v14940_v2  ;;  %vm1863_vm3 = vcmp.eq.s32.totalorder %v9645_v61, %v10891_v35  ;;  %vm948_vm8 = vcmp.eq.s32.totalorder %v9729_v22, %v9843_v9 }
 0x200   : > { %v10823_v23 = vpop.f32.mrf.mxu1  ;;  %7494 = vmatmul.msk.f32.gmra.mxu0 %vm1310_vm10, %v1228_v51 }
 0x201   : > { %14979 = vst [vmem:[#allocation35_spill] sm:$0xff] %v10823_v23 }
 0x202   : > { %v10830_v49 = vpop.f32.mrf.mxu2  ;;  %7475 = vmatmul.msk.f32.gmra.mxu3 %vm934_vm9, %v14940_v2 }
 0x203   : > { %7540 = vmatmul.msk.f32.gmra.mxu1 %vm1310_vm10, %v752_v37  ;;  %v644_v37 = vpop.f32.mrf.mxu0 }
 0x204   : > { %v758_v26 = vadd.f32 %v10628_v10, %v644_v37 }
 0x205   : > { %v1230_v32 = vpop.f32.mrf.mxu3 }
 0x206   : > { %v1231_v55 = vadd.f32 %v1230_v32, %v10465_v47  ;;  %v10860_v32 = vpop.permute.xlu1 %1781 }
 0x207   : > { %7631 = vmatmul.msk.f32.gmra.mxu2 %vm1855_vm11, %v14940_v2  ;;  %vm1859_vm15 = vcmp.eq.s32.totalorder %v9645_v61, %v10860_v32  ;;  %vm950_vm11 = vcmp.eq.s32.totalorder %v9729_v22, %v9884_v28 }
 0x208   : > { %v10839_v48 = vpop.f32.mrf.mxu1  ;;  %7495 = vmatmul.msk.f32.gmra.mxu0 %vm1310_vm10, %v1231_v55 }
 0x209   : > { %14980 = vst [vmem:[#allocation36_spill] sm:$0xff] %v10839_v48 }
 0x20a   : > { %v10846_v51 = vpop.f32.mrf.mxu2  ;;  %7476 = vmatmul.msk.f32.gmra.mxu3 %vm936_vm12, %v14940_v2 }
 0x20b   : > { %7541 = vmatmul.msk.f32.gmra.mxu1 %vm1310_vm10, %v755_v36 }
 0x20d   : > { %v1233_v47 = vpop.f32.mrf.mxu3 }
 0x20e   : > { %v1234_v16 = vadd.f32 %v1233_v47, %v10482_v42  ;;  %v647_v42 = vpop.f32.mrf.mxu0  ;;  %v10876_v47 = vpop.permute.xlu2 %1784 }
 0x20f   : > { %7632 = vmatmul.msk.f32.gmra.mxu2 %vm1857_vm13, %v14940_v2  ;;  %v761_v37 = vadd.f32 %v10664_v56, %v647_v42  ;;  %vm1861_vm1 = vcmp.eq.s32.totalorder %v9645_v61, %v10876_v47  ;;  %vm1826_vm13 = vcmp.eq.s32.totalorder %v9729_v22, %v10463_v44 }
 0x210   : > { %v10855_v60 = vpop.f32.mrf.mxu1  ;;  %7496 = vmatmul.msk.f32.gmra.mxu0 %vm1310_vm10, %v1234_v16 }
 0x211   : > { %14981 = vst [vmem:[#allocation37_spill] sm:$0xff] %v10855_v60 }
 0x212   : > { %7477 = vmatmul.msk.f32.gmra.mxu3 %vm938_vm14, %v14940_v2  ;;  %v10863_v55 = vpop.f32.mrf.mxu2 }
 0x213   : > { %7542 = vmatmul.msk.f32.gmra.mxu1 %vm1310_vm10, %v758_v26 }
 0x215   : > { %v1236_v10 = vpop.f32.mrf.mxu3 }
 0x216   : > { %v1237_v36 = vadd.f32 %v1236_v10, %v10499_v8 }
 0x217   : > { %7633 = vmatmul.msk.f32.gmra.mxu2 %vm1859_vm15, %v14940_v2  ;;  %vm1828_vm15 = vcmp.eq.s32.totalorder %v9729_v22, %v10480_v25 }
 0x218   : > { %v10871_v24 = vpop.f32.mrf.mxu1  ;;  %7497 = vmatmul.msk.f32.gmra.mxu0 %vm1310_vm10, %v1237_v36 }
 0x219   : > { %14982 = vst [vmem:[#allocation38_spill] sm:$0xff] %v10871_v24  ;;  %v11114_v24 = vld [vmem:[%s9381_s18 + $0x78] sm:$0xff] }
 0x21a   : > { %7478 = vmatmul.msk.f32.gmra.mxu3 %vm940_vm0, %v14940_v2  ;;  %v10879_v16 = vpop.f32.mrf.mxu2 }
 0x21b   : > { %7543 = vmatmul.msk.f32.gmra.mxu1 %vm1310_vm10, %v761_v37 }
 0x21d   : > { %v1239_v8 = vpop.f32.mrf.mxu3 }
 0x21e   : > { %v1240_v56 = vadd.f32 %v1239_v8, %v10515_v17 }
 0x21f   : > { %7634 = vmatmul.msk.f32.gmra.mxu2 %vm1861_vm1, %v14940_v2  ;;  %vm1830_vm1 = vcmp.eq.s32.totalorder %v9729_v22, %v10497_v18 }
 0x220   : > { %v10886_v26 = vpop.f32.mrf.mxu1  ;;  %7498 = vmatmul.msk.f32.gmra.mxu0 %vm1310_vm10, %v1240_v56  ;;  %v10929_v56 = vpop.permute.xlu2 %1793 }
 0x221   : > { %14983 = vst [vmem:[#allocation39_spill] sm:$0xff] %v10886_v26  ;;  %vm1867_vm7 = vcmp.eq.s32.totalorder %v9645_v61, %v10929_v56  ;;  %v15005_v26 = vld [vmem:[#allocation11_spill] sm:$0xff] }
 0x222   : > { %7479 = vmatmul.msk.f32.gmra.mxu3 %vm942_vm2, %v14940_v2  ;;  %v10894_v42 = vpop.f32.mrf.mxu2 }
 0x223   : > { %7544 = vmatmul.msk.f32.gmra.mxu1 %vm1310_vm10, %v10263_v50  ;;  %v10910_v50 = vpop.permute.xlu1 %1790 }
 0x224   : > { %vm1865_vm5 = vcmp.eq.s32.totalorder %v9645_v61, %v10910_v50 }
 0x225   : > { %v1242_v17 = vpop.f32.mrf.mxu3 }
 0x226   : > { %v1243_v10 = vadd.f32 %v1242_v17, %v10531_v63 }
 0x227   : > { %7635 = vmatmul.msk.f32.gmra.mxu2 %vm1863_vm3, %v14940_v2 }
 0x228   : > { %v10902_v36 = vpop.f32.mrf.mxu1  ;;  %7499 = vmatmul.msk.f32.gmra.mxu0 %vm1310_vm10, %v1243_v10 }
 0x229   : > { %14984 = vst [vmem:[#allocation40_spill] sm:$0xff] %v10902_v36 }
 0x22a   : > { %7480 = vmatmul.msk.f32.gmra.mxu3 %vm944_vm4, %v14940_v2  ;;  %v10908_v6 = vpop.f32.mrf.mxu2  ;;  %vm1832_vm4 = vcmp.eq.s32.totalorder %v9729_v22, %v10513_v27 }
 0x22b   : > { %7545 = vmatmul.msk.f32.gmra.mxu1 %vm1310_vm10, %v10295_v59 }
 0x22d   : > { %v1245_v63 = vpop.f32.mrf.mxu3 }
 0x22e   : > { %v1246_v37 = vadd.f32 %v1245_v63, %v10550_v11 }
 0x22f   : > { %7636 = vmatmul.msk.f32.gmra.mxu2 %vm1865_vm5, %v14940_v2 }
 0x230   : > { %v10918_v8 = vpop.f32.mrf.mxu1  ;;  %7500 = vmatmul.msk.f32.gmra.mxu0 %vm1310_vm10, %v1246_v37  ;;  %v10953_v37 = vpop.permute.xlu1 %1799 }
 0x231   : > { %14985 = vst [vmem:[#allocation41_spill] sm:$0xff] %v10918_v8  ;;  %vm1871_vm12 = vcmp.eq.s32.totalorder %v9645_v61, %v10953_v37  ;;  %v14999_v8 = vld [vmem:[#allocation18_spill] sm:$0xff] }
 0x232   : > { %7481 = vmatmul.msk.f32.gmra.mxu3 %vm946_vm6, %v14940_v2  ;;  %v10927_v59 = vpop.f32.mrf.mxu2 }
 0x233   : > { %7546 = vmatmul.msk.f32.gmra.mxu1 %vm1310_vm10, %v10322_v46  ;;  %v10945_v46 = vpop.permute.xlu0 %1796 }
 0x234   : > { %vm1869_vm9 = vcmp.eq.s32.totalorder %v9645_v61, %v10945_v46 }
 0x235   : > { %v1248_v11 = vpop.f32.mrf.mxu3 }
 0x236   : > { %v1249_v17 = vadd.f32 %v1248_v11, %v10566_v40  ;;  %v10969_v11 = vpop.permute.xlu2 %1802 }
 0x237   : > { %7637 = vmatmul.msk.f32.gmra.mxu2 %vm1867_vm7, %v14940_v2  ;;  %vm1873_vm14 = vcmp.eq.s32.totalorder %v9645_v61, %v10969_v11 }
 0x238   : > { %v10937_v10 = vpop.f32.mrf.mxu1  ;;  %7501 = vmatmul.msk.f32.gmra.mxu0 %vm1310_vm10, %v1249_v17  ;;  %v10976_v28 = vpop.permute.xlu1 %1808 }
 0x239   : > { %14986 = vst [vmem:[#allocation42_spill] sm:$0xff] %v10937_v10  ;;  %vm1877_vm2 = vcmp.eq.s32.totalorder %v9645_v61, %v10976_v28  ;;  %v14881_v10 = vmov 4  }
 0x23a   : > { %7482 = vmatmul.msk.f32.gmra.mxu3 %vm948_vm8, %v14940_v2  ;;  %v10943_v38 = vpop.f32.mrf.mxu2  ;;  %8863 = vset.pattern.permute.xlu1 %v14881_v10 }
 0x23b   : > { %7547 = vmatmul.msk.f32.gmra.mxu1 %vm1310_vm10, %v10349_v7  ;;  %v10989_v44 = vpop.permute.xlu0 %1805  ;;  %8862 = vset.pattern.permute.xlu2 %v14881_v10 }
 0x23c   : > { %vm1875_vm0 = vcmp.eq.s32.totalorder %v9645_v61, %v10989_v44  ;;  %3253 = vperm.xlu1 %8863, %v10625_v33   ;;  %8865 = vset.pattern.permute.xlu0 %v14881_v10  ;;  %v15001_v33 = vld [vmem:[#allocation9_spill] sm:$0xff]  ;;  %v15003_v10 = vmov 3  }
 0x23d   : > { %v1251_v40 = vpop.f32.mrf.mxu3  ;;  %3250 = vperm.xlu2 %8862, %v14999_v8   ;;  %3256 = vperm.xlu0 %8865, %v10615_v4   ;;  %vm1834_vm7 = vcmp.eq.s32.totalorder %v9729_v22, %v15001_v33  ;;  %v11082_v33 = vld [vmem:[%s14849_s1 + $0xa0] sm:$0xff] }
 0x23e   : > { %v1252_v63 = vadd.f32 %v1251_v40, %v10582_v45 }
 0x23f   : > { %7638 = vmatmul.msk.f32.gmra.mxu2 %vm1869_vm9, %v14940_v2 }
 0x240   : > { %v10955_v9 = vpop.f32.mrf.mxu1  ;;  %7502 = vmatmul.msk.f32.gmra.mxu0 %vm1310_vm10, %v1252_v63 }
 0x241   : > { %14987 = vst [vmem:[#allocation43_spill] sm:$0xff] %v10955_v9 }
 0x242   : > { %7483 = vmatmul.msk.f32.gmra.mxu3 %vm950_vm11, %v14940_v2  ;;  %v10961_v7 = vpop.f32.mrf.mxu2  ;;  %vm1836_vm11 = vcmp.eq.s32.totalorder %v9729_v22, %v15005_v26 }
 0x243   : > { %7548 = vmatmul.msk.f32.gmra.mxu1 %vm1310_vm10, %v10376_v1 }
 0x244   : > { %8866 = vset.pattern.permute.xlu1 %v15003_v10 }
 0x245   : > { %v1254_v19 = vpop.f32.mrf.mxu3  ;;  %2550 = vperm.xlu1 %8866, %v11082_v33   ;;  %8864 = vset.pattern.permute.xlu2 %v15003_v10 }
 0x246   : > { %v1255_v45 = vadd.f32 %v1254_v19, %v10598_v53  ;;  %8868 = vset.pattern.permute.xlu0 %v15003_v10 }
 0x247   : > { %7639 = vmatmul.msk.f32.gmra.mxu2 %vm1871_vm12, %v14940_v2 }
 0x248   : > { %v10971_v17 = vpop.f32.mrf.mxu1  ;;  %7503 = vmatmul.msk.f32.gmra.mxu0 %vm1310_vm10, %v1255_v45 }
 0x249   : > { %14988 = vst [vmem:[#allocation44_spill] sm:$0xff] %v10971_v17 }
 0x24a   : > { %v10978_v1 = vpop.f32.mrf.mxu2  ;;  %7648 = vmatmul.msk.f32.vlgmr.msra.gmra.mxu3 %vm1826_vm13, %v14940_v2 }
 0x24b   : > { %7549 = vmatmul.msk.f32.gmra.mxu1 %vm1310_vm10, %v10403_v57  ;;  %v10996_v57 = vpop.permute.xlu2 %1811 }
 0x24c   : > { %vm1879_vm5 = vcmp.eq.s32.totalorder %v9645_v61, %v10996_v57 }
 0x24d   : > { %v1257_v53 = vpop.f32.mrf.mxu3  ;;  %v10983_v40 = vpop.f32.mrf.mxu0 }
 0x24e   : > { %14989 = vst [vmem:[#allocation45_spill] sm:$0xff] %v10983_v40  ;;  %v1258_v63 = vadd.f32 %v1257_v53, %v10635_v3  ;;  %v11003_v3 = vpop.permute.xlu1 %1817 }
 0x24f   : > { %7640 = vmatmul.msk.f32.gmra.mxu2 %vm1873_vm14, %v14940_v2  ;;  %14991 = vst [vmem:[#allocation47_spill] sm:$0xff] %v11003_v3  ;;  %vm1883_vm12 = vcmp.eq.s32.totalorder %v9645_v61, %v11003_v3 }
 0x250   : > { %v10991_v19 = vpop.f32.mrf.mxu1  ;;  %7504 = vmatmul.msk.f32.gmra.mxu0 %vm1310_vm10, %v1258_v63 }
 0x251   : > { %14990 = vst [vmem:[#allocation46_spill] sm:$0xff] %v10991_v19 }
 0x252   : > { %v10998_v45 = vpop.f32.mrf.mxu2  ;;  %7649 = vmatmul.msk.f32.gmra.mxu3 %vm1828_vm15, %v14940_v2 }
 0x253   : > { %7550 = vmatmul.msk.f32.gmra.mxu1 %vm1310_vm10, %v10430_v31  ;;  %v11016_v31 = vpop.permute.xlu0 %1814 }
 0x254   : > { %vm1881_vm8 = vcmp.eq.s32.totalorder %v9645_v61, %v11016_v31 }
 0x255   : > { %v1260_v53 = vpop.f32.mrf.mxu3  ;;  %v11005_v17 = vpop.f32.mrf.mxu0 }
 0x256   : > { %14992 = vst [vmem:[#allocation48_spill] sm:$0xff] %v11005_v17  ;;  %v1261_v19 = vadd.f32 %v1260_v53, %v10669_v15  ;;  %v11023_v15 = vpop.permute.xlu2 %1820  ;;  %v11025_v53 = vpop.permute.xlu1 %2490 }
 0x257   : > { %7641 = vmatmul.msk.f32.gmra.mxu2 %vm1875_vm0, %v14940_v2  ;;  %14994 = vst [vmem:[#allocation50_spill] sm:$0xff] %v11023_v15  ;;  %vm2585_vm3 = vcmp.eq.s32.totalorder %v9645_v61, %v11025_v53  ;;  %vm1885_vm15 = vcmp.eq.s32.totalorder %v9645_v61, %v11023_v15 }
 0x258   : > { %v11011_v25 = vpop.f32.mrf.mxu1  ;;  %7505 = vmatmul.msk.f32.gmra.mxu0 %vm1310_vm10, %v1261_v19 }
 0x259   : > { %14993 = vst [vmem:[#allocation49_spill] sm:$0xff] %v11011_v25 }
 0x25a   : > { %v11018_v63 = vpop.f32.mrf.mxu2  ;;  %7650 = vmatmul.msk.f32.gmra.mxu3 %vm1830_vm1, %v14940_v2 }
 0x25b   : > { %7551 = vmatmul.msk.f32.gmra.mxu1 %vm1310_vm10, %v10454_v0 }
 0x25d   : > { %v1263_v9 = vpop.f32.mrf.mxu3  ;;  %v11027_v25 = vpop.f32.mrf.mxu0 }
 0x25e   : > { %14995 = vst [vmem:[#allocation51_spill] sm:$0xff] %v11027_v25  ;;  %v1264_v19 = vadd.f32 %v1263_v9, %v10703_v62  ;;  %v11044_v62 = vpop.permute.xlu0 %1823  ;;  %v11046_v9 = vpop.permute.xlu2 %2493 }
 0x25f   : > { %7642 = vmatmul.msk.f32.gmra.mxu2 %vm1877_vm2, %v14940_v2  ;;  %14997 = vst [vmem:[#allocation53_spill] sm:$0xff] %v11044_v62  ;;  %vm2587_vm6 = vcmp.eq.s32.totalorder %v9645_v61, %v11046_v9  ;;  %v11118_v26 = vpop.permute.xlu1 %2499  ;;  %vm1887_vm2 = vcmp.eq.s32.totalorder %v9645_v61, %v11044_v62  ;;  %v15029_v62 = vld [vmem:[#allocation5_spill] sm:$0xff] }
 0x260   : > { %v11033_v18 = vpop.f32.mrf.mxu1  ;;  %7506 = vmatmul.msk.f32.gmra.mxu0 %vm1310_vm10, %v1264_v19  ;;  %vm2591_vm13 = vcmp.eq.s32.totalorder %v9645_v61, %v11118_v26 }
 0x261   : > { %14996 = vst [vmem:[#allocation52_spill] sm:$0xff] %v11033_v18 }
 0x262   : > { %v11040_v0 = vpop.f32.mrf.mxu2  ;;  %7651 = vmatmul.msk.f32.gmra.mxu3 %vm1832_vm4, %v14940_v2 }
 0x263   : > { %7780 = vmatmul.msk.f32.vlgmr.msra.gmra.mxu1 %vm2585_vm3, %v14940_v2 }
 0x265   : > { %v1266_v18 = vpop.f32.mrf.mxu3  ;;  %v11050_v19 = vpop.f32.mrf.mxu0 }
 0x266   : > { %14998 = vst [vmem:[#allocation54_spill] sm:$0xff] %v11050_v19  ;;  %v1267_v27 = vadd.f32 %v1266_v18, %v10737_v20  ;;  %v11071_v8 = vpop.permute.xlu0 %2496  ;;  %v11136_v19 = vld [vmem:[%s9381_s18 + $0x68] sm:$0xff]  ;;  %v11159_v17 = vpop.permute.xlu2 %2502 }
 0x267   : > { %7643 = vmatmul.msk.f32.gmra.mxu2 %vm1879_vm5, %v14940_v2  ;;  %vm2589_vm9 = vcmp.eq.s32.totalorder %v9645_v61, %v11071_v8  ;;  %vm2593_vm0 = vcmp.eq.s32.totalorder %v9645_v61, %v11159_v17  ;;  %vm2586_vm5 = vcmp.eq.s32.totalorder %v9729_v22, %v11025_v53  ;;  %v11262_v53 = vld [vmem:[%s14849_s1 + $0xc8] sm:$0xff] }
 0x268   : > { %v11060_v36 = vpop.f32.mrf.mxu1  ;;  %7507 = vmatmul.msk.f32.gmra.mxu0 %vm1310_vm10, %v1267_v27 }
 0x269   : > { %15000 = vst [vmem:[#allocation18_spill] sm:$0xff] %v11060_v36 }
 0x26a   : > { %v11067_v20 = vpop.f32.mrf.mxu2  ;;  %7652 = vmatmul.msk.f32.gmra.mxu3 %vm1834_vm7, %v14940_v2 }
 0x26b   : > { %7781 = vmatmul.msk.f32.gmra.mxu1 %vm2587_vm6, %v14940_v2 }
 0x26d   : > { %v1269_v4 = vpop.f32.mrf.mxu3  ;;  %v11073_v18 = vpop.f32.mrf.mxu0 }
 0x26e   : > { %15002 = vst [vmem:[#allocation9_spill] sm:$0xff] %v11073_v18  ;;  %v1270_v27 = vadd.f32 %v1269_v4, %v10774_v41  ;;  %v7680_v41 = vld [vmem:[%s14850_s2 + $0x40] sm:$0xff]  ;;  %v11099_v4 = vld [vmem:[%s14849_s1 + $0x98] sm:$0xff]  ;;  %v11132_v18 = vld [vmem:[%s14849_s1 + $0xa8] sm:$0xff] }
 0x26f   : > { %7644 = vmatmul.msk.f32.gmra.mxu2 %vm1881_vm8, %v14940_v2  ;;  %2547 = vperm.xlu2 %8864, %v11099_v4  }
 0x270   : > { %v11088_v36 = vpop.f32.mrf.mxu1  ;;  %7508 = vmatmul.msk.f32.gmra.mxu0 %vm1310_vm10, %v1270_v27  ;;  %v11107_v27 = vld [vmem:[%s14849_s1 + $0xb0] sm:$0xff]  ;;  %2553 = vperm.xlu1 %8866, %v11132_v18  }
 0x271   : > { %15004 = vst [vmem:[#allocation55_spill] sm:$0xff] %v11088_v36  ;;  %2359 = vmatpush.msra.mxu0 %v7680_v41  ;;  %2556 = vperm.xlu0 %8868, %v11107_v27   ;;  %v11121_v41 = vld [vmem:[%s9381_s18 + $0x70] sm:$0xff] }
 0x272   : > { %v11110_v36 = vpop.f32.mrf.mxu2  ;;  %7653 = vmatmul.msk.f32.gmra.mxu3 %vm1836_vm11, %v14940_v2  ;;  %vm2588_vm11 = vcmp.eq.s32.totalorder %v9729_v22, %v11046_v9 }
 0x273   : > { %3537 = vmatpush.msrb.mxu0 %v11114_v24  ;;  %7782 = vmatmul.msk.f32.gmra.mxu1 %vm2589_vm9, %v14940_v2 }
 0x275   : > { %3538 = vmatpush.msrb.mxu0 %v11121_v41  ;;  %v1272_v60 = vpop.f32.mrf.mxu3  ;;  %v11124_v48 = vpop.f32.mrf.mxu0 }
 0x276   : > { %15006 = vst [vmem:[#allocation11_spill] sm:$0xff] %v11124_v48  ;;  %v1273_v23 = vadd.f32 %v1272_v60, %v10808_v29  ;;  %v15008_v29 = vmov 4   ;;  %v15009_v60 = vld [vmem:[#allocation13_spill] sm:$0xff] }
 0x277   : > { %3539 = vmatpush.msrb.mxu0 %v11136_v19  ;;  %7645 = vmatmul.msk.f32.gmra.mxu2 %vm1883_vm12, %v14940_v2  ;;  %vm1838_vm14 = vcmp.eq.s32.totalorder %v9729_v22, %v15009_v60 }
 0x278   : > { %v11140_v48 = vpop.f32.mrf.mxu1  ;;  %7509 = vmatmul.msk.f32.gmra.mxu0 %vm1310_vm10, %v1273_v23  ;;  %8867 = vset.pattern.permute.xlu2 %v15008_v29  ;;  %v11156_v23 = vld [vmem:[%s9381_s18 + $0x60] sm:$0xff] }
 0x279   : > { %15007 = vst [vmem:[#allocation56_spill] sm:$0xff] %v11140_v48  ;;  %3259 = vperm.xlu2 %8867, %v10644_v13   ;;  %8871 = vset.pattern.permute.xlu0 %v15008_v29  ;;  %v15011_v48 = vld [vmem:[#allocation20_spill] sm:$0xff] }
 0x27a   : > { %v11150_v25 = vpop.f32.mrf.mxu2  ;;  %7654 = vmatmul.msk.f32.gmra.mxu3 %vm1838_vm14, %v14940_v2  ;;  %3271 = vperm.xlu0 %8871, %v15011_v48   ;;  %15012 = vst [vmem:[#allocation20_spill] sm:$0xff] %v11156_v23  ;;  %v11164_v13 = vld [vmem:[%s9381_s18 + $0x58] sm:$0xff]  ;;  %vm2590_vm14 = vcmp.eq.s32.totalorder %v9729_v22, %v11071_v8 }
 0x27b   : > { %15010 = vst [vmem:[#allocation13_spill] sm:$0xff] %v11150_v25  ;;  %7783 = vmatmul.msk.f32.gmra.mxu1 %vm2591_vm13, %v14940_v2  ;;  %3540 = vmatpush.msrb.mxu0 %v11156_v23  ;;  %v11296_v23 = vld [vmem:[%s9381_s18 + $0x8] sm:$0xff]  ;;  %v7847_v8 = vld [vmem:[%s14850_s2 + $0x78] sm:$0xff] }
 0x27c   : > { %15014 = vst [vmem:[#allocation58_spill] sm:$0xff] %v11164_v13  ;;  %8869 = vset.pattern.permute.xlu1 %v15008_v29  ;;  %3116 = vmatpush.msrb.mxu3 %v7847_v8 }
 0x27d   : > { %v1275_v60 = vpop.f32.mrf.mxu3  ;;  %v11161_v40 = vpop.f32.mrf.mxu0  ;;  %3541 = vmatpush.msrb.mxu0 %v11164_v13  ;;  %3265 = vperm.xlu1 %8869, %v10678_v52   ;;  %v11193_v52 = vld [vmem:[%s14849_s1 + $0xd8] sm:$0xff] }
 0x27e   : > { %15013 = vst [vmem:[#allocation57_spill] sm:$0xff] %v11161_v40  ;;  %v1276_v25 = vadd.f32 %v1275_v60, %v10830_v49  ;;  %v15016_v40 = vld [vmem:[#allocation15_spill] sm:$0xff]  ;;  %v15017_v49 = vld [vmem:[#allocation21_spill] sm:$0xff] }
 0x27f   : > { %7646 = vmatmul.msk.f32.gmra.mxu2 %vm1885_vm15, %v14940_v2  ;;  %vm1840_vm1 = vcmp.eq.s32.totalorder %v9729_v22, %v15016_v40  ;;  %v11182_v60 = vld [vmem:[%s9381_s18 + $0x50] sm:$0xff]  ;;  %v11196_v40 = vpop.permute.xlu1 %2505 }
 0x280   : > { %v11173_v48 = vpop.f32.mrf.mxu1  ;;  %7510 = vmatmul.msk.f32.gmra.mxu0 %vm1310_vm10, %v1276_v25  ;;  %15018 = vst [vmem:[#allocation15_spill] sm:$0xff] %v11182_v60  ;;  %v11199_v25 = vld [vmem:[%s9381_s18 + $0x48] sm:$0xff]  ;;  %vm2595_vm3 = vcmp.eq.s32.totalorder %v9645_v61, %v11196_v40 }
 0x281   : > { %15015 = vst [vmem:[#allocation59_spill] sm:$0xff] %v11173_v48  ;;  %3262 = vperm.xlu2 %8867, %v15017_v49   ;;  %3542 = vmatpush.msrb.mxu0 %v11182_v60  ;;  %v11208_v60 = vld [vmem:[%s9381_s18 + $0x40] sm:$0xff] }
 0x282   : > { %v11185_v15 = vpop.f32.mrf.mxu2  ;;  %7655 = vmatmul.msk.f32.gmra.mxu3 %vm1840_vm1, %v14940_v2  ;;  %8874 = vset.pattern.permute.xlu0 %v15003_v10  ;;  %15020 = vst [vmem:[#allocation60_spill] sm:$0xff] %v11199_v25  ;;  %vm2592_vm1 = vcmp.eq.s32.totalorder %v9729_v22, %v11118_v26  ;;  %v8996_v26 = vld [vmem:[%s14849_s1 + $0xf0] sm:$0xff] }
 0x283   : > { %15019 = vst [vmem:[#allocation21_spill] sm:$0xff] %v11185_v15  ;;  %7784 = vmatmul.msk.f32.gmra.mxu1 %vm2593_vm0, %v14940_v2  ;;  %2571 = vperm.xlu0 %8874, %v11193_v52   ;;  %vm1850_vm0 = vcmp.eq.s32.totalorder %v9729_v22, %v10735_v30  ;;  %v11375_v30 = vld [vmem:[%s14849_s1 + $0xe0] sm:$0xff] }
 0x284   : > { %3543 = vmatpush.msrb.mxu0 %v11199_v25  ;;  %15022 = vst [vmem:[#allocation62_spill] sm:$0xff] %v11208_v60 }
 0x285   : > { %v1278_v49 = vpop.f32.mrf.mxu3  ;;  %v11202_v48 = vpop.f32.mrf.mxu0  ;;  %3268 = vperm.xlu1 %8869, %v10693_v14   ;;  %v11231_v14 = vld [vmem:[%s14849_s1 + $0xb8] sm:$0xff] }
 0x286   : > { %15021 = vst [vmem:[#allocation61_spill] sm:$0xff] %v11202_v48  ;;  %v1279_v15 = vadd.f32 %v1278_v49, %v10846_v51  ;;  %3544 = vmatpush.msrb.mxu0 %v11208_v60  ;;  %v15024_v51 = vld [vmem:[#allocation17_spill] sm:$0xff]  ;;  %v11222_v49 = vld [vmem:[%s9381_s18 + $0x38] sm:$0xff]  ;;  %v11249_v60 = vld [vmem:[%s9381_s18 + $0x28] sm:$0xff] }
 0x287   : > { %7647 = vmatmul.msk.f32.gmra.mxu2 %vm1887_vm2, %v14940_v2  ;;  %vm1842_vm4 = vcmp.eq.s32.totalorder %v9729_v22, %v15024_v51  ;;  %15025 = vst [vmem:[#allocation17_spill] sm:$0xff] %v11222_v49  ;;  %v11242_v51 = vld [vmem:[%s9381_s18 + $0x30] sm:$0xff] }
 0x288   : > { %v11213_v13 = vpop.f32.mrf.mxu1  ;;  %7511 = vmatmul.msk.f32.gmra.mxu0 %vm1310_vm10, %v1279_v15  ;;  %v11238_v15 = vpop.permute.xlu2 %2508  ;;  %15027 = vst [vmem:[#allocation65_spill] sm:$0xff] %v11242_v51 }
 0x289   : > { %15023 = vst [vmem:[#allocation63_spill] sm:$0xff] %v11213_v13  ;;  %8870 = vset.pattern.permute.xlu2 %v15003_v10  ;;  %3545 = vmatpush.msrb.mxu0 %v11222_v49  ;;  %vm2597_vm6 = vcmp.eq.s32.totalorder %v9645_v61, %v11238_v15 }
 0x28a   : > { %v11225_v48 = vpop.f32.mrf.mxu2  ;;  %7656 = vmatmul.msk.f32.gmra.mxu3 %vm1842_vm4, %v14940_v2  ;;  %2559 = vperm.xlu2 %8870, %v11231_v14   ;;  %15030 = vst [vmem:[#allocation5_spill] sm:$0xff] %v11249_v60  ;;  %vm2594_vm4 = vcmp.eq.s32.totalorder %v9729_v22, %v11159_v17  ;;  %v11428_v17 = vld [vmem:[%s14849_s1 + $0xf8] sm:$0xff] }
 0x28b   : > { %15026 = vst [vmem:[#allocation64_spill] sm:$0xff] %v11225_v48  ;;  %7785 = vmatmul.msk.f32.gmra.mxu1 %vm2595_vm3, %v14940_v2  ;;  %8877 = vset.pattern.permute.xlu0 %v15008_v29 }
 0x28c   : > { %3286 = vperm.xlu0 %8877, %v10761_v12   ;;  %3546 = vmatpush.msrb.mxu0 %v11242_v51  ;;  %v15037_v51 = vld [vmem:[#allocation6_spill] sm:$0xff] }
 0x28d   : > { %v1281_v13 = vpop.f32.mrf.mxu3  ;;  %v11245_v48 = vpop.f32.mrf.mxu0  ;;  %8872 = vset.pattern.permute.xlu1 %v15003_v10  ;;  %15038 = vst [vmem:[#allocation6_spill] sm:$0xff] %v11296_v23 }
 0x28e   : > { %15028 = vst [vmem:[#allocation66_spill] sm:$0xff] %v11245_v48  ;;  %v1282_v49 = vadd.f32 %v1281_v13, %v15029_v62  ;;  %3547 = vmatpush.msrb.mxu0 %v11249_v60  ;;  %2565 = vperm.xlu1 %8872, %v11262_v53   ;;  %v15032_v62 = vld [vmem:[#allocation19_spill] sm:$0xff]  ;;  %v11268_v13 = vld [vmem:[%s9381_s18 + $0x20] sm:$0xff]  ;;  %v11282_v48 = vld [vmem:[%s9381_s18 + $0x18] sm:$0xff] }
 0x28f   : > { %7812 = vmatmul.msk.f32.vlgmr.msra.gmra.mxu2 %vm2586_vm5, %v14940_v2  ;;  %vm1844_vm7 = vcmp.eq.s32.totalorder %v9729_v22, %v15032_v62  ;;  %15033 = vst [vmem:[#allocation19_spill] sm:$0xff] %v11268_v13  ;;  %v11285_v62 = vpop.permute.xlu0 %2511  ;;  %v11291_v60 = vld [vmem:[%s9381_s18 + $0x10] sm:$0xff] }
 0x290   : > { %v11254_v12 = vpop.f32.mrf.mxu1  ;;  %7512 = vmatmul.msk.f32.gmra.mxu0 %vm1310_vm10, %v1282_v49  ;;  %15036 = vst [vmem:[#allocation70_spill] sm:$0xff] %v11291_v60  ;;  %vm2599_vm8 = vcmp.eq.s32.totalorder %v9645_v61, %v11285_v62  ;;  %v11345_v9 = vpop.permute.xlu2 %2517 }
 0x291   : > { %15031 = vst [vmem:[#allocation67_spill] sm:$0xff] %v11254_v12  ;;  %3548 = vmatpush.msrb.mxu0 %v11268_v13  ;;  %v11277_v12 = vld [vmem:[%s14849_s1 + $0xc0] sm:$0xff]  ;;  %vm2603_vm15 = vcmp.eq.s32.totalorder %v9645_v61, %v11345_v9 }
 0x292   : > { %v11271_v49 = vpop.f32.mrf.mxu2  ;;  %7657 = vmatmul.msk.f32.gmra.mxu3 %vm1844_vm7, %v14940_v2  ;;  %2562 = vperm.xlu2 %8870, %v11277_v12   ;;  %vm2596_vm7 = vcmp.eq.s32.totalorder %v9729_v22, %v11196_v40  ;;  %v15064_v40 = vld [vmem:[#allocation29_spill] sm:$0xff] }
 0x293   : > { %15034 = vst [vmem:[#allocation68_spill] sm:$0xff] %v11271_v49  ;;  %7786 = vmatmul.msk.f32.gmra.mxu1 %vm2597_vm6, %v14940_v2  ;;  %3549 = vmatpush.msrb.mxu0 %v11282_v48 }
 0x294   : > { %3295 = vperm.xlu0 %8877, %v10798_v5   ;;  %v11307_v5 = vld [vmem:[%s14849_s1 + $0xd0] sm:$0xff] }
 0x295   : > { %v1284_v49 = vpop.f32.mrf.mxu3  ;;  %v11288_v13 = vpop.f32.mrf.mxu0  ;;  %3550 = vmatpush.msrb.mxu0 %v11291_v60 }
 0x296   : > { %15035 = vst [vmem:[#allocation69_spill] sm:$0xff] %v11288_v13  ;;  %v1285_v25 = vadd.f32 %v1284_v49, %v15037_v51  ;;  %2568 = vperm.xlu1 %8872, %v11307_v5   ;;  %v15040_v13 = vld [vmem:[#allocation22_spill] sm:$0xff]  ;;  %v11313_v51 = vld [vmem:[%s9381_s18] sm:$0xff] }
 0x297   : > { %3551 = vmatpush.msrb.mxu0 %v11296_v23  ;;  %vm1846_vm9 = vcmp.eq.s32.totalorder %v9729_v22, %v15040_v13  ;;  %v15043_v23 = vld [vmem:[#allocation7_spill] sm:$0xff]  ;;  %7813 = vmatmul.msk.f32.gmra.mxu2 %vm2588_vm11, %v14940_v2  ;;  %vm2598_vm11 = vcmp.eq.s32.totalorder %v9729_v22, %v11238_v15 }
 0x298   : > { %v11299_v3 = vpop.f32.mrf.mxu1  ;;  %7513 = vmatmul.msk.f32.gmra.mxu0 %vm1310_vm10, %v1285_v25  ;;  %v11322_v25 = vpop.permute.xlu1 %2514 }
 0x299   : > { %15039 = vst [vmem:[#allocation71_spill] sm:$0xff] %v11299_v3  ;;  %3552 = vmatpush.msrb.mxu0 %v11313_v51  ;;  %vm2601_vm12 = vcmp.eq.s32.totalorder %v9645_v61, %v11322_v25 }
 0x29a   : > { %v11316_v49 = vpop.f32.mrf.mxu2  ;;  %7658 = vmatmul.msk.f32.gmra.mxu3 %vm1846_vm9, %v14940_v2  ;;  %8873 = vset.pattern.permute.xlu2 %v15008_v29  ;;  %vm1856_vm9 = vcmp.eq.s32.totalorder %v9729_v22, %v10828_v43 }
 0x29b   : > { %15041 = vst [vmem:[#allocation22_spill] sm:$0xff] %v11316_v49  ;;  %7787 = vmatmul.msk.f32.gmra.mxu1 %vm2599_vm8, %v14940_v2  ;;  %3274 = vperm.xlu2 %8873, %v10712_v21   ;;  %v15045_v21 = vld [vmem:[#allocation25_spill] sm:$0xff] }
 0x29c   : > { %3304 = vperm.xlu0 %8877, %v10789_v34   ;;  %vm1848_vm13 = vcmp.eq.s32.totalorder %v9729_v22, %v15045_v21  ;;  %v15046_v34 = vld [vmem:[#allocation23_spill] sm:$0xff] }
 0x29d   : > { %v1287_v3 = vpop.f32.mrf.mxu3  ;;  %v11325_v13 = vpop.f32.mrf.mxu0 }
 0x29e   : > { %15042 = vst [vmem:[#allocation72_spill] sm:$0xff] %v11325_v13  ;;  %v1288_v60 = vadd.f32 %v1287_v3, %v15043_v23  ;;  %8875 = vset.pattern.permute.xlu1 %v15008_v29 }
 0x29f   : > { %3280 = vperm.xlu1 %8875, %v15046_v34   ;;  %7814 = vmatmul.msk.f32.gmra.mxu2 %vm2590_vm14, %v14940_v2  ;;  %vm2600_vm14 = vcmp.eq.s32.totalorder %v9729_v22, %v11285_v62  ;;  %v11504_v62 = vld [vmem:[%s9381_s18 + $0xf0] sm:$0xff] }
 0x2a0   : > { %v11331_v49 = vpop.f32.mrf.mxu1  ;;  %7514 = vmatmul.msk.f32.gmra.mxu0 %vm1310_vm10, %v1288_v60 }
 0x2a1   : > { %15044 = vst [vmem:[#allocation7_spill] sm:$0xff] %v11331_v49  ;;  %v15048_v49 = vld [vmem:[#allocation8_spill] sm:$0xff] }
 0x2a2   : > { %v11340_v3 = vpop.f32.mrf.mxu2  ;;  %7659 = vmatmul.msk.f32.gmra.mxu3 %vm1848_vm13, %v14940_v2  ;;  %vm1858_vm13 = vcmp.eq.s32.totalorder %v9729_v22, %v10844_v58 }
 0x2a3   : > { %7788 = vmatmul.msk.f32.gmra.mxu1 %vm2601_vm12, %v14940_v2  ;;  %3277 = vperm.xlu2 %8873, %v10727_v54   ;;  %v15050_v54 = vld [vmem:[#allocation28_spill] sm:$0xff] }
 0x2a4   : > { %3313 = vperm.xlu0 %8877, %v11132_v18  }
 0x2a5   : > { %v1290_v23 = vpop.f32.mrf.mxu3  ;;  %v11348_v60 = vpop.f32.mrf.mxu0 }
 0x2a6   : > { %15047 = vst [vmem:[#allocation25_spill] sm:$0xff] %v11348_v60  ;;  %v1291_v13 = vadd.f32 %v1290_v23, %v15048_v49  ;;  %v11370_v49 = vpop.permute.xlu0 %2520  ;;  %v15052_v23 = vld [vmem:[#allocation10_spill] sm:$0xff] }
 0x2a7   : > { %3283 = vperm.xlu1 %8875, %v15050_v54   ;;  %7815 = vmatmul.msk.f32.gmra.mxu2 %vm2592_vm1, %v14940_v2  ;;  %vm2605_vm2 = vcmp.eq.s32.totalorder %v9645_v61, %v11370_v49  ;;  %v15058_v60 = vld [vmem:[#allocation34_spill] sm:$0xff]  ;;  %vm2602_vm1 = vcmp.eq.s32.totalorder %v9729_v22, %v11322_v25 }
 0x2a8   : > { %v11354_v21 = vpop.f32.mrf.mxu1  ;;  %7515 = vmatmul.msk.f32.gmra.mxu0 %vm1310_vm10, %v1291_v13  ;;  %vm1854_vm6 = vcmp.eq.s32.totalorder %v9729_v22, %v15058_v60  ;;  %v15061_v60 = vld [vmem:[#allocation26_spill] sm:$0xff] }
 0x2a9   : > { %15049 = vst [vmem:[#allocation23_spill] sm:$0xff] %v11354_v21  ;;  %v15054_v21 = vld [vmem:[#allocation31_spill] sm:$0xff] }
 0x2aa   : > { %v11362_v18 = vpop.f32.mrf.mxu2  ;;  %7660 = vmatmul.msk.f32.gmra.mxu3 %vm1850_vm0, %v14940_v2  ;;  %vm1852_vm3 = vcmp.eq.s32.totalorder %v9729_v22, %v15054_v21  ;;  %vm1860_vm0 = vcmp.eq.s32.totalorder %v9729_v22, %v10860_v32 }
 0x2ab   : > { %7789 = vmatmul.msk.f32.gmra.mxu1 %vm2603_vm15, %v14940_v2  ;;  %8876 = vset.pattern.permute.xlu2 %v15003_v10 }
 0x2ac   : > { %2574 = vperm.xlu2 %8876, %v11375_v30   ;;  %3322 = vperm.xlu0 %8877, %v11277_v12  }
 0x2ad   : > { %v1293_v13 = vpop.f32.mrf.mxu3  ;;  %v11378_v34 = vpop.f32.mrf.mxu0 }
 0x2ae   : > { %15051 = vst [vmem:[#allocation8_spill] sm:$0xff] %v11378_v34  ;;  %v1294_v54 = vadd.f32 %v1293_v13, %v15052_v23  ;;  %v11400_v13 = vpop.permute.xlu1 %2523  ;;  %v11405_v23 = vld [vmem:[%s14849_s1 + $0xe8] sm:$0xff] }
 0x2af   : > { %8878 = vset.pattern.permute.xlu1 %v15003_v10  ;;  %7816 = vmatmul.msk.f32.gmra.mxu2 %vm2594_vm4, %v14940_v2  ;;  %vm2607_vm5 = vcmp.eq.s32.totalorder %v9645_v61, %v11400_v13  ;;  %vm2604_vm4 = vcmp.eq.s32.totalorder %v9729_v22, %v11345_v9 }
 0x2b0   : > { %v11385_v8 = vpop.f32.mrf.mxu1  ;;  %7516 = vmatmul.msk.f32.gmra.mxu0 %vm1310_vm10, %v1294_v54  ;;  %2580 = vperm.xlu1 %8878, %v8996_v26   ;;  %v15056_v54 = vld [vmem:[#allocation12_spill] sm:$0xff] }
 0x2b1   : > { %15053 = vst [vmem:[#allocation28_spill] sm:$0xff] %v11385_v8 }
 0x2b2   : > { %v11393_v12 = vpop.f32.mrf.mxu2  ;;  %7661 = vmatmul.msk.f32.gmra.mxu3 %vm1852_vm3, %v14940_v2  ;;  %vm1862_vm3 = vcmp.eq.s32.totalorder %v9729_v22, %v10876_v47 }
 0x2b3   : > { %7790 = vmatmul.msk.f32.gmra.mxu1 %vm2605_vm2, %v14940_v2 }
 0x2b4   : > { %2577 = vperm.xlu2 %8876, %v11405_v23   ;;  %3331 = vperm.xlu0 %8877, %v11193_v52   ;;  %v11432_v52 = vpop.permute.xlu2 %2526 }
 0x2b5   : > { %v1296_v10 = vpop.f32.mrf.mxu3  ;;  %v11408_v21 = vpop.f32.mrf.mxu0  ;;  %vm2609_vm8 = vcmp.eq.s32.totalorder %v9645_v61, %v11432_v52 }
 0x2b6   : > { %15055 = vst [vmem:[#allocation10_spill] sm:$0xff] %v11408_v21  ;;  %v1297_v8 = vadd.f32 %v1296_v10, %v15056_v54  ;;  %v15062_v54 = vld [vmem:[#allocation14_spill] sm:$0xff]  ;;  %v11476_v15 = vpop.permute.xlu1 %2532 }
 0x2b7   : > { %7817 = vmatmul.msk.f32.gmra.mxu2 %vm2596_vm7, %v14940_v2  ;;  %vm2613_vm15 = vcmp.eq.s32.totalorder %v9645_v61, %v11476_v15  ;;  %vm2606_vm7 = vcmp.eq.s32.totalorder %v9729_v22, %v11370_v49 }
 0x2b8   : > { %v11415_v34 = vpop.f32.mrf.mxu1  ;;  %7517 = vmatmul.msk.f32.gmra.mxu0 %vm1310_vm10, %v1297_v8  ;;  %2583 = vperm.xlu1 %8878, %v11428_v17  }
 0x2b9   : > { %15057 = vst [vmem:[#allocation31_spill] sm:$0xff] %v11415_v34 }
 0x2ba   : > { %v11422_v21 = vpop.f32.mrf.mxu2  ;;  %7662 = vmatmul.msk.f32.gmra.mxu3 %vm1854_vm6, %v14940_v2  ;;  %vm1864_vm6 = vcmp.eq.s32.totalorder %v9729_v22, %v10891_v35 }
 0x2bb   : > { %15059 = vst [vmem:[#allocation12_spill] sm:$0xff] %v11422_v21  ;;  %7791 = vmatmul.msk.f32.gmra.mxu1 %vm2607_vm5, %v14940_v2 }
 0x2bc   : > { %8879 = vset.pattern.permute.xlu2 %v15008_v29  ;;  %3340 = vperm.xlu0 %8877, %v8996_v26   ;;  %v11455_v26 = vpop.permute.xlu0 %2529 }
 0x2bd   : > { %v1299_v8 = vpop.f32.mrf.mxu3  ;;  %v11435_v10 = vpop.f32.mrf.mxu0  ;;  %3289 = vperm.xlu2 %8879, %v15061_v60   ;;  %v15066_v60 = vld [vmem:[#allocation32_spill] sm:$0xff]  ;;  %vm2611_vm12 = vcmp.eq.s32.totalorder %v9645_v61, %v11455_v26 }
 0x2be   : > { %15060 = vst [vmem:[#allocation34_spill] sm:$0xff] %v11435_v10  ;;  %v1300_v34 = vadd.f32 %v1299_v8, %v15062_v54  ;;  %v15067_v54 = vld [vmem:[#allocation16_spill] sm:$0xff]  ;;  %v11567_v9 = vpop.permute.xlu1 %2541 }
 0x2bf   : > { %7818 = vmatmul.msk.f32.gmra.mxu2 %vm2598_vm11, %v14940_v2  ;;  %vm2608_vm11 = vcmp.eq.s32.totalorder %v9729_v22, %v11400_v13 }
 0x2c0   : > { %v11442_v21 = vpop.f32.mrf.mxu1  ;;  %7518 = vmatmul.msk.f32.gmra.mxu0 %vm1310_vm10, %v1300_v34  ;;  %8880 = vset.pattern.permute.xlu1 %v15008_v29 }
 0x2c1   : > { %15063 = vst [vmem:[#allocation26_spill] sm:$0xff] %v11442_v21  ;;  %3298 = vperm.xlu1 %8880, %v15064_v40  }
 0x2c2   : > { %v11449_v10 = vpop.f32.mrf.mxu2  ;;  %7663 = vmatmul.msk.f32.gmra.mxu3 %vm1856_vm9, %v14940_v2  ;;  %vm1866_vm9 = vcmp.eq.s32.totalorder %v9729_v22, %v10910_v50 }
 0x2c3   : > { %7792 = vmatmul.msk.f32.gmra.mxu1 %vm2609_vm8, %v14940_v2  ;;  %vm2619_vm8 = vcmp.eq.s32.totalorder %v9645_v61, %v11567_v9 }
 0x2c4   : > { %v11534_v25 = vpop.permute.xlu0 %2538 }
 0x2c5   : > { %v1302_v8 = vpop.f32.mrf.mxu3  ;;  %v11457_v34 = vpop.f32.mrf.mxu0  ;;  %3292 = vperm.xlu2 %8879, %v15066_v60   ;;  %vm2617_vm5 = vcmp.eq.s32.totalorder %v9645_v61, %v11534_v25 }
 0x2c6   : > { %15065 = vst [vmem:[#allocation14_spill] sm:$0xff] %v11457_v34  ;;  %v1303_v21 = vadd.f32 %v1302_v8, %v15067_v54 }
 0x2c7   : > { %7819 = vmatmul.msk.f32.gmra.mxu2 %vm2600_vm14, %v14940_v2  ;;  %vm2610_vm14 = vcmp.eq.s32.totalorder %v9729_v22, %v11432_v52 }
 0x2c8   : > { %v11464_v43 = vpop.f32.mrf.mxu1  ;;  %7519 = vmatmul.msk.f32.gmra.mxu0 %vm1310_vm10, %v1303_v21 }
 0x2c9   : > { %15068 = vst [vmem:[#allocation29_spill] sm:$0xff] %v11464_v43  ;;  %3307 = vperm.xlu1 %8880, %v11099_v4   ;;  %v11493_v4 = vld [vmem:[%s9381_s18 + $0xf8] sm:$0xff] }
 0x2ca   : > { %v11471_v29 = vpop.f32.mrf.mxu2  ;;  %7664 = vmatmul.msk.f32.gmra.mxu3 %vm1858_vm13, %v14940_v2  ;;  %v11580_v43 = vld [vmem:[%s9381_s18 + $0xb8] sm:$0xff]  ;;  %vm1868_vm13 = vcmp.eq.s32.totalorder %v9729_v22, %v10929_v56 }
 0x2cb   : > { %7793 = vmatmul.msk.f32.gmra.mxu1 %vm2611_vm12, %v14940_v2 }
 0x2cc   : > { %v11605_v50 = vpop.permute.xlu0 %2544 }
 0x2cd   : > { %v11478_v40 = vpop.f32.mrf.mxu0  ;;  %v2147_v21 = vpop.f32.mrf.mxu3  ;;  %3301 = vperm.xlu2 %8879, %v10817_v39   ;;  %vm2621_vm12 = vcmp.eq.s32.totalorder %v9645_v61, %v11605_v50 }
 0x2ce   : > { %15069 = vst [vmem:[#allocation32_spill] sm:$0xff] %v11478_v40  ;;  %v2148_v8 = vadd.f32 %v2147_v21, %v10863_v55  ;;  %v11501_v55 = vpop.permute.xlu2 %2535  ;;  %v11514_v21 = vld [vmem:[%s9381_s18 + $0xe8] sm:$0xff] }
 0x2cf   : > { %7820 = vmatmul.msk.f32.gmra.mxu2 %vm2602_vm1, %v14940_v2  ;;  %vm2615_vm2 = vcmp.eq.s32.totalorder %v9645_v61, %v11501_v55  ;;  %v11648_v40 = vld [vmem:[%s9381_s18 + $0x88] sm:$0xff]  ;;  %vm2612_vm1 = vcmp.eq.s32.totalorder %v9729_v22, %v11455_v26 }
 0x2d0   : > { %v11485_v58 = vpop.f32.mrf.mxu1  ;;  %7684 = vmatmul.msk.f32.vlgmr.msra.gmra.mxu0 %vm1310_vm10, %v2148_v8  ;;  %v11537_v8 = vld [vmem:[%s9381_s18 + $0xd8] sm:$0xff] }
 0x2d1   : > { %15070 = vst [vmem:[#allocation16_spill] sm:$0xff] %v11485_v58  ;;  %4410 = vmatpush.msra.mxu0 %v11493_v4  ;;  %3316 = vperm.xlu1 %8880, %v11107_v27  }
 0x2d2   : > { %v11496_v39 = vpop.f32.mrf.mxu2  ;;  %7665 = vmatmul.msk.f32.gmra.mxu3 %vm1860_vm0, %v14940_v2  ;;  %vm1870_vm0 = vcmp.eq.s32.totalorder %v9729_v22, %v10945_v46 }
 0x2d3   : > { %15071 = vst [vmem:[#allocation73_spill] sm:$0xff] %v11496_v39  ;;  %7794 = vmatmul.msk.f32.gmra.mxu1 %vm2613_vm15, %v14940_v2  ;;  %4411 = vmatpush.msra.mxu0 %v11504_v62  ;;  %v15106_v39 = vld [vmem:[#allocation50_spill] sm:$0xff] }
 0x2d5   : > { %v11507_v32 = vpop.f32.mrf.mxu0  ;;  %v2150_v60 = vpop.f32.mrf.mxu3  ;;  %3310 = vperm.xlu2 %8879, %v11082_v33   ;;  %4412 = vmatpush.msra.mxu0 %v11514_v21 }
 0x2d6   : > { %15072 = vst [vmem:[#allocation74_spill] sm:$0xff] %v11507_v32  ;;  %v2151_v54 = vadd.f32 %v2150_v60, %v10879_v16  ;;  %v11526_v16 = vld [vmem:[%s9381_s18 + $0xe0] sm:$0xff]  ;;  %v11598_v49 = vpop.permute.xlu2 %3250 }
 0x2d7   : > { %4413 = vmatpush.msra.mxu0 %v11526_v16  ;;  %7821 = vmatmul.msk.f32.gmra.mxu2 %vm2604_vm4, %v14940_v2  ;;  %vm2614_vm4 = vcmp.eq.s32.totalorder %v9729_v22, %v11476_v15 }
 0x2d8   : > { %v11518_v27 = vpop.f32.mrf.mxu1  ;;  %7685 = vmatmul.msk.f32.gmra.mxu0 %vm1310_vm10, %v2151_v54 }
 0x2d9   : > { %15073 = vst [vmem:[#allocation75_spill] sm:$0xff] %v11518_v27  ;;  %3325 = vperm.xlu1 %8880, %v11262_v53   ;;  %4414 = vmatpush.msra.mxu0 %v11537_v8  ;;  %v11547_v27 = vld [vmem:[%s9381_s18 + $0xd0] sm:$0xff] }
 0x2da   : > { %v11529_v33 = vpop.f32.mrf.mxu2  ;;  %7666 = vmatmul.msk.f32.gmra.mxu3 %vm1862_vm3, %v14940_v2  ;;  %vm1872_vm3 = vcmp.eq.s32.totalorder %v9729_v22, %v10953_v37 }
 0x2db   : > { %15074 = vst [vmem:[#allocation76_spill] sm:$0xff] %v11529_v33  ;;  %7795 = vmatmul.msk.f32.gmra.mxu1 %vm2615_vm2, %v14940_v2  ;;  %4415 = vmatpush.msra.mxu0 %v11547_v27 }
 0x2dd   : > { %v11540_v47 = vpop.f32.mrf.mxu0  ;;  %v2153_v60 = vpop.f32.mrf.mxu3  ;;  %3319 = vperm.xlu2 %8879, %v11231_v14  }
 0x2de   : > { %15075 = vst [vmem:[#allocation77_spill] sm:$0xff] %v11540_v47  ;;  %v2154_v54 = vadd.f32 %v2153_v60, %v10894_v42  ;;  %v11559_v42 = vld [vmem:[%s9381_s18 + $0xc8] sm:$0xff]  ;;  %v11570_v60 = vld [vmem:[%s9381_s18 + $0xc0] sm:$0xff] }
 0x2df   : > { %4416 = vmatpush.msra.mxu0 %v11559_v42  ;;  %7822 = vmatmul.msk.f32.gmra.mxu2 %vm2606_vm7, %v14940_v2  ;;  %vm2616_vm7 = vcmp.eq.s32.totalorder %v9729_v22, %v11501_v55 }
 0x2e0   : > { %v11551_v53 = vpop.f32.mrf.mxu1  ;;  %7686 = vmatmul.msk.f32.gmra.mxu0 %vm1310_vm10, %v2154_v54 }
 0x2e1   : > { %3334 = vperm.xlu1 %8880, %v11375_v30   ;;  %4417 = vmatpush.msra.mxu0 %v11570_v60 }
 0x2e2   : > { %v11562_v14 = vpop.f32.mrf.mxu2  ;;  %7667 = vmatmul.msk.f32.gmra.mxu3 %vm1864_vm6, %v14940_v2  ;;  %vm1874_vm6 = vcmp.eq.s32.totalorder %v9729_v22, %v10969_v11 }
 0x2e3   : > { %15076 = vst [vmem:[#allocation78_spill] sm:$0xff] %v11562_v14  ;;  %7796 = vmatmul.msk.f32.gmra.mxu1 %vm2617_vm5, %v14940_v2  ;;  %4418 = vmatpush.msra.mxu0 %v11580_v43 }
 0x2e5   : > { %v11573_v35 = vpop.f32.mrf.mxu0  ;;  %v2156_v54 = vpop.f32.mrf.mxu3  ;;  %3328 = vperm.xlu2 %8879, %v11307_v5  }
 0x2e6   : > { %15077 = vst [vmem:[#allocation79_spill] sm:$0xff] %v11573_v35  ;;  %v2157_v58 = vadd.f32 %v2156_v54, %v10908_v6  ;;  %v11592_v6 = vld [vmem:[%s9381_s18 + $0xb0] sm:$0xff]  ;;  %v11608_v54 = vld [vmem:[%s9381_s18 + $0xa8] sm:$0xff] }
 0x2e7   : > { %4419 = vmatpush.msra.mxu0 %v11592_v6  ;;  %7823 = vmatmul.msk.f32.gmra.mxu2 %vm2608_vm11, %v14940_v2  ;;  %vm2618_vm11 = vcmp.eq.s32.totalorder %v9729_v22, %v11534_v25 }
 0x2e8   : > { %v11584_v30 = vpop.f32.mrf.mxu1  ;;  %7687 = vmatmul.msk.f32.gmra.mxu0 %vm1310_vm10, %v2157_v58  ;;  %v7846_v58 = vld [vmem:[%s14850_s2 + $0x70] sm:$0xff] }
 0x2e9   : > { %3343 = vperm.xlu1 %8880, %v11428_v17   ;;  %3117 = vmatpush.msrb.mxu3 %v7846_v58  ;;  %v11618_v17 = vld [vmem:[%s9381_s18 + $0xa0] sm:$0xff] }
 0x2ea   : > { %v11595_v5 = vpop.f32.mrf.mxu2  ;;  %7668 = vmatmul.msk.f32.gmra.mxu3 %vm1866_vm9, %v14940_v2  ;;  %4420 = vmatpush.msra.mxu0 %v11608_v54  ;;  %vm1876_vm9 = vcmp.eq.s32.totalorder %v9729_v22, %v10989_v44 }
 0x2eb   : > { %15078 = vst [vmem:[#allocation80_spill] sm:$0xff] %v11595_v5  ;;  %7797 = vmatmul.msk.f32.gmra.mxu1 %vm2619_vm8, %v14940_v2 }
 0x2ec   : > { %4421 = vmatpush.msra.mxu0 %v11618_v17 }
 0x2ed   : > { %v11611_v35 = vpop.f32.mrf.mxu0  ;;  %v2159_v47 = vpop.f32.mrf.mxu3  ;;  %3337 = vperm.xlu2 %8879, %v11405_v23  }
 0x2ee   : > { %15079 = vst [vmem:[#allocation81_spill] sm:$0xff] %v11611_v35  ;;  %v2160_v32 = vadd.f32 %v2159_v47, %v10927_v59  ;;  %v11627_v23 = vpop.permute.xlu1 %3253  ;;  %v11632_v59 = vld [vmem:[%s9381_s18 + $0x98] sm:$0xff]  ;;  %v11640_v47 = vld [vmem:[%s9381_s18 + $0x90] sm:$0xff] }
 0x2ef   : > { %4422 = vmatpush.msra.mxu0 %v11632_v59  ;;  %7824 = vmatmul.msk.f32.gmra.mxu2 %vm2610_vm14, %v14940_v2  ;;  %vm2620_vm14 = vcmp.eq.s32.totalorder %v9729_v22, %v11567_v9 }
 0x2f0   : > { %v11622_v58 = vpop.f32.mrf.mxu1  ;;  %7688 = vmatmul.msk.f32.gmra.mxu0 %vm1310_vm10, %v2160_v32  ;;  %v11643_v32 = vpop.permute.xlu2 %2547 }
 0x2f1   : > { %4423 = vmatpush.msra.mxu0 %v11640_v47  ;;  %vm2623_vm15 = vcmp.eq.s32.totalorder %v9645_v61, %v11643_v32 }
 0x2f2   : > { %v11635_v13 = vpop.f32.mrf.mxu2  ;;  %7669 = vmatmul.msk.f32.gmra.mxu3 %vm1868_vm13, %v14940_v2  ;;  %vm1878_vm13 = vcmp.eq.s32.totalorder %v9729_v22, %v10976_v28 }
 0x2f3   : > { %15080 = vst [vmem:[#allocation82_spill] sm:$0xff] %v11635_v13  ;;  %7798 = vmatmul.msk.f32.gmra.mxu1 %vm2621_vm12, %v14940_v2  ;;  %4424 = vmatpush.msra.mxu0 %v11648_v40  ;;  %v11656_v13 = vld [vmem:[%s9381_s18 + $0x80] sm:$0xff] }
 0x2f5   : > { %v11645_v35 = vpop.f32.mrf.mxu0  ;;  %v2162_v56 = vpop.f32.mrf.mxu3  ;;  %4425 = vmatpush.msra.mxu0 %v11656_v13 }
 0x2f6   : > { %15081 = vst [vmem:[#allocation83_spill] sm:$0xff] %v11645_v35  ;;  %v2163_v34 = vadd.f32 %v2162_v56, %v10943_v38  ;;  %v11667_v38 = vpop.permute.xlu1 %2550 }
 0x2f7   : > { %7825 = vmatmul.msk.f32.gmra.mxu2 %vm2612_vm1, %v14940_v2  ;;  %vm2625_vm2 = vcmp.eq.s32.totalorder %v9645_v61, %v11667_v38  ;;  %vm2622_vm1 = vcmp.eq.s32.totalorder %v9729_v22, %v11605_v50 }
 0x2f8   : > { %v11659_v5 = vpop.f32.mrf.mxu1  ;;  %7689 = vmatmul.msk.f32.gmra.mxu0 %vm1310_vm10, %v2163_v34  ;;  %v11675_v34 = vpop.permute.xlu2 %3259 }
 0x2fa   : > { %7670 = vmatmul.msk.f32.gmra.mxu3 %vm1870_vm0, %v14940_v2  ;;  %v11670_v52 = vpop.f32.mrf.mxu2  ;;  %vm1880_vm0 = vcmp.eq.s32.totalorder %v9729_v22, %v10996_v57  ;;  %v7845_v57 = vld [vmem:[%s14850_s2 + $0x68] sm:$0xff] }
 0x2fb   : > { %7799 = vmatmul.msk.f32.gmra.mxu1 %vm2623_vm15, %v14940_v2  ;;  %15082 = vst [vmem:[#allocation84_spill] sm:$0xff] %v11670_v52  ;;  %3118 = vmatpush.msrb.mxu3 %v7845_v57 }
 0x2fd   : > { %v11672_v56 = vpop.f32.mrf.mxu0  ;;  %v2165_v35 = vpop.f32.mrf.mxu3 }
 0x2fe   : > { %15083 = vst [vmem:[#allocation85_spill] sm:$0xff] %v11672_v56  ;;  %v2166_v14 = vadd.f32 %v2165_v35, %v10961_v7  ;;  %v11688_v7 = vpop.permute.xlu0 %3256  ;;  %v11691_v35 = vpop.permute.xlu1 %2553 }
 0x2ff   : > { %7826 = vmatmul.msk.f32.gmra.mxu2 %vm2614_vm4, %v14940_v2  ;;  %vm2627_vm5 = vcmp.eq.s32.totalorder %v9645_v61, %v11691_v35 }
 0x300   : > { %v11680_v46 = vpop.f32.mrf.mxu1  ;;  %7690 = vmatmul.msk.f32.gmra.mxu0 %vm1310_vm10, %v2166_v14  ;;  %v11706_v33 = vpop.permute.xlu2 %3262 }
 0x302   : > { %7671 = vmatmul.msk.f32.gmra.mxu3 %vm1872_vm3, %v14940_v2  ;;  %v11695_v52 = vpop.f32.mrf.mxu2  ;;  %vm1882_vm3 = vcmp.eq.s32.totalorder %v9729_v22, %v11016_v31 }
 0x303   : > { %7800 = vmatmul.msk.f32.gmra.mxu1 %vm2625_vm2, %v14940_v2  ;;  %15085 = vst [vmem:[#allocation87_spill] sm:$0xff] %v11695_v52 }
 0x305   : > { %v11693_v26 = vpop.f32.mrf.mxu0  ;;  %v2168_v56 = vpop.f32.mrf.mxu3 }
 0x306   : > { %15084 = vst [vmem:[#allocation86_spill] sm:$0xff] %v11693_v26  ;;  %v2169_v14 = vadd.f32 %v2168_v56, %v10978_v1  ;;  %v11712_v1 = vpop.permute.xlu0 %2556  ;;  %v11714_v15 = vpop.permute.xlu1 %3265 }
 0x307   : > { %15086 = vst [vmem:[#allocation88_spill] sm:$0xff] %v11714_v15  ;;  %7827 = vmatmul.msk.f32.gmra.mxu2 %vm2616_vm7, %v14940_v2  ;;  %vm2629_vm8 = vcmp.eq.s32.totalorder %v9645_v61, %v11712_v1  ;;  %vm1886_vm7 = vcmp.eq.s32.totalorder %v9729_v22, %v15106_v39  ;;  %v15120_v15 = vld [vmem:[#allocation70_spill] sm:$0xff] }
 0x308   : > { %v11701_v37 = vpop.f32.mrf.mxu1  ;;  %7691 = vmatmul.msk.f32.gmra.mxu0 %vm1310_vm10, %v2169_v14 }
 0x30a   : > { %7672 = vmatmul.msk.f32.gmra.mxu3 %vm1874_vm6, %v14940_v2  ;;  %v11722_v52 = vpop.f32.mrf.mxu2 }
 0x30b   : > { %7801 = vmatmul.msk.f32.gmra.mxu1 %vm2627_vm5, %v14940_v2  ;;  %15088 = vst [vmem:[#allocation90_spill] sm:$0xff] %v11722_v52 }
 0x30d   : > { %v11716_v56 = vpop.f32.mrf.mxu0  ;;  %v2171_v26 = vpop.f32.mrf.mxu3 }
 0x30e   : > { %15087 = vst [vmem:[#allocation89_spill] sm:$0xff] %v11716_v56  ;;  %v2172_v14 = vadd.f32 %v2171_v26, %v10998_v45  ;;  %v11732_v45 = vpop.permute.xlu2 %2559  ;;  %v11740_v52 = vpop.permute.xlu1 %3268 }
 0x30f   : > { %15090 = vst [vmem:[#allocation92_spill] sm:$0xff] %v11740_v52  ;;  %7828 = vmatmul.msk.f32.gmra.mxu2 %vm2618_vm11, %v14940_v2  ;;  %vm2631_vm12 = vcmp.eq.s32.totalorder %v9645_v61, %v11732_v45  ;;  %v11797_v50 = vpop.permute.xlu0 %3271 }
 0x310   : > { %v11724_v11 = vpop.f32.mrf.mxu1  ;;  %7692 = vmatmul.msk.f32.gmra.mxu0 %vm1310_vm10, %v2172_v14  ;;  %15095 = vst [vmem:[#allocation97_spill] sm:$0xff] %v11797_v50 }
 0x312   : > { %7673 = vmatmul.msk.f32.gmra.mxu3 %vm1876_vm9, %v14940_v2  ;;  %v11748_v44 = vpop.f32.mrf.mxu2 }
 0x313   : > { %7802 = vmatmul.msk.f32.gmra.mxu1 %vm2629_vm8, %v14940_v2  ;;  %vm2624_vm8 = vcmp.eq.s32.totalorder %v9729_v22, %v11643_v32 }
 0x315   : > { %v11737_v55 = vpop.f32.mrf.mxu0  ;;  %v2174_v26 = vpop.f32.mrf.mxu3 }
 0x316   : > { %15089 = vst [vmem:[#allocation91_spill] sm:$0xff] %v11737_v55  ;;  %v2175_v56 = vadd.f32 %v2174_v26, %v11018_v63  ;;  %v11754_v63 = vpop.permute.xlu2 %2562  ;;  %v11770_v28 = vpop.permute.xlu1 %2565 }
 0x317   : > { %7829 = vmatmul.msk.f32.gmra.mxu2 %vm2620_vm14, %v14940_v2  ;;  %vm2633_vm15 = vcmp.eq.s32.totalorder %v9645_v61, %v11754_v63  ;;  %vm2635_vm2 = vcmp.eq.s32.totalorder %v9645_v61, %v11770_v28  ;;  %vm2628_vm14 = vcmp.eq.s32.totalorder %v9729_v22, %v11691_v35  ;;  %v15123_v35 = vld [vmem:[#allocation22_spill] sm:$0xff] }
 0x318   : > { %v11743_v14 = vpop.f32.mrf.mxu1  ;;  %7693 = vmatmul.msk.f32.gmra.mxu0 %vm1310_vm10, %v2175_v56 }
 0x31a   : > { %7674 = vmatmul.msk.f32.gmra.mxu3 %vm1878_vm13, %v14940_v2 }
 0x31b   : > { %7803 = vmatmul.msk.f32.gmra.mxu1 %vm2631_vm12, %v14940_v2  ;;  %vm2626_vm12 = vcmp.eq.s32.totalorder %v9729_v22, %v11667_v38  ;;  %v15121_v38 = vld [vmem:[#allocation6_spill] sm:$0xff] }
 0x31d   : > { %v11756_v25 = vpop.f32.mrf.mxu0  ;;  %v2177_v26 = vpop.f32.mrf.mxu3 }
 0x31e   : > { %15091 = vst [vmem:[#allocation93_spill] sm:$0xff] %v11756_v25  ;;  %v2178_v55 = vadd.f32 %v2177_v26, %v11040_v0  ;;  %v11772_v0 = vpop.f32.mrf.mxu2  ;;  %v11780_v25 = vpop.permute.xlu2 %3274 }
 0x31f   : > { %15093 = vst [vmem:[#allocation95_spill] sm:$0xff] %v11780_v25  ;;  %7830 = vmatmul.msk.f32.gmra.mxu2 %vm2622_vm1, %v14940_v2 }
 0x320   : > { %v11762_v56 = vpop.f32.mrf.mxu1  ;;  %7694 = vmatmul.msk.f32.gmra.mxu0 %vm1310_vm10, %v2178_v55 }
 0x322   : > { %7675 = vmatmul.msk.f32.gmra.mxu3 %vm1880_vm0, %v14940_v2  ;;  %vm2630_vm0 = vcmp.eq.s32.totalorder %v9729_v22, %v11712_v1 }
 0x323   : > { %7804 = vmatmul.msk.f32.gmra.mxu1 %vm2633_vm15, %v14940_v2 }
 0x325   : > { %v11777_v9 = vpop.f32.mrf.mxu0  ;;  %v2180_v55 = vpop.f32.mrf.mxu3 }
 0x326   : > { %15092 = vst [vmem:[#allocation94_spill] sm:$0xff] %v11777_v9  ;;  %v2181_v26 = vadd.f32 %v2180_v55, %v11067_v20  ;;  %v7844_v20 = vld [vmem:[%s14850_s2 + $0x60] sm:$0xff]  ;;  %v11799_v55 = vpop.f32.mrf.mxu2  ;;  %v11812_v31 = vpop.permute.xlu2 %3277 }
 0x327   : > { %3119 = vmatpush.msrb.mxu3 %v7844_v20  ;;  %15097 = vst [vmem:[#allocation99_spill] sm:$0xff] %v11812_v31  ;;  %v15098_v20 = vld [vmem:[#allocation47_spill] sm:$0xff]  ;;  %v15102_v31 = vld [vmem:[#allocation58_spill] sm:$0xff]  ;;  %7831 = vmatmul.msk.f32.gmra.mxu2 %vm2624_vm8, %v14940_v2 }
 0x328   : > { %v11786_v52 = vpop.f32.mrf.mxu1  ;;  %7695 = vmatmul.msk.f32.gmra.mxu0 %vm1310_vm10, %v2181_v26  ;;  %v11802_v26 = vpop.permute.xlu1 %2568  ;;  %vm1884_vm5 = vcmp.eq.s32.totalorder %v9729_v22, %v15098_v20 }
 0x329   : > { %15094 = vst [vmem:[#allocation96_spill] sm:$0xff] %v11786_v52  ;;  %4297 = vmatpush.msra.mxu3 %v11114_v24  ;;  %vm2637_vm4 = vcmp.eq.s32.totalorder %v9645_v61, %v11802_v26  ;;  %v15113_v52 = vld [vmem:[#allocation65_spill] sm:$0xff]  ;;  %vm2638_vm8 = vcmp.eq.s32.totalorder %v9729_v22, %v11802_v26 }
 0x32a   : > { %7676 = vmatmul.msk.f32.gmra.mxu3 %vm1882_vm3, %v14940_v2  ;;  %vm3346_vm3 = vcmp.eq.s32.totalorder %v9729_v22, %v11598_v49 }
 0x32b   : > { %7805 = vmatmul.msk.f32.gmra.mxu1 %vm2635_vm2, %v14940_v2  ;;  %4298 = vmatpush.msra.mxu3 %v11121_v41  ;;  %v11824_v41 = vpop.permute.xlu0 %2571  ;;  %vm2632_vm2 = vcmp.eq.s32.totalorder %v9729_v22, %v11732_v45 }
 0x32c   : > { %vm2639_vm6 = vcmp.eq.s32.totalorder %v9645_v61, %v11824_v41 }
 0x32d   : > { %v11805_v57 = vpop.f32.mrf.mxu0  ;;  %v2183_v9 = vpop.f32.mrf.mxu3  ;;  %4299 = vmatpush.msra.mxu3 %v11136_v19  ;;  %v15103_v19 = vld [vmem:[#allocation13_spill] sm:$0xff] }
 0x32e   : > { %15096 = vst [vmem:[#allocation98_spill] sm:$0xff] %v11805_v57  ;;  %v2184_v25 = vadd.f32 %v2183_v9, %v11110_v36  ;;  %v11820_v57 = vpop.f32.mrf.mxu2  ;;  %v15100_v36 = vld [vmem:[#allocation20_spill] sm:$0xff] }
 0x32f   : > { %4300 = vmatpush.msra.mxu3 %v15100_v36  ;;  %v15107_v36 = vld [vmem:[#allocation60_spill] sm:$0xff]  ;;  %7832 = vmatmul.msk.f32.gmra.mxu2 %vm2626_vm12, %v14940_v2  ;;  %vm3354_vm12 = vcmp.eq.s32.totalorder %v9729_v22, %v11706_v33 }
 0x330   : > { %7696 = vmatmul.msk.f32.gmra.mxu0 %vm1310_vm10, %v2184_v25  ;;  %v11817_v24 = vpop.f32.mrf.mxu1  ;;  %v11830_v20 = vpop.permute.xlu1 %3280 }
 0x331   : > { %15099 = vst [vmem:[#allocation47_spill] sm:$0xff] %v11817_v24  ;;  %4301 = vmatpush.msra.mxu3 %v15102_v31  ;;  %v15105_v24 = vld [vmem:[#allocation15_spill] sm:$0xff] }
 0x332   : > { %7677 = vmatmul.msk.f32.gmra.mxu3 %vm1884_vm5, %v14940_v2  ;;  %15104 = vst [vmem:[#allocation58_spill] sm:$0xff] %v11830_v20  ;;  %vm3348_vm5 = vcmp.eq.s32.totalorder %v9729_v22, %v11627_v23 }
 0x333   : > { %7806 = vmatmul.msk.f32.gmra.mxu1 %vm2637_vm4, %v14940_v2  ;;  %4302 = vmatpush.msra.mxu3 %v15105_v24  ;;  %v15108_v24 = vld [vmem:[#allocation62_spill] sm:$0xff]  ;;  %vm2634_vm4 = vcmp.eq.s32.totalorder %v9729_v22, %v11754_v63 }
 0x335   : > { %v11826_v25 = vpop.f32.mrf.mxu0  ;;  %v2186_v9 = vpop.f32.mrf.mxu3  ;;  %4303 = vmatpush.msra.mxu3 %v15107_v36  ;;  %v15112_v36 = vld [vmem:[#allocation21_spill] sm:$0xff] }
 0x336   : > { %15101 = vst [vmem:[#allocation20_spill] sm:$0xff] %v11826_v25  ;;  %v2187_v50 = vadd.f32 %v2186_v9, %v15103_v19  ;;  %v11840_v25 = vpop.permute.xlu2 %2574  ;;  %v11842_v31 = vpop.f32.mrf.mxu2  ;;  %v15111_v19 = vld [vmem:[#allocation17_spill] sm:$0xff] }
 0x337   : > { %4304 = vmatpush.msra.mxu3 %v15108_v24  ;;  %vm2641_vm9 = vcmp.eq.s32.totalorder %v9645_v61, %v11840_v25  ;;  %v15115_v24 = vld [vmem:[#allocation53_spill] sm:$0xff]  ;;  %7833 = vmatmul.msk.f32.gmra.mxu2 %vm2628_vm14, %v14940_v2 }
 0x338   : > { %7697 = vmatmul.msk.f32.gmra.mxu0 %vm1310_vm10, %v2187_v50  ;;  %v11848_v9 = vpop.f32.mrf.mxu1  ;;  %v11859_v32 = vpop.permute.xlu1 %3283  ;;  %vm1888_vm11 = vcmp.eq.s32.totalorder %v9729_v22, %v15115_v24  ;;  %v15119_v24 = vld [vmem:[#allocation64_spill] sm:$0xff] }
 0x339   : > { %15109 = vst [vmem:[#allocation13_spill] sm:$0xff] %v11848_v9  ;;  %4305 = vmatpush.msra.mxu3 %v15111_v19  ;;  %v15116_v9 = vld [vmem:[#allocation5_spill] sm:$0xff] }
 0x33a   : > { %7678 = vmatmul.msk.f32.gmra.mxu3 %vm1886_vm7, %v14940_v2  ;;  %15114 = vst [vmem:[#allocation50_spill] sm:$0xff] %v11859_v32  ;;  %vm3350_vm7 = vcmp.eq.s32.totalorder %v9729_v22, %v11688_v7 }
 0x33b   : > { %7807 = vmatmul.msk.f32.gmra.mxu1 %vm2639_vm6, %v14940_v2  ;;  %4306 = vmatpush.msra.mxu3 %v15113_v52  ;;  %v15117_v52 = vld [vmem:[#allocation19_spill] sm:$0xff]  ;;  %vm2636_vm6 = vcmp.eq.s32.totalorder %v9729_v22, %v11770_v28 }
 0x33d   : > { %v11851_v39 = vpop.f32.mrf.mxu0  ;;  %v2189_v50 = vpop.f32.mrf.mxu3  ;;  %4307 = vmatpush.msra.mxu3 %v15116_v9  ;;  %v2908_v9 = vadd.f32 %v11748_v44, %v11551_v53  ;;  %v2911_v44 = vadd.f32 %v11772_v0, %v11584_v30 }
 0x33e   : > { %15110 = vst [vmem:[#allocation15_spill] sm:$0xff] %v11851_v39  ;;  %v2190_v20 = vadd.f32 %v2189_v50, %v15112_v36  ;;  %v11865_v39 = vpop.f32.mrf.mxu2 }
 0x33f   : > { %4308 = vmatpush.msra.mxu3 %v15117_v52  ;;  %7834 = vmatmul.msk.f32.gmra.mxu2 %vm2630_vm0, %v14940_v2 }
 0x340   : > { %7698 = vmatmul.msk.f32.gmra.mxu0 %vm1310_vm10, %v2190_v20  ;;  %v11871_v20 = vpop.permute.xlu2 %2577  ;;  %v11879_v36 = vpop.f32.mrf.mxu1 }
 0x341   : > { %4309 = vmatpush.msra.mxu3 %v11282_v48  ;;  %vm2643_vm13 = vcmp.eq.s32.totalorder %v9645_v61, %v11871_v20  ;;  %v11888_v52 = vpop.permute.xlu1 %2580 }
 0x342   : > { %7679 = vmatmul.msk.f32.gmra.mxu3 %vm1888_vm11, %v14940_v2  ;;  %vm2645_vm15 = vcmp.eq.s32.totalorder %v9645_v61, %v11888_v52  ;;  %vm2640_vm11 = vcmp.eq.s32.totalorder %v9729_v22, %v11824_v41 }
 0x343   : > { %7808 = vmatmul.msk.f32.gmra.mxu1 %vm2641_vm9, %v14940_v2  ;;  %4310 = vmatpush.msra.mxu3 %v15120_v15  ;;  %vm3352_vm9 = vcmp.eq.s32.totalorder %v9729_v22, %v11675_v34 }
 0x345   : > { %v11874_v50 = vpop.f32.mrf.mxu0  ;;  %v2192_v19 = vpop.f32.mrf.mxu3  ;;  %4311 = vmatpush.msra.mxu3 %v15121_v38 }
 0x346   : > { %15118 = vst [vmem:[#allocation60_spill] sm:$0xff] %v11874_v50  ;;  %v2193_v32 = vadd.f32 %v2192_v19, %v15119_v24  ;;  %v11890_v48 = vpop.f32.mrf.mxu2 }
 0x347   : > { %4312 = vmatpush.msra.mxu3 %v11313_v51  ;;  %7835 = vmatmul.msk.f32.gmra.mxu2 %vm2632_vm2, %v14940_v2 }
 0x348   : > { %7699 = vmatmul.msk.f32.gmra.mxu0 %vm1310_vm10, %v2193_v32  ;;  %v15122_v32 = vld [vmem:[#allocation68_spill] sm:$0xff] }
 0x34a   : > { %7848 = vmatmul.msk.f32.vlgmr.msrb.gmra.mxu3 %vm1310_vm10, %v2908_v9  ;;  %v11904_v9 = vpop.f32.mrf.mxu1 }
 0x34b   : > { %7809 = vmatmul.msk.f32.gmra.mxu1 %vm2643_vm13, %v14940_v2  ;;  %5170 = vmatpush.msrb.mxu3 %v11493_v4  ;;  %v11917_v4 = vpop.permute.xlu1 %2583  ;;  %vm2642_vm13 = vcmp.eq.s32.totalorder %v9729_v22, %v11840_v25 }
 0x34c   : > { %vm2647_vm1 = vcmp.eq.s32.totalorder %v9645_v61, %v11917_v4 }
 0x34d   : > { %v2195_v53 = vpop.f32.mrf.mxu3  ;;  %v11898_v15 = vpop.f32.mrf.mxu0  ;;  %5171 = vmatpush.msrb.mxu3 %v11504_v62 }
 0x34e   : > { %v2196_v19 = vadd.f32 %v2195_v53, %v15122_v32  ;;  %v11913_v51 = vpop.f32.mrf.mxu2 }
 0x34f   : > { %5172 = vmatpush.msrb.mxu3 %v11514_v21  ;;  %v2914_v21 = vadd.f32 %v11799_v55, %v11622_v58  ;;  %7836 = vmatmul.msk.f32.gmra.mxu2 %vm2634_vm4, %v14940_v2 }
 0x350   : > { %7700 = vmatmul.msk.f32.gmra.mxu0 %vm1310_vm10, %v2196_v19  ;;  %v15131_v19 = vld [vmem:[#allocation73_spill] sm:$0xff] }
 0x351   : > { %5173 = vmatpush.msrb.mxu3 %v11526_v16 }
 0x352   : > { %7849 = vmatmul.msk.f32.gmra.mxu3 %vm1310_vm10, %v2911_v44  ;;  %v11931_v16 = vpop.f32.mrf.mxu1 }
 0x353   : > { %7810 = vmatmul.msk.f32.gmra.mxu1 %vm2645_vm15, %v14940_v2  ;;  %5174 = vmatpush.msrb.mxu3 %v11537_v8  ;;  %vm2644_vm15 = vcmp.eq.s32.totalorder %v9729_v22, %v11871_v20 }
 0x355   : > { %v2198_v62 = vpop.f32.mrf.mxu3  ;;  %v11920_v30 = vpop.f32.mrf.mxu0  ;;  %5175 = vmatpush.msrb.mxu3 %v11547_v27 }
 0x356   : > { %v2199_v1 = vadd.f32 %v2198_v62, %v15123_v35  ;;  %v11934_v0 = vpop.f32.mrf.mxu2  ;;  %v15132_v62 = vld [vmem:[#allocation92_spill] sm:$0xff] }
 0x357   : > { %5176 = vmatpush.msrb.mxu3 %v11559_v42  ;;  %v2917_v42 = vadd.f32 %v11820_v57, %v11659_v5  ;;  %v2920_v5 = vadd.f32 %v11842_v31, %v11680_v46  ;;  %7837 = vmatmul.msk.f32.gmra.mxu2 %vm2636_vm6, %v14940_v2  ;;  %v2929_v57 = vadd.f32 %v11913_v51, %v11743_v14 }
 0x358   : > { %7701 = vmatmul.msk.f32.gmra.mxu0 %vm1310_vm10, %v2199_v1  ;;  %vm3358_vm0 = vcmp.eq.s32.totalorder %v9729_v22, %v15132_v62 }
 0x359   : > { %5177 = vmatpush.msrb.mxu3 %v11570_v60 }
 0x35a   : > { %7850 = vmatmul.msk.f32.gmra.mxu3 %vm1310_vm10, %v2914_v21 }
 0x35b   : > { %7811 = vmatmul.msk.f32.gmra.mxu1 %vm2647_vm1, %v14940_v2  ;;  %5178 = vmatpush.msrb.mxu3 %v11580_v43  ;;  %vm2646_vm1 = vcmp.eq.s32.totalorder %v9729_v22, %v11888_v52 }
 0x35d   : > { %v2201_v27 = vpop.f32.mrf.mxu3  ;;  %v11941_v8 = vpop.f32.mrf.mxu0  ;;  %5179 = vmatpush.msrb.mxu3 %v11592_v6 }
 0x35e   : > { %v2202_v58 = vadd.f32 %v2201_v27, %v11340_v3  ;;  %v11953_v60 = vpop.f32.mrf.mxu2  ;;  %v11959_v3 = vpop.f32.mrf.mxu1 }
 0x35f   : > { %5180 = vmatpush.msrb.mxu3 %v11608_v54  ;;  %7838 = vmatmul.msk.f32.gmra.mxu2 %vm2638_vm8, %v14940_v2 }
 0x360   : > { %7702 = vmatmul.msk.f32.gmra.mxu0 %vm1310_vm10, %v2202_v58 }
 0x361   : > { %5181 = vmatpush.msrb.mxu3 %v11618_v17 }
 0x362   : > { %7851 = vmatmul.msk.f32.gmra.mxu3 %vm1310_vm10, %v2917_v42  ;;  %v15135_v42 = vld [vmem:[#allocation76_spill] sm:$0xff] }
 0x363   : > { %7976 = vmatmul.msk.f32.vlgmr.msrb.gmra.mxu1 %vm3346_vm3, %v14940_v2  ;;  %5182 = vmatpush.msrb.mxu3 %v11632_v59  ;;  %vm2648_vm3 = vcmp.eq.s32.totalorder %v9729_v22, %v11917_v4 }
 0x365   : > { %v2204_v43 = vpop.f32.mrf.mxu3  ;;  %v11962_v6 = vpop.f32.mrf.mxu0  ;;  %5183 = vmatpush.msrb.mxu3 %v11640_v47 }
 0x366   : > { %v2205_v54 = vadd.f32 %v2204_v43, %v11362_v18  ;;  %v11978_v17 = vpop.f32.mrf.mxu2  ;;  %v11983_v47 = vpop.f32.mrf.mxu1 }
 0x367   : > { %5184 = vmatpush.msrb.mxu3 %v11648_v40  ;;  %v2923_v40 = vadd.f32 %v11865_v39, %v11701_v37  ;;  %v15125_v37 = vld [vmem:[#allocation12_spill] sm:$0xff]  ;;  %7839 = vmatmul.msk.f32.gmra.mxu2 %vm2640_vm11, %v14940_v2  ;;  %vm3345_vm11 = vcmp.eq.s32.totalorder %v9645_v61, %v11598_v49  ;;  %v12201_v49 = vld [vmem:[%s14849_s1 + $0x28] sm:$0xff] }
 0x368   : > { %7703 = vmatmul.msk.f32.gmra.mxu0 %vm1310_vm10, %v2205_v54 }
 0x369   : > { %5185 = vmatpush.msrb.mxu3 %v11656_v13 }
 0x36a   : > { %7852 = vmatmul.msk.f32.gmra.mxu3 %vm1310_vm10, %v2920_v5  ;;  %v15138_v5 = vld [vmem:[#allocation13_spill] sm:$0xff] }
 0x36b   : > { %7977 = vmatmul.msk.f32.gmra.mxu1 %vm3348_vm5, %v14940_v2 }
 0x36d   : > { %v2207_v18 = vpop.f32.mrf.mxu3  ;;  %v11981_v59 = vpop.f32.mrf.mxu0 }
 0x36e   : > { %v2208_v46 = vadd.f32 %v2207_v18, %v11393_v12  ;;  %v2926_v12 = vadd.f32 %v11890_v48, %v11724_v11  ;;  %v2940_v28 = vpop.f32.mrf.mxu2  ;;  %v12001_v55 = vpop.f32.mrf.mxu1  ;;  %v15128_v48 = vld [vmem:[#allocation88_spill] sm:$0xff] }
 0x36f   : > { %7840 = vmatmul.msk.f32.gmra.mxu2 %vm2642_vm13, %v14940_v2  ;;  %vm3356_vm14 = vcmp.eq.s32.totalorder %v9729_v22, %v15128_v48  ;;  %v2941_v54 = vadd.f32 %v2940_v28, %v15138_v5  ;;  %vm3347_vm13 = vcmp.eq.s32.totalorder %v9645_v61, %v11627_v23 }
 0x370   : > { %7704 = vmatmul.msk.f32.gmra.mxu0 %vm1310_vm10, %v2208_v46 }
 0x372   : > { %7853 = vmatmul.msk.f32.gmra.mxu3 %vm1310_vm10, %v2923_v40 }
 0x373   : > { %7978 = vmatmul.msk.f32.gmra.mxu1 %vm3350_vm7, %v14940_v2 }
 0x375   : > { %v2210_v13 = vpop.f32.mrf.mxu3  ;;  %v11996_v45 = vpop.f32.mrf.mxu0 }
 0x376   : > { %15124 = vst [vmem:[#allocation62_spill] sm:$0xff] %v11996_v45  ;;  %v2211_v63 = vadd.f32 %v2210_v13, %v15125_v37  ;;  %v2943_v41 = vpop.f32.mrf.mxu2  ;;  %v12019_v39 = vpop.f32.mrf.mxu1  ;;  %v15140_v13 = vld [vmem:[#allocation95_spill] sm:$0xff] }
 0x377   : > { %7841 = vmatmul.msk.f32.gmra.mxu2 %vm2644_vm15, %v14940_v2  ;;  %vm3362_vm4 = vcmp.eq.s32.totalorder %v9729_v22, %v15140_v13  ;;  %v2944_v37 = vadd.f32 %v2943_v41, %v11879_v36  ;;  %vm3349_vm15 = vcmp.eq.s32.totalorder %v9645_v61, %v11688_v7 }
 0x378   : > { %7705 = vmatmul.msk.f32.gmra.mxu0 %vm1310_vm10, %v2211_v63  ;;  %v15142_v63 = vld [vmem:[#allocation80_spill] sm:$0xff] }
 0x37a   : > { %7854 = vmatmul.msk.f32.gmra.mxu3 %vm1310_vm10, %v2926_v12 }
 0x37b   : > { %7979 = vmatmul.msk.f32.gmra.mxu1 %vm3352_vm9, %v14940_v2 }
 0x37d   : > { %v2213_v11 = vpop.f32.mrf.mxu3  ;;  %v12011_v26 = vpop.f32.mrf.mxu0 }
 0x37e   : > { %15126 = vst [vmem:[#allocation17_spill] sm:$0xff] %v12011_v26  ;;  %v2214_v31 = vadd.f32 %v2213_v11, %v11449_v10  ;;  %v2932_v10 = vadd.f32 %v11934_v0, %v11762_v56  ;;  %v2946_v53 = vpop.f32.mrf.mxu2  ;;  %v12038_v25 = vpop.f32.mrf.mxu1  ;;  %v15134_v0 = vld [vmem:[#allocation47_spill] sm:$0xff] }
 0x37f   : > { %7842 = vmatmul.msk.f32.gmra.mxu2 %vm2646_vm1, %v14940_v2  ;;  %v2938_v27 = vadd.f32 %v11978_v17, %v15134_v0  ;;  %v15139_v17 = vld [vmem:[#allocation78_spill] sm:$0xff]  ;;  %v15143_v11 = vld [vmem:[#allocation99_spill] sm:$0xff]  ;;  %vm3351_vm1 = vcmp.eq.s32.totalorder %v9645_v61, %v11675_v34 }
 0x380   : > { %7706 = vmatmul.msk.f32.gmra.mxu0 %vm1310_vm10, %v2214_v31  ;;  %vm3364_vm5 = vcmp.eq.s32.totalorder %v9729_v22, %v15143_v11  ;;  %v12302_v34 = vld [vmem:[%s14849_s1 + $0x70] sm:$0xff] }
 0x382   : > { %7855 = vmatmul.msk.f32.gmra.mxu3 %vm1310_vm10, %v2929_v57 }
 0x383   : > { %7980 = vmatmul.msk.f32.gmra.mxu1 %vm3354_vm12, %v14940_v2 }
 0x385   : > { %v2216_v14 = vpop.f32.mrf.mxu3  ;;  %v12026_v24 = vpop.f32.mrf.mxu0 }
 0x386   : > { %15127 = vst [vmem:[#allocation21_spill] sm:$0xff] %v12026_v24  ;;  %v2217_v38 = vadd.f32 %v2216_v14, %v11471_v29  ;;  %v15130_v29 = vld [vmem:[#allocation96_spill] sm:$0xff]  ;;  %v2949_v20 = vpop.f32.mrf.mxu2  ;;  %v12056_v1 = vpop.f32.mrf.mxu1 }
 0x387   : > { %v2935_v32 = vadd.f32 %v11953_v60, %v15130_v29  ;;  %v15136_v60 = vld [vmem:[#allocation97_spill] sm:$0xff]  ;;  %7843 = vmatmul.msk.f32.gmra.mxu2 %vm2648_vm3, %v14940_v2  ;;  %v8011_v14 = vld [vmem:[%s14850_s2 + $0x98] sm:$0xff]  ;;  %v15146_v29 = vld [vmem:[#allocation58_spill] sm:$0xff]  ;;  %v2950_v0 = vadd.f32 %v2949_v20, %v11931_v16  ;;  %vm3353_vm3 = vcmp.eq.s32.totalorder %v9645_v61, %v11706_v33 }
 0x388   : > { %7707 = vmatmul.msk.f32.gmra.mxu0 %vm1310_vm10, %v2217_v38  ;;  %vm3360_vm2 = vcmp.eq.s32.totalorder %v9729_v22, %v15136_v60  ;;  %3876 = vmatpush.msrb.mxu2 %v8011_v14  ;;  %v15145_v38 = vld [vmem:[#allocation82_spill] sm:$0xff]  ;;  %vm3366_vm6 = vcmp.eq.s32.totalorder %v9729_v22, %v15146_v29 }
 0x389   : > { %v12123_v20 = vld [vmem:[%s14849_s1 + $0x8] sm:$0xff] }
 0x38a   : > { %7856 = vmatmul.msk.f32.gmra.mxu3 %vm1310_vm10, %v2932_v10  ;;  %v2947_v10 = vadd.f32 %v2946_v53, %v11904_v9  ;;  %v15148_v9 = vld [vmem:[#allocation84_spill] sm:$0xff] }
 0x38b   : > { %7981 = vmatmul.msk.f32.gmra.mxu1 %vm3356_vm14, %v14940_v2 }
 0x38d   : > { %v2219_v56 = vpop.f32.mrf.mxu3  ;;  %v12041_v44 = vpop.f32.mrf.mxu0 }
 0x38e   : > { %15129 = vst [vmem:[#allocation65_spill] sm:$0xff] %v12041_v44  ;;  %v2220_v51 = vadd.f32 %v2219_v56, %v15131_v19  ;;  %v2952_v40 = vpop.f32.mrf.mxu2  ;;  %v12073_v46 = vpop.f32.mrf.mxu1 }
 0x390   : > { %7708 = vmatmul.msk.f32.gmra.mxu0 %vm1310_vm10, %v2220_v51 }
 0x392   : > { %7857 = vmatmul.msk.f32.gmra.mxu3 %vm1310_vm10, %v2935_v32 }
 0x393   : > { %7982 = vmatmul.msk.f32.gmra.mxu1 %vm3358_vm0, %v14940_v2 }
 0x395   : > { %v2222_v21 = vpop.f32.mrf.mxu3  ;;  %v12054_v35 = vpop.f32.mrf.mxu0 }
 0x396   : > { %15133 = vst [vmem:[#allocation53_spill] sm:$0xff] %v12054_v35  ;;  %v2223_v58 = vadd.f32 %v2222_v21, %v15135_v42  ;;  %v2955_v57 = vpop.f32.mrf.mxu2  ;;  %v12087_v31 = vpop.f32.mrf.mxu1  ;;  %v9033_v35 = vld [vmem:[%s14849_s1 + $0x98] sm:$0xff] }
 0x398   : > { %7709 = vmatmul.msk.f32.gmra.mxu0 %vm1310_vm10, %v2223_v58  ;;  %v12116_v58 = vpop.permute.xlu0 %3286 }
 0x399   : > { %vm3370_vm8 = vcmp.eq.s32.totalorder %v9729_v22, %v12116_v58 }
 0x39a   : > { %7858 = vmatmul.msk.f32.gmra.mxu3 %vm1310_vm10, %v2938_v27  ;;  %v15149_v27 = vld [vmem:[#allocation50_spill] sm:$0xff] }
 0x39b   : > { %7983 = vmatmul.msk.f32.gmra.mxu1 %vm3360_vm2, %v14940_v2  ;;  %vm3368_vm7 = vcmp.eq.s32.totalorder %v9729_v22, %v15149_v27 }
 0x39d   : > { %v2225_v52 = vpop.f32.mrf.mxu3  ;;  %v12069_v43 = vpop.f32.mrf.mxu0 }
 0x39e   : > { %15137 = vst [vmem:[#allocation5_spill] sm:$0xff] %v12069_v43  ;;  %v2226_v18 = vadd.f32 %v2225_v52, %v15139_v17  ;;  %v2958_v32 = vpop.f32.mrf.mxu2  ;;  %v12103_v19 = vpop.f32.mrf.mxu1  ;;  %v9231_v52 = vmov 5  }
 0x39f   : > { %8882 = vset.pattern.permute.xlu0 %v9231_v52  ;;  %8883 = vset.pattern.permute.xlu1 %v9231_v52 }
 0x3a0   : > { %7710 = vmatmul.msk.f32.gmra.mxu0 %vm1310_vm10, %v2226_v18  ;;  %4013 = vperm.xlu0 %8882, %v12123_v20   ;;  %v2953_v18 = vadd.f32 %v2952_v40, %v11959_v3 }
 0x3a1   : > { %8881 = vset.pattern.permute.xlu2 %v9231_v52 }
 0x3a2   : > { %7859 = vmatmul.msk.f32.gmra.mxu3 %vm1310_vm10, %v2941_v54  ;;  %v12129_v54 = vld [vmem:[%s14849_s1 + $0x10] sm:$0xff] }
 0x3a3   : > { %7984 = vmatmul.msk.f32.gmra.mxu1 %vm3362_vm4, %v14940_v2  ;;  %4016 = vperm.xlu1 %8883, %v12129_v54  }
 0x3a5   : > { %v2228_v4 = vpop.f32.mrf.mxu3  ;;  %v12080_v12 = vpop.f32.mrf.mxu0 }
 0x3a6   : > { %15141 = vst [vmem:[#allocation19_spill] sm:$0xff] %v12080_v12  ;;  %v2229_v28 = vadd.f32 %v2228_v4, %v15142_v63  ;;  %v12113_v42 = vpop.f32.mrf.mxu2  ;;  %v12132_v17 = vpop.f32.mrf.mxu1  ;;  %v15151_v4 = vld [vmem:[#allocation87_spill] sm:$0xff]  ;;  %v12139_v63 = vld [vmem:[%s14849_s1] sm:$0xff] }
 0x3a7   : > { %4010 = vperm.xlu2 %8881, %v12139_v63   ;;  %v2962_v23 = vadd.f32 %v12113_v42, %v12019_v39  ;;  %v12258_v39 = vld [vmem:[%s14849_s1 + $0x68] sm:$0xff]  ;;  %v12264_v42 = vld [vmem:[%s14849_s1 + $0x78] sm:$0xff] }
 0x3a8   : > { %7711 = vmatmul.msk.f32.gmra.mxu0 %vm1310_vm10, %v2229_v28  ;;  %v12146_v28 = vpop.permute.xlu2 %3289 }
 0x3a9   : > { %vm3372_vm9 = vcmp.eq.s32.totalorder %v9729_v22, %v12146_v28 }
 0x3aa   : > { %7860 = vmatmul.msk.f32.gmra.mxu3 %vm1310_vm10, %v2944_v37 }
 0x3ab   : > { %7985 = vmatmul.msk.f32.gmra.mxu1 %vm3364_vm5, %v14940_v2  ;;  %vm3355_vm5 = vcmp.eq.s32.totalorder %v9645_v61, %v15128_v48 }
 0x3ad   : > { %v2231_v36 = vpop.f32.mrf.mxu3  ;;  %v12094_v41 = vpop.f32.mrf.mxu0 }
 0x3ae   : > { %15144 = vst [vmem:[#allocation64_spill] sm:$0xff] %v12094_v41  ;;  %v2232_v56 = vadd.f32 %v2231_v36, %v15145_v38  ;;  %v2964_v3 = vpop.f32.mrf.mxu2  ;;  %v12154_v36 = vld [vmem:[%s14849_s1 + $0x20] sm:$0xff]  ;;  %v2956_v38 = vadd.f32 %v2955_v57, %v11983_v47 }
 0x3af   : > { %4022 = vperm.xlu1 %8883, %v12154_v36   ;;  %v2965_v7 = vadd.f32 %v2964_v3, %v12038_v25 }
 0x3b0   : > { %7712 = vmatmul.msk.f32.gmra.mxu0 %vm1310_vm10, %v2232_v56  ;;  %v15153_v56 = vld [vmem:[#allocation90_spill] sm:$0xff]  ;;  %v12178_v47 = vpop.permute.xlu2 %3292 }
 0x3b1   : > { %vm3374_vm12 = vcmp.eq.s32.totalorder %v9729_v22, %v12178_v47 }
 0x3b2   : > { %7861 = vmatmul.msk.f32.gmra.mxu3 %vm1310_vm10, %v2947_v10  ;;  %v12160_v10 = vld [vmem:[%s14849_s1 + $0x30] sm:$0xff] }
 0x3b3   : > { %7986 = vmatmul.msk.f32.gmra.mxu1 %vm3366_vm6, %v14940_v2  ;;  %4028 = vperm.xlu0 %8882, %v12160_v10  }
 0x3b5   : > { %v2234_v51 = vpop.f32.mrf.mxu3  ;;  %v12105_v21 = vpop.f32.mrf.mxu0 }
 0x3b6   : > { %15147 = vst [vmem:[#allocation70_spill] sm:$0xff] %v12105_v21  ;;  %v2235_v53 = vadd.f32 %v2234_v51, %v15148_v9  ;;  %v12171_v9 = vpop.f32.mrf.mxu1  ;;  %v2967_v57 = vpop.f32.mrf.mxu2  ;;  %v12290_v21 = vld [vmem:[%s14849_s1 + $0x80] sm:$0xff] }
 0x3b8   : > { %7713 = vmatmul.msk.f32.gmra.mxu0 %vm1310_vm10, %v2235_v53 }
 0x3ba   : > { %7862 = vmatmul.msk.f32.gmra.mxu3 %vm1310_vm10, %v2950_v0  ;;  %v12168_v0 = vld [vmem:[%s14849_s1 + $0x18] sm:$0xff] }
 0x3bb   : > { %7987 = vmatmul.msk.f32.gmra.mxu1 %vm3368_vm7, %v14940_v2  ;;  %4019 = vperm.xlu2 %8881, %v12168_v0   ;;  %vm3357_vm7 = vcmp.eq.s32.totalorder %v9645_v61, %v15132_v62 }
 0x3bd   : > { %v2237_v5 = vpop.f32.mrf.mxu3  ;;  %v12118_v16 = vpop.f32.mrf.mxu0 }
 0x3be   : > { %15150 = vst [vmem:[#allocation6_spill] sm:$0xff] %v12118_v16  ;;  %v2238_v37 = vadd.f32 %v2237_v5, %v15151_v4  ;;  %v12189_v5 = vld [vmem:[%s14849_s1 + $0x38] sm:$0xff]  ;;  %v2959_v4 = vadd.f32 %v2958_v32, %v12001_v55  ;;  %v12223_v55 = vld [vmem:[%s14849_s1 + $0x50] sm:$0xff]  ;;  %v12229_v32 = vld [vmem:[%s14849_s1 + $0x60] sm:$0xff]  ;;  %v12279_v16 = vpop.permute.xlu2 %3301 }
 0x3bf   : > { %4031 = vperm.xlu1 %8883, %v12189_v5   ;;  %vm3380_vm2 = vcmp.eq.s32.totalorder %v9729_v22, %v12279_v16 }
 0x3c0   : > { %7714 = vmatmul.msk.f32.gmra.mxu0 %vm1310_vm10, %v2238_v37  ;;  %v12208_v37 = vpop.f32.mrf.mxu1 }
 0x3c2   : > { %7863 = vmatmul.msk.f32.gmra.mxu3 %vm1310_vm10, %v2953_v18  ;;  %v12195_v18 = vld [vmem:[%s14849_s1 + $0x48] sm:$0xff] }
 0x3c3   : > { %7988 = vmatmul.msk.f32.gmra.mxu1 %vm3370_vm8, %v14940_v2  ;;  %4037 = vperm.xlu0 %8882, %v12195_v18  }
 0x3c4   : > { %4025 = vperm.xlu2 %8881, %v12201_v49  }
 0x3c5   : > { %v2240_v40 = vpop.f32.mrf.mxu3  ;;  %v12149_v14 = vpop.f32.mrf.mxu0 }
 0x3c6   : > { %15152 = vst [vmem:[#allocation68_spill] sm:$0xff] %v12149_v14  ;;  %v2241_v51 = vadd.f32 %v2240_v40, %v15153_v56  ;;  %v12212_v40 = vpop.permute.xlu0 %3295 }
 0x3c7   : > { %4040 = vperm.xlu1 %8883, %v12223_v55   ;;  %vm3376_vm14 = vcmp.eq.s32.totalorder %v9729_v22, %v12212_v40 }
 0x3c8   : > { %7715 = vmatmul.msk.f32.gmra.mxu0 %vm1310_vm10, %v2241_v51  ;;  %v2970_v51 = vpop.f32.mrf.mxu2  ;;  %v12245_v50 = vpop.f32.mrf.mxu1 }
 0x3c9   : > { %v2971_v44 = vadd.f32 %v2970_v51, %v12073_v46 }
 0x3ca   : > { %7864 = vmatmul.msk.f32.gmra.mxu3 %vm1310_vm10, %v2956_v38 }
 0x3cb   : > { %7989 = vmatmul.msk.f32.gmra.mxu1 %vm3372_vm9, %v14940_v2  ;;  %4046 = vperm.xlu0 %8882, %v12229_v32   ;;  %vm3359_vm9 = vcmp.eq.s32.totalorder %v9645_v61, %v15136_v60  ;;  %v9044_v60 = vld [vmem:[%s14849_s1 + $0xd0] sm:$0xff] }
 0x3cd   : > { %v12182_v53 = vpop.f32.mrf.mxu0  ;;  %v12184_v52 = vpop.f32.mrf.mxu3 }
 0x3ce   : > { %15154 = vst [vmem:[#allocation22_spill] sm:$0xff] %v12182_v53 }
 0x3cf   : > { %4049 = vperm.xlu1 %8883, %v12258_v39  }
 0x3d0   : > { %7944 = vmatmul.msk.f32.vlgmr.msrb.gmra.mxu0 %vm3345_vm11, %v14940_v2  ;;  %v12296_v41 = vpop.f32.mrf.mxu1 }
 0x3d2   : > { %7865 = vmatmul.msk.f32.gmra.mxu3 %vm1310_vm10, %v2959_v4  ;;  %v12235_v4 = vld [vmem:[%s14849_s1 + $0x40] sm:$0xff] }
 0x3d3   : > { %7990 = vmatmul.msk.f32.gmra.mxu1 %vm3374_vm12, %v14940_v2  ;;  %4034 = vperm.xlu2 %8881, %v12235_v4   ;;  %vm3361_vm12 = vcmp.eq.s32.totalorder %v9645_v61, %v15140_v13 }
 0x3d4   : > { %4055 = vperm.xlu0 %8882, %v12264_v42  }
 0x3d5   : > { %v12214_v38 = vpop.f32.mrf.mxu0  ;;  %v12216_v56 = vpop.f32.mrf.mxu3 }
 0x3d6   : > { %15155 = vst [vmem:[#allocation12_spill] sm:$0xff] %v12214_v38  ;;  %v12247_v38 = vpop.permute.xlu1 %3298 }
 0x3d7   : > { %vm3378_vm0 = vcmp.eq.s32.totalorder %v9729_v22, %v12247_v38  ;;  %4058 = vperm.xlu1 %8883, %v12290_v21  }
 0x3d8   : > { %7945 = vmatmul.msk.f32.gmra.mxu0 %vm3347_vm13, %v14940_v2 }
 0x3da   : > { %7866 = vmatmul.msk.f32.gmra.mxu3 %vm1310_vm10, %v2962_v23  ;;  %v12271_v23 = vld [vmem:[%s14849_s1 + $0x58] sm:$0xff] }
 0x3db   : > { %7991 = vmatmul.msk.f32.gmra.mxu1 %vm3376_vm14, %v14940_v2  ;;  %4043 = vperm.xlu2 %8881, %v12271_v23   ;;  %vm3363_vm14 = vcmp.eq.s32.totalorder %v9645_v61, %v15143_v11 }
 0x3dd   : > { %v12251_v53 = vpop.f32.mrf.mxu0  ;;  %v12253_v14 = vpop.f32.mrf.mxu3 }
 0x3de   : > { %15156 = vst [vmem:[#allocation88_spill] sm:$0xff] %v12251_v53  ;;  %v2973_v53 = vpop.f32.mrf.mxu2 }
 0x3df   : > { %4067 = vperm.xlu1 %8883, %v9033_v35   ;;  %v12341_v35 = vpop.permute.xlu1 %3307  ;;  %v2974_v24 = vadd.f32 %v2973_v53, %v12087_v31  ;;  %v9039_v53 = vld [vmem:[%s14849_s1 + $0xc8] sm:$0xff] }
 0x3e0   : > { %7946 = vmatmul.msk.f32.gmra.mxu0 %vm3349_vm15, %v14940_v2  ;;  %vm3384_vm6 = vcmp.eq.s32.totalorder %v9729_v22, %v12341_v35 }
 0x3e2   : > { %7867 = vmatmul.msk.f32.gmra.mxu3 %vm1310_vm10, %v2965_v7  ;;  %v9031_v7 = vld [vmem:[%s14849_s1 + $0x90] sm:$0xff] }
 0x3e3   : > { %7992 = vmatmul.msk.f32.gmra.mxu1 %vm3378_vm0, %v14940_v2  ;;  %4064 = vperm.xlu0 %8882, %v9031_v7   ;;  %vm3365_vm0 = vcmp.eq.s32.totalorder %v9645_v61, %v15146_v29 }
 0x3e4   : > { %4052 = vperm.xlu2 %8881, %v12302_v34  }
 0x3e5   : > { %v12281_v25 = vpop.f32.mrf.mxu0  ;;  %v12283_v3 = vpop.f32.mrf.mxu3 }
 0x3e6   : > { %15157 = vst [vmem:[#allocation96_spill] sm:$0xff] %v12281_v25  ;;  %v2968_v25 = vadd.f32 %v2967_v57, %v12056_v1  ;;  %v2976_v12 = vpop.f32.mrf.mxu2  ;;  %v8010_v1 = vld [vmem:[%s14850_s2 + $0x90] sm:$0xff]  ;;  %v12313_v57 = vpop.permute.xlu0 %3304 }
 0x3e7   : > { %3877 = vmatpush.msrb.mxu2 %v8010_v1  ;;  %v12331_v1 = vld [vmem:[%s14849_s1 + $0x88] sm:$0xff]  ;;  %vm3382_vm4 = vcmp.eq.s32.totalorder %v9729_v22, %v12313_v57 }
 0x3e8   : > { %7947 = vmatmul.msk.f32.gmra.mxu0 %vm3351_vm1, %v14940_v2 }
 0x3ea   : > { %7868 = vmatmul.msk.f32.gmra.mxu3 %vm1310_vm10, %v2968_v25  ;;  %v9034_v25 = vld [vmem:[%s14849_s1 + $0xa8] sm:$0xff] }
 0x3eb   : > { %7993 = vmatmul.msk.f32.gmra.mxu1 %vm3380_vm2, %v14940_v2  ;;  %4073 = vperm.xlu0 %8882, %v9034_v25   ;;  %v9036_v25 = vld [vmem:[%s14849_s1 + $0xb0] sm:$0xff]  ;;  %vm3367_vm2 = vcmp.eq.s32.totalorder %v9645_v61, %v15149_v27 }
 0x3ec   : > { %4061 = vperm.xlu2 %8881, %v12331_v1   ;;  %4076 = vperm.xlu1 %8883, %v9036_v25   ;;  %v12366_v25 = vpop.permute.xlu2 %3310 }
 0x3ed   : > { %v12315_v7 = vpop.f32.mrf.mxu0  ;;  %v12317_v43 = vpop.f32.mrf.mxu3  ;;  %vm3386_vm8 = vcmp.eq.s32.totalorder %v9729_v22, %v12366_v25 }
 0x3ee   : > { %15158 = vst [vmem:[#allocation73_spill] sm:$0xff] %v12315_v7  ;;  %v12334_v7 = vpop.f32.mrf.mxu1  ;;  %v2979_v33 = vpop.f32.mrf.mxu2 }
 0x3f0   : > { %7948 = vmatmul.msk.f32.gmra.mxu0 %vm3353_vm3, %v14940_v2 }
 0x3f2   : > { %7869 = vmatmul.msk.f32.gmra.mxu3 %vm1310_vm10, %v2971_v44  ;;  %v9037_v44 = vld [vmem:[%s14849_s1 + $0xc0] sm:$0xff] }
 0x3f3   : > { %7994 = vmatmul.msk.f32.gmra.mxu1 %vm3382_vm4, %v14940_v2  ;;  %4082 = vperm.xlu0 %8882, %v9037_v44   ;;  %vm3369_vm4 = vcmp.eq.s32.totalorder %v9645_v61, %v12116_v58  ;;  %v8175_v58 = vld [vmem:[%s14850_s2 + $0xb8] sm:$0xff] }
 0x3f4   : > { %4085 = vperm.xlu1 %8883, %v9039_v53   ;;  %4636 = vmatpush.msra.mxu1 %v8175_v58  ;;  %v12522_v58 = vld [vmem:[%s9381_s18 + $0x68] sm:$0xff] }
 0x3f5   : > { %v12343_v46 = vpop.f32.mrf.mxu0  ;;  %v12345_v51 = vpop.f32.mrf.mxu3  ;;  %15177 = vst [vmem:[#allocation103_spill] sm:$0xff] %v12522_v58 }
 0x3f6   : > { %15159 = vst [vmem:[#allocation92_spill] sm:$0xff] %v12343_v46  ;;  %v9038_v46 = vld [vmem:[%s14849_s1 + $0xa0] sm:$0xff]  ;;  %v12362_v48 = vpop.f32.mrf.mxu1  ;;  %v2982_v26 = vpop.f32.mrf.mxu2 }
 0x3f7   : > { %15160 = vst [vmem:[#allocation47_spill] sm:$0xff] %v12345_v51  ;;  %4070 = vperm.xlu2 %8881, %v9038_v46   ;;  %v9040_v46 = vld [vmem:[%s14849_s1 + $0xd8] sm:$0xff]  ;;  %v12556_v51 = vld [vmem:[%s9381_s18 + $0x48] sm:$0xff] }
 0x3f8   : > { %7949 = vmatmul.msk.f32.gmra.mxu0 %vm3355_vm5, %v14940_v2  ;;  %15183 = vst [vmem:[#allocation109_spill] sm:$0xff] %v12556_v51 }
 0x3fa   : > { %7870 = vmatmul.msk.f32.gmra.mxu3 %vm1310_vm10, %v2974_v24  ;;  %v2977_v24 = vadd.f32 %v2976_v12, %v12103_v19  ;;  %v12391_v12 = vpop.permute.xlu0 %3313 }
 0x3fb   : > { %7995 = vmatmul.msk.f32.gmra.mxu1 %vm3384_vm6, %v14940_v2  ;;  %4091 = vperm.xlu0 %8882, %v9040_v46   ;;  %v9043_v46 = vld [vmem:[%s14849_s1 + $0xf0] sm:$0xff]  ;;  %vm3388_vm11 = vcmp.eq.s32.totalorder %v9729_v22, %v12391_v12  ;;  %vm3371_vm6 = vcmp.eq.s32.totalorder %v9645_v61, %v12146_v28 }
 0x3fd   : > { %v12368_v44 = vpop.f32.mrf.mxu0  ;;  %v12370_v31 = vpop.f32.mrf.mxu3 }
 0x3fe   : > { %15161 = vst [vmem:[#allocation76_spill] sm:$0xff] %v12368_v44  ;;  %v9041_v44 = vld [vmem:[%s14849_s1 + $0xb8] sm:$0xff]  ;;  %v12389_v53 = vpop.f32.mrf.mxu1 }
 0x3ff   : > { %15162 = vst [vmem:[#allocation97_spill] sm:$0xff] %v12370_v31  ;;  %4079 = vperm.xlu2 %8881, %v9041_v44   ;;  %v9042_v44 = vld [vmem:[%s14849_s1 + $0xe0] sm:$0xff] }
 0x400   : > { %7950 = vmatmul.msk.f32.gmra.mxu0 %vm3357_vm7, %v14940_v2  ;;  %4094 = vperm.xlu1 %8883, %v9042_v44   ;;  %v12414_v44 = vpop.permute.xlu1 %3316 }
 0x401   : > { %vm3390_vm13 = vcmp.eq.s32.totalorder %v9729_v22, %v12414_v44 }
 0x402   : > { %7871 = vmatmul.msk.f32.gmra.mxu3 %vm1310_vm10, %v2977_v24  ;;  %v2980_v24 = vadd.f32 %v2979_v33, %v12132_v17  ;;  %v9045_v33 = vld [vmem:[%s14849_s1 + $0xf8] sm:$0xff] }
 0x403   : > { %7996 = vmatmul.msk.f32.gmra.mxu1 %vm3386_vm8, %v14940_v2  ;;  %4100 = vperm.xlu0 %8882, %v9043_v46   ;;  %vm3373_vm8 = vcmp.eq.s32.totalorder %v9645_v61, %v12178_v47  ;;  %v12578_v47 = vld [vmem:[%s9381_s18 + $0x30] sm:$0xff] }
 0x404   : > { %15186 = vst [vmem:[#allocation112_spill] sm:$0xff] %v12578_v47 }
 0x405   : > { %v12395_v62 = vpop.f32.mrf.mxu0  ;;  %v12397_v19 = vpop.f32.mrf.mxu3 }
 0x406   : > { %15163 = vst [vmem:[#allocation13_spill] sm:$0xff] %v12395_v62  ;;  %v2985_v62 = vpop.f32.mrf.mxu2 }
 0x407   : > { %15164 = vst [vmem:[#allocation78_spill] sm:$0xff] %v12397_v19  ;;  %4088 = vperm.xlu2 %8881, %v9044_v60   ;;  %v12425_v60 = vpop.f32.mrf.mxu1  ;;  %v9046_v19 = vld [vmem:[%s14849_s1 + $0xe8] sm:$0xff] }
 0x408   : > { %7951 = vmatmul.msk.f32.gmra.mxu0 %vm3359_vm9, %v14940_v2  ;;  %4103 = vperm.xlu1 %8883, %v9045_v33   ;;  %v12436_v33 = vpop.permute.xlu2 %3319 }
 0x409   : > { %vm3392_vm15 = vcmp.eq.s32.totalorder %v9729_v22, %v12436_v33 }
 0x40a   : > { %7872 = vmatmul.msk.f32.gmra.mxu3 %vm1310_vm10, %v2980_v24  ;;  %v2983_v24 = vadd.f32 %v2982_v26, %v12171_v9  ;;  %v2986_v9 = vadd.f32 %v2985_v62, %v12208_v37  ;;  %v12459_v37 = vpop.permute.xlu0 %3322 }
 0x40b   : > { %7997 = vmatmul.msk.f32.gmra.mxu1 %vm3388_vm11, %v14940_v2  ;;  %vm3394_vm1 = vcmp.eq.s32.totalorder %v9729_v22, %v12459_v37  ;;  %vm3375_vm11 = vcmp.eq.s32.totalorder %v9645_v61, %v12212_v40  ;;  %v12613_v40 = vld [vmem:[%s9381_s18 + $0x10] sm:$0xff] }
 0x40c   : > { %15192 = vst [vmem:[#allocation118_spill] sm:$0xff] %v12613_v40 }
 0x40d   : > { %v12416_v46 = vpop.f32.mrf.mxu0  ;;  %v12418_v17 = vpop.f32.mrf.mxu3 }
 0x40e   : > { %15165 = vst [vmem:[#allocation95_spill] sm:$0xff] %v12416_v46  ;;  %v2988_v13 = vpop.f32.mrf.mxu2 }
 0x40f   : > { %15166 = vst [vmem:[#allocation80_spill] sm:$0xff] %v12418_v17  ;;  %4097 = vperm.xlu2 %8881, %v9046_v19   ;;  %v12445_v19 = vpop.f32.mrf.mxu1  ;;  %v2989_v11 = vadd.f32 %v2988_v13, %v12245_v50 }
 0x410   : > { %7952 = vmatmul.msk.f32.gmra.mxu0 %vm3361_vm12, %v14940_v2 }
 0x412   : > { %7873 = vmatmul.msk.f32.gmra.mxu3 %vm1310_vm10, %v2983_v24 }
 0x413   : > { %7998 = vmatmul.msk.f32.gmra.mxu1 %vm3390_vm13, %v14940_v2 }
 0x415   : > { %v12438_v46 = vpop.f32.mrf.mxu0  ;;  %v12440_v26 = vpop.f32.mrf.mxu3 }
 0x416   : > { %15167 = vst [vmem:[#allocation99_spill] sm:$0xff] %v12438_v46  ;;  %v2991_v24 = vpop.f32.mrf.mxu2 }
 0x417   : > { %15168 = vst [vmem:[#allocation82_spill] sm:$0xff] %v12440_v26  ;;  %v12464_v62 = vpop.f32.mrf.mxu1  ;;  %v2992_v50 = vadd.f32 %v2991_v24, %v12296_v41 }
 0x418   : > { %7953 = vmatmul.msk.f32.gmra.mxu0 %vm3363_vm14, %v14940_v2  ;;  %vm3377_vm14 = vcmp.eq.s32.totalorder %v9645_v61, %v12247_v38  ;;  %v12646_v38 = vld [vmem:[%s9381_s18 + $0xf0] sm:$0xff] }
 0x419   : > { %15197 = vst [vmem:[#allocation123_spill] sm:$0xff] %v12646_v38 }
 0x41a   : > { %7874 = vmatmul.msk.f32.gmra.mxu3 %vm1310_vm10, %v2986_v9  ;;  %v12468_v9 = vpop.permute.xlu1 %3325 }
 0x41b   : > { %7999 = vmatmul.msk.f32.gmra.mxu1 %vm3392_vm15, %v14940_v2  ;;  %vm3396_vm3 = vcmp.eq.s32.totalorder %v9729_v22, %v12468_v9 }
 0x41d   : > { %v12452_v46 = vpop.f32.mrf.mxu0  ;;  %v12454_v26 = vpop.f32.mrf.mxu3 }
 0x41e   : > { %15169 = vst [vmem:[#allocation58_spill] sm:$0xff] %v12452_v46  ;;  %v2994_v13 = vpop.f32.mrf.mxu2 }
 0x41f   : > { %15170 = vst [vmem:[#allocation84_spill] sm:$0xff] %v12454_v26  ;;  %v2995_v24 = vadd.f32 %v2994_v13, %v12334_v7  ;;  %v12506_v7 = vld [vmem:[%s9381_s18 + $0x78] sm:$0xff]  ;;  %v12512_v13 = vld [vmem:[%s9381_s18 + $0x70] sm:$0xff]  ;;  %v12529_v26 = vld [vmem:[%s9381_s18 + $0x60] sm:$0xff] }
 0x420   : > { %7954 = vmatmul.msk.f32.gmra.mxu0 %vm3365_vm0, %v14940_v2  ;;  %15178 = vst [vmem:[#allocation104_spill] sm:$0xff] %v12529_v26 }
 0x422   : > { %7875 = vmatmul.msk.f32.gmra.mxu3 %vm1310_vm10, %v2989_v11  ;;  %v8009_v11 = vld [vmem:[%s14850_s2 + $0x88] sm:$0xff]  ;;  %v12549_v17 = vpop.permute.xlu1 %3334 }
 0x423   : > { %8000 = vmatmul.msk.f32.gmra.mxu1 %vm3394_vm1, %v14940_v2  ;;  %3878 = vmatpush.msrb.mxu2 %v8009_v11  ;;  %vm3402_vm9 = vcmp.eq.s32.totalorder %v9729_v22, %v12549_v17 }
 0x425   : > { %v12470_v46 = vpop.f32.mrf.mxu0  ;;  %v12472_v29 = vpop.f32.mrf.mxu3 }
 0x426   : > { %15171 = vst [vmem:[#allocation50_spill] sm:$0xff] %v12470_v46  ;;  %v12485_v46 = vpop.f32.mrf.mxu1  ;;  %v2997_v11 = vpop.f32.mrf.mxu2 }
 0x427   : > { %15172 = vst [vmem:[#allocation87_spill] sm:$0xff] %v12472_v29  ;;  %v8008_v29 = vld [vmem:[%s14850_s2 + $0x80] sm:$0xff] }
 0x428   : > { %7955 = vmatmul.msk.f32.gmra.mxu0 %vm3367_vm2, %v14940_v2  ;;  %3879 = vmatpush.msrb.mxu2 %v8008_v29  ;;  %vm3379_vm2 = vcmp.eq.s32.totalorder %v9645_v61, %v12279_v16  ;;  %v12679_v16 = vld [vmem:[%s9381_s18 + $0xd0] sm:$0xff] }
 0x429   : > { %15202 = vst [vmem:[#allocation128_spill] sm:$0xff] %v12679_v16 }
 0x42a   : > { %7876 = vmatmul.msk.f32.gmra.mxu3 %vm1310_vm10, %v2992_v50  ;;  %v12494_v50 = vpop.permute.xlu2 %3328  ;;  %5057 = vmatpush.msra.mxu2 %v12506_v7 }
 0x42b   : > { %8001 = vmatmul.msk.f32.gmra.mxu1 %vm3396_vm3, %v14940_v2  ;;  %vm3398_vm5 = vcmp.eq.s32.totalorder %v9729_v22, %v12494_v50 }
 0x42c   : > { %5058 = vmatpush.msra.mxu2 %v12512_v13 }
 0x42d   : > { %v12489_v41 = vpop.f32.mrf.mxu0  ;;  %v12491_v27 = vpop.f32.mrf.mxu3 }
 0x42e   : > { %15173 = vst [vmem:[#allocation90_spill] sm:$0xff] %v12489_v41  ;;  %5059 = vmatpush.msra.mxu2 %v12522_v58  ;;  %v3000_v28 = vpop.f32.mrf.mxu2 }
 0x42f   : > { %15174 = vst [vmem:[#allocation100_spill] sm:$0xff] %v12491_v27  ;;  %v12525_v27 = vpop.f32.mrf.mxu1 }
 0x430   : > { %7956 = vmatmul.msk.f32.gmra.mxu0 %vm3369_vm4, %v14940_v2  ;;  %5060 = vmatpush.msra.mxu2 %v12529_v26  ;;  %vm3381_vm4 = vcmp.eq.s32.totalorder %v9645_v61, %v12313_v57  ;;  %v12709_v57 = vld [vmem:[%s9381_s18 + $0xb0] sm:$0xff] }
 0x431   : > { %15207 = vst [vmem:[#allocation133_spill] sm:$0xff] %v12709_v57 }
 0x432   : > { %7877 = vmatmul.msk.f32.gmra.mxu3 %vm1310_vm10, %v2995_v24  ;;  %v2998_v24 = vadd.f32 %v2997_v11, %v12362_v48  ;;  %v12544_v48 = vld [vmem:[%s9381_s18 + $0x50] sm:$0xff]  ;;  %v12547_v11 = vpop.permute.xlu2 %3337 }
 0x433   : > { %8002 = vmatmul.msk.f32.gmra.mxu1 %vm3398_vm5, %v14940_v2  ;;  %15180 = vst [vmem:[#allocation106_spill] sm:$0xff] %v12544_v48  ;;  %vm3404_vm13 = vcmp.eq.s32.totalorder %v9729_v22, %v12547_v11 }
 0x435   : > { %v12515_v29 = vpop.f32.mrf.mxu0  ;;  %v12517_v41 = vpop.f32.mrf.mxu3 }
 0x436   : > { %15175 = vst [vmem:[#allocation101_spill] sm:$0xff] %v12515_v29  ;;  %v12533_v29 = vpop.permute.xlu0 %3331 }
 0x437   : > { %15176 = vst [vmem:[#allocation102_spill] sm:$0xff] %v12517_v41  ;;  %v12536_v41 = vld [vmem:[%s9381_s18 + $0x58] sm:$0xff]  ;;  %vm3400_vm7 = vcmp.eq.s32.totalorder %v9729_v22, %v12533_v29  ;;  %v12566_v26 = vpop.f32.mrf.mxu1 }
 0x438   : > { %7957 = vmatmul.msk.f32.gmra.mxu0 %vm3371_vm6, %v14940_v2  ;;  %15179 = vst [vmem:[#allocation105_spill] sm:$0xff] %v12536_v41  ;;  %5061 = vmatpush.msra.mxu2 %v12536_v41 }
 0x43a   : > { %7878 = vmatmul.msk.f32.gmra.mxu3 %vm1310_vm10, %v2998_v24  ;;  %5062 = vmatpush.msra.mxu2 %v12544_v48  ;;  %v3001_v24 = vadd.f32 %v3000_v28, %v12389_v53  ;;  %v12563_v48 = vld [vmem:[%s9381_s18 + $0x40] sm:$0xff]  ;;  %v12583_v28 = vpop.permute.xlu2 %4010 }
 0x43b   : > { %8003 = vmatmul.msk.f32.gmra.mxu1 %vm3400_vm7, %v14940_v2  ;;  %15184 = vst [vmem:[#allocation110_spill] sm:$0xff] %v12563_v48  ;;  %vm4105_vm12 = vcmp.eq.s32.totalorder %v9645_v61, %v12583_v28  ;;  %vm3383_vm7 = vcmp.eq.s32.totalorder %v9645_v61, %v12341_v35 }
 0x43c   : > { %5063 = vmatpush.msra.mxu2 %v12556_v51  ;;  %v12590_v51 = vld [vmem:[%s9381_s18 + $0x28] sm:$0xff] }
 0x43d   : > { %v12551_v31 = vpop.f32.mrf.mxu0  ;;  %v12553_v41 = vpop.f32.mrf.mxu3  ;;  %15189 = vst [vmem:[#allocation115_spill] sm:$0xff] %v12590_v51 }
 0x43e   : > { %15181 = vst [vmem:[#allocation107_spill] sm:$0xff] %v12551_v31  ;;  %5064 = vmatpush.msra.mxu2 %v12563_v48  ;;  %v12572_v31 = vld [vmem:[%s9381_s18 + $0x38] sm:$0xff]  ;;  %v12581_v53 = vpop.permute.xlu0 %3340 }
 0x43f   : > { %15182 = vst [vmem:[#allocation108_spill] sm:$0xff] %v12553_v41  ;;  %vm3406_vm0 = vcmp.eq.s32.totalorder %v9729_v22, %v12581_v53 }
 0x440   : > { %7958 = vmatmul.msk.f32.gmra.mxu0 %vm3373_vm8, %v14940_v2  ;;  %15185 = vst [vmem:[#allocation111_spill] sm:$0xff] %v12572_v31  ;;  %5065 = vmatpush.msra.mxu2 %v12572_v31  ;;  %v12625_v31 = vld [vmem:[%s9381_s18 + $0x8] sm:$0xff] }
 0x441   : > { %15194 = vst [vmem:[#allocation120_spill] sm:$0xff] %v12625_v31 }
 0x442   : > { %7879 = vmatmul.msk.f32.gmra.mxu3 %vm1310_vm10, %v3001_v24  ;;  %5066 = vmatpush.msra.mxu2 %v12578_v47  ;;  %v12598_v24 = vld [vmem:[%s9381_s18 + $0x20] sm:$0xff] }
 0x443   : > { %8004 = vmatmul.msk.f32.gmra.mxu1 %vm3402_vm9, %v14940_v2  ;;  %15190 = vst [vmem:[#allocation116_spill] sm:$0xff] %v12598_v24  ;;  %vm3385_vm9 = vcmp.eq.s32.totalorder %v9645_v61, %v12366_v25 }
 0x444   : > { %5067 = vmatpush.msra.mxu2 %v12590_v51 }
 0x445   : > { %v12585_v41 = vpop.f32.mrf.mxu0  ;;  %v12587_v48 = vpop.f32.mrf.mxu3 }
 0x446   : > { %15187 = vst [vmem:[#allocation113_spill] sm:$0xff] %v12585_v41  ;;  %5068 = vmatpush.msra.mxu2 %v12598_v24  ;;  %v12603_v41 = vld [vmem:[%s9381_s18 + $0x18] sm:$0xff]  ;;  %v12616_v24 = vpop.permute.xlu1 %3343  ;;  %v12618_v51 = vpop.permute.xlu0 %4013 }
 0x447   : > { %15188 = vst [vmem:[#allocation114_spill] sm:$0xff] %v12587_v48  ;;  %v12606_v48 = vpop.f32.mrf.mxu1  ;;  %vm4107_vm15 = vcmp.eq.s32.totalorder %v9645_v61, %v12618_v51  ;;  %vm3408_vm3 = vcmp.eq.s32.totalorder %v9729_v22, %v12616_v24 }
 0x448   : > { %7959 = vmatmul.msk.f32.gmra.mxu0 %vm3375_vm11, %v14940_v2  ;;  %15191 = vst [vmem:[#allocation117_spill] sm:$0xff] %v12603_v41  ;;  %5069 = vmatpush.msra.mxu2 %v12603_v41  ;;  %vm3387_vm11 = vcmp.eq.s32.totalorder %v9645_v61, %v12391_v12 }
 0x44a   : > { %8108 = vmatmul.msk.f32.vlgmr.msra.gmra.mxu3 %vm4105_vm12, %v14940_v2  ;;  %5070 = vmatpush.msra.mxu2 %v12613_v40  ;;  %v12632_v40 = vld [vmem:[%s9381_s18] sm:$0xff] }
 0x44b   : > { %8005 = vmatmul.msk.f32.gmra.mxu1 %vm3404_vm13, %v14940_v2  ;;  %15195 = vst [vmem:[#allocation121_spill] sm:$0xff] %v12632_v40 }
 0x44c   : > { %5071 = vmatpush.msra.mxu2 %v12625_v31 }
 0x44d   : > { %v12620_v41 = vpop.f32.mrf.mxu3  ;;  %v3554_v47 = vpop.f32.mrf.mxu0 }
 0x44e   : > { %15193 = vst [vmem:[#allocation119_spill] sm:$0xff] %v12620_v41  ;;  %v3668_v45 = vadd.f32 %v12425_v60, %v3554_v47  ;;  %5072 = vmatpush.msra.mxu2 %v12632_v40  ;;  %v12638_v41 = vld [vmem:[%s9381_s18 + $0xf8] sm:$0xff]  ;;  %v12656_v40 = vld [vmem:[%s9381_s18 + $0xe8] sm:$0xff] }
 0x44f   : > { %15196 = vst [vmem:[#allocation122_spill] sm:$0xff] %v12638_v41  ;;  %v12649_v60 = vpop.f32.mrf.mxu1 }
 0x450   : > { %7960 = vmatmul.msk.f32.gmra.mxu0 %vm3377_vm14, %v14940_v2  ;;  %8012 = vmatmul.msk.f32.vlgmr.msrb.gmra.mxu2 %vm1310_vm10, %v3668_v45  ;;  %v12651_v45 = vpop.permute.xlu1 %4016  ;;  %15199 = vst [vmem:[#allocation125_spill] sm:$0xff] %v12656_v40  ;;  %vm3389_vm14 = vcmp.eq.s32.totalorder %v9645_v61, %v12414_v44 }
 0x451   : > { %5930 = vmatpush.msrb.mxu2 %v12638_v41  ;;  %vm4109_vm1 = vcmp.eq.s32.totalorder %v9645_v61, %v12651_v45 }
 0x452   : > { %8109 = vmatmul.msk.f32.gmra.mxu3 %vm4107_vm15, %v14940_v2  ;;  %vm3391_vm15 = vcmp.eq.s32.totalorder %v9645_v61, %v12436_v33 }
 0x453   : > { %8006 = vmatmul.msk.f32.gmra.mxu1 %vm3406_vm0, %v14940_v2  ;;  %5931 = vmatpush.msrb.mxu2 %v12646_v38  ;;  %v12665_v38 = vld [vmem:[%s9381_s18 + $0xe0] sm:$0xff] }
 0x454   : > { %15200 = vst [vmem:[#allocation126_spill] sm:$0xff] %v12665_v38 }
 0x455   : > { %v12653_v47 = vpop.f32.mrf.mxu3  ;;  %v3557_v41 = vpop.f32.mrf.mxu0  ;;  %5932 = vmatpush.msrb.mxu2 %v12656_v40 }
 0x456   : > { %15198 = vst [vmem:[#allocation124_spill] sm:$0xff] %v12653_v47  ;;  %v3671_v31 = vadd.f32 %v12445_v19, %v3557_v41  ;;  %v12671_v47 = vld [vmem:[%s9381_s18 + $0xd8] sm:$0xff]  ;;  %v12682_v19 = vpop.permute.xlu2 %4019 }
 0x457   : > { %5933 = vmatpush.msrb.mxu2 %v12665_v38  ;;  %15201 = vst [vmem:[#allocation127_spill] sm:$0xff] %v12671_v47  ;;  %v12687_v38 = vld [vmem:[%s9381_s18 + $0xc8] sm:$0xff]  ;;  %vm4111_vm5 = vcmp.eq.s32.totalorder %v9645_v61, %v12682_v19 }
 0x458   : > { %7961 = vmatmul.msk.f32.gmra.mxu0 %vm3379_vm2, %v14940_v2  ;;  %8013 = vmatmul.msk.f32.gmra.mxu2 %vm1310_vm10, %v3671_v31  ;;  %15204 = vst [vmem:[#allocation130_spill] sm:$0xff] %v12687_v38 }
 0x459   : > { %5934 = vmatpush.msrb.mxu2 %v12671_v47  ;;  %v12690_v47 = vpop.f32.mrf.mxu1 }
 0x45a   : > { %8110 = vmatmul.msk.f32.gmra.mxu3 %vm4109_vm1, %v14940_v2  ;;  %vm3393_vm1 = vcmp.eq.s32.totalorder %v9645_v61, %v12459_v37 }
 0x45b   : > { %8007 = vmatmul.msk.f32.gmra.mxu1 %vm3408_vm3, %v14940_v2  ;;  %5935 = vmatpush.msrb.mxu2 %v12679_v16  ;;  %v12698_v16 = vld [vmem:[%s9381_s18 + $0xc0] sm:$0xff]  ;;  %vm3395_vm3 = vcmp.eq.s32.totalorder %v9645_v61, %v12468_v9 }
 0x45c   : > { %15205 = vst [vmem:[#allocation131_spill] sm:$0xff] %v12698_v16 }
 0x45d   : > { %v12684_v31 = vpop.f32.mrf.mxu3  ;;  %v3560_v41 = vpop.f32.mrf.mxu0  ;;  %5936 = vmatpush.msrb.mxu2 %v12687_v38  ;;  %v12717_v38 = vld [vmem:[%s9381_s18 + $0xa8] sm:$0xff] }
 0x45e   : > { %15203 = vst [vmem:[#allocation129_spill] sm:$0xff] %v12684_v31  ;;  %v3674_v40 = vadd.f32 %v12464_v62, %v3560_v41  ;;  %v12704_v31 = vld [vmem:[%s9381_s18 + $0xb8] sm:$0xff]  ;;  %v12712_v62 = vpop.permute.xlu1 %4022  ;;  %v12742_v35 = vpop.permute.xlu2 %4025 }
 0x45f   : > { %5937 = vmatpush.msrb.mxu2 %v12698_v16  ;;  %15206 = vst [vmem:[#allocation132_spill] sm:$0xff] %v12704_v31  ;;  %vm4113_vm6 = vcmp.eq.s32.totalorder %v9645_v61, %v12712_v62  ;;  %vm4115_vm8 = vcmp.eq.s32.totalorder %v9645_v61, %v12742_v35 }
 0x460   : > { %7962 = vmatmul.msk.f32.gmra.mxu0 %vm3381_vm4, %v14940_v2  ;;  %8014 = vmatmul.msk.f32.gmra.mxu2 %vm1310_vm10, %v3674_v40  ;;  %15209 = vst [vmem:[#allocation135_spill] sm:$0xff] %v12717_v38 }
 0x461   : > { %5938 = vmatpush.msrb.mxu2 %v12704_v31  ;;  %v12729_v31 = vpop.f32.mrf.mxu1 }
 0x462   : > { %8111 = vmatmul.msk.f32.gmra.mxu3 %vm4111_vm5, %v14940_v2  ;;  %vm3397_vm5 = vcmp.eq.s32.totalorder %v9645_v61, %v12494_v50 }
 0x463   : > { %5939 = vmatpush.msrb.mxu2 %v12709_v57  ;;  %v12726_v57 = vld [vmem:[%s9381_s18 + $0xa0] sm:$0xff] }
 0x464   : > { %15210 = vst [vmem:[#allocation136_spill] sm:$0xff] %v12726_v57 }
 0x465   : > { %v12714_v41 = vpop.f32.mrf.mxu3  ;;  %v3563_v16 = vpop.f32.mrf.mxu0  ;;  %5940 = vmatpush.msrb.mxu2 %v12717_v38  ;;  %v9077_v38 = vld [vmem:[%s9381_s18 + $0x88] sm:$0xff] }
 0x466   : > { %15208 = vst [vmem:[#allocation134_spill] sm:$0xff] %v12714_v41  ;;  %v3677_v40 = vadd.f32 %v12485_v46, %v3563_v16  ;;  %v12734_v41 = vld [vmem:[%s9381_s18 + $0x98] sm:$0xff]  ;;  %v12739_v46 = vld [vmem:[%s9381_s18 + $0x90] sm:$0xff]  ;;  %v12783_v12 = vpop.permute.xlu2 %4034 }
 0x467   : > { %5941 = vmatpush.msrb.mxu2 %v12726_v57  ;;  %15211 = vst [vmem:[#allocation137_spill] sm:$0xff] %v12739_v46  ;;  %vm4121_vm0 = vcmp.eq.s32.totalorder %v9645_v61, %v12783_v12 }
 0x468   : > { %7963 = vmatmul.msk.f32.gmra.mxu0 %vm3383_vm7, %v14940_v2  ;;  %8015 = vmatmul.msk.f32.gmra.mxu2 %vm1310_vm10, %v3677_v40  ;;  %v9078_v40 = vld [vmem:[%s9381_s18 + $0x80] sm:$0xff]  ;;  %vm3399_vm7 = vcmp.eq.s32.totalorder %v9645_v61, %v12533_v29  ;;  %v8173_v29 = vld [vmem:[%s14850_s2 + $0xa8] sm:$0xff] }
 0x469   : > { %5942 = vmatpush.msrb.mxu2 %v12734_v41 }
 0x46a   : > { %8112 = vmatmul.msk.f32.gmra.mxu3 %vm4113_vm6, %v14940_v2 }
 0x46b   : > { %5943 = vmatpush.msrb.mxu2 %v12739_v46 }
 0x46d   : > { %v12744_v16 = vpop.f32.mrf.mxu3  ;;  %v3566_v57 = vpop.f32.mrf.mxu0  ;;  %5944 = vmatpush.msrb.mxu2 %v9077_v38 }
 0x46e   : > { %15212 = vst [vmem:[#allocation138_spill] sm:$0xff] %v12744_v16  ;;  %v3680_v58 = vadd.f32 %v12525_v27, %v3566_v57  ;;  %v8174_v16 = vld [vmem:[%s14850_s2 + $0xb0] sm:$0xff]  ;;  %v3697_v38 = vpop.f32.mrf.mxu1  ;;  %v12759_v27 = vpop.permute.xlu0 %4028 }
 0x46f   : > { %5945 = vmatpush.msrb.mxu2 %v9078_v40  ;;  %4637 = vmatpush.msra.mxu1 %v8174_v16  ;;  %vm4117_vm12 = vcmp.eq.s32.totalorder %v9645_v61, %v12759_v27  ;;  %v12771_v16 = vpop.permute.xlu1 %4031 }
 0x470   : > { %7964 = vmatmul.msk.f32.gmra.mxu0 %vm3385_vm9, %v14940_v2  ;;  %8016 = vmatmul.msk.f32.gmra.mxu2 %vm1310_vm10, %v3680_v58  ;;  %vm4119_vm13 = vcmp.eq.s32.totalorder %v9645_v61, %v12771_v16  ;;  %vm3401_vm9 = vcmp.eq.s32.totalorder %v9645_v61, %v12549_v17 }
 0x471   : > { %4638 = vmatpush.msra.mxu1 %v8173_v29  ;;  %v14931_v29 = vmov 6  }
 0x472   : > { %8113 = vmatmul.msk.f32.gmra.mxu3 %vm4115_vm8, %v14940_v2  ;;  %8885 = vset.pattern.permute.xlu0 %v14931_v29 }
 0x473   : > { %8886 = vset.pattern.permute.xlu1 %v14931_v29  ;;  %4773 = vperm.xlu0 %8885, %v12123_v20  }
 0x474   : > { %4776 = vperm.xlu1 %8886, %v12129_v54   ;;  %8884 = vset.pattern.permute.xlu2 %v14931_v29 }
 0x475   : > { %v12761_v57 = vpop.f32.mrf.mxu3  ;;  %v3569_v46 = vpop.f32.mrf.mxu0  ;;  %4770 = vperm.xlu2 %8884, %v12139_v63  }
 0x476   : > { %15213 = vst [vmem:[#allocation139_spill] sm:$0xff] %v12761_v57  ;;  %v3683_v25 = vadd.f32 %v12566_v26, %v3569_v46  ;;  %v3700_v58 = vpop.f32.mrf.mxu1  ;;  %v12795_v44 = vpop.permute.xlu0 %4037 }
 0x477   : > { %vm4123_vm2 = vcmp.eq.s32.totalorder %v9645_v61, %v12795_v44 }
 0x478   : > { %7965 = vmatmul.msk.f32.gmra.mxu0 %vm3387_vm11, %v14940_v2  ;;  %8017 = vmatmul.msk.f32.gmra.mxu2 %vm1310_vm10, %v3683_v25 }
 0x47a   : > { %8114 = vmatmul.msk.f32.gmra.mxu3 %vm4117_vm12, %v14940_v2  ;;  %vm3403_vm12 = vcmp.eq.s32.totalorder %v9645_v61, %v12547_v11 }
 0x47b   : > { %4788 = vperm.xlu0 %8885, %v12160_v10   ;;  %v15221_v10 = vld [vmem:[#allocation24_spill] sm:$0xff] }
 0x47c   : > { %4782 = vperm.xlu1 %8886, %v12154_v36   ;;  %v15220_v36 = vld [vmem:[#allocation45_spill] sm:$0xff] }
 0x47d   : > { %v12773_v40 = vpop.f32.mrf.mxu3  ;;  %v3572_v57 = vpop.f32.mrf.mxu0  ;;  %4779 = vperm.xlu2 %8884, %v12168_v0  }
 0x47e   : > { %15214 = vst [vmem:[#allocation140_spill] sm:$0xff] %v12773_v40  ;;  %v3686_v26 = vadd.f32 %v12606_v48, %v3572_v57  ;;  %v3703_v40 = vpop.f32.mrf.mxu1 }
 0x480   : > { %7966 = vmatmul.msk.f32.gmra.mxu0 %vm3389_vm14, %v14940_v2  ;;  %8018 = vmatmul.msk.f32.gmra.mxu2 %vm1310_vm10, %v3686_v26  ;;  %vm3405_vm14 = vcmp.eq.s32.totalorder %v9645_v61, %v12581_v53 }
 0x482   : > { %8115 = vmatmul.msk.f32.gmra.mxu3 %vm4119_vm13, %v14940_v2 }
 0x483   : > { %4797 = vperm.xlu0 %8885, %v12195_v18  }
 0x484   : > { %4791 = vperm.xlu1 %8886, %v12189_v5  }
 0x485   : > { %v12785_v46 = vpop.f32.mrf.mxu3  ;;  %v3575_v25 = vpop.f32.mrf.mxu0  ;;  %4785 = vperm.xlu2 %8884, %v12201_v49  }
 0x486   : > { %15215 = vst [vmem:[#allocation141_spill] sm:$0xff] %v12785_v46  ;;  %v3689_v48 = vadd.f32 %v12649_v60, %v3575_v25  ;;  %v3706_v33 = vpop.f32.mrf.mxu1  ;;  %v12807_v60 = vpop.permute.xlu1 %4040 }
 0x487   : > { %vm4125_vm4 = vcmp.eq.s32.totalorder %v9645_v61, %v12807_v60 }
 0x488   : > { %7967 = vmatmul.msk.f32.gmra.mxu0 %vm3391_vm15, %v14940_v2  ;;  %8019 = vmatmul.msk.f32.gmra.mxu2 %vm1310_vm10, %v3689_v48 }
 0x48a   : > { %8116 = vmatmul.msk.f32.gmra.mxu3 %vm4121_vm0, %v14940_v2  ;;  %vm3407_vm0 = vcmp.eq.s32.totalorder %v9645_v61, %v12616_v24 }
 0x48b   : > { %4806 = vperm.xlu0 %8885, %v12229_v32  }
 0x48c   : > { %4800 = vperm.xlu1 %8886, %v12223_v55  }
 0x48d   : > { %v12797_v57 = vpop.f32.mrf.mxu3  ;;  %v3578_v26 = vpop.f32.mrf.mxu0  ;;  %4794 = vperm.xlu2 %8884, %v12235_v4  }
 0x48e   : > { %15216 = vst [vmem:[#allocation142_spill] sm:$0xff] %v12797_v57  ;;  %v3692_v46 = vadd.f32 %v12690_v47, %v3578_v26  ;;  %v3709_v37 = vpop.f32.mrf.mxu1 }
 0x490   : > { %7968 = vmatmul.msk.f32.gmra.mxu0 %vm3393_vm1, %v14940_v2  ;;  %8020 = vmatmul.msk.f32.gmra.mxu2 %vm1310_vm10, %v3692_v46 }
 0x492   : > { %8117 = vmatmul.msk.f32.gmra.mxu3 %vm4123_vm2, %v14940_v2  ;;  %vm4106_vm2 = vcmp.eq.s32.totalorder %v9729_v22, %v12583_v28 }
 0x493   : > { %4815 = vperm.xlu0 %8885, %v12264_v42  }
 0x494   : > { %4809 = vperm.xlu1 %8886, %v12258_v39  }
 0x495   : > { %v12809_v25 = vpop.f32.mrf.mxu3  ;;  %v3581_v48 = vpop.f32.mrf.mxu0  ;;  %4803 = vperm.xlu2 %8884, %v12271_v23  }
 0x496   : > { %15217 = vst [vmem:[#allocation143_spill] sm:$0xff] %v12809_v25  ;;  %v3695_v47 = vadd.f32 %v12729_v31, %v3581_v48  ;;  %v12821_v25 = vpop.permute.xlu2 %4043  ;;  %v3712_v9 = vpop.f32.mrf.mxu1 }
 0x497   : > { %vm4127_vm6 = vcmp.eq.s32.totalorder %v9645_v61, %v12821_v25 }
 0x498   : > { %7969 = vmatmul.msk.f32.gmra.mxu0 %vm3395_vm3, %v14940_v2  ;;  %8021 = vmatmul.msk.f32.gmra.mxu2 %vm1310_vm10, %v3695_v47  ;;  %v12832_v47 = vpop.permute.xlu0 %4046 }
 0x499   : > { %vm4129_vm8 = vcmp.eq.s32.totalorder %v9645_v61, %v12832_v47 }
 0x49a   : > { %8118 = vmatmul.msk.f32.gmra.mxu3 %vm4125_vm4, %v14940_v2  ;;  %vm4108_vm4 = vcmp.eq.s32.totalorder %v9729_v22, %v12618_v51 }
 0x49b   : > { %4821 = vperm.xlu0 %8885, %v12331_v1  }
 0x49c   : > { %4818 = vperm.xlu1 %8886, %v12290_v21  }
 0x49d   : > { %v12819_v46 = vpop.f32.mrf.mxu3  ;;  %v3584_v26 = vpop.f32.mrf.mxu0  ;;  %4812 = vperm.xlu2 %8884, %v12302_v34  }
 0x49e   : > { %15218 = vst [vmem:[#allocation144_spill] sm:$0xff] %v12819_v46  ;;  %v3698_v57 = vadd.f32 %v3697_v38, %v3584_v26  ;;  %v12843_v26 = vpop.permute.xlu1 %4049 }
 0x49f   : > { %vm4131_vm11 = vcmp.eq.s32.totalorder %v9645_v61, %v12843_v26 }
 0x4a0   : > { %7970 = vmatmul.msk.f32.gmra.mxu0 %vm3397_vm5, %v14940_v2  ;;  %8022 = vmatmul.msk.f32.gmra.mxu2 %vm1310_vm10, %v3698_v57  ;;  %v3715_v57 = vpop.f32.mrf.mxu1 }
 0x4a2   : > { %8119 = vmatmul.msk.f32.gmra.mxu3 %vm4127_vm6, %v14940_v2  ;;  %vm4110_vm6 = vcmp.eq.s32.totalorder %v9729_v22, %v12651_v45 }
 0x4a5   : > { %v12830_v31 = vpop.f32.mrf.mxu3  ;;  %v3587_v48 = vpop.f32.mrf.mxu0 }
 0x4a6   : > { %15219 = vst [vmem:[#allocation145_spill] sm:$0xff] %v12830_v31  ;;  %v3701_v46 = vadd.f32 %v3700_v58, %v3587_v48 }
 0x4a8   : > { %7971 = vmatmul.msk.f32.gmra.mxu0 %vm3399_vm7, %v14940_v2  ;;  %8023 = vmatmul.msk.f32.gmra.mxu2 %vm1310_vm10, %v3701_v46  ;;  %v12857_v46 = vpop.permute.xlu2 %4052 }
 0x4a9   : > { %vm4133_vm13 = vcmp.eq.s32.totalorder %v9645_v61, %v12857_v46 }
 0x4aa   : > { %8120 = vmatmul.msk.f32.gmra.mxu3 %vm4129_vm8, %v14940_v2  ;;  %vm4112_vm8 = vcmp.eq.s32.totalorder %v9729_v22, %v12682_v19 }
 0x4ad   : > { %v12841_v50 = vpop.f32.mrf.mxu3  ;;  %v3590_v38 = vpop.f32.mrf.mxu0 }
 0x4ae   : > { %v3704_v31 = vadd.f32 %v3703_v40, %v3590_v38 }
 0x4b0   : > { %7972 = vmatmul.msk.f32.gmra.mxu0 %vm3401_vm9, %v14940_v2  ;;  %8024 = vmatmul.msk.f32.gmra.mxu2 %vm1310_vm10, %v3704_v31  ;;  %v3718_v31 = vpop.f32.mrf.mxu1  ;;  %v12906_v0 = vpop.permute.xlu2 %4061 }
 0x4b1   : > { %vm4139_vm3 = vcmp.eq.s32.totalorder %v9645_v61, %v12906_v0 }
 0x4b2   : > { %8121 = vmatmul.msk.f32.gmra.mxu3 %vm4131_vm11, %v14940_v2  ;;  %vm4114_vm11 = vcmp.eq.s32.totalorder %v9729_v22, %v12712_v62 }
 0x4b5   : > { %v12855_v58 = vpop.f32.mrf.mxu3  ;;  %v3593_v40 = vpop.f32.mrf.mxu0 }
 0x4b6   : > { %v3707_v17 = vadd.f32 %v3706_v33, %v3593_v40  ;;  %v12870_v33 = vpop.permute.xlu0 %4055 }
 0x4b7   : > { %vm4135_vm15 = vcmp.eq.s32.totalorder %v9645_v61, %v12870_v33 }
 0x4b8   : > { %7973 = vmatmul.msk.f32.gmra.mxu0 %vm3403_vm12, %v14940_v2  ;;  %8025 = vmatmul.msk.f32.gmra.mxu2 %vm1310_vm10, %v3707_v17  ;;  %v3721_v40 = vpop.f32.mrf.mxu1  ;;  %v12966_v23 = vpop.permute.xlu2 %4070 }
 0x4b9   : > { %vm4145_vm9 = vcmp.eq.s32.totalorder %v9645_v61, %v12966_v23 }
 0x4ba   : > { %8122 = vmatmul.msk.f32.gmra.mxu3 %vm4133_vm13, %v14940_v2  ;;  %vm4116_vm13 = vcmp.eq.s32.totalorder %v9729_v22, %v12742_v35 }
 0x4bd   : > { %v12866_v48 = vpop.f32.mrf.mxu3  ;;  %v3596_v38 = vpop.f32.mrf.mxu0 }
 0x4be   : > { %v3710_v11 = vadd.f32 %v3709_v37, %v3596_v38  ;;  %v12885_v37 = vpop.permute.xlu1 %4058  ;;  %v1634_v38 = vadd.f32 %v15221_v10, %v15220_v36  ;;  %v12926_v49 = vpop.permute.xlu0 %4064 }
 0x4bf   : > { %vm4137_vm1 = vcmp.eq.s32.totalorder %v9645_v61, %v12885_v37  ;;  %vm4141_vm5 = vcmp.eq.s32.totalorder %v9645_v61, %v12926_v49 }
 0x4c0   : > { %7974 = vmatmul.msk.f32.gmra.mxu0 %vm3405_vm14, %v14940_v2  ;;  %8026 = vmatmul.msk.f32.gmra.mxu2 %vm1310_vm10, %v3710_v11  ;;  %v3724_v63 = vpop.f32.mrf.mxu1  ;;  %v2457_v24 = vadd.f32 %v11898_v15, %v1634_v38  ;;  %v15224_v38 = vld [vmem:[#allocation51_spill] sm:$0xff] }
 0x4c2   : > { %8123 = vmatmul.msk.f32.gmra.mxu3 %vm4135_vm15, %v14940_v2  ;;  %v3217_v5 = vadd.f32 %v12184_v52, %v2457_v24  ;;  %vm4118_vm15 = vcmp.eq.s32.totalorder %v9729_v22, %v12759_v27 }
 0x4c5   : > { %v12883_v20 = vpop.f32.mrf.mxu3  ;;  %v3599_v54 = vpop.f32.mrf.mxu0 }
 0x4c6   : > { %v3713_v53 = vadd.f32 %v3712_v9, %v3599_v54  ;;  %v15222_v54 = vld [vmem:[#allocation48_spill] sm:$0xff] }
 0x4c8   : > { %7975 = vmatmul.msk.f32.gmra.mxu0 %vm3407_vm0, %v14940_v2  ;;  %8027 = vmatmul.msk.f32.gmra.mxu2 %vm1310_vm10, %v3713_v53  ;;  %v15223_v53 = vld [vmem:[#allocation27_spill] sm:$0xff]  ;;  %v3727_v36 = vpop.f32.mrf.mxu1 }
 0x4ca   : > { %8124 = vmatmul.msk.f32.gmra.mxu3 %vm4137_vm1, %v14940_v2  ;;  %vm4120_vm1 = vcmp.eq.s32.totalorder %v9729_v22, %v12771_v16 }
 0x4cd   : > { %v3602_v9 = vpop.f32.mrf.mxu0  ;;  %v12897_v17 = vpop.f32.mrf.mxu3 }
 0x4ce   : > { %v3716_v11 = vadd.f32 %v3715_v57, %v3602_v9  ;;  %v1637_v9 = vadd.f32 %v15223_v53, %v15222_v54  ;;  %v15228_v54 = vld [vmem:[#allocation33_spill] sm:$0xff] }
 0x4d0   : > { %8028 = vmatmul.msk.f32.gmra.mxu2 %vm1310_vm10, %v3716_v11  ;;  %8140 = vmatmul.msk.f32.vlgmr.msra.gmra.mxu0 %vm4106_vm2, %v14940_v2  ;;  %v2458_v52 = vadd.f32 %v11920_v30, %v1637_v9  ;;  %v15225_v11 = vld [vmem:[#allocation30_spill] sm:$0xff]  ;;  %v3730_v4 = vpop.f32.mrf.mxu1 }
 0x4d1   : > { %v1640_v24 = vadd.f32 %v15225_v11, %v15224_v38  ;;  %v12984_v38 = vpop.permute.xlu0 %4073 }
 0x4d2   : > { %8125 = vmatmul.msk.f32.gmra.mxu3 %vm4139_vm3, %v14940_v2  ;;  %v3218_v55 = vadd.f32 %v12216_v56, %v2458_v52  ;;  %v15230_v52 = vld [vmem:[#allocation9_spill] sm:$0xff]  ;;  %vm4147_vm12 = vcmp.eq.s32.totalorder %v9645_v61, %v12984_v38  ;;  %vm4122_vm3 = vcmp.eq.s32.totalorder %v9729_v22, %v12783_v12 }
 0x4d3   : > { %v3881_v18 = vpop.f32.mrf.mxu2  ;;  %v2459_v56 = vadd.f32 %v11941_v8, %v1640_v24 }
 0x4d4   : > { %v12915_v57 = vadd.f32 %v3881_v18, %v3217_v5  ;;  %v12946_v18 = vpop.permute.xlu1 %4067 }
 0x4d5   : > { %v3605_v28 = vpop.f32.mrf.mxu0  ;;  %v12917_v15 = vpop.f32.mrf.mxu3  ;;  %vm4143_vm7 = vcmp.eq.s32.totalorder %v9645_v61, %v12946_v18  ;;  %v3219_v39 = vadd.f32 %v12253_v14, %v2459_v56  ;;  %v15233_v56 = vld [vmem:[#allocation11_spill] sm:$0xff] }
 0x4d6   : > { %v3719_v10 = vadd.f32 %v3718_v31, %v3605_v28  ;;  %v15227_v28 = vld [vmem:[#allocation54_spill] sm:$0xff] }
 0x4d7   : > { %v1643_v53 = vadd.f32 %v15228_v54, %v15227_v28  ;;  %v15235_v28 = vld [vmem:[#allocation103_spill] sm:$0xff] }
 0x4d8   : > { %8029 = vmatmul.msk.f32.gmra.mxu2 %vm1310_vm10, %v3719_v10  ;;  %8141 = vmatmul.msk.f32.gmra.mxu0 %vm4108_vm4, %v14940_v2 }
 0x4d9   : > { %v2460_v14 = vadd.f32 %v11962_v6, %v1643_v53  ;;  %v15238_v53 = vld [vmem:[#allocation47_spill] sm:$0xff] }
 0x4da   : > { %8126 = vmatmul.msk.f32.gmra.mxu3 %vm4141_vm5, %v14940_v2  ;;  %vm4124_vm5 = vcmp.eq.s32.totalorder %v9729_v22, %v12795_v44 }
 0x4db   : > { %v3884_v32 = vpop.f32.mrf.mxu2  ;;  %v3220_v21 = vadd.f32 %v12283_v3, %v2460_v14  ;;  %v8172_v3 = vld [vmem:[%s14850_s2 + $0xa0] sm:$0xff] }
 0x4dc   : > { %v12935_v31 = vadd.f32 %v3884_v32, %v3218_v55  ;;  %v15231_v55 = vld [vmem:[#allocation35_spill] sm:$0xff]  ;;  %4639 = vmatpush.msra.mxu1 %v8172_v3  ;;  %v13007_v54 = vpop.permute.xlu1 %4076  ;;  %v15239_v14 = vld [vmem:[#allocation105_spill] sm:$0xff] }
 0x4dd   : > { %v3608_v51 = vpop.f32.mrf.mxu0  ;;  %v12937_v30 = vpop.f32.mrf.mxu3  ;;  %v1646_v32 = vadd.f32 %v15231_v55, %v15230_v52  ;;  %vm4149_vm14 = vcmp.eq.s32.totalorder %v9645_v61, %v13007_v54  ;;  %v15242_v52 = vld [vmem:[#allocation57_spill] sm:$0xff] }
 0x4de   : > { %v3722_v5 = vadd.f32 %v3721_v40, %v3608_v51  ;;  %5817 = vmatpush.msrb.mxu1 %v12506_v7  ;;  %v15243_v55 = vld [vmem:[#allocation37_spill] sm:$0xff] }
 0x4df   : > { %v2461_v34 = vadd.f32 %v11981_v59, %v1646_v32  ;;  %v1652_v32 = vadd.f32 %v15243_v55, %v15242_v52  ;;  %v15244_v3 = vld [vmem:[#allocation109_spill] sm:$0xff]  ;;  %v13049_v55 = vpop.permute.xlu0 %4082 }
 0x4e0   : > { %8030 = vmatmul.msk.f32.gmra.mxu2 %vm1310_vm10, %v3722_v5  ;;  %8142 = vmatmul.msk.f32.gmra.mxu0 %vm4110_vm6, %v14940_v2  ;;  %vm4153_vm2 = vcmp.eq.s32.totalorder %v9645_v61, %v13049_v55 }
 0x4e1   : > { %5818 = vmatpush.msrb.mxu1 %v12512_v13  ;;  %v15237_v13 = vld [vmem:[#allocation104_spill] sm:$0xff] }
 0x4e2   : > { %8127 = vmatmul.msk.f32.gmra.mxu3 %vm4143_vm7, %v14940_v2  ;;  %vm4126_vm7 = vcmp.eq.s32.totalorder %v9729_v22, %v12807_v60 }
 0x4e3   : > { %v3887_v42 = vpop.f32.mrf.mxu2  ;;  %5819 = vmatpush.msrb.mxu1 %v15235_v28 }
 0x4e4   : > { %v12955_v45 = vadd.f32 %v3887_v42, %v3219_v39  ;;  %v15234_v39 = vld [vmem:[#allocation36_spill] sm:$0xff] }
 0x4e5   : > { %v3611_v8 = vpop.f32.mrf.mxu0  ;;  %v12957_v40 = vpop.f32.mrf.mxu3  ;;  %v1649_v42 = vadd.f32 %v15234_v39, %v15233_v56  ;;  %5820 = vmatpush.msrb.mxu1 %v15237_v13  ;;  %v15246_v56 = vld [vmem:[#allocation110_spill] sm:$0xff]  ;;  %v15247_v39 = vld [vmem:[#allocation97_spill] sm:$0xff] }
 0x4e6   : > { %15226 = vst [vmem:[#allocation45_spill] sm:$0xff] %v12955_v45  ;;  %v3725_v9 = vadd.f32 %v3724_v63, %v3611_v8  ;;  %v3733_v63 = vpop.f32.mrf.mxu1  ;;  %v15251_v13 = vld [vmem:[#allocation61_spill] sm:$0xff] }
 0x4e7   : > { %5821 = vmatpush.msrb.mxu1 %v15239_v14  ;;  %v15253_v14 = vld [vmem:[#allocation115_spill] sm:$0xff] }
 0x4e8   : > { %8031 = vmatmul.msk.f32.gmra.mxu2 %vm1310_vm10, %v3725_v9  ;;  %8143 = vmatmul.msk.f32.gmra.mxu0 %vm4112_vm8, %v14940_v2 }
 0x4ea   : > { %8128 = vmatmul.msk.f32.gmra.mxu3 %vm4145_vm9, %v14940_v2  ;;  %vm4128_vm9 = vcmp.eq.s32.totalorder %v9729_v22, %v12821_v25 }
 0x4eb   : > { %v3890_v1 = vpop.f32.mrf.mxu2 }
 0x4ec   : > { %v12975_v19 = vadd.f32 %v3890_v1, %v3220_v21 }
 0x4ed   : > { %v3614_v6 = vpop.f32.mrf.mxu0  ;;  %v12977_v10 = vpop.f32.mrf.mxu3 }
 0x4ee   : > { %15229 = vst [vmem:[#allocation24_spill] sm:$0xff] %v12975_v19  ;;  %v3728_v51 = vadd.f32 %v3727_v36, %v3614_v6  ;;  %v3221_v36 = vadd.f32 %v12317_v43, %v2461_v34  ;;  %v3736_v62 = vpop.f32.mrf.mxu1  ;;  %v15236_v43 = vld [vmem:[#allocation62_spill] sm:$0xff] }
 0x4ef   : > { %v2462_v7 = vadd.f32 %v15236_v43, %v1649_v42  ;;  %v15241_v6 = vld [vmem:[#allocation106_spill] sm:$0xff]  ;;  %v15248_v42 = vld [vmem:[#allocation111_spill] sm:$0xff] }
 0x4f0   : > { %8032 = vmatmul.msk.f32.gmra.mxu2 %vm1310_vm10, %v3728_v51  ;;  %8144 = vmatmul.msk.f32.gmra.mxu0 %vm4114_vm11, %v14940_v2 }
 0x4f1   : > { %5822 = vmatpush.msrb.mxu1 %v15241_v6 }
 0x4f2   : > { %8129 = vmatmul.msk.f32.gmra.mxu3 %vm4147_vm12, %v14940_v2  ;;  %vm4130_vm12 = vcmp.eq.s32.totalorder %v9729_v22, %v12832_v47 }
 0x4f3   : > { %v3893_v59 = vpop.f32.mrf.mxu2  ;;  %5823 = vmatpush.msrb.mxu1 %v15244_v3  ;;  %v15257_v3 = vld [vmem:[#allocation117_spill] sm:$0xff] }
 0x4f4   : > { %v12996_v11 = vadd.f32 %v3893_v59, %v3221_v36  ;;  %v15245_v36 = vld [vmem:[#allocation17_spill] sm:$0xff] }
 0x4f5   : > { %v3617_v24 = vpop.f32.mrf.mxu0  ;;  %v12999_v5 = vpop.f32.mrf.mxu3  ;;  %v2463_v59 = vadd.f32 %v15245_v36, %v1652_v32  ;;  %5824 = vmatpush.msrb.mxu1 %v15246_v56  ;;  %v15255_v32 = vld [vmem:[#allocation116_spill] sm:$0xff] }
 0x4f6   : > { %15232 = vst [vmem:[#allocation48_spill] sm:$0xff] %v12996_v11  ;;  %v3731_v8 = vadd.f32 %v3730_v4, %v3617_v24  ;;  %v3222_v4 = vadd.f32 %v15238_v53, %v2462_v7  ;;  %v3739_v51 = vpop.f32.mrf.mxu1  ;;  %v13028_v24 = vpop.permute.xlu2 %4079  ;;  %v15250_v7 = vld [vmem:[#allocation112_spill] sm:$0xff]  ;;  %v15252_v53 = vld [vmem:[#allocation38_spill] sm:$0xff] }
 0x4f7   : > { %vm4151_vm0 = vcmp.eq.s32.totalorder %v9645_v61, %v13028_v24  ;;  %5825 = vmatpush.msrb.mxu1 %v15248_v42 }
 0x4f8   : > { %8033 = vmatmul.msk.f32.gmra.mxu2 %vm1310_vm10, %v3731_v8  ;;  %8145 = vmatmul.msk.f32.gmra.mxu0 %vm4116_vm13, %v14940_v2 }
 0x4f9   : > { %5826 = vmatpush.msrb.mxu1 %v15250_v7  ;;  %v15262_v7 = vld [vmem:[#allocation120_spill] sm:$0xff] }
 0x4fa   : > { %8130 = vmatmul.msk.f32.gmra.mxu3 %vm4149_vm14, %v14940_v2  ;;  %vm4132_vm14 = vcmp.eq.s32.totalorder %v9729_v22, %v12843_v26  ;;  %v15292_v26 = vld [vmem:[#allocation34_spill] sm:$0xff] }
 0x4fb   : > { %v3896_v9 = vpop.f32.mrf.mxu2  ;;  %5827 = vmatpush.msrb.mxu1 %v15253_v14  ;;  %v15265_v14 = vld [vmem:[#allocation80_spill] sm:$0xff] }
 0x4fc   : > { %v13017_v35 = vadd.f32 %v3896_v9, %v3222_v4  ;;  %v1655_v4 = vadd.f32 %v15252_v53, %v15251_v13  ;;  %v15263_v13 = vld [vmem:[#allocation65_spill] sm:$0xff] }
 0x4fd   : > { %v3620_v21 = vpop.f32.mrf.mxu0  ;;  %v13019_v1 = vpop.f32.mrf.mxu3  ;;  %5828 = vmatpush.msrb.mxu1 %v15255_v32 }
 0x4fe   : > { %15240 = vst [vmem:[#allocation27_spill] sm:$0xff] %v13017_v35  ;;  %v3734_v34 = vadd.f32 %v3733_v63, %v3620_v21  ;;  %v3223_v63 = vadd.f32 %v15247_v39, %v2463_v59  ;;  %v15254_v21 = vld [vmem:[#allocation21_spill] sm:$0xff]  ;;  %v3742_v52 = vpop.f32.mrf.mxu1  ;;  %v15259_v39 = vld [vmem:[#allocation118_spill] sm:$0xff]  ;;  %v15353_v35 = vld [vmem:[#allocation71_spill] sm:$0xff] }
 0x4ff   : > { %v2464_v6 = vadd.f32 %v15254_v21, %v1655_v4  ;;  %5829 = vmatpush.msrb.mxu1 %v15257_v3  ;;  %v13070_v4 = vpop.permute.xlu1 %4085 }
 0x500   : > { %8034 = vmatmul.msk.f32.gmra.mxu2 %vm1310_vm10, %v3734_v34  ;;  %8146 = vmatmul.msk.f32.gmra.mxu0 %vm4118_vm15, %v14940_v2  ;;  %vm4155_vm4 = vcmp.eq.s32.totalorder %v9645_v61, %v13070_v4 }
 0x501   : > { %5830 = vmatpush.msrb.mxu1 %v15259_v39  ;;  %v15269_v39 = vld [vmem:[#allocation53_spill] sm:$0xff] }
 0x502   : > { %8131 = vmatmul.msk.f32.gmra.mxu3 %vm4151_vm0, %v14940_v2  ;;  %vm4134_vm0 = vcmp.eq.s32.totalorder %v9729_v22, %v12857_v46 }
 0x503   : > { %v3899_v27 = vpop.f32.mrf.mxu2  ;;  %5831 = vmatpush.msrb.mxu1 %v15262_v7 }
 0x504   : > { %v13038_v8 = vadd.f32 %v3899_v27, %v3223_v63  ;;  %v15260_v63 = vld [vmem:[#allocation66_spill] sm:$0xff]  ;;  %v15261_v27 = vld [vmem:[#allocation39_spill] sm:$0xff] }
 0x505   : > { %v3623_v28 = vpop.f32.mrf.mxu0  ;;  %v13040_v43 = vpop.f32.mrf.mxu3  ;;  %v1658_v42 = vadd.f32 %v15261_v27, %v15260_v63 }
 0x506   : > { %15249 = vst [vmem:[#allocation51_spill] sm:$0xff] %v13038_v8  ;;  %v3737_v9 = vadd.f32 %v3736_v62, %v3623_v28  ;;  %v15256_v62 = vld [vmem:[#allocation78_spill] sm:$0xff]  ;;  %v3745_v21 = vpop.f32.mrf.mxu1  ;;  %v13088_v27 = vpop.permute.xlu2 %4088 }
 0x507   : > { %v3224_v34 = vadd.f32 %v15256_v62, %v2464_v6  ;;  %v2465_v53 = vadd.f32 %v15263_v13, %v1658_v42  ;;  %vm4157_vm6 = vcmp.eq.s32.totalorder %v9645_v61, %v13088_v27  ;;  %v15270_v42 = vld [vmem:[#allocation82_spill] sm:$0xff] }
 0x508   : > { %8035 = vmatmul.msk.f32.gmra.mxu2 %vm1310_vm10, %v3737_v9  ;;  %8147 = vmatmul.msk.f32.gmra.mxu0 %vm4120_vm1, %v14940_v2  ;;  %v15264_v9 = vld [vmem:[#allocation121_spill] sm:$0xff] }
 0x509   : > { %5832 = vmatpush.msrb.mxu1 %v15264_v9  ;;  %v15272_v9 = vld [vmem:[#allocation72_spill] sm:$0xff] }
 0x50a   : > { %8132 = vmatmul.msk.f32.gmra.mxu3 %vm4153_vm2, %v14940_v2  ;;  %vm4136_vm2 = vcmp.eq.s32.totalorder %v9729_v22, %v12870_v33  ;;  %v9079_v33 = vld [vmem:[%s14849_s1 + $0x8] sm:$0xff] }
 0x50b   : > { %v3902_v16 = vpop.f32.mrf.mxu2 }
 0x50c   : > { %v13059_v36 = vadd.f32 %v3902_v16, %v3224_v34  ;;  %v15267_v34 = vld [vmem:[#allocation69_spill] sm:$0xff]  ;;  %v15268_v16 = vld [vmem:[#allocation40_spill] sm:$0xff] }
 0x50d   : > { %v3626_v59 = vpop.f32.mrf.mxu0  ;;  %v13061_v56 = vpop.f32.mrf.mxu3  ;;  %v1661_v3 = vadd.f32 %v15268_v16, %v15267_v34 }
 0x50e   : > { %15258 = vst [vmem:[#allocation30_spill] sm:$0xff] %v13059_v36  ;;  %v3740_v28 = vadd.f32 %v3739_v51, %v3626_v59  ;;  %v3225_v51 = vadd.f32 %v15265_v14, %v2465_v53  ;;  %v15273_v14 = vld [vmem:[#allocation41_spill] sm:$0xff]  ;;  %v13105_v16 = vpop.permute.xlu0 %4091 }
 0x50f   : > { %v2466_v63 = vadd.f32 %v15269_v39, %v1661_v3  ;;  %vm4159_vm8 = vcmp.eq.s32.totalorder %v9645_v61, %v13105_v16  ;;  %v15275_v3 = vld [vmem:[#allocation84_spill] sm:$0xff] }
 0x510   : > { %8036 = vmatmul.msk.f32.gmra.mxu2 %vm1310_vm10, %v3740_v28  ;;  %8148 = vmatmul.msk.f32.gmra.mxu0 %vm4122_vm3, %v14940_v2 }
 0x511   : > { %v3226_v28 = vadd.f32 %v15270_v42, %v2466_v63  ;;  %v15277_v42 = vld [vmem:[#allocation25_spill] sm:$0xff] }
 0x512   : > { %8133 = vmatmul.msk.f32.gmra.mxu3 %vm4155_vm4, %v14940_v2 }
 0x513   : > { %v3905_v12 = vpop.f32.mrf.mxu2 }
 0x514   : > { %v13079_v6 = vadd.f32 %v3905_v12, %v3225_v51  ;;  %v1664_v51 = vadd.f32 %v15273_v14, %v15272_v9  ;;  %v15279_v14 = vld [vmem:[#allocation19_spill] sm:$0xff] }
 0x515   : > { %v3629_v32 = vpop.f32.mrf.mxu0  ;;  %v13081_v62 = vpop.f32.mrf.mxu3 }
 0x516   : > { %15266 = vst [vmem:[#allocation54_spill] sm:$0xff] %v13079_v6  ;;  %v3743_v59 = vadd.f32 %v3742_v52, %v3629_v32  ;;  %v3748_v52 = vpop.f32.mrf.mxu1  ;;  %v15274_v32 = vld [vmem:[#allocation5_spill] sm:$0xff] }
 0x517   : > { %v2467_v34 = vadd.f32 %v15274_v32, %v1664_v51  ;;  %v15280_v32 = vld [vmem:[#allocation87_spill] sm:$0xff] }
 0x518   : > { %8037 = vmatmul.msk.f32.gmra.mxu2 %vm1310_vm10, %v3743_v59  ;;  %8149 = vmatmul.msk.f32.gmra.mxu0 %vm4124_vm5, %v14940_v2  ;;  %vm4138_vm5 = vcmp.eq.s32.totalorder %v9729_v22, %v12885_v37  ;;  %v15308_v37 = vld [vmem:[#allocation123_spill] sm:$0xff] }
 0x519   : > { %v3227_v59 = vadd.f32 %v15275_v3, %v2467_v34 }
 0x51a   : > { %8134 = vmatmul.msk.f32.gmra.mxu3 %vm4157_vm6, %v14940_v2 }
 0x51b   : > { %v3908_v7 = vpop.f32.mrf.mxu2 }
 0x51c   : > { %v13096_v13 = vadd.f32 %v3908_v7, %v3226_v28  ;;  %v15278_v28 = vld [vmem:[#allocation42_spill] sm:$0xff] }
 0x51d   : > { %v3632_v44 = vpop.f32.mrf.mxu0  ;;  %v13098_v53 = vpop.f32.mrf.mxu3  ;;  %v1667_v7 = vadd.f32 %v15278_v28, %v15277_v42 }
 0x51e   : > { %15271 = vst [vmem:[#allocation33_spill] sm:$0xff] %v13096_v13  ;;  %v3746_v12 = vadd.f32 %v3745_v21, %v3632_v44  ;;  %v3751_v44 = vpop.f32.mrf.mxu1  ;;  %v13136_v28 = vpop.permute.xlu2 %4097  ;;  %v15321_v13 = vld [vmem:[#allocation55_spill] sm:$0xff] }
 0x51f   : > { %v2468_v51 = vadd.f32 %v15279_v14, %v1667_v7  ;;  %vm4163_vm13 = vcmp.eq.s32.totalorder %v9645_v61, %v13136_v28 }
 0x520   : > { %8038 = vmatmul.msk.f32.gmra.mxu2 %vm1310_vm10, %v3746_v12  ;;  %8150 = vmatmul.msk.f32.gmra.mxu0 %vm4126_vm7, %v14940_v2  ;;  %v13122_v12 = vpop.permute.xlu1 %4094 }
 0x521   : > { %vm4161_vm11 = vcmp.eq.s32.totalorder %v9645_v61, %v13122_v12  ;;  %v3228_v34 = vadd.f32 %v15280_v32, %v2468_v51  ;;  %v8339_v32 = vld [vmem:[%s14850_s2 + $0xd8] sm:$0xff] }
 0x522   : > { %8135 = vmatmul.msk.f32.gmra.mxu3 %vm4159_vm8, %v14940_v2  ;;  %5396 = vmatpush.msrb.mxu0 %v8339_v32  ;;  %v15290_v32 = vld [vmem:[#allocation102_spill] sm:$0xff]  ;;  %vm4140_vm8 = vcmp.eq.s32.totalorder %v9729_v22, %v12906_v0 }
 0x523   : > { %v3911_v39 = vpop.f32.mrf.mxu2 }
 0x524   : > { %v13113_v21 = vadd.f32 %v3911_v39, %v3227_v59  ;;  %v15282_v39 = vld [vmem:[#allocation8_spill] sm:$0xff] }
 0x525   : > { %v3635_v63 = vpop.f32.mrf.mxu0  ;;  %v13115_v60 = vpop.f32.mrf.mxu3 }
 0x526   : > { %15276 = vst [vmem:[#allocation9_spill] sm:$0xff] %v13113_v21  ;;  %v3749_v9 = vadd.f32 %v3748_v52, %v3635_v63  ;;  %v15283_v63 = vld [vmem:[#allocation43_spill] sm:$0xff]  ;;  %v3754_v51 = vpop.f32.mrf.mxu1 }
 0x527   : > { %v1670_v42 = vadd.f32 %v15283_v63, %v15282_v39  ;;  %v15287_v63 = vld [vmem:[#allocation10_spill] sm:$0xff] }
 0x528   : > { %8039 = vmatmul.msk.f32.gmra.mxu2 %vm1310_vm10, %v3749_v9  ;;  %8151 = vmatmul.msk.f32.gmra.mxu0 %vm4128_vm9, %v14940_v2  ;;  %v15284_v9 = vld [vmem:[#allocation64_spill] sm:$0xff] }
 0x529   : > { %v2469_v14 = vadd.f32 %v15284_v9, %v1670_v42  ;;  %v15288_v42 = vld [vmem:[#allocation44_spill] sm:$0xff]  ;;  %v13156_v9 = vpop.permute.xlu0 %4100 }
 0x52a   : > { %8136 = vmatmul.msk.f32.gmra.mxu3 %vm4161_vm11, %v14940_v2  ;;  %vm4165_vm15 = vcmp.eq.s32.totalorder %v9645_v61, %v13156_v9 }
 0x52b   : > { %v3914_v3 = vpop.f32.mrf.mxu2 }
 0x52c   : > { %v13130_v52 = vadd.f32 %v3914_v3, %v3228_v34  ;;  %v15285_v34 = vld [vmem:[#allocation100_spill] sm:$0xff] }
 0x52d   : > { %v3638_v59 = vpop.f32.mrf.mxu0  ;;  %v13132_v25 = vpop.f32.mrf.mxu3  ;;  %v3229_v3 = vadd.f32 %v15285_v34, %v2469_v14 }
 0x52e   : > { %15281 = vst [vmem:[#allocation35_spill] sm:$0xff] %v13130_v52  ;;  %v3752_v7 = vadd.f32 %v3751_v44, %v3638_v59  ;;  %v15289_v52 = vld [vmem:[#allocation70_spill] sm:$0xff] }
 0x530   : > { %8040 = vmatmul.msk.f32.gmra.mxu2 %vm1310_vm10, %v3752_v7  ;;  %8152 = vmatmul.msk.f32.gmra.mxu0 %vm4130_vm12, %v14940_v2  ;;  %v1673_v7 = vadd.f32 %v15288_v42, %v15287_v63  ;;  %vm4142_vm12 = vcmp.eq.s32.totalorder %v9729_v22, %v12926_v49  ;;  %v15325_v49 = vld [vmem:[#allocation129_spill] sm:$0xff] }
 0x532   : > { %8137 = vmatmul.msk.f32.gmra.mxu3 %vm4163_vm13, %v14940_v2  ;;  %v2470_v14 = vadd.f32 %v15289_v52, %v1673_v7  ;;  %v15293_v52 = vld [vmem:[#allocation46_spill] sm:$0xff] }
 0x533   : > { %v3917_v47 = vpop.f32.mrf.mxu2  ;;  %v1676_v42 = vadd.f32 %v15293_v52, %v15292_v26 }
 0x534   : > { %v13150_v44 = vadd.f32 %v3917_v47, %v3229_v3  ;;  %v3230_v34 = vadd.f32 %v15290_v32, %v2470_v14  ;;  %v3757_v3 = vpop.f32.mrf.mxu1  ;;  %v15295_v32 = vld [vmem:[#allocation108_spill] sm:$0xff] }
 0x535   : > { %v3641_v59 = vpop.f32.mrf.mxu0  ;;  %v13152_v39 = vpop.f32.mrf.mxu3 }
 0x536   : > { %15286 = vst [vmem:[#allocation11_spill] sm:$0xff] %v13150_v44  ;;  %v3755_v29 = vadd.f32 %v3754_v51, %v3641_v59  ;;  %v15294_v44 = vld [vmem:[#allocation6_spill] sm:$0xff] }
 0x537   : > { %v2471_v14 = vadd.f32 %v15294_v44, %v1676_v42  ;;  %v15297_v44 = vld [vmem:[#allocation14_spill] sm:$0xff]  ;;  %v15298_v42 = vld [vmem:[#allocation49_spill] sm:$0xff] }
 0x538   : > { %8041 = vmatmul.msk.f32.gmra.mxu2 %vm1310_vm10, %v3755_v29  ;;  %8153 = vmatmul.msk.f32.gmra.mxu0 %vm4132_vm14, %v14940_v2  ;;  %v13173_v29 = vpop.permute.xlu1 %4103 }
 0x539   : > { %vm4167_vm1 = vcmp.eq.s32.totalorder %v9645_v61, %v13173_v29 }
 0x53a   : > { %8138 = vmatmul.msk.f32.gmra.mxu3 %vm4165_vm15, %v14940_v2  ;;  %vm4144_vm15 = vcmp.eq.s32.totalorder %v9729_v22, %v12946_v18  ;;  %v15333_v18 = vld [vmem:[#allocation134_spill] sm:$0xff] }
 0x53b   : > { %v3920_v47 = vpop.f32.mrf.mxu2 }
 0x53c   : > { %v13167_v63 = vadd.f32 %v3920_v47, %v3230_v34  ;;  %v3231_v34 = vadd.f32 %v15295_v32, %v2471_v14  ;;  %v3760_v26 = vpop.f32.mrf.mxu1  ;;  %v15299_v14 = vld [vmem:[#allocation68_spill] sm:$0xff] }
 0x53d   : > { %v3644_v51 = vpop.f32.mrf.mxu0  ;;  %v13169_v59 = vpop.f32.mrf.mxu3 }
 0x53e   : > { %15291 = vst [vmem:[#allocation36_spill] sm:$0xff] %v13167_v63  ;;  %v3758_v7 = vadd.f32 %v3757_v3, %v3644_v51  ;;  %v4771_v3 = vpop.permute.xlu2 %4770 }
 0x53f   : > { %vm4866_vm3 = vcmp.eq.s32.totalorder %v9729_v22, %v4771_v3  ;;  %vm4865_vm4 = vcmp.eq.s32.totalorder %v9645_v61, %v4771_v3  ;;  %v15307_v3 = vmov 6  }
 0x540   : > { %8042 = vmatmul.msk.f32.gmra.mxu2 %vm1310_vm10, %v3758_v7  ;;  %8154 = vmatmul.msk.f32.gmra.mxu0 %vm4134_vm0, %v14940_v2  ;;  %v1679_v7 = vadd.f32 %v15298_v42, %v15297_v44 }
 0x542   : > { %8139 = vmatmul.msk.f32.gmra.mxu3 %vm4167_vm1, %v14940_v2  ;;  %v2472_v32 = vadd.f32 %v15299_v14, %v1679_v7  ;;  %v9081_v14 = vld [vmem:[%s14849_s1 + $0x10] sm:$0xff] }
 0x543   : > { %v3923_v47 = vpop.f32.mrf.mxu2 }
 0x544   : > { %v13184_v52 = vadd.f32 %v3923_v47, %v3231_v34  ;;  %v15300_v34 = vld [vmem:[#allocation114_spill] sm:$0xff] }
 0x545   : > { %v3647_v51 = vpop.f32.mrf.mxu0  ;;  %v13186_v46 = vpop.f32.mrf.mxu3  ;;  %v3232_v47 = vadd.f32 %v15300_v34, %v2472_v32  ;;  %v15302_v32 = vld [vmem:[#allocation32_spill] sm:$0xff] }
 0x546   : > { %15296 = vst [vmem:[#allocation103_spill] sm:$0xff] %v13184_v52  ;;  %v3761_v63 = vadd.f32 %v3760_v26, %v3647_v51  ;;  %v14933_v52 = vmov 7   ;;  %v9080_v51 = vld [vmem:[%s14849_s1] sm:$0xff]  ;;  %v15303_v34 = vld [vmem:[#allocation52_spill] sm:$0xff]  ;;  %v4780_v21 = vpop.permute.xlu2 %4779 }
 0x547   : > { %8888 = vset.pattern.permute.xlu1 %v14933_v52  ;;  %8887 = vset.pattern.permute.xlu2 %v14933_v52  ;;  %vm4872_vm13 = vcmp.eq.s32.totalorder %v9729_v22, %v4780_v21  ;;  %vm4871_vm14 = vcmp.eq.s32.totalorder %v9645_v61, %v4780_v21 }
 0x548   : > { %8043 = vmatmul.msk.f32.gmra.mxu2 %vm1310_vm10, %v3761_v63  ;;  %8155 = vmatmul.msk.f32.gmra.mxu0 %vm4136_vm2, %v14940_v2  ;;  %v4774_v63 = vpop.permute.xlu0 %4773  ;;  %vm4146_vm2 = vcmp.eq.s32.totalorder %v9729_v22, %v12966_v23  ;;  %v8338_v23 = vld [vmem:[%s14850_s2 + $0xd0] sm:$0xff] }
 0x549   : > { %5533 = vperm.xlu1 %8888, %v9079_v33   ;;  %8890 = vset.pattern.permute.xlu0 %v14933_v52  ;;  %vm4868_vm6 = vcmp.eq.s32.totalorder %v9729_v22, %v4774_v63  ;;  %v15304_v33 = vld [vmem:[#allocation22_spill] sm:$0xff]  ;;  %vm4867_vm7 = vcmp.eq.s32.totalorder %v9645_v61, %v4774_v63  ;;  %v15315_v63 = vld [vmem:[#allocation124_spill] sm:$0xff] }
 0x54a   : > { %8304 = vmatmul.msk.f32.vlgmr.msrb.gmra.mxu3 %vm4866_vm3, %v14940_v2  ;;  %5530 = vperm.xlu2 %8887, %v9080_v51   ;;  %v13255_v52 = vld [vmem:[%s14849_s1 + $0xa8] sm:$0xff] }
 0x54b   : > { %v3926_v44 = vpop.f32.mrf.mxu2  ;;  %5536 = vperm.xlu0 %8890, %v9081_v14   ;;  %v15305_v14 = vld [vmem:[#allocation122_spill] sm:$0xff]  ;;  %5397 = vmatpush.msrb.mxu0 %v8338_v23  ;;  %v15342_v23 = vld [vmem:[#allocation83_spill] sm:$0xff] }
 0x54c   : > { %v13203_v26 = vadd.f32 %v3926_v44, %v3232_v47  ;;  %v1682_v47 = vadd.f32 %v15303_v34, %v15302_v32  ;;  %v15306_v32 = vld [vmem:[#allocation119_spill] sm:$0xff] }
 0x54d   : > { %v13209_v42 = vpop.f32.mrf.mxu3  ;;  %v4427_v7 = vpop.f32.mrf.mxu0 }
 0x54e   : > { %15301 = vst [vmem:[#allocation62_spill] sm:$0xff] %v13203_v26  ;;  %v4428_v44 = vadd.f32 %v4427_v7, %v12897_v17  ;;  %v2473_v51 = vadd.f32 %v15304_v33, %v1682_v47  ;;  %v4777_v47 = vpop.permute.xlu1 %4776  ;;  %v15313_v26 = vld [vmem:[#allocation12_spill] sm:$0xff] }
 0x54f   : > { %vm4870_vm9 = vcmp.eq.s32.totalorder %v9729_v22, %v4777_v47  ;;  %vm4869_vm11 = vcmp.eq.s32.totalorder %v9645_v61, %v4777_v47  ;;  %v15322_v47 = vld [vmem:[#allocation130_spill] sm:$0xff] }
 0x550   : > { %8156 = vmatmul.msk.f32.gmra.mxu0 %vm4138_vm5, %v14940_v2  ;;  %8176 = vmatmul.msk.f32.vlgmr.msra.gmra.mxu1 %vm1310_vm10, %v4428_v44  ;;  %v3233_v34 = vadd.f32 %v15306_v32, %v2473_v51  ;;  %v13235_v44 = vld [vmem:[%s14849_s1 + $0x98] sm:$0xff]  ;;  %v15310_v32 = vld [vmem:[#allocation74_spill] sm:$0xff]  ;;  %vm4148_vm5 = vcmp.eq.s32.totalorder %v9729_v22, %v12984_v38 }
 0x551   : > { %8272 = vmatmul.msk.f32.vlgmr.msra.gmra.mxu2 %vm4865_vm4, %v14940_v2  ;;  %6690 = vmatpush.msra.mxu1 %v15305_v14  ;;  %v13245_v14 = vld [vmem:[%s14849_s1 + $0x90] sm:$0xff] }
 0x552   : > { %8305 = vmatmul.msk.f32.gmra.mxu3 %vm4868_vm6, %v14940_v2  ;;  %8891 = vset.pattern.permute.xlu1 %v15307_v3 }
 0x553   : > { %v3929_v17 = vpop.f32.mrf.mxu2  ;;  %6691 = vmatpush.msra.mxu1 %v15308_v37  ;;  %4827 = vperm.xlu1 %8891, %v13235_v44  }
 0x554   : > { %v13230_v7 = vadd.f32 %v3929_v17, %v3233_v34  ;;  %8889 = vset.pattern.permute.xlu2 %v15307_v3  ;;  %8893 = vset.pattern.permute.xlu0 %v15307_v3  ;;  %v15311_v34 = vld [vmem:[#allocation18_spill] sm:$0xff] }
 0x555   : > { %v13239_v33 = vpop.f32.mrf.mxu3  ;;  %v4430_v51 = vpop.f32.mrf.mxu0  ;;  %4824 = vperm.xlu2 %8889, %v13245_v14   ;;  %v1685_v17 = vadd.f32 %v15311_v34, %v15310_v32  ;;  %4833 = vperm.xlu0 %8893, %v13255_v52   ;;  %v15316_v34 = vld [vmem:[#allocation127_spill] sm:$0xff] }
 0x556   : > { %15309 = vst [vmem:[#allocation104_spill] sm:$0xff] %v13230_v7  ;;  %v4431_v37 = vadd.f32 %v4430_v51, %v12917_v15  ;;  %v15312_v7 = vld [vmem:[#allocation125_spill] sm:$0xff]  ;;  %v15314_v15 = vld [vmem:[#allocation126_spill] sm:$0xff] }
 0x557   : > { %6692 = vmatpush.msra.mxu1 %v15312_v7  ;;  %v2474_v32 = vadd.f32 %v15313_v26, %v1685_v17  ;;  %v13275_v26 = vld [vmem:[%s14849_s1 + $0xa0] sm:$0xff] }
 0x558   : > { %8157 = vmatmul.msk.f32.gmra.mxu0 %vm4140_vm8, %v14940_v2  ;;  %8177 = vmatmul.msk.f32.gmra.mxu1 %vm1310_vm10, %v4431_v37  ;;  %vm4150_vm8 = vcmp.eq.s32.totalorder %v9729_v22, %v13007_v54  ;;  %v15350_v54 = vld [vmem:[#allocation140_spill] sm:$0xff] }
 0x559   : > { %8273 = vmatmul.msk.f32.gmra.mxu2 %vm4867_vm7, %v14940_v2  ;;  %6693 = vmatpush.msra.mxu1 %v15314_v15  ;;  %v3234_v51 = vadd.f32 %v15315_v63, %v2474_v32  ;;  %v15318_v15 = vmov 7   ;;  %v15319_v32 = vld [vmem:[#allocation128_spill] sm:$0xff]  ;;  %v15320_v63 = vld [vmem:[#allocation77_spill] sm:$0xff] }
 0x55a   : > { %8306 = vmatmul.msk.f32.gmra.mxu3 %vm4870_vm9, %v14940_v2 }
 0x55b   : > { %v3932_v7 = vpop.f32.mrf.mxu2  ;;  %6694 = vmatpush.msra.mxu1 %v15316_v34  ;;  %4830 = vperm.xlu1 %8891, %v13275_v26   ;;  %v1688_v34 = vadd.f32 %v15321_v13, %v15320_v63  ;;  %v9087_v13 = vld [vmem:[%s14849_s1 + $0x38] sm:$0xff] }
 0x55c   : > { %v13270_v0 = vadd.f32 %v3932_v7, %v3234_v51  ;;  %v9086_v7 = vld [vmem:[%s14849_s1 + $0x18] sm:$0xff] }
 0x55d   : > { %v13278_v17 = vpop.f32.mrf.mxu3  ;;  %v4433_v37 = vpop.f32.mrf.mxu0  ;;  %8892 = vset.pattern.permute.xlu2 %v15318_v15  ;;  %6695 = vmatpush.msra.mxu1 %v15319_v32  ;;  %v15324_v32 = vld [vmem:[#allocation131_spill] sm:$0xff] }
 0x55e   : > { %15317 = vst [vmem:[#allocation47_spill] sm:$0xff] %v13270_v0  ;;  %v4434_v51 = vadd.f32 %v4433_v37, %v12937_v30  ;;  %5539 = vperm.xlu2 %8892, %v9086_v7   ;;  %8896 = vset.pattern.permute.xlu0 %v15318_v15  ;;  %v15323_v30 = vld [vmem:[#allocation88_spill] sm:$0xff] }
 0x55f   : > { %5551 = vperm.xlu0 %8896, %v9087_v13   ;;  %6696 = vmatpush.msra.mxu1 %v15322_v47  ;;  %v2475_v37 = vadd.f32 %v15323_v30, %v1688_v34  ;;  %v15326_v0 = vld [vmem:[#allocation132_spill] sm:$0xff]  ;;  %v4783_v47 = vpop.permute.xlu1 %4782 }
 0x560   : > { %8158 = vmatmul.msk.f32.gmra.mxu0 %vm4142_vm12, %v14940_v2  ;;  %8178 = vmatmul.msk.f32.gmra.mxu1 %vm1310_vm10, %v4434_v51  ;;  %v9088_v51 = vld [vmem:[%s14849_s1 + $0x28] sm:$0xff]  ;;  %vm4874_vm0 = vcmp.eq.s32.totalorder %v9729_v22, %v4783_v47  ;;  %vm4873_vm1 = vcmp.eq.s32.totalorder %v9645_v61, %v4783_v47  ;;  %v15339_v47 = vld [vmem:[#allocation73_spill] sm:$0xff]  ;;  %vm4152_vm12 = vcmp.eq.s32.totalorder %v9729_v22, %v13028_v24 }
 0x561   : > { %8274 = vmatmul.msk.f32.gmra.mxu2 %vm4869_vm11, %v14940_v2  ;;  %6697 = vmatpush.msra.mxu1 %v15324_v32  ;;  %v3235_v63 = vadd.f32 %v15325_v49, %v2475_v37  ;;  %v15328_v32 = vld [vmem:[#allocation133_spill] sm:$0xff]  ;;  %v15329_v37 = vld [vmem:[#allocation79_spill] sm:$0xff]  ;;  %v15330_v49 = vld [vmem:[#allocation56_spill] sm:$0xff] }
 0x562   : > { %8307 = vmatmul.msk.f32.gmra.mxu3 %vm4872_vm13, %v14940_v2  ;;  %v1691_v6 = vadd.f32 %v15330_v49, %v15329_v37  ;;  %v4786_v49 = vpop.permute.xlu2 %4785  ;;  %v13480_v24 = vld [vmem:[%s14849_s1 + $0x48] sm:$0xff] }
 0x563   : > { %v3935_v7 = vpop.f32.mrf.mxu2  ;;  %6698 = vmatpush.msra.mxu1 %v15326_v0  ;;  %8894 = vset.pattern.permute.xlu1 %v15318_v15  ;;  %vm4876_vm3 = vcmp.eq.s32.totalorder %v9729_v22, %v4786_v49  ;;  %vm4875_vm4 = vcmp.eq.s32.totalorder %v9645_v61, %v4786_v49  ;;  %v15345_v49 = vld [vmem:[#allocation139_spill] sm:$0xff] }
 0x564   : > { %v13305_v13 = vadd.f32 %v3935_v7, %v3235_v63  ;;  %5545 = vperm.xlu1 %8894, %v9088_v51   ;;  %v13321_v63 = vld [vmem:[%s14849_s1 + $0x20] sm:$0xff]  ;;  %v15331_v7 = vld [vmem:[#allocation135_spill] sm:$0xff]  ;;  %v15332_v51 = vld [vmem:[#allocation96_spill] sm:$0xff] }
 0x565   : > { %v13308_v34 = vpop.f32.mrf.mxu3  ;;  %v4436_v30 = vpop.f32.mrf.mxu0  ;;  %6699 = vmatpush.msra.mxu1 %v15328_v32  ;;  %v2476_v21 = vadd.f32 %v15332_v51, %v1691_v6  ;;  %v15334_v32 = vld [vmem:[#allocation136_spill] sm:$0xff]  ;;  %v13350_v51 = vld [vmem:[%s14849_s1 + $0x30] sm:$0xff] }
 0x566   : > { %15327 = vst [vmem:[#allocation105_spill] sm:$0xff] %v13305_v13  ;;  %v4437_v0 = vadd.f32 %v4436_v30, %v12957_v40  ;;  %5542 = vperm.xlu2 %8892, %v13321_v63   ;;  %v13336_v40 = vld [vmem:[%s14849_s1 + $0xd0] sm:$0xff] }
 0x567   : > { %8899 = vset.pattern.permute.xlu0 %v15307_v3  ;;  %6700 = vmatpush.msra.mxu1 %v15331_v7  ;;  %v3236_v30 = vadd.f32 %v15333_v18, %v2476_v21  ;;  %v15336_v21 = vld [vmem:[#allocation81_spill] sm:$0xff]  ;;  %v15337_v18 = vld [vmem:[#allocation59_spill] sm:$0xff] }
 0x568   : > { %8159 = vmatmul.msk.f32.gmra.mxu0 %vm4144_vm15, %v14940_v2  ;;  %8179 = vmatmul.msk.f32.gmra.mxu1 %vm1310_vm10, %v4437_v0  ;;  %v1694_v13 = vadd.f32 %v15337_v18, %v15336_v21  ;;  %v9094_v18 = vld [vmem:[%s9381_s18 + $0x88] sm:$0xff]  ;;  %vm4154_vm15 = vcmp.eq.s32.totalorder %v9729_v22, %v13049_v55 }
 0x569   : > { %8275 = vmatmul.msk.f32.gmra.mxu2 %vm4871_vm14, %v14940_v2  ;;  %4848 = vperm.xlu0 %8899, %v13336_v40   ;;  %v15360_v55 = vld [vmem:[#allocation142_spill] sm:$0xff] }
 0x56a   : > { %8308 = vmatmul.msk.f32.gmra.mxu3 %vm4874_vm0, %v14940_v2  ;;  %6701 = vmatpush.msra.mxu1 %v15334_v32  ;;  %v13365_v32 = vld [vmem:[%s14849_s1 + $0xb0] sm:$0xff] }
 0x56b   : > { %v3938_v6 = vpop.f32.mrf.mxu2 }
 0x56c   : > { %v13342_v37 = vadd.f32 %v3938_v6, %v3236_v30  ;;  %6702 = vmatpush.msra.mxu1 %v12734_v41  ;;  %5548 = vperm.xlu1 %8894, %v13350_v51   ;;  %v15338_v41 = vld [vmem:[#allocation137_spill] sm:$0xff]  ;;  %v2477_v6 = vadd.f32 %v15339_v47, %v1694_v13 }
 0x56d   : > { %v13345_v0 = vpop.f32.mrf.mxu3  ;;  %v4439_v7 = vpop.f32.mrf.mxu0  ;;  %v13381_v13 = vld [vmem:[%s14849_s1 + $0x60] sm:$0xff] }
 0x56e   : > { %15335 = vst [vmem:[#allocation106_spill] sm:$0xff] %v13342_v37  ;;  %v4440_v30 = vadd.f32 %v4439_v7, %v12977_v10  ;;  %8895 = vset.pattern.permute.xlu2 %v15307_v3  ;;  %6703 = vmatpush.msra.mxu1 %v15338_v41  ;;  %v15340_v10 = vld [vmem:[#allocation138_spill] sm:$0xff]  ;;  %v4789_v41 = vpop.permute.xlu0 %4788 }
 0x56f   : > { %4836 = vperm.xlu2 %8895, %v13365_v32   ;;  %v3237_v7 = vadd.f32 %v15340_v10, %v2477_v6  ;;  %v9095_v6 = vld [vmem:[%s9381_s18 + $0x80] sm:$0xff]  ;;  %v15343_v10 = vld [vmem:[#allocation63_spill] sm:$0xff]  ;;  %vm4878_vm6 = vcmp.eq.s32.totalorder %v9729_v22, %v4789_v41  ;;  %vm4877_vm7 = vcmp.eq.s32.totalorder %v9645_v61, %v4789_v41 }
 0x570   : > { %8160 = vmatmul.msk.f32.gmra.mxu0 %vm4146_vm2, %v14940_v2  ;;  %8180 = vmatmul.msk.f32.gmra.mxu1 %vm1310_vm10, %v4440_v30  ;;  %v1697_v36 = vadd.f32 %v15343_v10, %v15342_v23  ;;  %v4792_v23 = vpop.permute.xlu1 %4791  ;;  %vm4156_vm2 = vcmp.eq.s32.totalorder %v9729_v22, %v13070_v4  ;;  %v15365_v4 = vld [vmem:[#allocation143_spill] sm:$0xff] }
 0x571   : > { %8276 = vmatmul.msk.f32.gmra.mxu2 %vm4873_vm1, %v14940_v2  ;;  %8902 = vset.pattern.permute.xlu0 %v15318_v15  ;;  %vm4880_vm9 = vcmp.eq.s32.totalorder %v9729_v22, %v4792_v23  ;;  %vm4879_vm11 = vcmp.eq.s32.totalorder %v9645_v61, %v4792_v23 }
 0x572   : > { %8309 = vmatmul.msk.f32.gmra.mxu3 %vm4876_vm3, %v14940_v2  ;;  %5566 = vperm.xlu0 %8902, %v13381_v13  }
 0x573   : > { %v3941_v21 = vpop.f32.mrf.mxu2  ;;  %6704 = vmatpush.msra.mxu1 %v9094_v18 }
 0x574   : > { %v13385_v30 = vadd.f32 %v3941_v21, %v3237_v7  ;;  %8897 = vset.pattern.permute.xlu1 %v15307_v3  ;;  %v13398_v7 = vld [vmem:[%s14849_s1 + $0xc0] sm:$0xff]  ;;  %v13407_v21 = vld [vmem:[%s14849_s1 + $0xb8] sm:$0xff] }
 0x575   : > { %v13387_v47 = vpop.f32.mrf.mxu3  ;;  %v4442_v37 = vpop.f32.mrf.mxu0  ;;  %6705 = vmatpush.msra.mxu1 %v9095_v6  ;;  %4842 = vperm.xlu1 %8897, %v13398_v7  }
 0x576   : > { %15341 = vst [vmem:[#allocation57_spill] sm:$0xff] %v13385_v30  ;;  %v4443_v8 = vadd.f32 %v4442_v37, %v12999_v5  ;;  %v15344_v5 = vld [vmem:[#allocation92_spill] sm:$0xff] }
 0x577   : > { %4839 = vperm.xlu2 %8895, %v13407_v21   ;;  %v2478_v37 = vadd.f32 %v15344_v5, %v1697_v36  ;;  %v13422_v36 = vld [vmem:[%s14849_s1 + $0xf8] sm:$0xff]  ;;  %v15347_v5 = vld [vmem:[#allocation85_spill] sm:$0xff] }
 0x578   : > { %8161 = vmatmul.msk.f32.gmra.mxu0 %vm4148_vm5, %v14940_v2  ;;  %8181 = vmatmul.msk.f32.gmra.mxu1 %vm1310_vm10, %v4443_v8  ;;  %vm4158_vm5 = vcmp.eq.s32.totalorder %v9729_v22, %v13088_v27  ;;  %v13575_v27 = vld [vmem:[%s14849_s1 + $0x68] sm:$0xff] }
 0x579   : > { %8277 = vmatmul.msk.f32.gmra.mxu2 %vm4875_vm4, %v14940_v2  ;;  %v3238_v18 = vadd.f32 %v15345_v49, %v2478_v37  ;;  %v15348_v37 = vld [vmem:[#allocation67_spill] sm:$0xff] }
 0x57a   : > { %8310 = vmatmul.msk.f32.gmra.mxu3 %vm4878_vm6, %v14940_v2  ;;  %8905 = vset.pattern.permute.xlu0 %v15307_v3  ;;  %v1700_v49 = vadd.f32 %v15348_v37, %v15347_v5 }
 0x57b   : > { %v3944_v38 = vpop.f32.mrf.mxu2  ;;  %4863 = vperm.xlu0 %8905, %v13422_v36  }
 0x57c   : > { %v13417_v6 = vadd.f32 %v3944_v38, %v3238_v18  ;;  %v13434_v18 = vld [vmem:[%s14849_s1 + $0xc8] sm:$0xff]  ;;  %v15349_v38 = vld [vmem:[#allocation76_spill] sm:$0xff] }
 0x57d   : > { %v13425_v8 = vpop.f32.mrf.mxu3  ;;  %v4445_v10 = vpop.f32.mrf.mxu0  ;;  %4845 = vperm.xlu1 %8897, %v13434_v18   ;;  %v2479_v5 = vadd.f32 %v15349_v38, %v1700_v49 }
 0x57e   : > { %15346 = vst [vmem:[#allocation37_spill] sm:$0xff] %v13417_v6  ;;  %v4446_v30 = vadd.f32 %v4445_v10, %v13019_v1  ;;  %v13448_v1 = vld [vmem:[%s14849_s1 + $0x40] sm:$0xff]  ;;  %v4795_v49 = vpop.permute.xlu2 %4794  ;;  %v15352_v6 = vld [vmem:[#allocation86_spill] sm:$0xff] }
 0x57f   : > { %8898 = vset.pattern.permute.xlu2 %v15318_v15  ;;  %v3239_v41 = vadd.f32 %v15350_v54, %v2479_v5  ;;  %v1703_v11 = vadd.f32 %v15353_v35, %v15352_v6  ;;  %vm4882_vm13 = vcmp.eq.s32.totalorder %v9729_v22, %v4795_v49  ;;  %v13470_v54 = vld [vmem:[%s14849_s1 + $0x50] sm:$0xff]  ;;  %vm4881_vm14 = vcmp.eq.s32.totalorder %v9645_v61, %v4795_v49  ;;  %v13513_v49 = vld [vmem:[%s14849_s1 + $0xd8] sm:$0xff] }
 0x580   : > { %8162 = vmatmul.msk.f32.gmra.mxu0 %vm4150_vm8, %v14940_v2  ;;  %8182 = vmatmul.msk.f32.gmra.mxu1 %vm1310_vm10, %v4446_v30  ;;  %vm4160_vm8 = vcmp.eq.s32.totalorder %v9729_v22, %v13105_v16  ;;  %v13599_v16 = vld [vmem:[%s14849_s1 + $0x78] sm:$0xff] }
 0x581   : > { %8278 = vmatmul.msk.f32.gmra.mxu2 %vm4877_vm7, %v14940_v2  ;;  %5554 = vperm.xlu2 %8898, %v13448_v1  }
 0x582   : > { %8311 = vmatmul.msk.f32.gmra.mxu3 %vm4880_vm9, %v14940_v2 }
 0x583   : > { %v3947_v10 = vpop.f32.mrf.mxu2  ;;  %8907 = vset.pattern.permute.xlu0 %v15318_v15 }
 0x584   : > { %v13453_v37 = vadd.f32 %v3947_v10, %v3239_v41  ;;  %5587 = vperm.xlu0 %8907, %v13235_v44   ;;  %v15354_v44 = vld [vmem:[#allocation13_spill] sm:$0xff] }
 0x585   : > { %v13456_v30 = vpop.f32.mrf.mxu3  ;;  %v4448_v38 = vpop.f32.mrf.mxu0  ;;  %8900 = vset.pattern.permute.xlu1 %v15318_v15  ;;  %v2480_v35 = vadd.f32 %v15354_v44, %v1703_v11  ;;  %v15358_v44 = vld [vmem:[#allocation7_spill] sm:$0xff] }
 0x586   : > { %15351 = vst [vmem:[#allocation109_spill] sm:$0xff] %v13453_v37  ;;  %v4449_v5 = vadd.f32 %v4448_v38, %v13040_v43  ;;  %5560 = vperm.xlu1 %8900, %v13470_v54   ;;  %v15355_v43 = vld [vmem:[#allocation141_spill] sm:$0xff]  ;;  %v4798_v11 = vpop.permute.xlu0 %4797 }
 0x587   : > { %v3240_v6 = vadd.f32 %v15355_v43, %v2480_v35  ;;  %vm4884_vm0 = vcmp.eq.s32.totalorder %v9729_v22, %v4798_v11  ;;  %v13500_v35 = vld [vmem:[%s14849_s1 + $0x58] sm:$0xff]  ;;  %vm4883_vm1 = vcmp.eq.s32.totalorder %v9645_v61, %v4798_v11  ;;  %v13536_v11 = vld [vmem:[%s14849_s1 + $0xe8] sm:$0xff] }
 0x588   : > { %8163 = vmatmul.msk.f32.gmra.mxu0 %vm4152_vm12, %v14940_v2  ;;  %8183 = vmatmul.msk.f32.gmra.mxu1 %vm1310_vm10, %v4449_v5  ;;  %v15357_v5 = vld [vmem:[#allocation89_spill] sm:$0xff]  ;;  %vm4162_vm12 = vcmp.eq.s32.totalorder %v9729_v22, %v13122_v12 }
 0x589   : > { %8279 = vmatmul.msk.f32.gmra.mxu2 %vm4879_vm11, %v14940_v2  ;;  %5557 = vperm.xlu2 %8898, %v13480_v24   ;;  %v1706_v37 = vadd.f32 %v15358_v44, %v15357_v5  ;;  %v15362_v5 = vld [vmem:[#allocation91_spill] sm:$0xff] }
 0x58a   : > { %8312 = vmatmul.msk.f32.gmra.mxu3 %vm4882_vm13, %v14940_v2  ;;  %v15363_v44 = vld [vmem:[#allocation23_spill] sm:$0xff] }
 0x58b   : > { %v3950_v23 = vpop.f32.mrf.mxu2 }
 0x58c   : > { %v13485_v41 = vadd.f32 %v3950_v23, %v3240_v6  ;;  %5602 = vperm.xlu0 %8907, %v13398_v7   ;;  %v15359_v7 = vld [vmem:[#allocation95_spill] sm:$0xff]  ;;  %v4801_v23 = vpop.permute.xlu1 %4800 }
 0x58d   : > { %v13487_v10 = vpop.f32.mrf.mxu3  ;;  %v4451_v38 = vpop.f32.mrf.mxu0  ;;  %v2481_v43 = vadd.f32 %v15359_v7, %v1706_v37  ;;  %v1709_v7 = vadd.f32 %v15363_v44, %v15362_v5  ;;  %vm4886_vm3 = vcmp.eq.s32.totalorder %v9729_v22, %v4801_v23  ;;  %vm4885_vm4 = vcmp.eq.s32.totalorder %v9645_v61, %v4801_v23 }
 0x58e   : > { %15356 = vst [vmem:[#allocation17_spill] sm:$0xff] %v13485_v41  ;;  %v4452_v19 = vadd.f32 %v4451_v38, %v13061_v56  ;;  %5563 = vperm.xlu1 %8900, %v13500_v35   ;;  %v4804_v5 = vpop.permute.xlu2 %4803  ;;  %v15374_v41 = vld [vmem:[#allocation50_spill] sm:$0xff] }
 0x58f   : > { %v3241_v56 = vadd.f32 %v15360_v55, %v2481_v43  ;;  %v15364_v55 = vld [vmem:[#allocation99_spill] sm:$0xff]  ;;  %vm4888_vm6 = vcmp.eq.s32.totalorder %v9729_v22, %v4804_v5  ;;  %vm4887_vm7 = vcmp.eq.s32.totalorder %v9645_v61, %v4804_v5 }
 0x590   : > { %8164 = vmatmul.msk.f32.gmra.mxu0 %vm4154_vm15, %v14940_v2  ;;  %8184 = vmatmul.msk.f32.gmra.mxu1 %vm1310_vm10, %v4452_v19  ;;  %vm4164_vm15 = vcmp.eq.s32.totalorder %v9729_v22, %v13136_v28 }
 0x591   : > { %8280 = vmatmul.msk.f32.gmra.mxu2 %vm4881_vm14, %v14940_v2  ;;  %8901 = vset.pattern.permute.xlu2 %v15307_v3 }
 0x592   : > { %8313 = vmatmul.msk.f32.gmra.mxu3 %vm4884_vm0, %v14940_v2  ;;  %4851 = vperm.xlu2 %8901, %v13513_v49  }
 0x593   : > { %v3953_v37 = vpop.f32.mrf.mxu2 }
 0x594   : > { %v13516_v6 = vadd.f32 %v3953_v37, %v3241_v56  ;;  %5611 = vperm.xlu0 %8907, %v13513_v49   ;;  %v2482_v56 = vadd.f32 %v15364_v55, %v1709_v7  ;;  %v15367_v55 = vld [vmem:[#allocation93_spill] sm:$0xff] }
 0x595   : > { %v13518_v19 = vpop.f32.mrf.mxu3  ;;  %v4454_v38 = vpop.f32.mrf.mxu0 }
 0x596   : > { %15361 = vst [vmem:[#allocation110_spill] sm:$0xff] %v13516_v6  ;;  %v4455_v43 = vadd.f32 %v4454_v38, %v13081_v62  ;;  %8903 = vset.pattern.permute.xlu1 %v15307_v3  ;;  %v3242_v62 = vadd.f32 %v15365_v4, %v2482_v56  ;;  %v13544_v3 = vld [vmem:[%s14849_s1 + $0xe0] sm:$0xff]  ;;  %v15368_v56 = vld [vmem:[#allocation28_spill] sm:$0xff] }
 0x597   : > { %4857 = vperm.xlu1 %8903, %v13536_v11   ;;  %v1712_v4 = vadd.f32 %v15368_v56, %v15367_v55  ;;  %v15370_v55 = vld [vmem:[#allocation144_spill] sm:$0xff] }
 0x598   : > { %8165 = vmatmul.msk.f32.gmra.mxu0 %vm4156_vm2, %v14940_v2  ;;  %8185 = vmatmul.msk.f32.gmra.mxu1 %vm1310_vm10, %v4455_v43  ;;  %v13554_v43 = vld [vmem:[%s14849_s1 + $0xf0] sm:$0xff]  ;;  %vm4166_vm2 = vcmp.eq.s32.totalorder %v9729_v22, %v13156_v9 }
 0x599   : > { %8281 = vmatmul.msk.f32.gmra.mxu2 %vm4883_vm1, %v14940_v2 }
 0x59a   : > { %8314 = vmatmul.msk.f32.gmra.mxu3 %vm4886_vm3, %v14940_v2  ;;  %4854 = vperm.xlu2 %8901, %v13544_v3  }
 0x59b   : > { %v3956_v37 = vpop.f32.mrf.mxu2 }
 0x59c   : > { %v13547_v38 = vadd.f32 %v3956_v37, %v3242_v62  ;;  %5620 = vperm.xlu0 %8907, %v13554_v43   ;;  %v15369_v62 = vld [vmem:[#allocation58_spill] sm:$0xff] }
 0x59d   : > { %v13549_v44 = vpop.f32.mrf.mxu3  ;;  %v4457_v7 = vpop.f32.mrf.mxu0  ;;  %v2483_v37 = vadd.f32 %v15369_v62, %v1712_v4  ;;  %v15372_v62 = vld [vmem:[#allocation94_spill] sm:$0xff] }
 0x59e   : > { %15366 = vst [vmem:[#allocation97_spill] sm:$0xff] %v13547_v38  ;;  %v4458_v6 = vadd.f32 %v4457_v7, %v13098_v53 }
 0x59f   : > { %4860 = vperm.xlu1 %8903, %v13554_v43   ;;  %v3243_v56 = vadd.f32 %v15370_v55, %v2483_v37  ;;  %v15373_v37 = vld [vmem:[#allocation31_spill] sm:$0xff] }
 0x5a0   : > { %8166 = vmatmul.msk.f32.gmra.mxu0 %vm4158_vm5, %v14940_v2  ;;  %8186 = vmatmul.msk.f32.gmra.mxu1 %vm1310_vm10, %v4458_v6  ;;  %v4807_v6 = vpop.permute.xlu0 %4806  ;;  %v1715_v55 = vadd.f32 %v15373_v37, %v15372_v62  ;;  %v15378_v62 = vld [vmem:[#allocation26_spill] sm:$0xff]  ;;  %vm4168_vm5 = vcmp.eq.s32.totalorder %v9729_v22, %v13173_v29 }
 0x5a1   : > { %8282 = vmatmul.msk.f32.gmra.mxu2 %vm4885_vm4, %v14940_v2  ;;  %vm4890_vm9 = vcmp.eq.s32.totalorder %v9729_v22, %v4807_v6  ;;  %vm4889_vm11 = vcmp.eq.s32.totalorder %v9645_v61, %v4807_v6 }
 0x5a2   : > { %8315 = vmatmul.msk.f32.gmra.mxu3 %vm4888_vm6, %v14940_v2  ;;  %8904 = vset.pattern.permute.xlu2 %v15318_v15  ;;  %v2484_v45 = vadd.f32 %v15374_v41, %v1715_v55  ;;  %v13605_v41 = vld [vmem:[%s14849_s1 + $0x70] sm:$0xff] }
 0x5a3   : > { %v3959_v53 = vpop.f32.mrf.mxu2  ;;  %5569 = vperm.xlu2 %8904, %v13575_v27  }
 0x5a4   : > { %v13578_v23 = vadd.f32 %v3959_v53, %v3243_v56  ;;  %v15375_v56 = vld [vmem:[#allocation145_spill] sm:$0xff] }
 0x5a5   : > { %v13580_v7 = vpop.f32.mrf.mxu3  ;;  %v4460_v4 = vpop.f32.mrf.mxu0  ;;  %v3244_v53 = vadd.f32 %v15375_v56, %v2484_v45  ;;  %v15379_v56 = vld [vmem:[#allocation90_spill] sm:$0xff] }
 0x5a6   : > { %15371 = vst [vmem:[#allocation111_spill] sm:$0xff] %v13578_v23  ;;  %v4461_v38 = vadd.f32 %v4460_v4, %v13115_v60  ;;  %v4810_v45 = vpop.permute.xlu1 %4809  ;;  %v15377_v4 = vld [vmem:[#allocation98_spill] sm:$0xff] }
 0x5a7   : > { %8906 = vset.pattern.permute.xlu1 %v15318_v15  ;;  %v1718_v37 = vadd.f32 %v15378_v62, %v15377_v4  ;;  %vm4892_vm13 = vcmp.eq.s32.totalorder %v9729_v22, %v4810_v45  ;;  %v8336_v62 = vld [vmem:[%s14850_s2 + $0xc0] sm:$0xff]  ;;  %vm4891_vm14 = vcmp.eq.s32.totalorder %v9645_v61, %v4810_v45  ;;  %v9114_v45 = vld [vmem:[%s9381_s18 + $0x70] sm:$0xff] }
 0x5a8   : > { %8167 = vmatmul.msk.f32.gmra.mxu0 %vm4160_vm8, %v14940_v2  ;;  %8187 = vmatmul.msk.f32.gmra.mxu1 %vm1310_vm10, %v4461_v38 }
 0x5a9   : > { %8283 = vmatmul.msk.f32.gmra.mxu2 %vm4887_vm7, %v14940_v2  ;;  %5575 = vperm.xlu1 %8906, %v13599_v16   ;;  %v2485_v23 = vadd.f32 %v15379_v56, %v1718_v37  ;;  %v15381_v37 = vld [vmem:[#allocation20_spill] sm:$0xff] }
 0x5aa   : > { %8316 = vmatmul.msk.f32.gmra.mxu3 %vm4890_vm9, %v14940_v2 }
 0x5ab   : > { %v3962_v60 = vpop.f32.mrf.mxu2  ;;  %5572 = vperm.xlu2 %8904, %v13605_v41   ;;  %v3245_v6 = vadd.f32 %v12841_v50, %v2485_v23  ;;  %v4813_v23 = vpop.permute.xlu2 %4812 }
 0x5ac   : > { %v13608_v15 = vadd.f32 %v3962_v60, %v3244_v53  ;;  %v8337_v53 = vld [vmem:[%s14850_s2 + $0xc8] sm:$0xff]  ;;  %v13637_v60 = vld [vmem:[%s14849_s1 + $0x80] sm:$0xff]  ;;  %vm4894_vm0 = vcmp.eq.s32.totalorder %v9729_v22, %v4813_v23  ;;  %vm4893_vm1 = vcmp.eq.s32.totalorder %v9645_v61, %v4813_v23 }
 0x5ad   : > { %v13610_v38 = vpop.f32.mrf.mxu3  ;;  %v4463_v5 = vpop.f32.mrf.mxu0  ;;  %5398 = vmatpush.msrb.mxu0 %v8337_v53 }
 0x5ae   : > { %15376 = vst [vmem:[#allocation112_spill] sm:$0xff] %v13608_v15  ;;  %v4464_v55 = vadd.f32 %v4463_v5, %v13132_v25  ;;  %v13631_v25 = vld [vmem:[%s14849_s1 + $0x88] sm:$0xff] }
 0x5af   : > { %5399 = vmatpush.msrb.mxu0 %v8336_v62  ;;  %v4816_v62 = vpop.permute.xlu0 %4815 }
 0x5b0   : > { %8168 = vmatmul.msk.f32.gmra.mxu0 %vm4162_vm12, %v14940_v2  ;;  %8188 = vmatmul.msk.f32.gmra.mxu1 %vm1310_vm10, %v4464_v55  ;;  %v15382_v55 = vld [vmem:[#allocation29_spill] sm:$0xff]  ;;  %vm4896_vm3 = vcmp.eq.s32.totalorder %v9729_v22, %v4816_v62  ;;  %vm4895_vm4 = vcmp.eq.s32.totalorder %v9645_v61, %v4816_v62 }
 0x5b1   : > { %8284 = vmatmul.msk.f32.gmra.mxu2 %vm4889_vm11, %v14940_v2  ;;  %5581 = vperm.xlu1 %8906, %v13631_v25   ;;  %v1721_v56 = vadd.f32 %v15382_v55, %v15381_v37  ;;  %v9115_v37 = vld [vmem:[%s9381_s18 + $0x68] sm:$0xff] }
 0x5b2   : > { %8317 = vmatmul.msk.f32.gmra.mxu3 %vm4892_vm13, %v14940_v2 }
 0x5b3   : > { %v3965_v12 = vpop.f32.mrf.mxu2  ;;  %5578 = vperm.xlu2 %8904, %v13637_v60   ;;  %v13706_v62 = vpop.permute.xlu2 %5530 }
 0x5b4   : > { %v13640_v50 = vadd.f32 %v3965_v12, %v3245_v6  ;;  %v9113_v6 = vld [vmem:[%s9381_s18 + $0x78] sm:$0xff]  ;;  %v15383_v12 = vld [vmem:[#allocation101_spill] sm:$0xff] }
 0x5b5   : > { %v13642_v5 = vpop.f32.mrf.mxu3  ;;  %v4466_v4 = vpop.f32.mrf.mxu0  ;;  %6577 = vmatpush.msra.mxu0 %v9113_v6  ;;  %v15386_v6 = vld [vmem:[#allocation16_spill] sm:$0xff] }
 0x5b6   : > { %15380 = vst [vmem:[#allocation61_spill] sm:$0xff] %v13640_v50  ;;  %v4467_v53 = vadd.f32 %v4466_v4, %v13152_v39  ;;  %v2486_v50 = vadd.f32 %v15383_v12, %v1721_v56 }
 0x5b7   : > { %6578 = vmatpush.msra.mxu0 %v9114_v45  ;;  %v9117_v45 = vld [vmem:[%s9381_s18 + $0x58] sm:$0xff] }
 0x5b8   : > { %8169 = vmatmul.msk.f32.gmra.mxu0 %vm4164_vm15, %v14940_v2  ;;  %8189 = vmatmul.msk.f32.gmra.mxu1 %vm1310_vm10, %v4467_v53  ;;  %v3246_v39 = vadd.f32 %v12855_v58, %v2486_v50  ;;  %v15385_v53 = vld [vmem:[#allocation15_spill] sm:$0xff]  ;;  %v9116_v50 = vld [vmem:[%s9381_s18 + $0x60] sm:$0xff] }
 0x5b9   : > { %8285 = vmatmul.msk.f32.gmra.mxu2 %vm4891_vm14, %v14940_v2  ;;  %5590 = vperm.xlu1 %8906, %v13275_v26   ;;  %v1724_v12 = vadd.f32 %v15386_v6, %v15385_v53  ;;  %v15389_v53 = vld [vmem:[#allocation60_spill] sm:$0xff]  ;;  %v15390_v6 = vld [vmem:[#allocation75_spill] sm:$0xff] }
 0x5ba   : > { %8318 = vmatmul.msk.f32.gmra.mxu3 %vm4894_vm0, %v14940_v2  ;;  %6579 = vmatpush.msra.mxu0 %v9115_v37 }
 0x5bb   : > { %v3968_v28 = vpop.f32.mrf.mxu2  ;;  %5584 = vperm.xlu2 %8904, %v13245_v14   ;;  %v15387_v14 = vld [vmem:[#allocation107_spill] sm:$0xff] }
 0x5bc   : > { %v13664_v4 = vadd.f32 %v3968_v28, %v3246_v39  ;;  %6580 = vmatpush.msra.mxu0 %v9116_v50  ;;  %v2487_v26 = vadd.f32 %v15387_v14, %v1724_v12  ;;  %v4819_v39 = vpop.permute.xlu1 %4818  ;;  %v9118_v28 = vld [vmem:[%s9381_s18 + $0x50] sm:$0xff]  ;;  %v1727_v12 = vadd.f32 %v15390_v6, %v15389_v53  ;;  %v9120_v50 = vld [vmem:[%s9381_s18 + $0x40] sm:$0xff] }
 0x5bd   : > { %v13667_v55 = vpop.f32.mrf.mxu3  ;;  %v4469_v56 = vpop.f32.mrf.mxu0  ;;  %vm4898_vm6 = vcmp.eq.s32.totalorder %v9729_v22, %v4819_v39  ;;  %vm4897_vm7 = vcmp.eq.s32.totalorder %v9645_v61, %v4819_v39  ;;  %v9124_v53 = vld [vmem:[%s9381_s18 + $0x20] sm:$0xff] }
 0x5be   : > { %15384 = vst [vmem:[#allocation38_spill] sm:$0xff] %v13664_v4  ;;  %v4470_v58 = vadd.f32 %v4469_v56, %v13169_v59  ;;  %6581 = vmatpush.msra.mxu0 %v9117_v45  ;;  %v3247_v59 = vadd.f32 %v12866_v48, %v2487_v26  ;;  %v4822_v26 = vpop.permute.xlu0 %4821  ;;  %v9121_v45 = vld [vmem:[%s9381_s18 + $0x38] sm:$0xff]  ;;  %v4825_v39 = vpop.permute.xlu2 %4824  ;;  %v8500_v4 = vld [vmem:[%s14850_s2 + $0xe0] sm:$0xff] }
 0x5bf   : > { %vm4900_vm8 = vcmp.eq.s32.totalorder %v9729_v22, %v4822_v26  ;;  %vm4902_vm9 = vcmp.eq.s32.totalorder %v9729_v22, %v4825_v39  ;;  %vm4899_vm11 = vcmp.eq.s32.totalorder %v9645_v61, %v4822_v26  ;;  %vm4901_vm12 = vcmp.eq.s32.totalorder %v9645_v61, %v4825_v39 }
 0x5c0   : > { %8170 = vmatmul.msk.f32.gmra.mxu0 %vm4166_vm2, %v14940_v2  ;;  %8190 = vmatmul.msk.f32.gmra.mxu1 %vm1310_vm10, %v4470_v58  ;;  %v9119_v58 = vld [vmem:[%s9381_s18 + $0x48] sm:$0xff] }
 0x5c1   : > { %8286 = vmatmul.msk.f32.gmra.mxu2 %vm4893_vm1, %v14940_v2  ;;  %5596 = vperm.xlu1 %8906, %v13365_v32  }
 0x5c2   : > { %8319 = vmatmul.msk.f32.gmra.mxu3 %vm4896_vm3, %v14940_v2  ;;  %6582 = vmatpush.msra.mxu0 %v9118_v28 }
 0x5c3   : > { %v3971_v23 = vpop.f32.mrf.mxu2  ;;  %5593 = vperm.xlu2 %8904, %v13255_v52   ;;  %v15391_v52 = vld [vmem:[#allocation113_spill] sm:$0xff] }
 0x5c4   : > { %v13686_v9 = vadd.f32 %v3971_v23, %v3247_v59  ;;  %6583 = vmatpush.msra.mxu0 %v9119_v58  ;;  %v2488_v32 = vadd.f32 %v15391_v52, %v1727_v12 }
 0x5c5   : > { %v13689_v37 = vpop.f32.mrf.mxu3  ;;  %v4472_v56 = vpop.f32.mrf.mxu0 }
 0x5c6   : > { %15388 = vst [vmem:[#allocation115_spill] sm:$0xff] %v13686_v9  ;;  %v4473_v48 = vadd.f32 %v4472_v56, %v13186_v46  ;;  %6584 = vmatpush.msra.mxu0 %v9120_v50  ;;  %v3248_v46 = vadd.f32 %v12883_v20, %v2488_v32  ;;  %v9122_v56 = vld [vmem:[%s9381_s18 + $0x30] sm:$0xff]  ;;  %v9125_v32 = vld [vmem:[%s9381_s18 + $0x18] sm:$0xff] }
 0x5c8   : > { %8171 = vmatmul.msk.f32.gmra.mxu0 %vm4168_vm5, %v14940_v2  ;;  %8191 = vmatmul.msk.f32.gmra.mxu1 %vm1310_vm10, %v4473_v48 }
 0x5c9   : > { %8287 = vmatmul.msk.f32.gmra.mxu2 %vm4895_vm4, %v14940_v2  ;;  %5605 = vperm.xlu1 %8906, %v13434_v18   ;;  %v9123_v18 = vld [vmem:[%s9381_s18 + $0x28] sm:$0xff] }
 0x5ca   : > { %8320 = vmatmul.msk.f32.gmra.mxu3 %vm4898_vm6, %v14940_v2  ;;  %6585 = vmatpush.msra.mxu0 %v9121_v45 }
 0x5cb   : > { %v3974_v29 = vpop.f32.mrf.mxu2  ;;  %5599 = vperm.xlu2 %8904, %v13407_v21   ;;  %v13720_v21 = vpop.permute.xlu1 %5533 }
 0x5cc   : > { %v13710_v14 = vadd.f32 %v3974_v29, %v3248_v46  ;;  %6586 = vmatpush.msra.mxu0 %v9122_v56  ;;  %v9127_v46 = vld [vmem:[%s9381_s18 + $0x8] sm:$0xff]  ;;  %v9128_v56 = vld [vmem:[%s9381_s18] sm:$0xff] }
 0x5cd   : > { %v4475_v59 = vpop.f32.mrf.mxu0  ;;  %v13713_v23 = vpop.f32.mrf.mxu1 }
 0x5ce   : > { %15392 = vst [vmem:[#allocation21_spill] sm:$0xff] %v13710_v14  ;;  %v4476_v20 = vadd.f32 %v4475_v59, %v13209_v42  ;;  %v5187_v28 = vpop.f32.mrf.mxu3  ;;  %6587 = vmatpush.msra.mxu0 %v9123_v18 }
 0x5d0   : > { %8192 = vmatmul.msk.f32.gmra.mxu1 %vm1310_vm10, %v4476_v20  ;;  %6588 = vmatpush.msra.mxu0 %v9124_v53 }
 0x5d1   : > { %8288 = vmatmul.msk.f32.gmra.mxu2 %vm4897_vm7, %v14940_v2  ;;  %5614 = vperm.xlu1 %8906, %v13544_v3  }
 0x5d2   : > { %8321 = vmatmul.msk.f32.gmra.mxu3 %vm4900_vm8, %v14940_v2  ;;  %6589 = vmatpush.msra.mxu0 %v9125_v32 }
 0x5d3   : > { %5608 = vperm.xlu2 %8904, %v13336_v40   ;;  %v9126_v40 = vld [vmem:[%s9381_s18 + $0x10] sm:$0xff]  ;;  %s8706_s18 = sshll.u32 %s9215_s15, 8  ;;  %s7114_s15 = scalar_lea.sflag [#allocation3], %s191_s7 }
 0x5d4   : > { %v5074_v42 = vpop.f32.mrf.mxu2  ;;  %6590 = vmatpush.msra.mxu0 %v9126_v40  ;;  %s7127_s19 = scalar_lea.hbm %s14851_s3, %s8706_s18 }
 0x5d5   : > { %v5188_v6 = vadd.f32 %v5187_v28, %v5074_v42  ;;  %v4478_v12 = vpop.f32.mrf.mxu0  ;;  %v13728_v48 = vpop.f32.mrf.mxu1  ;;  %s7130_s23 = sshll.u32 %s7127_s19, 4  ;;  %s7131_s23 = int_to_ptr.hbm [resolvable:$true] %s7130_s23 }
 0x5d6   : > { %v4479_v58 = vadd.f32 %v4478_v12, %v13239_v33  ;;  %v5190_v52 = vpop.f32.mrf.mxu3  ;;  %v4828_v33 = vpop.permute.xlu1 %4827  ;;  %6591 = vmatpush.msra.mxu0 %v9127_v46  ;;  %s9159_s26 = sshra.s32 %s7131_s23, 4  ;;  %s9160_s26 = int_to_ptr.hbm [resolvable:$true] %s9159_s26 }
 0x5d7   : > { %8340 = vmatmul.msk.f32.vlgmr.msrb.gmra.mxu0 %vm1310_vm10, %v5188_v6  ;;  %v13746_v28 = vpop.permute.xlu2 %5539  ;;  %vm4904_vm13 = vcmp.eq.s32.totalorder %v9729_v22, %v4828_v33  ;;  %vm4903_vm14 = vcmp.eq.s32.totalorder %v9645_v61, %v4828_v33  ;;  %s9161_s27 = scalar_lea.hbm %s9160_s26, 256  ;;  %p9166_p1 = scmp.lt.s32.totalorder %s9160_s26, %s14851_s3 }
 0x5d8   : > { %8193 = vmatmul.msk.f32.gmra.mxu1 %vm1310_vm10, %v4479_v58  ;;  %6592 = vmatpush.msra.mxu0 %v9128_v56  ;;  %p9162_p12 = scmp.ne.s32.totalorder %s9160_s26, %s9161_s27  ;;  %p9167_p2 = scmp.lt.s32.totalorder %s9165_s30, %s9161_s27 }
 0x5d9   : > { %8289 = vmatmul.msk.f32.gmra.mxu2 %vm4899_vm11, %v14940_v2  ;;  %5623 = vperm.xlu1 %8906, %v13422_v36   ;;  %v13754_v36 = vpop.permute.xlu0 %5536 }
 0x5da   : > { %8322 = vmatmul.msk.f32.gmra.mxu3 %vm4902_vm9, %v14940_v2  ;;  %p9163_p13 = pnand %p9162_p12, %p9297_p4  ;;  %p9168_p3 = por %p9167_p2, %p9166_p1 }
 0x5db   : > { %5617 = vperm.xlu2 %8904, %v13536_v11  }
 0x5dc   : > { %v5077_v50 = vpop.f32.mrf.mxu2  ;;  %p9164_p0 = pneg %p9163_p13 }
 0x5dd   : > { %v5191_v29 = vadd.f32 %v5190_v52, %v5077_v50  ;;  %v4481_v45 = vpop.f32.mrf.mxu0  ;;  %v13742_v26 = vpop.f32.mrf.mxu1 }
 0x5de   : > { %v4482_v59 = vadd.f32 %v4481_v45, %v13278_v17  ;;  %v5193_v20 = vpop.f32.mrf.mxu3  ;;  %v4831_v18 = vpop.permute.xlu1 %4830  ;;  %p9169_p5 = pnand %p9168_p3, %p9164_p0 }
 0x5df   : > { %8341 = vmatmul.msk.f32.gmra.mxu0 %vm1310_vm10, %v5191_v29  ;;  %vm4906_vm15 = vcmp.eq.s32.totalorder %v9729_v22, %v4831_v18  ;;  %v13763_v58 = vpop.permute.xlu2 %5542  ;;  %vm4905_vm0 = vcmp.eq.s32.totalorder %v9645_v61, %v4831_v18 }
 0x5e0   : > { %8194 = vmatmul.msk.f32.gmra.mxu1 %vm1310_vm10, %v4482_v59 }
 0x5e1   : > { %8290 = vmatmul.msk.f32.gmra.mxu2 %vm4901_vm12, %v14940_v2  ;;  %v4834_v32 = vpop.permute.xlu0 %4833 }
 0x5e2   : > { %8323 = vmatmul.msk.f32.gmra.mxu3 %vm4904_vm13, %v14940_v2  ;;  %vm4908_vm1 = vcmp.eq.s32.totalorder %v9729_v22, %v4834_v32  ;;  %vm4907_vm2 = vcmp.eq.s32.totalorder %v9645_v61, %v4834_v32 }
 0x5e4   : > { %v5080_v17 = vpop.f32.mrf.mxu2 }
 0x5e5   : > { %v5194_v42 = vadd.f32 %v5193_v20, %v5080_v17  ;;  %v4484_v39 = vpop.f32.mrf.mxu0  ;;  %v13756_v53 = vpop.f32.mrf.mxu1 }
 0x5e6   : > { %v4485_v6 = vadd.f32 %v4484_v39, %v13308_v34  ;;  %v5196_v12 = vpop.f32.mrf.mxu3  ;;  %v13771_v29 = vpop.permute.xlu1 %5545 }
 0x5e7   : > { %8342 = vmatmul.msk.f32.gmra.mxu0 %vm1310_vm10, %v5194_v42  ;;  %v4837_v45 = vpop.permute.xlu2 %4836 }
 0x5e8   : > { %8195 = vmatmul.msk.f32.gmra.mxu1 %vm1310_vm10, %v4485_v6  ;;  %vm4910_vm3 = vcmp.eq.s32.totalorder %v9729_v22, %v4837_v45  ;;  %vm4909_vm4 = vcmp.eq.s32.totalorder %v9645_v61, %v4837_v45 }
 0x5e9   : > { %8291 = vmatmul.msk.f32.gmra.mxu2 %vm4903_vm14, %v14940_v2 }
 0x5ea   : > { %8324 = vmatmul.msk.f32.gmra.mxu3 %vm4906_vm15, %v14940_v2 }
 0x5ec   : > { %v5083_v52 = vpop.f32.mrf.mxu2 }
 0x5ed   : > { %v5197_v40 = vadd.f32 %v5196_v12, %v5083_v52  ;;  %v4487_v50 = vpop.f32.mrf.mxu0  ;;  %v13767_v34 = vpop.f32.mrf.mxu1 }
 0x5ee   : > { %v4488_v33 = vadd.f32 %v4487_v50, %v13345_v0  ;;  %v5199_v46 = vpop.f32.mrf.mxu3  ;;  %v13785_v42 = vpop.permute.xlu1 %5548 }
 0x5ef   : > { %8343 = vmatmul.msk.f32.gmra.mxu0 %vm1310_vm10, %v5197_v40  ;;  %v4840_v6 = vpop.permute.xlu2 %4839 }
 0x5f0   : > { %8196 = vmatmul.msk.f32.gmra.mxu1 %vm1310_vm10, %v4488_v33  ;;  %vm4912_vm5 = vcmp.eq.s32.totalorder %v9729_v22, %v4840_v6  ;;  %vm4911_vm6 = vcmp.eq.s32.totalorder %v9645_v61, %v4840_v6 }
 0x5f1   : > { %8292 = vmatmul.msk.f32.gmra.mxu2 %vm4905_vm0, %v14940_v2 }
 0x5f2   : > { %8325 = vmatmul.msk.f32.gmra.mxu3 %vm4908_vm1, %v14940_v2 }
 0x5f4   : > { %v5086_v59 = vpop.f32.mrf.mxu2 }
 0x5f5   : > { %v5200_v20 = vadd.f32 %v5199_v46, %v5086_v59  ;;  %v4490_v56 = vpop.f32.mrf.mxu0  ;;  %v13778_v0 = vpop.f32.mrf.mxu1 }
 0x5f6   : > { %v4491_v17 = vadd.f32 %v4490_v56, %v13387_v47  ;;  %v5202_v18 = vpop.f32.mrf.mxu3  ;;  %v4843_v50 = vpop.permute.xlu1 %4842 }
 0x5f7   : > { %8344 = vmatmul.msk.f32.gmra.mxu0 %vm1310_vm10, %v5200_v20  ;;  %v13802_v45 = vpop.permute.xlu2 %5554  ;;  %vm4914_vm7 = vcmp.eq.s32.totalorder %v9729_v22, %v4843_v50  ;;  %vm4913_vm8 = vcmp.eq.s32.totalorder %v9645_v61, %v4843_v50 }
 0x5f8   : > { %8197 = vmatmul.msk.f32.gmra.mxu1 %vm1310_vm10, %v4491_v17  ;;  %v13809_v17 = vpop.permute.xlu0 %5551 }
 0x5f9   : > { %8293 = vmatmul.msk.f32.gmra.mxu2 %vm4907_vm2, %v14940_v2 }
 0x5fa   : > { %8326 = vmatmul.msk.f32.gmra.mxu3 %vm4910_vm3, %v14940_v2 }
 0x5fc   : > { %v5089_v39 = vpop.f32.mrf.mxu2 }
 0x5fd   : > { %v5203_v12 = vadd.f32 %v5202_v18, %v5089_v39  ;;  %v4493_v52 = vpop.f32.mrf.mxu0  ;;  %v13789_v47 = vpop.f32.mrf.mxu1 }
 0x5fe   : > { %v4494_v32 = vadd.f32 %v4493_v52, %v13425_v8  ;;  %v5205_v40 = vpop.f32.mrf.mxu3  ;;  %v4846_v39 = vpop.permute.xlu1 %4845 }
 0x5ff   : > { %8345 = vmatmul.msk.f32.gmra.mxu0 %vm1310_vm10, %v5203_v12  ;;  %vm4916_vm9 = vcmp.eq.s32.totalorder %v9729_v22, %v4846_v39  ;;  %vm4915_vm11 = vcmp.eq.s32.totalorder %v9645_v61, %v4846_v39 }
 0x600   : > { %8198 = vmatmul.msk.f32.gmra.mxu1 %vm1310_vm10, %v4494_v32 }
 0x601   : > { %8294 = vmatmul.msk.f32.gmra.mxu2 %vm4909_vm4, %v14940_v2 }
 0x602   : > { %8327 = vmatmul.msk.f32.gmra.mxu3 %vm4912_vm5, %v14940_v2 }
 0x604   : > { %v5092_v33 = vpop.f32.mrf.mxu2 }
 0x605   : > { %v5206_v46 = vadd.f32 %v5205_v40, %v5092_v33  ;;  %v4496_v59 = vpop.f32.mrf.mxu0  ;;  %v13798_v20 = vpop.f32.mrf.mxu1 }
 0x606   : > { %v4497_v8 = vadd.f32 %v4496_v59, %v13456_v30  ;;  %v5208_v56 = vpop.f32.mrf.mxu3  ;;  %v13818_v40 = vpop.permute.xlu2 %5557 }
 0x607   : > { %8346 = vmatmul.msk.f32.gmra.mxu0 %vm1310_vm10, %v5206_v46  ;;  %v4849_v46 = vpop.permute.xlu0 %4848 }
 0x608   : > { %8199 = vmatmul.msk.f32.gmra.mxu1 %vm1310_vm10, %v4497_v8  ;;  %vm4918_vm12 = vcmp.eq.s32.totalorder %v9729_v22, %v4849_v46  ;;  %vm4917_vm13 = vcmp.eq.s32.totalorder %v9645_v61, %v4849_v46 }
 0x609   : > { %8295 = vmatmul.msk.f32.gmra.mxu2 %vm4911_vm6, %v14940_v2 }
 0x60a   : > { %8328 = vmatmul.msk.f32.gmra.mxu3 %vm4914_vm7, %v14940_v2 }
 0x60c   : > { %v5095_v18 = vpop.f32.mrf.mxu2 }
 0x60d   : > { %v5209_v30 = vadd.f32 %v5208_v56, %v5095_v18  ;;  %v4499_v12 = vpop.f32.mrf.mxu0  ;;  %v13811_v52 = vpop.f32.mrf.mxu1 }
 0x60e   : > { %v4500_v6 = vadd.f32 %v4499_v12, %v13487_v10  ;;  %v5211_v32 = vpop.f32.mrf.mxu3  ;;  %v13826_v18 = vpop.permute.xlu1 %5560 }
 0x60f   : > { %8347 = vmatmul.msk.f32.gmra.mxu0 %vm1310_vm10, %v5209_v30  ;;  %v4852_v30 = vpop.permute.xlu2 %4851 }
 0x610   : > { %8200 = vmatmul.msk.f32.gmra.mxu1 %vm1310_vm10, %v4500_v6  ;;  %vm4920_vm14 = vcmp.eq.s32.totalorder %v9729_v22, %v4852_v30  ;;  %vm4919_vm15 = vcmp.eq.s32.totalorder %v9645_v61, %v4852_v30  ;;  %v13862_v30 = vpop.permute.xlu0 %5566 }
 0x611   : > { %8296 = vmatmul.msk.f32.gmra.mxu2 %vm4913_vm8, %v14940_v2  ;;  %vm5625_vm8 = vcmp.eq.s32.totalorder %v9645_v61, %v13706_v62 }
 0x612   : > { %8329 = vmatmul.msk.f32.gmra.mxu3 %vm4916_vm9, %v14940_v2  ;;  %vm5626_vm9 = vcmp.eq.s32.totalorder %v9729_v22, %v13706_v62  ;;  %v9132_v62 = vld [vmem:[%s14849_s1 + $0x18] sm:$0xff] }
 0x614   : > { %v5098_v33 = vpop.f32.mrf.mxu2 }
 0x615   : > { %v5212_v59 = vadd.f32 %v5211_v32, %v5098_v33  ;;  %v4502_v8 = vpop.f32.mrf.mxu0  ;;  %v13822_v10 = vpop.f32.mrf.mxu1 }
 0x616   : > { %v4503_v50 = vadd.f32 %v4502_v8, %v13518_v19  ;;  %v5214_v56 = vpop.f32.mrf.mxu3 }
 0x617   : > { %8348 = vmatmul.msk.f32.gmra.mxu0 %vm1310_vm10, %v5212_v59  ;;  %v13840_v59 = vpop.permute.xlu1 %5563 }
 0x618   : > { %8201 = vmatmul.msk.f32.gmra.mxu1 %vm1310_vm10, %v4503_v50  ;;  %v4855_v50 = vpop.permute.xlu2 %4854 }
 0x619   : > { %8297 = vmatmul.msk.f32.gmra.mxu2 %vm4915_vm11, %v14940_v2  ;;  %vm4922_vm0 = vcmp.eq.s32.totalorder %v9729_v22, %v4855_v50  ;;  %vm4921_vm1 = vcmp.eq.s32.totalorder %v9645_v61, %v4855_v50  ;;  %vm5627_vm11 = vcmp.eq.s32.totalorder %v9645_v61, %v13720_v21 }
 0x61a   : > { %8330 = vmatmul.msk.f32.gmra.mxu3 %vm4918_vm12, %v14940_v2  ;;  %vm5628_vm12 = vcmp.eq.s32.totalorder %v9729_v22, %v13720_v21 }
 0x61c   : > { %v5101_v12 = vpop.f32.mrf.mxu2 }
 0x61d   : > { %v5215_v6 = vadd.f32 %v5214_v56, %v5101_v12  ;;  %v4505_v32 = vpop.f32.mrf.mxu0  ;;  %v13833_v19 = vpop.f32.mrf.mxu1 }
 0x61e   : > { %v4506_v39 = vadd.f32 %v4505_v32, %v13549_v44  ;;  %v5217_v33 = vpop.f32.mrf.mxu3 }
 0x61f   : > { %8349 = vmatmul.msk.f32.gmra.mxu0 %vm1310_vm10, %v5215_v6  ;;  %v4858_v6 = vpop.permute.xlu1 %4857 }
 0x620   : > { %8202 = vmatmul.msk.f32.gmra.mxu1 %vm1310_vm10, %v4506_v39  ;;  %vm4924_vm2 = vcmp.eq.s32.totalorder %v9729_v22, %v4858_v6  ;;  %vm4923_vm3 = vcmp.eq.s32.totalorder %v9645_v61, %v4858_v6 }
 0x621   : > { %8298 = vmatmul.msk.f32.gmra.mxu2 %vm4917_vm13, %v14940_v2  ;;  %vm5629_vm13 = vcmp.eq.s32.totalorder %v9645_v61, %v13754_v36 }
 0x622   : > { %8331 = vmatmul.msk.f32.gmra.mxu3 %vm4920_vm14, %v14940_v2  ;;  %vm5630_vm14 = vcmp.eq.s32.totalorder %v9729_v22, %v13754_v36 }
 0x624   : > { %v5104_v8 = vpop.f32.mrf.mxu2 }
 0x625   : > { %v5218_v56 = vadd.f32 %v5217_v33, %v5104_v8  ;;  %v4508_v12 = vpop.f32.mrf.mxu0  ;;  %v13844_v44 = vpop.f32.mrf.mxu1 }
 0x626   : > { %v4509_v46 = vadd.f32 %v4508_v12, %v13580_v7  ;;  %v5220_v32 = vpop.f32.mrf.mxu3 }
 0x627   : > { %8350 = vmatmul.msk.f32.gmra.mxu0 %vm1310_vm10, %v5218_v56 }
 0x628   : > { %8203 = vmatmul.msk.f32.gmra.mxu1 %vm1310_vm10, %v4509_v46  ;;  %v4861_v46 = vpop.permute.xlu1 %4860 }
 0x629   : > { %8299 = vmatmul.msk.f32.gmra.mxu2 %vm4919_vm15, %v14940_v2  ;;  %vm4926_vm4 = vcmp.eq.s32.totalorder %v9729_v22, %v4861_v46  ;;  %vm4925_vm5 = vcmp.eq.s32.totalorder %v9645_v61, %v4861_v46  ;;  %v9234_v46 = vmov 8   ;;  %vm5631_vm15 = vcmp.eq.s32.totalorder %v9645_v61, %v13746_v28 }
 0x62a   : > { %8332 = vmatmul.msk.f32.gmra.mxu3 %vm4922_vm0, %v14940_v2  ;;  %8909 = vset.pattern.permute.xlu0 %v9234_v46  ;;  %vm5632_vm0 = vcmp.eq.s32.totalorder %v9729_v22, %v13746_v28 }
 0x62b   : > { %8910 = vset.pattern.permute.xlu1 %v9234_v46  ;;  %8908 = vset.pattern.permute.xlu2 %v9234_v46 }
 0x62c   : > { %v5107_v39 = vpop.f32.mrf.mxu2 }
 0x62d   : > { %v5221_v33 = vadd.f32 %v5220_v32, %v5107_v39  ;;  %v4511_v8 = vpop.f32.mrf.mxu0  ;;  %v13853_v14 = vpop.f32.mrf.mxu1 }
 0x62e   : > { %v4512_v7 = vadd.f32 %v4511_v8, %v13610_v38  ;;  %v5223_v12 = vpop.f32.mrf.mxu3 }
 0x62f   : > { %8351 = vmatmul.msk.f32.gmra.mxu0 %vm1310_vm10, %v5221_v33 }
 0x630   : > { %8204 = vmatmul.msk.f32.gmra.mxu1 %vm1310_vm10, %v4512_v7  ;;  %v4864_v7 = vpop.permute.xlu0 %4863 }
 0x631   : > { %8300 = vmatmul.msk.f32.gmra.mxu2 %vm4921_vm1, %v14940_v2  ;;  %vm4928_vm6 = vcmp.eq.s32.totalorder %v9729_v22, %v4864_v7  ;;  %vm4927_vm7 = vcmp.eq.s32.totalorder %v9645_v61, %v4864_v7  ;;  %vm5633_vm1 = vcmp.eq.s32.totalorder %v9645_v61, %v13763_v58 }
 0x632   : > { %8333 = vmatmul.msk.f32.gmra.mxu3 %vm4924_vm2, %v14940_v2  ;;  %vm5634_vm2 = vcmp.eq.s32.totalorder %v9729_v22, %v13763_v58  ;;  %v9136_v58 = vld [vmem:[%s14849_s1 + $0x98] sm:$0xff] }
 0x634   : > { %v5110_v56 = vpop.f32.mrf.mxu2 }
 0x635   : > { %v5224_v32 = vadd.f32 %v5223_v12, %v5110_v56  ;;  %v4514_v39 = vpop.f32.mrf.mxu0  ;;  %v13864_v38 = vpop.f32.mrf.mxu1 }
 0x636   : > { %v4515_v50 = vadd.f32 %v4514_v39, %v13642_v5  ;;  %v5226_v8 = vpop.f32.mrf.mxu3 }
 0x637   : > { %8352 = vmatmul.msk.f32.gmra.mxu0 %vm1310_vm10, %v5224_v32 }
 0x638   : > { %8205 = vmatmul.msk.f32.gmra.mxu1 %vm1310_vm10, %v4515_v50 }
 0x639   : > { %8301 = vmatmul.msk.f32.gmra.mxu2 %vm4923_vm3, %v14940_v2  ;;  %vm5635_vm3 = vcmp.eq.s32.totalorder %v9645_v61, %v13771_v29 }
 0x63a   : > { %8334 = vmatmul.msk.f32.gmra.mxu3 %vm4926_vm4, %v14940_v2  ;;  %vm5636_vm4 = vcmp.eq.s32.totalorder %v9729_v22, %v13771_v29 }
 0x63c   : > { %v5113_v33 = vpop.f32.mrf.mxu2 }
 0x63d   : > { %v5227_v12 = vadd.f32 %v5226_v8, %v5113_v33  ;;  %v4517_v56 = vpop.f32.mrf.mxu0  ;;  %v13873_v9 = vpop.f32.mrf.mxu1 }
 0x63e   : > { %v4518_v5 = vadd.f32 %v4517_v56, %v13667_v55  ;;  %v5229_v39 = vpop.f32.mrf.mxu3 }
 0x63f   : > { %8353 = vmatmul.msk.f32.gmra.mxu0 %vm1310_vm10, %v5227_v12  ;;  %v9129_v12 = vld [vmem:[%s14849_s1 + $0x8] sm:$0xff] }
 0x640   : > { %8206 = vmatmul.msk.f32.gmra.mxu1 %vm1310_vm10, %v4518_v5  ;;  %6293 = vperm.xlu0 %8909, %v9129_v12  }
 0x641   : > { %8302 = vmatmul.msk.f32.gmra.mxu2 %vm4925_vm5, %v14940_v2  ;;  %vm5637_vm5 = vcmp.eq.s32.totalorder %v9645_v61, %v13785_v42 }
 0x642   : > { %8335 = vmatmul.msk.f32.gmra.mxu3 %vm4928_vm6, %v14940_v2  ;;  %vm5638_vm6 = vcmp.eq.s32.totalorder %v9729_v22, %v13785_v42 }
 0x644   : > { %v5116_v6 = vpop.f32.mrf.mxu2 }
 0x645   : > { %v5230_v32 = vadd.f32 %v5229_v39, %v5116_v6  ;;  %v4520_v50 = vpop.f32.mrf.mxu0  ;;  %v13882_v8 = vpop.f32.mrf.mxu1  ;;  %v9131_v39 = vld [vmem:[%s14849_s1] sm:$0xff] }
 0x646   : > { %v4521_v55 = vadd.f32 %v4520_v50, %v13689_v37  ;;  %v5232_v33 = vpop.f32.mrf.mxu3  ;;  %v9130_v37 = vld [vmem:[%s14849_s1 + $0x10] sm:$0xff]  ;;  %6290 = vperm.xlu2 %8908, %v9131_v39  }
 0x647   : > { %8354 = vmatmul.msk.f32.gmra.mxu0 %vm1310_vm10, %v5230_v32  ;;  %6296 = vperm.xlu1 %8910, %v9130_v37  }
 0x648   : > { %8207 = vmatmul.msk.f32.gmra.mxu1 %vm1310_vm10, %v4521_v55  ;;  %6308 = vperm.xlu0 %8909, %v13350_v51   ;;  %v9133_v51 = vld [vmem:[%s14849_s1 + $0x38] sm:$0xff] }
 0x649   : > { %8303 = vmatmul.msk.f32.gmra.mxu2 %vm4927_vm7, %v14940_v2  ;;  %vm5639_vm7 = vcmp.eq.s32.totalorder %v9645_v61, %v13809_v17 }
 0x64c   : > { %v5119_v7 = vpop.f32.mrf.mxu2 }
 0x64d   : > { %v5233_v56 = vadd.f32 %v5232_v33, %v5119_v7  ;;  %v13897_v5 = vpop.f32.mrf.mxu1  ;;  %v9134_v7 = vld [vmem:[%s14849_s1 + $0x28] sm:$0xff] }
 0x64e   : > { %v5235_v6 = vpop.f32.mrf.mxu3  ;;  %6299 = vperm.xlu2 %8908, %v9132_v62  }
 0x64f   : > { %8355 = vmatmul.msk.f32.gmra.mxu0 %vm1310_vm10, %v5233_v56  ;;  %6302 = vperm.xlu1 %8910, %v13321_v63  }
 0x650   : > { %8436 = vmatmul.msk.f32.vlgmr.msrb.gmra.mxu1 %vm5625_vm8, %v14940_v2  ;;  %6317 = vperm.xlu0 %8909, %v13480_v24   ;;  %vm5640_vm8 = vcmp.eq.s32.totalorder %v9729_v22, %v13809_v17 }
 0x651   : > { %8468 = vmatmul.msk.f32.vlgmr.msrb.gmra.mxu2 %vm5626_vm9, %v14940_v2  ;;  %vm5641_vm9 = vcmp.eq.s32.totalorder %v9645_v61, %v13802_v45 }
 0x654   : > { %v5122_v32 = vpop.f32.mrf.mxu2  ;;  %v13909_v50 = vpop.f32.mrf.mxu0 }
 0x655   : > { %v5236_v55 = vadd.f32 %v5235_v6, %v5122_v32  ;;  %v13913_v33 = vpop.f32.mrf.mxu1 }
 0x656   : > { %15393 = vst [vmem:[#allocation116_spill] sm:$0xff] %v13913_v33  ;;  %v5238_v63 = vpop.f32.mrf.mxu3  ;;  %6305 = vperm.xlu2 %8908, %v9134_v7  }
 0x657   : > { %8356 = vmatmul.msk.f32.gmra.mxu0 %vm1310_vm10, %v5236_v55  ;;  %6311 = vperm.xlu1 %8910, %v9133_v51   ;;  %v9137_v51 = vld [vmem:[%s14849_s1 + $0xa8] sm:$0xff] }
 0x658   : > { %8437 = vmatmul.msk.f32.gmra.mxu1 %vm5627_vm11, %v14940_v2  ;;  %6326 = vperm.xlu0 %8909, %v13381_v13   ;;  %vm5642_vm11 = vcmp.eq.s32.totalorder %v9729_v22, %v13802_v45  ;;  %v9143_v45 = vld [vmem:[%s14849_s1 + $0xd0] sm:$0xff] }
 0x659   : > { %8469 = vmatmul.msk.f32.gmra.mxu2 %vm5628_vm12, %v14940_v2  ;;  %vm5643_vm12 = vcmp.eq.s32.totalorder %v9645_v61, %v13818_v40 }
 0x65c   : > { %v5125_v46 = vpop.f32.mrf.mxu2  ;;  %v13927_v12 = vpop.f32.mrf.mxu0 }
 0x65d   : > { %v5239_v21 = vadd.f32 %v5238_v63, %v5125_v46  ;;  %v13931_v37 = vpop.f32.mrf.mxu1 }
 0x65e   : > { %15394 = vst [vmem:[#allocation78_spill] sm:$0xff] %v13931_v37  ;;  %v5241_v56 = vpop.f32.mrf.mxu3  ;;  %6314 = vperm.xlu2 %8908, %v13448_v1  }
 0x65f   : > { %8357 = vmatmul.msk.f32.gmra.mxu0 %vm1310_vm10, %v5239_v21  ;;  %6320 = vperm.xlu1 %8910, %v13470_v54  }
 0x660   : > { %8438 = vmatmul.msk.f32.gmra.mxu1 %vm5629_vm13, %v14940_v2  ;;  %6335 = vperm.xlu0 %8909, %v13599_v16   ;;  %vm5644_vm13 = vcmp.eq.s32.totalorder %v9729_v22, %v13818_v40 }
 0x661   : > { %8470 = vmatmul.msk.f32.gmra.mxu2 %vm5630_vm14, %v14940_v2  ;;  %vm5645_vm14 = vcmp.eq.s32.totalorder %v9645_v61, %v13826_v18 }
 0x664   : > { %v5128_v24 = vpop.f32.mrf.mxu2  ;;  %v13943_v39 = vpop.f32.mrf.mxu0 }
 0x665   : > { %v5242_v6 = vadd.f32 %v5241_v56, %v5128_v24  ;;  %v13947_v32 = vpop.f32.mrf.mxu1  ;;  %v14003_v56 = vpop.permute.xlu2 %5569  ;;  %v9138_v24 = vld [vmem:[%s14849_s1 + $0xb0] sm:$0xff] }
 0x666   : > { %15395 = vst [vmem:[#allocation117_spill] sm:$0xff] %v13947_v32  ;;  %v5244_v36 = vpop.f32.mrf.mxu3  ;;  %6323 = vperm.xlu2 %8908, %v13500_v35  }
 0x667   : > { %8358 = vmatmul.msk.f32.gmra.mxu0 %vm1310_vm10, %v5242_v6  ;;  %6329 = vperm.xlu1 %8910, %v13575_v27   ;;  %v9135_v27 = vld [vmem:[%s14849_s1 + $0x90] sm:$0xff] }
 0x668   : > { %8439 = vmatmul.msk.f32.gmra.mxu1 %vm5631_vm15, %v14940_v2  ;;  %6344 = vperm.xlu0 %8909, %v9135_v27   ;;  %v9141_v27 = vld [vmem:[%s14849_s1 + $0xc8] sm:$0xff]  ;;  %vm5646_vm15 = vcmp.eq.s32.totalorder %v9729_v22, %v13826_v18 }
 0x669   : > { %8471 = vmatmul.msk.f32.gmra.mxu2 %vm5632_vm0, %v14940_v2  ;;  %vm5647_vm0 = vcmp.eq.s32.totalorder %v9645_v61, %v13840_v59 }
 0x66c   : > { %v5131_v13 = vpop.f32.mrf.mxu2  ;;  %v13957_v54 = vpop.f32.mrf.mxu0 }
 0x66d   : > { %v5245_v55 = vadd.f32 %v5244_v36, %v5131_v13  ;;  %v13959_v62 = vpop.f32.mrf.mxu1 }
 0x66e   : > { %15396 = vst [vmem:[#allocation118_spill] sm:$0xff] %v13959_v62  ;;  %v5247_v1 = vpop.f32.mrf.mxu3  ;;  %6332 = vperm.xlu2 %8908, %v13605_v41  }
 0x66f   : > { %8359 = vmatmul.msk.f32.gmra.mxu0 %vm1310_vm10, %v5245_v55  ;;  %6338 = vperm.xlu1 %8910, %v13637_v60   ;;  %v9140_v55 = vld [vmem:[%s14849_s1 + $0xa0] sm:$0xff] }
 0x670   : > { %8440 = vmatmul.msk.f32.gmra.mxu1 %vm5633_vm1, %v14940_v2  ;;  %6353 = vperm.xlu0 %8909, %v9137_v51   ;;  %vm5648_vm1 = vcmp.eq.s32.totalorder %v9729_v22, %v13840_v59  ;;  %v8503_v59 = vld [vmem:[%s14850_s2 + $0xf8] sm:$0xff] }
 0x671   : > { %8472 = vmatmul.msk.f32.gmra.mxu2 %vm5634_vm2, %v14940_v2  ;;  %vm5649_vm2 = vcmp.eq.s32.totalorder %v9645_v61, %v13862_v30  ;;  %6156 = vmatpush.msra.mxu3 %v8503_v59 }
 0x674   : > { %v5134_v35 = vpop.f32.mrf.mxu2  ;;  %v13973_v16 = vpop.f32.mrf.mxu0 }
 0x675   : > { %v5248_v28 = vadd.f32 %v5247_v1, %v5134_v35  ;;  %v13977_v63 = vpop.f32.mrf.mxu1 }
 0x676   : > { %15397 = vst [vmem:[#allocation66_spill] sm:$0xff] %v13977_v63  ;;  %v5250_v60 = vpop.f32.mrf.mxu3  ;;  %6341 = vperm.xlu2 %8908, %v13631_v25   ;;  %v9139_v25 = vld [vmem:[%s14849_s1 + $0xc0] sm:$0xff] }
 0x677   : > { %8360 = vmatmul.msk.f32.gmra.mxu0 %vm1310_vm10, %v5248_v28  ;;  %6347 = vperm.xlu1 %8910, %v9136_v58   ;;  %v14031_v28 = vpop.permute.xlu2 %5572  ;;  %v9142_v58 = vld [vmem:[%s14849_s1 + $0xb8] sm:$0xff] }
 0x678   : > { %8441 = vmatmul.msk.f32.gmra.mxu1 %vm5635_vm3, %v14940_v2  ;;  %6362 = vperm.xlu0 %8909, %v9139_v25   ;;  %vm5650_vm3 = vcmp.eq.s32.totalorder %v9729_v22, %v13862_v30  ;;  %v8667_v30 = vld [vmem:[%s14850_s2 + $0x118] sm:$0xff] }
 0x679   : > { %8473 = vmatmul.msk.f32.gmra.mxu2 %vm5636_vm4, %v14940_v2  ;;  %vm5651_vm4 = vcmp.eq.s32.totalorder %v9645_v61, %v14003_v56 }
 0x67a   : > { %6916 = vmatpush.msra.mxu2 %v8667_v30 }
 0x67c   : > { %v5137_v41 = vpop.f32.mrf.mxu2  ;;  %v13991_v46 = vpop.f32.mrf.mxu0 }
 0x67d   : > { %v5251_v29 = vadd.f32 %v5250_v60, %v5137_v41  ;;  %v13993_v21 = vpop.f32.mrf.mxu1 }
 0x67e   : > { %15398 = vst [vmem:[#allocation39_spill] sm:$0xff] %v13993_v21  ;;  %v5253_v7 = vpop.f32.mrf.mxu3  ;;  %6350 = vperm.xlu2 %8908, %v9140_v55  }
 0x67f   : > { %8361 = vmatmul.msk.f32.gmra.mxu0 %vm1310_vm10, %v5251_v29  ;;  %6356 = vperm.xlu1 %8910, %v9138_v24   ;;  %v14054_v25 = vpop.permute.xlu2 %5578 }
 0x680   : > { %8442 = vmatmul.msk.f32.gmra.mxu1 %vm5637_vm5, %v14940_v2  ;;  %6371 = vperm.xlu0 %8909, %v13513_v49   ;;  %vm5652_vm5 = vcmp.eq.s32.totalorder %v9729_v22, %v14003_v56 }
 0x681   : > { %8474 = vmatmul.msk.f32.gmra.mxu2 %vm5638_vm6, %v14940_v2  ;;  %vm5653_vm6 = vcmp.eq.s32.totalorder %v9645_v61, %v14031_v28 }
 0x684   : > { %v5140_v6 = vpop.f32.mrf.mxu2  ;;  %v14013_v36 = vpop.f32.mrf.mxu0 }
 0x685   : > { %v5254_v42 = vadd.f32 %v5253_v7, %v5140_v6  ;;  %v14015_v13 = vpop.f32.mrf.mxu1  ;;  %v14066_v6 = vpop.permute.xlu1 %5575 }
 0x686   : > { %15399 = vst [vmem:[#allocation120_spill] sm:$0xff] %v14015_v13  ;;  %v5256_v1 = vpop.f32.mrf.mxu3  ;;  %6359 = vperm.xlu2 %8908, %v9142_v58  }
 0x687   : > { %8362 = vmatmul.msk.f32.gmra.mxu0 %vm1310_vm10, %v5254_v42  ;;  %6365 = vperm.xlu1 %8910, %v9141_v27   ;;  %v14077_v27 = vpop.permute.xlu2 %5584 }
 0x688   : > { %8443 = vmatmul.msk.f32.gmra.mxu1 %vm5639_vm7, %v14940_v2  ;;  %6380 = vperm.xlu0 %8909, %v13554_v43   ;;  %v9144_v43 = vld [vmem:[%s14849_s1 + $0xf8] sm:$0xff]  ;;  %vm5654_vm7 = vcmp.eq.s32.totalorder %v9729_v22, %v14031_v28 }
 0x689   : > { %8475 = vmatmul.msk.f32.gmra.mxu2 %vm5640_vm8, %v14940_v2  ;;  %vm5655_vm8 = vcmp.eq.s32.totalorder %v9645_v61, %v14066_v6 }
 0x68c   : > { %v5143_v35 = vpop.f32.mrf.mxu2  ;;  %v14040_v41 = vpop.f32.mrf.mxu0 }
 0x68d   : > { %v5257_v17 = vadd.f32 %v5256_v1, %v5143_v35  ;;  %v14033_v60 = vpop.f32.mrf.mxu1 }
 0x68e   : > { %15400 = vst [vmem:[#allocation65_spill] sm:$0xff] %v14033_v60  ;;  %v5259_v51 = vpop.f32.mrf.mxu3  ;;  %6368 = vperm.xlu2 %8908, %v9143_v45  }
 0x68f   : > { %8363 = vmatmul.msk.f32.gmra.mxu0 %vm1310_vm10, %v5257_v17  ;;  %6374 = vperm.xlu1 %8910, %v13544_v3   ;;  %v14093_v18 = vpop.permute.xlu2 %5593 }
 0x690   : > { %8444 = vmatmul.msk.f32.gmra.mxu1 %vm5641_vm9, %v14940_v2  ;;  %vm5656_vm9 = vcmp.eq.s32.totalorder %v9729_v22, %v14066_v6 }
 0x691   : > { %8476 = vmatmul.msk.f32.gmra.mxu2 %vm5642_vm11, %v14940_v2  ;;  %vm5657_vm11 = vcmp.eq.s32.totalorder %v9645_v61, %v14054_v25 }
 0x694   : > { %v5146_v49 = vpop.f32.mrf.mxu2  ;;  %v14060_v3 = vpop.f32.mrf.mxu0 }
 0x695   : > { %v5260_v29 = vadd.f32 %v5259_v51, %v5146_v49  ;;  %v14047_v7 = vpop.f32.mrf.mxu1  ;;  %v14084_v49 = vpop.permute.xlu1 %5581 }
 0x696   : > { %15401 = vst [vmem:[#allocation121_spill] sm:$0xff] %v14047_v7  ;;  %v5262_v24 = vpop.f32.mrf.mxu3  ;;  %6377 = vperm.xlu2 %8908, %v13536_v11  }
 0x697   : > { %8364 = vmatmul.msk.f32.gmra.mxu0 %vm1310_vm10, %v5260_v29  ;;  %6383 = vperm.xlu1 %8910, %v9144_v43  }
 0x698   : > { %8445 = vmatmul.msk.f32.gmra.mxu1 %vm5643_vm12, %v14940_v2  ;;  %vm5658_vm12 = vcmp.eq.s32.totalorder %v9729_v22, %v14054_v25 }
 0x699   : > { %8477 = vmatmul.msk.f32.gmra.mxu2 %vm5644_vm13, %v14940_v2 }
 0x69c   : > { %v5149_v42 = vpop.f32.mrf.mxu2  ;;  %v14080_v35 = vpop.f32.mrf.mxu0 }
 0x69d   : > { %v5263_v55 = vadd.f32 %v5262_v24, %v5149_v42  ;;  %v14070_v1 = vpop.f32.mrf.mxu1 }
 0x69e   : > { %15402 = vst [vmem:[#allocation80_spill] sm:$0xff] %v14070_v1  ;;  %v5265_v40 = vpop.f32.mrf.mxu3 }
 0x69f   : > { %8365 = vmatmul.msk.f32.gmra.mxu0 %vm1310_vm10, %v5263_v55  ;;  %v14107_v55 = vpop.permute.xlu1 %5590 }
 0x6a0   : > { %8446 = vmatmul.msk.f32.gmra.mxu1 %vm5645_vm14, %v14940_v2  ;;  %vm5659_vm14 = vcmp.eq.s32.totalorder %v9645_v61, %v14084_v49 }
 0x6a1   : > { %8478 = vmatmul.msk.f32.gmra.mxu2 %vm5646_vm15, %v14940_v2  ;;  %vm5660_vm15 = vcmp.eq.s32.totalorder %v9729_v22, %v14084_v49 }
 0x6a4   : > { %v5152_v17 = vpop.f32.mrf.mxu2  ;;  %v14097_v45 = vpop.f32.mrf.mxu0 }
 0x6a5   : > { %v5266_v58 = vadd.f32 %v5265_v40, %v5152_v17  ;;  %v14082_v51 = vpop.f32.mrf.mxu1  ;;  %v14111_v40 = vpop.permute.xlu0 %5587  ;;  %v8502_v17 = vld [vmem:[%s14850_s2 + $0xf0] sm:$0xff] }
 0x6a6   : > { %15403 = vst [vmem:[#allocation69_spill] sm:$0xff] %v14082_v51  ;;  %v5268_v11 = vpop.f32.mrf.mxu3  ;;  %6157 = vmatpush.msra.mxu3 %v8502_v17 }
 0x6a7   : > { %8366 = vmatmul.msk.f32.gmra.mxu0 %vm1310_vm10, %v5266_v58  ;;  %v8501_v58 = vld [vmem:[%s14850_s2 + $0xe8] sm:$0xff] }
 0x6a8   : > { %8447 = vmatmul.msk.f32.gmra.mxu1 %vm5647_vm0, %v14940_v2  ;;  %6158 = vmatpush.msra.mxu3 %v8501_v58 }
 0x6a9   : > { %8479 = vmatmul.msk.f32.gmra.mxu2 %vm5648_vm1, %v14940_v2  ;;  %vm5661_vm1 = vcmp.eq.s32.totalorder %v9645_v61, %v14077_v27 }
 0x6aa   : > { %6159 = vmatpush.msra.mxu3 %v8500_v4 }
 0x6ac   : > { %v5155_v29 = vpop.f32.mrf.mxu2  ;;  %v14133_v17 = vpop.f32.mrf.mxu0 }
 0x6ad   : > { %v5269_v24 = vadd.f32 %v5268_v11, %v5155_v29  ;;  %v14099_v43 = vpop.f32.mrf.mxu1  ;;  %v14124_v29 = vpop.permute.xlu2 %5599 }
 0x6ae   : > { %15404 = vst [vmem:[#allocation40_spill] sm:$0xff] %v14099_v43  ;;  %v5271_v42 = vpop.f32.mrf.mxu3  ;;  %v14140_v58 = vpop.permute.xlu0 %5602 }
 0x6af   : > { %8367 = vmatmul.msk.f32.gmra.mxu0 %vm1310_vm10, %v5269_v24 }
 0x6b0   : > { %8448 = vmatmul.msk.f32.gmra.mxu1 %vm5649_vm2, %v14940_v2  ;;  %vm5662_vm2 = vcmp.eq.s32.totalorder %v9729_v22, %v14077_v27 }
 0x6b1   : > { %8480 = vmatmul.msk.f32.gmra.mxu2 %vm5650_vm3, %v14940_v2 }
 0x6b4   : > { %v5158_v11 = vpop.f32.mrf.mxu2 }
 0x6b5   : > { %v5272_v24 = vadd.f32 %v5271_v42, %v5158_v11  ;;  %v14126_v59 = vpop.f32.mrf.mxu1  ;;  %v14138_v42 = vpop.permute.xlu1 %5596 }
 0x6b6   : > { %15405 = vst [vmem:[#allocation53_spill] sm:$0xff] %v14126_v59  ;;  %v5274_v30 = vpop.f32.mrf.mxu3  ;;  %v14146_v4 = vpop.permute.xlu2 %5608 }
 0x6b7   : > { %8368 = vmatmul.msk.f32.gmra.mxu0 %vm1310_vm10, %v5272_v24  ;;  %v14152_v24 = vpop.f32.mrf.mxu0 }
 0x6b8   : > { %8449 = vmatmul.msk.f32.gmra.mxu1 %vm5651_vm4, %v14940_v2  ;;  %vm5663_vm4 = vcmp.eq.s32.totalorder %v9645_v61, %v14111_v40 }
 0x6b9   : > { %8481 = vmatmul.msk.f32.gmra.mxu2 %vm5652_vm5, %v14940_v2  ;;  %vm5664_vm5 = vcmp.eq.s32.totalorder %v9729_v22, %v14111_v40 }
 0x6bc   : > { %v5161_v11 = vpop.f32.mrf.mxu2 }
 0x6bd   : > { %v5275_v59 = vadd.f32 %v5274_v30, %v5161_v11  ;;  %v14142_v43 = vpop.f32.mrf.mxu1  ;;  %v14155_v30 = vpop.permute.xlu1 %5605 }
 0x6be   : > { %15406 = vst [vmem:[#allocation82_spill] sm:$0xff] %v14142_v43  ;;  %v5277_v56 = vpop.f32.mrf.mxu3  ;;  %v14167_v28 = vpop.permute.xlu2 %5617 }
 0x6bf   : > { %8369 = vmatmul.msk.f32.gmra.mxu0 %vm1310_vm10, %v5275_v59  ;;  %v14161_v59 = vpop.permute.xlu0 %5611  ;;  %v14170_v1 = vpop.f32.mrf.mxu0 }
 0x6c0   : > { %8450 = vmatmul.msk.f32.gmra.mxu1 %vm5653_vm6, %v14940_v2 }
 0x6c1   : > { %8482 = vmatmul.msk.f32.gmra.mxu2 %vm5654_vm7, %v14940_v2  ;;  %vm5665_vm7 = vcmp.eq.s32.totalorder %v9645_v61, %v14107_v55 }
 0x6c4   : > { %v5164_v11 = vpop.f32.mrf.mxu2 }
 0x6c5   : > { %v5278_v43 = vadd.f32 %v5277_v56, %v5164_v11  ;;  %v14159_v51 = vpop.f32.mrf.mxu1 }
 0x6c6   : > { %15407 = vst [vmem:[#allocation72_spill] sm:$0xff] %v14159_v51  ;;  %v5280_v15 = vpop.f32.mrf.mxu3  ;;  %v14174_v51 = vpop.permute.xlu1 %5614 }
 0x6c7   : > { %8370 = vmatmul.msk.f32.gmra.mxu0 %vm1310_vm10, %v5278_v43  ;;  %v14177_v6 = vpop.permute.xlu0 %5620  ;;  %v14183_v43 = vpop.permute.xlu2 %6290 }
 0x6c8   : > { %8451 = vmatmul.msk.f32.gmra.mxu1 %vm5655_vm8, %v14940_v2  ;;  %vm6385_vm13 = vcmp.eq.s32.totalorder %v9645_v61, %v14183_v43  ;;  %vm5666_vm8 = vcmp.eq.s32.totalorder %v9729_v22, %v14107_v55 }
 0x6c9   : > { %8483 = vmatmul.msk.f32.gmra.mxu2 %vm5656_vm9, %v14940_v2 }
 0x6cc   : > { %v5167_v7 = vpop.f32.mrf.mxu2 }
 0x6cd   : > { %v5281_v56 = vadd.f32 %v5280_v15, %v5167_v7  ;;  %v5834_v11 = vpop.f32.mrf.mxu1  ;;  %v14187_v7 = vpop.f32.mrf.mxu0 }
 0x6ce   : > { %v14196_v25 = vpop.permute.xlu1 %5623 }
 0x6cf   : > { %8371 = vmatmul.msk.f32.gmra.mxu0 %vm1310_vm10, %v5281_v56  ;;  %v14199_v56 = vpop.permute.xlu0 %6293  ;;  %v14227_v63 = vpop.permute.xlu2 %6299 }
 0x6d0   : > { %8452 = vmatmul.msk.f32.gmra.mxu1 %vm5657_vm11, %v14940_v2  ;;  %vm6387_vm0 = vcmp.eq.s32.totalorder %v9645_v61, %v14199_v56  ;;  %vm6391_vm6 = vcmp.eq.s32.totalorder %v9645_v61, %v14227_v63  ;;  %vm5667_vm11 = vcmp.eq.s32.totalorder %v9645_v61, %v14093_v18 }
 0x6d1   : > { %8484 = vmatmul.msk.f32.gmra.mxu2 %vm5658_vm12, %v14940_v2  ;;  %vm5668_vm12 = vcmp.eq.s32.totalorder %v9729_v22, %v14093_v18 }
 0x6d4   : > { %v5947_v15 = vpop.f32.mrf.mxu2 }
 0x6d5   : > { %v5948_v60 = vadd.f32 %v5947_v15, %v5834_v11  ;;  %v5837_v13 = vpop.f32.mrf.mxu1 }
 0x6d6   : > { %v14213_v49 = vpop.permute.xlu1 %6296 }
 0x6d7   : > { %8504 = vmatmul.msk.f32.vlgmr.msra.gmra.mxu3 %vm1310_vm10, %v5948_v60  ;;  %8600 = vmatmul.msk.f32.vlgmr.msra.gmra.mxu0 %vm6385_vm13, %v14940_v2  ;;  %v14205_v60 = vpop.f32.mrf.mxu0  ;;  %vm6389_vm3 = vcmp.eq.s32.totalorder %v9645_v61, %v14213_v49  ;;  %v14256_v55 = vpop.permute.xlu2 %6305 }
 0x6d8   : > { %8453 = vmatmul.msk.f32.gmra.mxu1 %vm5659_vm14, %v14940_v2  ;;  %vm6395_vm13 = vcmp.eq.s32.totalorder %v9645_v61, %v14256_v55  ;;  %vm5669_vm14 = vcmp.eq.s32.totalorder %v9645_v61, %v14138_v42  ;;  %v14270_v18 = vpop.permute.xlu0 %6308 }
 0x6d9   : > { %8485 = vmatmul.msk.f32.gmra.mxu2 %vm5660_vm15, %v14940_v2  ;;  %vm5670_vm15 = vcmp.eq.s32.totalorder %v9729_v22, %v14138_v42 }
 0x6dc   : > { %v5950_v11 = vpop.f32.mrf.mxu2 }
 0x6dd   : > { %v5951_v15 = vadd.f32 %v5950_v11, %v5837_v13  ;;  %v5840_v21 = vpop.f32.mrf.mxu1 }
 0x6de   : > { %v14239_v40 = vpop.permute.xlu1 %6302 }
 0x6df   : > { %8505 = vmatmul.msk.f32.gmra.mxu3 %vm1310_vm10, %v5951_v15  ;;  %8601 = vmatmul.msk.f32.gmra.mxu0 %vm6387_vm0, %v14940_v2  ;;  %v14224_v27 = vpop.f32.mrf.mxu0  ;;  %vm6393_vm9 = vcmp.eq.s32.totalorder %v9645_v61, %v14239_v40  ;;  %vm6397_vm0 = vcmp.eq.s32.totalorder %v9645_v61, %v14270_v18 }
 0x6e0   : > { %8454 = vmatmul.msk.f32.gmra.mxu1 %vm5661_vm1, %v14940_v2  ;;  %15408 = vst [vmem:[#allocation41_spill] sm:$0xff] %v14224_v27  ;;  %vm5671_vm1 = vcmp.eq.s32.totalorder %v9645_v61, %v14124_v29 }
 0x6e1   : > { %8486 = vmatmul.msk.f32.gmra.mxu2 %vm5662_vm2, %v14940_v2  ;;  %vm5672_vm2 = vcmp.eq.s32.totalorder %v9729_v22, %v14124_v29 }
 0x6e4   : > { %v5953_v13 = vpop.f32.mrf.mxu2 }
 0x6e5   : > { %v5954_v11 = vadd.f32 %v5953_v13, %v5840_v21  ;;  %v5843_v15 = vpop.f32.mrf.mxu1 }
 0x6e6   : > { %v14284_v42 = vpop.permute.xlu1 %6311 }
 0x6e7   : > { %8506 = vmatmul.msk.f32.gmra.mxu3 %vm1310_vm10, %v5954_v11  ;;  %8602 = vmatmul.msk.f32.gmra.mxu0 %vm6389_vm3, %v14940_v2  ;;  %v14244_v11 = vpop.f32.mrf.mxu0  ;;  %vm6399_vm3 = vcmp.eq.s32.totalorder %v9645_v61, %v14284_v42 }
 0x6e8   : > { %8455 = vmatmul.msk.f32.gmra.mxu1 %vm5663_vm4, %v14940_v2  ;;  %15409 = vst [vmem:[#allocation5_spill] sm:$0xff] %v14244_v11  ;;  %vm5673_vm4 = vcmp.eq.s32.totalorder %v9645_v61, %v14140_v58 }
 0x6e9   : > { %8487 = vmatmul.msk.f32.gmra.mxu2 %vm5664_vm5, %v14940_v2  ;;  %vm5674_vm5 = vcmp.eq.s32.totalorder %v9729_v22, %v14140_v58  ;;  %v14310_v58 = vpop.permute.xlu0 %6317 }
 0x6ec   : > { %v5956_v62 = vpop.f32.mrf.mxu2 }
 0x6ed   : > { %v5957_v21 = vadd.f32 %v5956_v62, %v5843_v15  ;;  %v5846_v13 = vpop.f32.mrf.mxu1  ;;  %v8666_v62 = vld [vmem:[%s14850_s2 + $0x110] sm:$0xff] }
 0x6ee   : > { %6917 = vmatpush.msra.mxu2 %v8666_v62 }
 0x6ef   : > { %8507 = vmatmul.msk.f32.gmra.mxu3 %vm1310_vm10, %v5957_v21  ;;  %8603 = vmatmul.msk.f32.gmra.mxu0 %vm6391_vm6, %v14940_v2 }
 0x6f0   : > { %8456 = vmatmul.msk.f32.gmra.mxu1 %vm5665_vm7, %v14940_v2  ;;  %vm5675_vm7 = vcmp.eq.s32.totalorder %v9645_v61, %v14155_v30 }
 0x6f1   : > { %8488 = vmatmul.msk.f32.gmra.mxu2 %vm5666_vm8, %v14940_v2  ;;  %vm5676_vm8 = vcmp.eq.s32.totalorder %v9729_v22, %v14155_v30  ;;  %v14324_v30 = vpop.permute.xlu1 %6320 }
 0x6f4   : > { %v5959_v15 = vpop.f32.mrf.mxu2 }
 0x6f5   : > { %v5960_v21 = vadd.f32 %v5959_v15, %v5846_v13  ;;  %v5849_v32 = vpop.f32.mrf.mxu1  ;;  %v14260_v13 = vpop.f32.mrf.mxu0 }
 0x6f6   : > { %15410 = vst [vmem:[#allocation84_spill] sm:$0xff] %v14260_v13 }
 0x6f7   : > { %8508 = vmatmul.msk.f32.gmra.mxu3 %vm1310_vm10, %v5960_v21  ;;  %8604 = vmatmul.msk.f32.gmra.mxu0 %vm6393_vm9, %v14940_v2  ;;  %vm6403_vm9 = vcmp.eq.s32.totalorder %v9645_v61, %v14310_v58 }
 0x6f8   : > { %8457 = vmatmul.msk.f32.gmra.mxu1 %vm5667_vm11, %v14940_v2  ;;  %vm5677_vm11 = vcmp.eq.s32.totalorder %v9645_v61, %v14146_v4 }
 0x6f9   : > { %8489 = vmatmul.msk.f32.gmra.mxu2 %vm5668_vm12, %v14940_v2  ;;  %vm5678_vm12 = vcmp.eq.s32.totalorder %v9729_v22, %v14146_v4 }
 0x6fc   : > { %v5962_v62 = vpop.f32.mrf.mxu2 }
 0x6fd   : > { %v5963_v15 = vadd.f32 %v5962_v62, %v5849_v32  ;;  %v5852_v37 = vpop.f32.mrf.mxu1 }
 0x6ff   : > { %8509 = vmatmul.msk.f32.gmra.mxu3 %vm1310_vm10, %v5963_v15  ;;  %8605 = vmatmul.msk.f32.gmra.mxu0 %vm6395_vm13, %v14940_v2  ;;  %v14276_v15 = vpop.f32.mrf.mxu0  ;;  %vm6405_vm13 = vcmp.eq.s32.totalorder %v9645_v61, %v14324_v30 }
 0x700   : > { %8458 = vmatmul.msk.f32.gmra.mxu1 %vm5669_vm14, %v14940_v2  ;;  %15411 = vst [vmem:[#allocation25_spill] sm:$0xff] %v14276_v15  ;;  %vm5679_vm14 = vcmp.eq.s32.totalorder %v9645_v61, %v14161_v59 }
 0x701   : > { %8490 = vmatmul.msk.f32.gmra.mxu2 %vm5670_vm15, %v14940_v2  ;;  %vm5680_vm15 = vcmp.eq.s32.totalorder %v9729_v22, %v14161_v59  ;;  %v8665_v59 = vld [vmem:[%s14850_s2 + $0x108] sm:$0xff] }
 0x702   : > { %6918 = vmatpush.msra.mxu2 %v8665_v59  ;;  %v14369_v59 = vpop.permute.xlu1 %6329 }
 0x704   : > { %v5965_v21 = vpop.f32.mrf.mxu2 }
 0x705   : > { %v5966_v32 = vadd.f32 %v5965_v21, %v5852_v37  ;;  %v5855_v62 = vpop.f32.mrf.mxu1 }
 0x707   : > { %8510 = vmatmul.msk.f32.gmra.mxu3 %vm1310_vm10, %v5966_v32  ;;  %8606 = vmatmul.msk.f32.gmra.mxu0 %vm6397_vm0, %v14940_v2  ;;  %v14295_v29 = vpop.f32.mrf.mxu0  ;;  %v14298_v32 = vpop.permute.xlu2 %6314 }
 0x708   : > { %8459 = vmatmul.msk.f32.gmra.mxu1 %vm5671_vm1, %v14940_v2  ;;  %15412 = vst [vmem:[#allocation42_spill] sm:$0xff] %v14295_v29  ;;  %vm6401_vm6 = vcmp.eq.s32.totalorder %v9645_v61, %v14298_v32  ;;  %vm5681_vm1 = vcmp.eq.s32.totalorder %v9645_v61, %v14174_v51 }
 0x709   : > { %8491 = vmatmul.msk.f32.gmra.mxu2 %vm5672_vm2, %v14940_v2  ;;  %vm5682_vm2 = vcmp.eq.s32.totalorder %v9729_v22, %v14174_v51 }
 0x70c   : > { %v5968_v37 = vpop.f32.mrf.mxu2 }
 0x70d   : > { %v5969_v21 = vadd.f32 %v5968_v37, %v5855_v62  ;;  %v5858_v13 = vpop.f32.mrf.mxu1 }
 0x70f   : > { %8511 = vmatmul.msk.f32.gmra.mxu3 %vm1310_vm10, %v5969_v21  ;;  %8607 = vmatmul.msk.f32.gmra.mxu0 %vm6399_vm3, %v14940_v2  ;;  %v14312_v21 = vpop.f32.mrf.mxu0  ;;  %v14338_v4 = vpop.permute.xlu2 %6323 }
 0x710   : > { %8460 = vmatmul.msk.f32.gmra.mxu1 %vm5673_vm4, %v14940_v2  ;;  %15413 = vst [vmem:[#allocation19_spill] sm:$0xff] %v14312_v21  ;;  %vm6407_vm0 = vcmp.eq.s32.totalorder %v9645_v61, %v14338_v4  ;;  %vm5683_vm4 = vcmp.eq.s32.totalorder %v9645_v61, %v14167_v28 }
 0x711   : > { %8492 = vmatmul.msk.f32.gmra.mxu2 %vm5674_vm5, %v14940_v2  ;;  %vm5684_vm5 = vcmp.eq.s32.totalorder %v9729_v22, %v14167_v28 }
 0x714   : > { %v5971_v62 = vpop.f32.mrf.mxu2 }
 0x715   : > { %v5972_v37 = vadd.f32 %v5971_v62, %v5858_v13  ;;  %v5861_v15 = vpop.f32.mrf.mxu1 }
 0x717   : > { %8512 = vmatmul.msk.f32.gmra.mxu3 %vm1310_vm10, %v5972_v37  ;;  %8608 = vmatmul.msk.f32.gmra.mxu0 %vm6401_vm6, %v14940_v2  ;;  %vm6411_vm6 = vcmp.eq.s32.totalorder %v9645_v61, %v14369_v59 }
 0x718   : > { %8461 = vmatmul.msk.f32.gmra.mxu1 %vm5675_vm7, %v14940_v2  ;;  %vm5685_vm7 = vcmp.eq.s32.totalorder %v9645_v61, %v14177_v6 }
 0x719   : > { %8493 = vmatmul.msk.f32.gmra.mxu2 %vm5676_vm8, %v14940_v2  ;;  %vm5686_vm8 = vcmp.eq.s32.totalorder %v9729_v22, %v14177_v6 }
 0x71c   : > { %v5974_v13 = vpop.f32.mrf.mxu2 }
 0x71d   : > { %v5975_v62 = vadd.f32 %v5974_v13, %v5861_v15  ;;  %v5864_v29 = vpop.f32.mrf.mxu1  ;;  %v14328_v15 = vpop.f32.mrf.mxu0 }
 0x71e   : > { %15414 = vst [vmem:[#allocation87_spill] sm:$0xff] %v14328_v15 }
 0x71f   : > { %8513 = vmatmul.msk.f32.gmra.mxu3 %vm1310_vm10, %v5975_v62  ;;  %8609 = vmatmul.msk.f32.gmra.mxu0 %vm6403_vm9, %v14940_v2 }
 0x720   : > { %8462 = vmatmul.msk.f32.gmra.mxu1 %vm5677_vm11, %v14940_v2  ;;  %vm5687_vm11 = vcmp.eq.s32.totalorder %v9645_v61, %v14196_v25 }
 0x721   : > { %8494 = vmatmul.msk.f32.gmra.mxu2 %vm5678_vm12, %v14940_v2  ;;  %vm5688_vm12 = vcmp.eq.s32.totalorder %v9729_v22, %v14196_v25  ;;  %v14406_v25 = vpop.permute.xlu1 %6338 }
 0x724   : > { %v5977_v37 = vpop.f32.mrf.mxu2 }
 0x725   : > { %v5978_v13 = vadd.f32 %v5977_v37, %v5864_v29  ;;  %v5867_v21 = vpop.f32.mrf.mxu1 }
 0x727   : > { %8514 = vmatmul.msk.f32.gmra.mxu3 %vm1310_vm10, %v5978_v13  ;;  %8610 = vmatmul.msk.f32.gmra.mxu0 %vm6405_vm13, %v14940_v2  ;;  %v14344_v13 = vpop.f32.mrf.mxu0 }
 0x728   : > { %8463 = vmatmul.msk.f32.gmra.mxu1 %vm5679_vm14, %v14940_v2  ;;  %15415 = vst [vmem:[#allocation8_spill] sm:$0xff] %v14344_v13  ;;  %vm6386_vm14 = vcmp.eq.s32.totalorder %v9729_v22, %v14183_v43 }
 0x729   : > { %8495 = vmatmul.msk.f32.gmra.mxu2 %vm5680_vm15, %v14940_v2  ;;  %vm6417_vm15 = vcmp.eq.s32.totalorder %v9645_v61, %v14406_v25 }
 0x72c   : > { %v5980_v29 = vpop.f32.mrf.mxu2 }
 0x72d   : > { %v5981_v62 = vadd.f32 %v5980_v29, %v5867_v21  ;;  %v5870_v37 = vpop.f32.mrf.mxu1  ;;  %v14355_v21 = vpop.permute.xlu0 %6326 }
 0x72e   : > { %vm6409_vm3 = vcmp.eq.s32.totalorder %v9645_v61, %v14355_v21 }
 0x72f   : > { %8515 = vmatmul.msk.f32.gmra.mxu3 %vm1310_vm10, %v5981_v62  ;;  %8611 = vmatmul.msk.f32.gmra.mxu0 %vm6407_vm0, %v14940_v2  ;;  %v14366_v51 = vpop.f32.mrf.mxu0  ;;  %vm6388_vm0 = vcmp.eq.s32.totalorder %v9729_v22, %v14199_v56 }
 0x730   : > { %8464 = vmatmul.msk.f32.gmra.mxu1 %vm5681_vm1, %v14940_v2  ;;  %15416 = vst [vmem:[#allocation43_spill] sm:$0xff] %v14366_v51  ;;  %vm6390_vm1 = vcmp.eq.s32.totalorder %v9729_v22, %v14213_v49 }
 0x731   : > { %8496 = vmatmul.msk.f32.gmra.mxu2 %vm5682_vm2, %v14940_v2 }
 0x734   : > { %v5983_v29 = vpop.f32.mrf.mxu2 }
 0x735   : > { %v5984_v62 = vadd.f32 %v5983_v29, %v5870_v37  ;;  %v5873_v13 = vpop.f32.mrf.mxu1  ;;  %v14395_v6 = vpop.permute.xlu0 %6335 }
 0x736   : > { %vm6415_vm13 = vcmp.eq.s32.totalorder %v9645_v61, %v14395_v6 }
 0x737   : > { %8516 = vmatmul.msk.f32.gmra.mxu3 %vm1310_vm10, %v5984_v62  ;;  %8612 = vmatmul.msk.f32.gmra.mxu0 %vm6409_vm3, %v14940_v2  ;;  %v14381_v28 = vpop.f32.mrf.mxu0  ;;  %v14383_v62 = vpop.permute.xlu2 %6332 }
 0x738   : > { %8465 = vmatmul.msk.f32.gmra.mxu1 %vm5683_vm4, %v14940_v2  ;;  %15417 = vst [vmem:[#allocation64_spill] sm:$0xff] %v14381_v28  ;;  %vm6413_vm9 = vcmp.eq.s32.totalorder %v9645_v61, %v14383_v62  ;;  %vm6392_vm4 = vcmp.eq.s32.totalorder %v9729_v22, %v14227_v63  ;;  %v15420_v63 = vld [vmem:[#allocation24_spill] sm:$0xff] }
 0x739   : > { %8497 = vmatmul.msk.f32.gmra.mxu2 %vm5684_vm5, %v14940_v2 }
 0x73c   : > { %v5986_v37 = vpop.f32.mrf.mxu2 }
 0x73d   : > { %v5987_v29 = vadd.f32 %v5986_v37, %v5873_v13  ;;  %v5876_v15 = vpop.f32.mrf.mxu1 }
 0x73f   : > { %8517 = vmatmul.msk.f32.gmra.mxu3 %vm1310_vm10, %v5987_v29  ;;  %8613 = vmatmul.msk.f32.gmra.mxu0 %vm6411_vm6, %v14940_v2  ;;  %v14401_v29 = vpop.f32.mrf.mxu0  ;;  %v14424_v56 = vpop.permute.xlu2 %6341  ;;  %vm6394_vm6 = vcmp.eq.s32.totalorder %v9729_v22, %v14239_v40 }
 0x740   : > { %8466 = vmatmul.msk.f32.gmra.mxu1 %vm5685_vm7, %v14940_v2  ;;  %15418 = vst [vmem:[#allocation100_spill] sm:$0xff] %v14401_v29  ;;  %vm6419_vm2 = vcmp.eq.s32.totalorder %v9645_v61, %v14424_v56 }
 0x741   : > { %8498 = vmatmul.msk.f32.gmra.mxu2 %vm5686_vm8, %v14940_v2  ;;  %vm6396_vm8 = vcmp.eq.s32.totalorder %v9729_v22, %v14256_v55 }
 0x744   : > { %v5989_v13 = vpop.f32.mrf.mxu2 }
 0x745   : > { %v5990_v37 = vadd.f32 %v5989_v13, %v5876_v15  ;;  %v5879_v51 = vpop.f32.mrf.mxu1 }
 0x747   : > { %8518 = vmatmul.msk.f32.gmra.mxu3 %vm1310_vm10, %v5990_v37  ;;  %8614 = vmatmul.msk.f32.gmra.mxu0 %vm6413_vm9, %v14940_v2 }
 0x748   : > { %8467 = vmatmul.msk.f32.gmra.mxu1 %vm5687_vm11, %v14940_v2  ;;  %vm6398_vm11 = vcmp.eq.s32.totalorder %v9729_v22, %v14270_v18  ;;  %v15423_v18 = vld [vmem:[#allocation51_spill] sm:$0xff] }
 0x749   : > { %8499 = vmatmul.msk.f32.gmra.mxu2 %vm5688_vm12, %v14940_v2 }
 0x74c   : > { %v5992_v15 = vpop.f32.mrf.mxu2 }
 0x74d   : > { %v5993_v13 = vadd.f32 %v5992_v15, %v5879_v51  ;;  %v5882_v37 = vpop.f32.mrf.mxu1  ;;  %v4737_v51 = vadd.f32 %v13713_v23, %v12915_v57  ;;  %v14414_v15 = vpop.f32.mrf.mxu0 }
 0x74f   : > { %8519 = vmatmul.msk.f32.gmra.mxu3 %vm1310_vm10, %v5993_v13  ;;  %8615 = vmatmul.msk.f32.gmra.mxu0 %vm6415_vm13, %v14940_v2  ;;  %v5497_v13 = vadd.f32 %v13909_v50, %v4737_v51  ;;  %vm6400_vm13 = vcmp.eq.s32.totalorder %v9729_v22, %v14284_v42  ;;  %v15424_v42 = vld [vmem:[#allocation30_spill] sm:$0xff] }
 0x750   : > { %8632 = vmatmul.msk.f32.vlgmr.msra.gmra.mxu1 %vm6386_vm14, %v14940_v2 }
 0x754   : > { %v5995_v28 = vpop.f32.mrf.mxu2 }
 0x755   : > { %v5996_v43 = vadd.f32 %v5995_v28, %v5882_v37  ;;  %v5885_v11 = vpop.f32.mrf.mxu1  ;;  %v4738_v28 = vadd.f32 %v13728_v48, %v12935_v31  ;;  %v15419_v31 = vld [vmem:[#allocation45_spill] sm:$0xff] }
 0x756   : > { %v4739_v48 = vadd.f32 %v13742_v26, %v15419_v31 }
 0x757   : > { %8520 = vmatmul.msk.f32.gmra.mxu3 %vm1310_vm10, %v5996_v43  ;;  %8616 = vmatmul.msk.f32.gmra.mxu0 %vm6417_vm15, %v14940_v2  ;;  %v5498_v50 = vadd.f32 %v13927_v12, %v4738_v28  ;;  %vm6402_vm15 = vcmp.eq.s32.totalorder %v9729_v22, %v14298_v32 }
 0x758   : > { %8633 = vmatmul.msk.f32.gmra.mxu1 %vm6388_vm0, %v14940_v2  ;;  %v5499_v12 = vadd.f32 %v13943_v39, %v4739_v48  ;;  %v8664_v39 = vld [vmem:[%s14850_s2 + $0x100] sm:$0xff] }
 0x759   : > { %6919 = vmatpush.msra.mxu2 %v8664_v39 }
 0x75a   : > { %v6161_v29 = vpop.f32.mrf.mxu3 }
 0x75b   : > { %v14420_v33 = vadd.f32 %v6161_v29, %v5497_v13  ;;  %v14434_v29 = vpop.f32.mrf.mxu0 }
 0x75c   : > { %v5998_v27 = vpop.f32.mrf.mxu2 }
 0x75d   : > { %v5999_v57 = vadd.f32 %v5998_v27, %v5885_v11  ;;  %v5888_v23 = vpop.f32.mrf.mxu1  ;;  %v14438_v11 = vpop.permute.xlu0 %6344 }
 0x75e   : > { %vm6421_vm3 = vcmp.eq.s32.totalorder %v9645_v61, %v14438_v11 }
 0x75f   : > { %8521 = vmatmul.msk.f32.gmra.mxu3 %vm1310_vm10, %v5999_v57  ;;  %8617 = vmatmul.msk.f32.gmra.mxu0 %vm6419_vm2, %v14940_v2 }
 0x760   : > { %8634 = vmatmul.msk.f32.gmra.mxu1 %vm6390_vm1, %v14940_v2  ;;  %vm6404_vm1 = vcmp.eq.s32.totalorder %v9729_v22, %v14310_v58 }
 0x762   : > { %v6164_v49 = vpop.f32.mrf.mxu3 }
 0x763   : > { %v14436_v37 = vadd.f32 %v6164_v49, %v5498_v50  ;;  %v14450_v57 = vpop.f32.mrf.mxu0  ;;  %v14454_v50 = vpop.permute.xlu1 %6347 }
 0x764   : > { %v6001_v27 = vpop.f32.mrf.mxu2  ;;  %vm6423_vm5 = vcmp.eq.s32.totalorder %v9645_v61, %v14454_v50 }
 0x765   : > { %v6002_v43 = vadd.f32 %v6001_v27, %v5888_v23  ;;  %v5891_v51 = vpop.f32.mrf.mxu1  ;;  %v4740_v27 = vadd.f32 %v13756_v53, %v15420_v63  ;;  %v14471_v53 = vpop.permute.xlu2 %6350 }
 0x766   : > { %vm6425_vm7 = vcmp.eq.s32.totalorder %v9645_v61, %v14471_v53  ;;  %v14487_v39 = vpop.permute.xlu0 %6353 }
 0x767   : > { %8522 = vmatmul.msk.f32.gmra.mxu3 %vm1310_vm10, %v6002_v43  ;;  %8618 = vmatmul.msk.f32.gmra.mxu0 %vm6421_vm3, %v14940_v2  ;;  %v5500_v43 = vadd.f32 %v13957_v54, %v4740_v27  ;;  %vm6427_vm9 = vcmp.eq.s32.totalorder %v9645_v61, %v14487_v39  ;;  %vm6406_vm3 = vcmp.eq.s32.totalorder %v9729_v22, %v14324_v30 }
 0x768   : > { %8635 = vmatmul.msk.f32.gmra.mxu1 %vm6392_vm4, %v14940_v2 }
 0x76a   : > { %v6167_v13 = vpop.f32.mrf.mxu3 }
 0x76b   : > { %v14452_v23 = vadd.f32 %v6167_v13, %v5499_v12  ;;  %v14473_v40 = vpop.f32.mrf.mxu0 }
 0x76c   : > { %v6004_v28 = vpop.f32.mrf.mxu2 }
 0x76d   : > { %v6005_v26 = vadd.f32 %v6004_v28, %v5891_v51  ;;  %v5894_v49 = vpop.f32.mrf.mxu1  ;;  %v15421_v28 = vld [vmem:[#allocation48_spill] sm:$0xff] }
 0x76f   : > { %8523 = vmatmul.msk.f32.gmra.mxu3 %vm1310_vm10, %v6005_v26  ;;  %8619 = vmatmul.msk.f32.gmra.mxu0 %vm6423_vm5, %v14940_v2  ;;  %v4741_v26 = vadd.f32 %v13767_v34, %v15421_v28  ;;  %v15422_v34 = vld [vmem:[#allocation27_spill] sm:$0xff]  ;;  %vm6408_vm5 = vcmp.eq.s32.totalorder %v9729_v22, %v14338_v4 }
 0x770   : > { %8636 = vmatmul.msk.f32.gmra.mxu1 %vm6394_vm6, %v14940_v2  ;;  %v4742_v55 = vadd.f32 %v13778_v0, %v15422_v34 }
 0x771   : > { %v5501_v54 = vadd.f32 %v13973_v16, %v4741_v26  ;;  %v14503_v26 = vpop.permute.xlu1 %6356 }
 0x772   : > { %v6170_v51 = vpop.f32.mrf.mxu3  ;;  %v5502_v16 = vadd.f32 %v13991_v46, %v4742_v55  ;;  %vm6429_vm12 = vcmp.eq.s32.totalorder %v9645_v61, %v14503_v26  ;;  %v14519_v55 = vpop.permute.xlu2 %6359 }
 0x773   : > { %v14469_v31 = vadd.f32 %v6170_v51, %v5500_v43  ;;  %vm6431_vm14 = vcmp.eq.s32.totalorder %v9645_v61, %v14519_v55 }
 0x774   : > { %v6007_v48 = vpop.f32.mrf.mxu2 }
 0x775   : > { %v6008_v12 = vadd.f32 %v6007_v48, %v5894_v49  ;;  %v5897_v13 = vpop.f32.mrf.mxu1  ;;  %v14495_v48 = vpop.f32.mrf.mxu0 }
 0x777   : > { %8524 = vmatmul.msk.f32.gmra.mxu3 %vm1310_vm10, %v6008_v12  ;;  %8620 = vmatmul.msk.f32.gmra.mxu0 %vm6425_vm7, %v14940_v2  ;;  %vm6410_vm7 = vcmp.eq.s32.totalorder %v9729_v22, %v14355_v21 }
 0x778   : > { %8637 = vmatmul.msk.f32.gmra.mxu1 %vm6396_vm8, %v14940_v2 }
 0x77a   : > { %v6173_v63 = vpop.f32.mrf.mxu3 }
 0x77b   : > { %v14485_v49 = vadd.f32 %v6173_v63, %v5501_v54  ;;  %v4743_v63 = vadd.f32 %v13789_v47, %v15423_v18 }
 0x77c   : > { %v6010_v27 = vpop.f32.mrf.mxu2 }
 0x77d   : > { %v6011_v43 = vadd.f32 %v6010_v27, %v5897_v13  ;;  %v5900_v51 = vpop.f32.mrf.mxu1  ;;  %v5503_v46 = vadd.f32 %v14013_v36, %v4743_v63  ;;  %v14515_v27 = vpop.f32.mrf.mxu0 }
 0x77e   : > { %v14535_v63 = vpop.permute.xlu0 %6362 }
 0x77f   : > { %8525 = vmatmul.msk.f32.gmra.mxu3 %vm1310_vm10, %v6011_v43  ;;  %8621 = vmatmul.msk.f32.gmra.mxu0 %vm6427_vm9, %v14940_v2  ;;  %vm6433_vm0 = vcmp.eq.s32.totalorder %v9645_v61, %v14535_v63  ;;  %vm6412_vm9 = vcmp.eq.s32.totalorder %v9729_v22, %v14369_v59 }
 0x780   : > { %8638 = vmatmul.msk.f32.gmra.mxu1 %vm6398_vm11, %v14940_v2 }
 0x782   : > { %v6176_v12 = vpop.f32.mrf.mxu3 }
 0x783   : > { %v14501_v13 = vadd.f32 %v6176_v12, %v5502_v16  ;;  %v4744_v12 = vadd.f32 %v13798_v20, %v15424_v42 }
 0x784   : > { %v6013_v28 = vpop.f32.mrf.mxu2 }
 0x785   : > { %v6014_v0 = vadd.f32 %v6013_v28, %v5900_v51  ;;  %v5903_v54 = vpop.f32.mrf.mxu1  ;;  %v5504_v36 = vadd.f32 %v14040_v41, %v4744_v12  ;;  %v14544_v41 = vpop.permute.xlu1 %6365 }
 0x786   : > { %vm6435_vm2 = vcmp.eq.s32.totalorder %v9645_v61, %v14544_v41 }
 0x787   : > { %8526 = vmatmul.msk.f32.gmra.mxu3 %vm1310_vm10, %v6014_v0  ;;  %8622 = vmatmul.msk.f32.gmra.mxu0 %vm6429_vm12, %v14940_v2  ;;  %v14531_v0 = vpop.f32.mrf.mxu0  ;;  %vm6414_vm12 = vcmp.eq.s32.totalorder %v9729_v22, %v14383_v62 }
 0x788   : > { %8639 = vmatmul.msk.f32.gmra.mxu1 %vm6400_vm13, %v14940_v2 }
 0x78a   : > { %v6179_v43 = vpop.f32.mrf.mxu3 }
 0x78b   : > { %v14517_v51 = vadd.f32 %v6179_v43, %v5503_v46 }
 0x78c   : > { %v6016_v34 = vpop.f32.mrf.mxu2 }
 0x78d   : > { %v6017_v47 = vadd.f32 %v6016_v34, %v5903_v54  ;;  %v5906_v16 = vpop.f32.mrf.mxu1 }
 0x78f   : > { %8527 = vmatmul.msk.f32.gmra.mxu3 %vm1310_vm10, %v6017_v47  ;;  %8623 = vmatmul.msk.f32.gmra.mxu0 %vm6431_vm14, %v14940_v2  ;;  %v14546_v43 = vpop.f32.mrf.mxu0  ;;  %vm6416_vm14 = vcmp.eq.s32.totalorder %v9729_v22, %v14395_v6 }
 0x790   : > { %8640 = vmatmul.msk.f32.gmra.mxu1 %vm6402_vm15, %v14940_v2 }
 0x792   : > { %v6182_v28 = vpop.f32.mrf.mxu3 }
 0x793   : > { %v14533_v54 = vadd.f32 %v6182_v28, %v5504_v36  ;;  %v14566_v28 = vpop.permute.xlu0 %6371 }
 0x794   : > { %v6019_v18 = vpop.f32.mrf.mxu2  ;;  %vm6439_vm6 = vcmp.eq.s32.totalorder %v9645_v61, %v14566_v28 }
 0x795   : > { %v6020_v20 = vadd.f32 %v6019_v18, %v5906_v16  ;;  %v5909_v46 = vpop.f32.mrf.mxu1  ;;  %v14555_v16 = vpop.permute.xlu2 %6368 }
 0x796   : > { %vm6437_vm4 = vcmp.eq.s32.totalorder %v9645_v61, %v14555_v16 }
 0x797   : > { %8528 = vmatmul.msk.f32.gmra.mxu3 %vm1310_vm10, %v6020_v20  ;;  %8624 = vmatmul.msk.f32.gmra.mxu0 %vm6433_vm0, %v14940_v2  ;;  %v14561_v36 = vpop.f32.mrf.mxu0  ;;  %vm6418_vm0 = vcmp.eq.s32.totalorder %v9729_v22, %v14406_v25 }
 0x798   : > { %8641 = vmatmul.msk.f32.gmra.mxu1 %vm6404_vm1, %v14940_v2  ;;  %vm6420_vm1 = vcmp.eq.s32.totalorder %v9729_v22, %v14424_v56 }
 0x79b   : > { %v14593_v59 = vpop.permute.xlu0 %6380 }
 0x79c   : > { %v6022_v32 = vpop.f32.mrf.mxu2  ;;  %vm6445_vm13 = vcmp.eq.s32.totalorder %v9645_v61, %v14593_v59 }
 0x79d   : > { %v6023_v34 = vadd.f32 %v6022_v32, %v5909_v46  ;;  %v5912_v47 = vpop.f32.mrf.mxu1  ;;  %v14575_v32 = vpop.permute.xlu1 %6374 }
 0x79e   : > { %vm6441_vm8 = vcmp.eq.s32.totalorder %v9645_v61, %v14575_v32  ;;  %v14584_v21 = vpop.permute.xlu2 %6377 }
 0x79f   : > { %8529 = vmatmul.msk.f32.gmra.mxu3 %vm1310_vm10, %v6023_v34  ;;  %8625 = vmatmul.msk.f32.gmra.mxu0 %vm6435_vm2, %v14940_v2  ;;  %v6606_v4 = vpop.f32.mrf.mxu0  ;;  %vm6443_vm11 = vcmp.eq.s32.totalorder %v9645_v61, %v14584_v21  ;;  %vm6422_vm2 = vcmp.eq.s32.totalorder %v9729_v22, %v14438_v11 }
 0x7a0   : > { %8642 = vmatmul.msk.f32.gmra.mxu1 %vm6406_vm3, %v14940_v2  ;;  %vm6424_vm3 = vcmp.eq.s32.totalorder %v9729_v22, %v14454_v50 }
 0x7a4   : > { %v6025_v58 = vpop.f32.mrf.mxu2 }
 0x7a5   : > { %v6026_v42 = vadd.f32 %v6025_v58, %v5912_v47  ;;  %v5915_v12 = vpop.f32.mrf.mxu1  ;;  %v14602_v62 = vpop.permute.xlu1 %6383 }
 0x7a6   : > { %vm6447_vm15 = vcmp.eq.s32.totalorder %v9645_v61, %v14602_v62 }
 0x7a7   : > { %8530 = vmatmul.msk.f32.gmra.mxu3 %vm1310_vm10, %v6026_v42  ;;  %8626 = vmatmul.msk.f32.gmra.mxu0 %vm6437_vm4, %v14940_v2  ;;  %v6609_v58 = vpop.f32.mrf.mxu0  ;;  %vm6426_vm4 = vcmp.eq.s32.totalorder %v9729_v22, %v14471_v53 }
 0x7a8   : > { %8643 = vmatmul.msk.f32.gmra.mxu1 %vm6408_vm5, %v14940_v2  ;;  %vm6428_vm5 = vcmp.eq.s32.totalorder %v9729_v22, %v14487_v39 }
 0x7ac   : > { %v6028_v30 = vpop.f32.mrf.mxu2 }
 0x7ad   : > { %v6029_v18 = vadd.f32 %v6028_v30, %v5915_v12  ;;  %v5918_v20 = vpop.f32.mrf.mxu1 }
 0x7af   : > { %8531 = vmatmul.msk.f32.gmra.mxu3 %vm1310_vm10, %v6029_v18  ;;  %8627 = vmatmul.msk.f32.gmra.mxu0 %vm6439_vm6, %v14940_v2  ;;  %vm6430_vm6 = vcmp.eq.s32.totalorder %v9729_v22, %v14503_v26 }
 0x7b0   : > { %8644 = vmatmul.msk.f32.gmra.mxu1 %vm6410_vm7, %v14940_v2  ;;  %vm6432_vm7 = vcmp.eq.s32.totalorder %v9729_v22, %v14519_v55 }
 0x7b4   : > { %v6031_v46 = vpop.f32.mrf.mxu2 }
 0x7b5   : > { %v6032_v34 = vadd.f32 %v6031_v46, %v5918_v20  ;;  %v5921_v47 = vpop.f32.mrf.mxu1  ;;  %v6612_v20 = vpop.f32.mrf.mxu0 }
 0x7b7   : > { %8532 = vmatmul.msk.f32.gmra.mxu3 %vm1310_vm10, %v6032_v34  ;;  %8628 = vmatmul.msk.f32.gmra.mxu0 %vm6441_vm8, %v14940_v2  ;;  %vm6434_vm8 = vcmp.eq.s32.totalorder %v9729_v22, %v14535_v63 }
 0x7b8   : > { %8645 = vmatmul.msk.f32.gmra.mxu1 %vm6412_vm9, %v14940_v2  ;;  %vm6436_vm9 = vcmp.eq.s32.totalorder %v9729_v22, %v14544_v41 }
 0x7bc   : > { %v6034_v42 = vpop.f32.mrf.mxu2 }
 0x7bd   : > { %v6035_v12 = vadd.f32 %v6034_v42, %v5921_v47  ;;  %v5924_v30 = vpop.f32.mrf.mxu1  ;;  %v6615_v6 = vpop.f32.mrf.mxu0 }
 0x7bf   : > { %8533 = vmatmul.msk.f32.gmra.mxu3 %vm1310_vm10, %v6035_v12  ;;  %8629 = vmatmul.msk.f32.gmra.mxu0 %vm6443_vm11, %v14940_v2  ;;  %vm6438_vm11 = vcmp.eq.s32.totalorder %v9729_v22, %v14555_v16 }
 0x7c0   : > { %8646 = vmatmul.msk.f32.gmra.mxu1 %vm6414_vm12, %v14940_v2  ;;  %vm6440_vm12 = vcmp.eq.s32.totalorder %v9729_v22, %v14566_v28 }
 0x7c4   : > { %v6037_v18 = vpop.f32.mrf.mxu2 }
 0x7c5   : > { %v6038_v46 = vadd.f32 %v6037_v18, %v5924_v30  ;;  %v5927_v34 = vpop.f32.mrf.mxu1 }
 0x7c7   : > { %8534 = vmatmul.msk.f32.gmra.mxu3 %vm1310_vm10, %v6038_v46  ;;  %8630 = vmatmul.msk.f32.gmra.mxu0 %vm6445_vm13, %v14940_v2  ;;  %vm6442_vm13 = vcmp.eq.s32.totalorder %v9729_v22, %v14575_v32 }
 0x7c8   : > { %8647 = vmatmul.msk.f32.gmra.mxu1 %vm6416_vm14, %v14940_v2  ;;  %vm6444_vm14 = vcmp.eq.s32.totalorder %v9729_v22, %v14584_v21 }
 0x7cc   : > { %v6040_v47 = vpop.f32.mrf.mxu2 }
 0x7cd   : > { %v6041_v42 = vadd.f32 %v6040_v47, %v5927_v34  ;;  %v6707_v12 = vpop.f32.mrf.mxu1 }
 0x7ce   : > { %v6708_v30 = vadd.f32 %v6707_v12, %v14515_v27  ;;  %v6618_v27 = vpop.f32.mrf.mxu0 }
 0x7cf   : > { %8535 = vmatmul.msk.f32.gmra.mxu3 %vm1310_vm10, %v6041_v42  ;;  %8631 = vmatmul.msk.f32.gmra.mxu0 %vm6447_vm15, %v14940_v2  ;;  %vm6446_vm15 = vcmp.eq.s32.totalorder %v9729_v22, %v14593_v59 }
 0x7d0   : > { %8648 = vmatmul.msk.f32.gmra.mxu1 %vm6418_vm0, %v14940_v2  ;;  %8668 = vmatmul.msk.f32.vlgmr.msra.gmra.mxu2 %vm1310_vm10, %v6708_v30  ;;  %vm6448_vm0 = vcmp.eq.s32.totalorder %v9729_v22, %v14602_v62 }
 0x7d5   : > { %v6710_v18 = vpop.f32.mrf.mxu1 }
 0x7d6   : > { %v6711_v46 = vadd.f32 %v6710_v18, %v14531_v0  ;;  %v6621_v56 = vpop.f32.mrf.mxu0 }
 0x7d8   : > { %8649 = vmatmul.msk.f32.gmra.mxu1 %vm6420_vm1, %v14940_v2  ;;  %8669 = vmatmul.msk.f32.gmra.mxu2 %vm1310_vm10, %v6711_v46 }
 0x7dd   : > { %v6713_v61 = vpop.f32.mrf.mxu1 }
 0x7de   : > { %v6714_v25 = vadd.f32 %v6713_v61, %v14546_v43  ;;  %v6624_v11 = vpop.f32.mrf.mxu0 }
 0x7e0   : > { %8650 = vmatmul.msk.f32.gmra.mxu1 %vm6422_vm2, %v14940_v2  ;;  %8670 = vmatmul.msk.f32.gmra.mxu2 %vm1310_vm10, %v6714_v25 }
 0x7e5   : > { %v6716_v34 = vpop.f32.mrf.mxu1 }
 0x7e6   : > { %v6717_v0 = vadd.f32 %v6716_v34, %v14561_v36  ;;  %v6627_v50 = vpop.f32.mrf.mxu0 }
 0x7e8   : > { %8651 = vmatmul.msk.f32.gmra.mxu1 %vm6424_vm3, %v14940_v2  ;;  %8671 = vmatmul.msk.f32.gmra.mxu2 %vm1310_vm10, %v6717_v0 }
 0x7ed   : > { %v6719_v43 = vpop.f32.mrf.mxu1 }
 0x7ee   : > { %v6720_v47 = vadd.f32 %v6719_v43, %v6606_v4  ;;  %v6630_v39 = vpop.f32.mrf.mxu0 }
 0x7f0   : > { %8652 = vmatmul.msk.f32.gmra.mxu1 %vm6426_vm4, %v14940_v2  ;;  %8672 = vmatmul.msk.f32.gmra.mxu2 %vm1310_vm10, %v6720_v47 }
 0x7f5   : > { %v6722_v42 = vpop.f32.mrf.mxu1 }
 0x7f6   : > { %v6723_v36 = vadd.f32 %v6722_v42, %v6609_v58  ;;  %v6633_v26 = vpop.f32.mrf.mxu0 }
 0x7f8   : > { %8653 = vmatmul.msk.f32.gmra.mxu1 %vm6428_vm5, %v14940_v2  ;;  %8673 = vmatmul.msk.f32.gmra.mxu2 %vm1310_vm10, %v6723_v36 }
 0x7fd   : > { %v6725_v12 = vpop.f32.mrf.mxu1 }
 0x7fe   : > { %v6726_v4 = vadd.f32 %v6725_v12, %v6612_v20  ;;  %v6636_v55 = vpop.f32.mrf.mxu0 }
 0x800   : > { %8654 = vmatmul.msk.f32.gmra.mxu1 %vm6430_vm6, %v14940_v2  ;;  %8674 = vmatmul.msk.f32.gmra.mxu2 %vm1310_vm10, %v6726_v4 }
 0x805   : > { %v6728_v53 = vpop.f32.mrf.mxu1 }
 0x806   : > { %v6729_v30 = vadd.f32 %v6728_v53, %v6615_v6  ;;  %v6639_v63 = vpop.f32.mrf.mxu0 }
 0x808   : > { %8655 = vmatmul.msk.f32.gmra.mxu1 %vm6432_vm7, %v14940_v2  ;;  %8675 = vmatmul.msk.f32.gmra.mxu2 %vm1310_vm10, %v6729_v30 }
 0x80d   : > { %v6731_v58 = vpop.f32.mrf.mxu1 }
 0x80e   : > { %v6732_v18 = vadd.f32 %v6731_v58, %v6618_v27  ;;  %v6642_v16 = vpop.f32.mrf.mxu0 }
 0x810   : > { %8656 = vmatmul.msk.f32.gmra.mxu1 %vm6434_vm8, %v14940_v2  ;;  %8676 = vmatmul.msk.f32.gmra.mxu2 %vm1310_vm10, %v6732_v18 }
 0x815   : > { %v6734_v20 = vpop.f32.mrf.mxu1 }
 0x816   : > { %v6735_v6 = vadd.f32 %v6734_v20, %v6621_v56  ;;  %v6645_v28 = vpop.f32.mrf.mxu0 }
 0x818   : > { %8657 = vmatmul.msk.f32.gmra.mxu1 %vm6436_vm9, %v14940_v2  ;;  %8677 = vmatmul.msk.f32.gmra.mxu2 %vm1310_vm10, %v6735_v6 }
 0x81d   : > { %v6737_v46 = vpop.f32.mrf.mxu1 }
 0x81e   : > { %v6738_v61 = vadd.f32 %v6737_v46, %v6624_v11  ;;  %v6648_v32 = vpop.f32.mrf.mxu0 }
 0x820   : > { %8658 = vmatmul.msk.f32.gmra.mxu1 %vm6438_vm11, %v14940_v2  ;;  %8678 = vmatmul.msk.f32.gmra.mxu2 %vm1310_vm10, %v6738_v61 }
 0x825   : > { %v6740_v25 = vpop.f32.mrf.mxu1 }
 0x826   : > { %v6741_v27 = vadd.f32 %v6740_v25, %v6627_v50  ;;  %v6651_v21 = vpop.f32.mrf.mxu0 }
 0x828   : > { %8659 = vmatmul.msk.f32.gmra.mxu1 %vm6440_vm12, %v14940_v2  ;;  %8679 = vmatmul.msk.f32.gmra.mxu2 %vm1310_vm10, %v6741_v27 }
 0x82d   : > { %v6743_v41 = vpop.f32.mrf.mxu1 }
 0x82e   : > { %v6744_v34 = vadd.f32 %v6743_v41, %v6630_v39  ;;  %v6654_v39 = vpop.f32.mrf.mxu0 }
 0x830   : > { %8660 = vmatmul.msk.f32.gmra.mxu1 %vm6442_vm13, %v14940_v2  ;;  %8680 = vmatmul.msk.f32.gmra.mxu2 %vm1310_vm10, %v6744_v34 }
 0x835   : > { %v6746_v0 = vpop.f32.mrf.mxu1 }
 0x836   : > { %v6747_v56 = vadd.f32 %v6746_v0, %v6633_v26  ;;  %v6185_v26 = vpop.f32.mrf.mxu3 }
 0x838   : > { %8661 = vmatmul.msk.f32.gmra.mxu1 %vm6444_vm14, %v14940_v2  ;;  %8681 = vmatmul.msk.f32.gmra.mxu2 %vm1310_vm10, %v6747_v56 }
 0x83d   : > { %v6749_v43 = vpop.f32.mrf.mxu1 }
 0x83e   : > { %v6750_v47 = vadd.f32 %v6749_v43, %v6636_v55 }
 0x840   : > { %8662 = vmatmul.msk.f32.gmra.mxu1 %vm6446_vm15, %v14940_v2  ;;  %8682 = vmatmul.msk.f32.gmra.mxu2 %vm1310_vm10, %v6750_v47 }
 0x845   : > { %v6752_v11 = vpop.f32.mrf.mxu1 }
 0x846   : > { %v6753_v42 = vadd.f32 %v6752_v11, %v6639_v63  ;;  %v6188_v63 = vpop.f32.mrf.mxu3 }
 0x848   : > { %8663 = vmatmul.msk.f32.gmra.mxu1 %vm6448_vm0, %v14940_v2  ;;  %8683 = vmatmul.msk.f32.gmra.mxu2 %vm1310_vm10, %v6753_v42 }
 0x84d   : > { %v6755_v36 = vpop.f32.mrf.mxu1 }
 0x84e   : > { %v6756_v50 = vadd.f32 %v6755_v36, %v6642_v16 }
 0x850   : > { %8684 = vmatmul.msk.f32.gmra.mxu2 %vm1310_vm10, %v6756_v50 }
 0x853   : > { %v6921_v59 = vpop.f32.mrf.mxu2 }
 0x854   : > { %v7017_v12 = vadd.f32 %v6921_v59, %v14420_v33  ;;  %v6657_v33 = vpop.f32.mrf.mxu0 }
 0x855   : > { %v6758_v4 = vpop.f32.mrf.mxu1 }
 0x856   : > { %v7049_v53 = vmax.f32 %v7017_v12, 0.0  ;;  %v6759_v30 = vadd.f32 %v6758_v4, %v6645_v28 }
 0x858   : > { %7081 = vst [vmem:[%s14681_s9] sm:$0xff] %v7049_v53  ;;  %8685 = vmatmul.msk.f32.gmra.mxu2 %vm1310_vm10, %v6759_v30 }
 0x85b   : > { %v6924_v22 = vpop.f32.mrf.mxu2 }
 0x85c   : > { %v7018_v2 = vadd.f32 %v6924_v22, %v14436_v37  ;;  %v6660_v37 = vpop.f32.mrf.mxu0 }
 0x85d   : > { %v6761_v62 = vpop.f32.mrf.mxu1 }
 0x85e   : > { %v7050_v58 = vmax.f32 %v7018_v2, 0.0  ;;  %v6762_v18 = vadd.f32 %v6761_v62, %v6648_v32 }
 0x860   : > { %7082 = vst [vmem:[%s14681_s9 + $0x8] sm:$0xff] %v7050_v58  ;;  %8686 = vmatmul.msk.f32.gmra.mxu2 %vm1310_vm10, %v6762_v18  ;;  %v15425_v58 = vld [vmem:[#allocation54_spill] sm:$0xff] }
 0x861   : > { %v4745_v18 = vadd.f32 %v13811_v52, %v15425_v58 }
 0x863   : > { %v6927_v20 = vpop.f32.mrf.mxu2 }
 0x864   : > { %v7019_v6 = vadd.f32 %v6927_v20, %v14452_v23  ;;  %v6191_v23 = vpop.f32.mrf.mxu3  ;;  %v6663_v28 = vpop.f32.mrf.mxu0 }
 0x865   : > { %v6764_v55 = vpop.f32.mrf.mxu1 }
 0x866   : > { %v7051_v46 = vmax.f32 %v7019_v6, 0.0  ;;  %v6765_v61 = vadd.f32 %v6764_v55, %v6651_v21 }
 0x868   : > { %7083 = vst [vmem:[%s14681_s9 + $0x10] sm:$0xff] %v7051_v46  ;;  %8687 = vmatmul.msk.f32.gmra.mxu2 %vm1310_vm10, %v6765_v61 }
 0x86b   : > { %v6930_v25 = vpop.f32.mrf.mxu2 }
 0x86c   : > { %v7020_v27 = vadd.f32 %v6930_v25, %v14469_v31  ;;  %v6194_v21 = vpop.f32.mrf.mxu3  ;;  %v6666_v59 = vpop.f32.mrf.mxu0 }
 0x86d   : > { %v6767_v41 = vpop.f32.mrf.mxu1 }
 0x86e   : > { %v7052_v34 = vmax.f32 %v7020_v27, 0.0  ;;  %v6768_v16 = vadd.f32 %v6767_v41, %v6654_v39  ;;  %v15426_v27 = vld [vmem:[#allocation33_spill] sm:$0xff] }
 0x870   : > { %7084 = vst [vmem:[%s14681_s9 + $0x18] sm:$0xff] %v7052_v34  ;;  %8688 = vmatmul.msk.f32.gmra.mxu2 %vm1310_vm10, %v6768_v16 }
 0x873   : > { %v6933_v0 = vpop.f32.mrf.mxu2 }
 0x874   : > { %v7021_v56 = vadd.f32 %v6933_v0, %v14485_v49  ;;  %v6197_v39 = vpop.f32.mrf.mxu3 }
 0x875   : > { %v6770_v43 = vpop.f32.mrf.mxu1 }
 0x876   : > { %v7053_v47 = vmax.f32 %v7021_v56, 0.0  ;;  %v6771_v32 = vadd.f32 %v6770_v43, %v6657_v33  ;;  %v15427_v43 = vld [vmem:[#allocation9_spill] sm:$0xff] }
 0x878   : > { %7085 = vst [vmem:[%s14681_s9 + $0x20] sm:$0xff] %v7053_v47  ;;  %8689 = vmatmul.msk.f32.gmra.mxu2 %vm1310_vm10, %v6771_v32  ;;  %v4747_v47 = vadd.f32 %v13833_v19, %v15427_v43  ;;  %v15432_v43 = vld [vmem:[#allocation62_spill] sm:$0xff] }
 0x87b   : > { %v6936_v31 = vpop.f32.mrf.mxu2 }
 0x87c   : > { %v7022_v11 = vadd.f32 %v6936_v31, %v14501_v13  ;;  %v6669_v13 = vpop.f32.mrf.mxu0  ;;  %v6200_v55 = vpop.f32.mrf.mxu3  ;;  %v5507_v31 = vadd.f32 %v14097_v45, %v4747_v47  ;;  %v4752_v47 = vadd.f32 %v13882_v8, %v15432_v43 }
 0x87d   : > { %v6773_v42 = vpop.f32.mrf.mxu1 }
 0x87e   : > { %v7054_v36 = vmax.f32 %v7022_v11, 0.0  ;;  %v6774_v50 = vadd.f32 %v6773_v42, %v6660_v37 }
 0x880   : > { %7086 = vst [vmem:[%s14681_s9 + $0x28] sm:$0xff] %v7054_v36  ;;  %8690 = vmatmul.msk.f32.gmra.mxu2 %vm1310_vm10, %v6774_v50  ;;  %v15428_v36 = vld [vmem:[#allocation35_spill] sm:$0xff] }
 0x881   : > { %v4748_v50 = vadd.f32 %v13844_v44, %v15428_v36  ;;  %v15434_v36 = vld [vmem:[#allocation41_spill] sm:$0xff] }
 0x883   : > { %v6939_v49 = vpop.f32.mrf.mxu2 }
 0x884   : > { %v7023_v12 = vadd.f32 %v6939_v49, %v14517_v51  ;;  %v5505_v51 = vadd.f32 %v14060_v3, %v4745_v18  ;;  %v6672_v46 = vpop.f32.mrf.mxu0  ;;  %v6203_v0 = vpop.f32.mrf.mxu3 }
 0x885   : > { %v6776_v4 = vpop.f32.mrf.mxu1 }
 0x886   : > { %v7055_v53 = vmax.f32 %v7023_v12, 0.0  ;;  %v6777_v30 = vadd.f32 %v6776_v4, %v6663_v28  ;;  %v6265_v6 = vadd.f32 %v6185_v26, %v5505_v51  ;;  %v5508_v4 = vadd.f32 %v14133_v17, %v4748_v50  ;;  %v15430_v51 = vld [vmem:[#allocation36_spill] sm:$0xff] }
 0x888   : > { %7087 = vst [vmem:[%s14681_s9 + $0x30] sm:$0xff] %v7055_v53  ;;  %8691 = vmatmul.msk.f32.gmra.mxu2 %vm1310_vm10, %v6777_v30  ;;  %v6268_v45 = vadd.f32 %v6194_v21, %v5508_v4 }
 0x88b   : > { %v6942_v22 = vpop.f32.mrf.mxu2 }
 0x88c   : > { %v7024_v2 = vadd.f32 %v6942_v22, %v14533_v54  ;;  %v4746_v54 = vadd.f32 %v13822_v10, %v15426_v27  ;;  %v6675_v56 = vpop.f32.mrf.mxu0 }
 0x88d   : > { %v6779_v62 = vpop.f32.mrf.mxu1 }
 0x88e   : > { %v7056_v33 = vmax.f32 %v7024_v2, 0.0  ;;  %v6780_v20 = vadd.f32 %v6779_v62, %v6666_v59  ;;  %v5506_v34 = vadd.f32 %v14080_v35, %v4746_v54  ;;  %v6267_v35 = vadd.f32 %v6191_v23, %v5507_v31  ;;  %v6206_v59 = vpop.f32.mrf.mxu3 }
 0x890   : > { %7088 = vst [vmem:[%s14681_s9 + $0x38] sm:$0xff] %v7056_v33  ;;  %8692 = vmatmul.msk.f32.gmra.mxu2 %vm1310_vm10, %v6780_v20  ;;  %v6266_v3 = vadd.f32 %v6188_v63, %v5506_v34 }
 0x893   : > { %v6945_v61 = vpop.f32.mrf.mxu2 }
 0x894   : > { %v7025_v37 = vadd.f32 %v6945_v61, %v6265_v6  ;;  %v6678_v19 = vpop.f32.mrf.mxu0  ;;  %v4750_v6 = vadd.f32 %v13864_v38, %v15430_v51  ;;  %v15441_v51 = vld [vmem:[#allocation106_spill] sm:$0xff] }
 0x895   : > { %v6782_v25 = vpop.f32.mrf.mxu1 }
 0x896   : > { %v7057_v41 = vmax.f32 %v7025_v37, 0.0  ;;  %v6783_v52 = vadd.f32 %v6782_v25, %v6669_v13  ;;  %v15429_v13 = vld [vmem:[#allocation11_spill] sm:$0xff]  ;;  %v6209_v58 = vpop.f32.mrf.mxu3  ;;  %v5510_v61 = vadd.f32 %v14170_v1, %v4750_v6  ;;  %v15442_v6 = vld [vmem:[#allocation117_spill] sm:$0xff] }
 0x897   : > { %v4749_v22 = vadd.f32 %v13853_v14, %v15429_v13 }
 0x898   : > { %7089 = vst [vmem:[%s14681_s9 + $0x40] sm:$0xff] %v7057_v41  ;;  %8693 = vmatmul.msk.f32.gmra.mxu2 %vm1310_vm10, %v6783_v52  ;;  %v15431_v41 = vld [vmem:[#allocation103_spill] sm:$0xff] }
 0x899   : > { %v5509_v62 = vadd.f32 %v14152_v24, %v4749_v22  ;;  %v6270_v24 = vadd.f32 %v6200_v55, %v5510_v61  ;;  %v4751_v52 = vadd.f32 %v13873_v9, %v15431_v41  ;;  %v15438_v22 = vld [vmem:[#allocation105_spill] sm:$0xff]  ;;  %v15445_v41 = vld [vmem:[#allocation118_spill] sm:$0xff] }
 0x89a   : > { %v15443_v61 = vld [vmem:[#allocation25_spill] sm:$0xff] }
 0x89b   : > { %v6948_v16 = vpop.f32.mrf.mxu2  ;;  %v6269_v18 = vadd.f32 %v6197_v39, %v5509_v62 }
 0x89c   : > { %v7026_v26 = vadd.f32 %v6948_v16, %v6266_v3  ;;  %v6681_v17 = vpop.f32.mrf.mxu0  ;;  %v5511_v3 = vadd.f32 %v14187_v7, %v4751_v52 }
 0x89d   : > { %v6785_v28 = vpop.f32.mrf.mxu1 }
 0x89e   : > { %v7058_v32 = vmax.f32 %v7026_v26, 0.0  ;;  %v6786_v10 = vadd.f32 %v6785_v28, %v6672_v46  ;;  %v6212_v37 = vpop.f32.mrf.mxu3  ;;  %v6271_v1 = vadd.f32 %v6203_v0, %v5511_v3 }
 0x8a0   : > { %7090 = vst [vmem:[%s14681_s9 + $0x48] sm:$0xff] %v7058_v32  ;;  %8694 = vmatmul.msk.f32.gmra.mxu2 %vm1310_vm10, %v6786_v10  ;;  %v5512_v10 = vadd.f32 %v14205_v60, %v4752_v47  ;;  %v15435_v60 = vld [vmem:[#allocation47_spill] sm:$0xff] }
 0x8a2   : > { %v6272_v7 = vadd.f32 %v6206_v59, %v5512_v10 }
 0x8a3   : > { %v6951_v11 = vpop.f32.mrf.mxu2 }
 0x8a4   : > { %v7027_v42 = vadd.f32 %v6951_v11, %v6267_v35  ;;  %v6684_v25 = vpop.f32.mrf.mxu0  ;;  %v15433_v35 = vld [vmem:[#allocation104_spill] sm:$0xff] }
 0x8a5   : > { %v6788_v63 = vpop.f32.mrf.mxu1  ;;  %v4753_v11 = vadd.f32 %v13897_v5, %v15433_v35  ;;  %v15451_v35 = vld [vmem:[#allocation39_spill] sm:$0xff] }
 0x8a6   : > { %v7059_v49 = vmax.f32 %v7027_v42, 0.0  ;;  %v6789_v12 = vadd.f32 %v6788_v63, %v6675_v56  ;;  %v6215_v26 = vpop.f32.mrf.mxu3 }
 0x8a7   : > { %v5513_v50 = vadd.f32 %v15434_v36, %v4753_v11 }
 0x8a8   : > { %7091 = vst [vmem:[%s14681_s9 + $0x50] sm:$0xff] %v7059_v49  ;;  %8695 = vmatmul.msk.f32.gmra.mxu2 %vm1310_vm10, %v6789_v12 }
 0x8a9   : > { %v6273_v8 = vadd.f32 %v6209_v58, %v5513_v50 }
 0x8ab   : > { %v6954_v53 = vpop.f32.mrf.mxu2 }
 0x8ac   : > { %v7028_v30 = vadd.f32 %v6954_v53, %v6268_v45  ;;  %v6687_v56 = vpop.f32.mrf.mxu0  ;;  %v15437_v53 = vld [vmem:[#allocation5_spill] sm:$0xff] }
 0x8ad   : > { %v6791_v23 = vpop.f32.mrf.mxu1 }
 0x8ae   : > { %v7060_v2 = vmax.f32 %v7028_v30, 0.0  ;;  %v6792_v44 = vadd.f32 %v6791_v23, %v6678_v19  ;;  %v6218_v63 = vpop.f32.mrf.mxu3  ;;  %v15436_v19 = vld [vmem:[#allocation116_spill] sm:$0xff] }
 0x8af   : > { %v4754_v4 = vadd.f32 %v15436_v19, %v15435_v60  ;;  %v15453_v60 = vld [vmem:[#allocation17_spill] sm:$0xff]  ;;  %v15454_v19 = vld [vmem:[#allocation120_spill] sm:$0xff] }
 0x8b0   : > { %7092 = vst [vmem:[%s14681_s9 + $0x58] sm:$0xff] %v7060_v2  ;;  %8696 = vmatmul.msk.f32.gmra.mxu2 %vm1310_vm10, %v6792_v44  ;;  %v15439_v2 = vld [vmem:[#allocation78_spill] sm:$0xff] }
 0x8b1   : > { %v5514_v59 = vadd.f32 %v15437_v53, %v4754_v4  ;;  %v4755_v44 = vadd.f32 %v15439_v2, %v15438_v22  ;;  %v4760_v4 = vadd.f32 %v15454_v19, %v15453_v60  ;;  %v15455_v53 = vld [vmem:[#allocation8_spill] sm:$0xff]  ;;  %v15456_v22 = vld [vmem:[#allocation110_spill] sm:$0xff]  ;;  %v15457_v2 = vld [vmem:[#allocation65_spill] sm:$0xff] }
 0x8b3   : > { %v6957_v33 = vpop.f32.mrf.mxu2  ;;  %v6274_v23 = vadd.f32 %v6212_v37, %v5514_v59  ;;  %v5520_v59 = vadd.f32 %v15455_v53, %v4760_v4 }
 0x8b4   : > { %v7029_v20 = vadd.f32 %v6957_v33, %v6269_v18 }
 0x8b5   : > { %v6794_v21 = vpop.f32.mrf.mxu1 }
 0x8b6   : > { %v7061_v46 = vmax.f32 %v7029_v20, 0.0  ;;  %v6795_v14 = vadd.f32 %v6794_v21, %v6681_v17  ;;  %v6221_v30 = vpop.f32.mrf.mxu3  ;;  %v15440_v17 = vld [vmem:[#allocation84_spill] sm:$0xff] }
 0x8b7   : > { %v5515_v58 = vadd.f32 %v15440_v17, %v4755_v44  ;;  %v4761_v44 = vadd.f32 %v15457_v2, %v15456_v22  ;;  %v15458_v17 = vld [vmem:[#allocation43_spill] sm:$0xff] }
 0x8b8   : > { %7093 = vst [vmem:[%s14681_s9 + $0x60] sm:$0xff] %v7061_v46  ;;  %8697 = vmatmul.msk.f32.gmra.mxu2 %vm1310_vm10, %v6795_v14  ;;  %v4756_v46 = vadd.f32 %v15442_v6, %v15441_v51  ;;  %v15459_v51 = vld [vmem:[#allocation97_spill] sm:$0xff] }
 0x8b9   : > { %v6275_v18 = vadd.f32 %v6215_v26, %v5515_v58  ;;  %v5521_v58 = vadd.f32 %v15458_v17, %v4761_v44  ;;  %v15460_v6 = vld [vmem:[#allocation121_spill] sm:$0xff] }
 0x8bb   : > { %v6960_v27 = vpop.f32.mrf.mxu2 }
 0x8bc   : > { %v7030_v54 = vadd.f32 %v6960_v27, %v6270_v24  ;;  %v5516_v24 = vadd.f32 %v15443_v61, %v4756_v46  ;;  %v4762_v46 = vadd.f32 %v15460_v6, %v15459_v51  ;;  %v15461_v61 = vld [vmem:[#allocation64_spill] sm:$0xff] }
 0x8bd   : > { %v6797_v39 = vpop.f32.mrf.mxu1 }
 0x8be   : > { %v7062_v34 = vmax.f32 %v7030_v54, 0.0  ;;  %v6798_v38 = vadd.f32 %v6797_v39, %v6684_v25  ;;  %v6224_v33 = vpop.f32.mrf.mxu3  ;;  %v6276_v37 = vadd.f32 %v6218_v63, %v5516_v24  ;;  %v15444_v39 = vld [vmem:[#allocation57_spill] sm:$0xff]  ;;  %v15452_v63 = vld [vmem:[#allocation87_spill] sm:$0xff]  ;;  %v5522_v24 = vadd.f32 %v15461_v61, %v4762_v46 }
 0x8bf   : > { %v4757_v52 = vadd.f32 %v15445_v41, %v15444_v39  ;;  %v15463_v39 = vld [vmem:[#allocation80_spill] sm:$0xff] }
 0x8c0   : > { %7094 = vst [vmem:[%s14681_s9 + $0x68] sm:$0xff] %v7062_v34  ;;  %8698 = vmatmul.msk.f32.gmra.mxu2 %vm1310_vm10, %v6798_v38  ;;  %v15446_v38 = vld [vmem:[#allocation42_spill] sm:$0xff] }
 0x8c1   : > { %v5517_v3 = vadd.f32 %v15446_v38, %v4757_v52  ;;  %v15464_v38 = vld [vmem:[#allocation100_spill] sm:$0xff] }
 0x8c3   : > { %v6963_v16 = vpop.f32.mrf.mxu2 }
 0x8c4   : > { %v7031_v55 = vadd.f32 %v6963_v16, %v6271_v1  ;;  %v6277_v1 = vadd.f32 %v6221_v30, %v5517_v3 }
 0x8c5   : > { %v6800_v28 = vpop.f32.mrf.mxu1 }
 0x8c6   : > { %v7063_v32 = vmax.f32 %v7031_v55, 0.0  ;;  %v6801_v9 = vadd.f32 %v6800_v28, %v6687_v56  ;;  %v6227_v54 = vpop.f32.mrf.mxu3  ;;  %v15447_v55 = vld [vmem:[#allocation37_spill] sm:$0xff]  ;;  %v15448_v56 = vld [vmem:[#allocation66_spill] sm:$0xff] }
 0x8c7   : > { %v4758_v28 = vadd.f32 %v15448_v56, %v15447_v55  ;;  %v15465_v55 = vld [vmem:[#allocation112_spill] sm:$0xff]  ;;  %v15466_v56 = vld [vmem:[#allocation69_spill] sm:$0xff] }
 0x8c8   : > { %7095 = vst [vmem:[%s14681_s9 + $0x70] sm:$0xff] %v7063_v32  ;;  %8699 = vmatmul.msk.f32.gmra.mxu2 %vm1310_vm10, %v6801_v9  ;;  %v15449_v32 = vld [vmem:[#allocation19_spill] sm:$0xff] }
 0x8c9   : > { %v5518_v9 = vadd.f32 %v15449_v32, %v4758_v28  ;;  %v4764_v28 = vadd.f32 %v15466_v56, %v15465_v55 }
 0x8cb   : > { %v6966_v31 = vpop.f32.mrf.mxu2  ;;  %v6278_v10 = vadd.f32 %v6224_v33, %v5518_v9 }
 0x8cc   : > { %v7032_v0 = vadd.f32 %v6966_v31, %v6272_v7 }
 0x8ce   : > { %v7064_v42 = vmax.f32 %v7032_v0, 0.0  ;;  %v6230_v47 = vpop.f32.mrf.mxu3  ;;  %v15450_v0 = vld [vmem:[#allocation109_spill] sm:$0xff] }
 0x8cf   : > { %v4759_v11 = vadd.f32 %v15451_v35, %v15450_v0  ;;  %v6280_v30 = vadd.f32 %v6230_v47, %v5520_v59  ;;  %v5524_v47 = vadd.f32 %v14414_v15, %v4764_v28  ;;  %v15468_v0 = vld [vmem:[#allocation40_spill] sm:$0xff]  ;;  %v15470_v15 = vld [vmem:[#allocation53_spill] sm:$0xff] }
 0x8d0   : > { %7096 = vst [vmem:[%s14681_s9 + $0x78] sm:$0xff] %v7064_v42 }
 0x8d1   : > { %v5519_v36 = vadd.f32 %v15452_v63, %v4759_v11 }
 0x8d3   : > { %v6969_v49 = vpop.f32.mrf.mxu2 }
 0x8d4   : > { %v7033_v12 = vadd.f32 %v6969_v49, %v6273_v8  ;;  %v6279_v8 = vadd.f32 %v6227_v54, %v5519_v36  ;;  %v15462_v54 = vld [vmem:[#allocation111_spill] sm:$0xff] }
 0x8d5   : > { %v4763_v41 = vadd.f32 %v15463_v39, %v15462_v54 }
 0x8d6   : > { %v7065_v45 = vmax.f32 %v7033_v12, 0.0  ;;  %v6233_v50 = vpop.f32.mrf.mxu3 }
 0x8d7   : > { %v5523_v3 = vadd.f32 %v15464_v38, %v4763_v41 }
 0x8d8   : > { %7097 = vst [vmem:[%s14681_s9 + $0x80] sm:$0xff] %v7065_v45 }
 0x8db   : > { %v6972_v5 = vpop.f32.mrf.mxu2 }
 0x8dc   : > { %v7034_v13 = vadd.f32 %v6972_v5, %v6274_v23 }
 0x8de   : > { %v7066_v62 = vmax.f32 %v7034_v13, 0.0  ;;  %v6236_v23 = vpop.f32.mrf.mxu3 }
 0x8e0   : > { %7098 = vst [vmem:[%s14681_s9 + $0x88] sm:$0xff] %v7066_v62 }
 0x8e3   : > { %v6975_v20 = vpop.f32.mrf.mxu2 }
 0x8e4   : > { %v7035_v21 = vadd.f32 %v6975_v20, %v6275_v18  ;;  %v6281_v18 = vadd.f32 %v6233_v50, %v5521_v58 }
 0x8e6   : > { %v7067_v14 = vmax.f32 %v7035_v21, 0.0  ;;  %v6239_v21 = vpop.f32.mrf.mxu3 }
 0x8e8   : > { %7099 = vst [vmem:[%s14681_s9 + $0x90] sm:$0xff] %v7067_v14 }
 0x8eb   : > { %v6978_v25 = vpop.f32.mrf.mxu2 }
 0x8ec   : > { %v7036_v27 = vadd.f32 %v6978_v25, %v6276_v37  ;;  %v6282_v37 = vadd.f32 %v6236_v23, %v5522_v24 }
 0x8ee   : > { %v7068_v34 = vmax.f32 %v7036_v27, 0.0 }
 0x8f0   : > { %7100 = vst [vmem:[%s14681_s9 + $0x98] sm:$0xff] %v7068_v34  ;;  %v6242_v34 = vpop.f32.mrf.mxu3 }
 0x8f1   : > { %v6284_v9 = vadd.f32 %v6242_v34, %v5524_v47 }
 0x8f3   : > { %v6981_v16 = vpop.f32.mrf.mxu2 }
 0x8f4   : > { %v7037_v26 = vadd.f32 %v6981_v16, %v6277_v1  ;;  %v6283_v1 = vadd.f32 %v6239_v21, %v5523_v3 }
 0x8f6   : > { %v7069_v43 = vmax.f32 %v7037_v26, 0.0 }
 0x8f8   : > { %7101 = vst [vmem:[%s14681_s9 + $0xa0] sm:$0xff] %v7069_v43  ;;  %v6245_v32 = vpop.f32.mrf.mxu3 }
 0x8fb   : > { %v6984_v7 = vpop.f32.mrf.mxu2 }
 0x8fc   : > { %v7038_v31 = vadd.f32 %v6984_v7, %v6278_v10 }
 0x8fe   : > { %v7070_v42 = vmax.f32 %v7038_v31, 0.0  ;;  %v15467_v31 = vld [vmem:[#allocation61_spill] sm:$0xff] }
 0x8ff   : > { %v4765_v35 = vadd.f32 %v15468_v0, %v15467_v31 }
 0x900   : > { %7102 = vst [vmem:[%s14681_s9 + $0xa8] sm:$0xff] %v7070_v42  ;;  %v6248_v36 = vpop.f32.mrf.mxu3 }
 0x901   : > { %v5525_v42 = vadd.f32 %v14434_v29, %v4765_v35  ;;  %v15471_v29 = vld [vmem:[#allocation115_spill] sm:$0xff] }
 0x903   : > { %v6987_v49 = vpop.f32.mrf.mxu2  ;;  %v6285_v63 = vadd.f32 %v6245_v32, %v5525_v42 }
 0x904   : > { %v7039_v12 = vadd.f32 %v6987_v49, %v6279_v8  ;;  %v15469_v49 = vld [vmem:[#allocation38_spill] sm:$0xff] }
 0x906   : > { %v7071_v45 = vmax.f32 %v7039_v12, 0.0  ;;  %v4766_v12 = vadd.f32 %v15470_v15, %v15469_v49 }
 0x908   : > { %7103 = vst [vmem:[%s14681_s9 + $0xb0] sm:$0xff] %v7071_v45  ;;  %v5526_v19 = vadd.f32 %v14450_v57, %v4766_v12  ;;  %v6251_v59 = vpop.f32.mrf.mxu3  ;;  %v15473_v57 = vld [vmem:[#allocation21_spill] sm:$0xff] }
 0x90a   : > { %v6286_v4 = vadd.f32 %v6248_v36, %v5526_v19 }
 0x90b   : > { %v6990_v5 = vpop.f32.mrf.mxu2 }
 0x90c   : > { %v7040_v13 = vadd.f32 %v6990_v5, %v6280_v30  ;;  %v15472_v30 = vld [vmem:[#allocation82_spill] sm:$0xff] }
 0x90d   : > { %v4767_v23 = vadd.f32 %v15472_v30, %v15471_v29 }
 0x90e   : > { %v7072_v62 = vmax.f32 %v7040_v13, 0.0 }
 0x90f   : > { %v5527_v13 = vadd.f32 %v14473_v40, %v4767_v23 }
 0x910   : > { %7104 = vst [vmem:[%s14681_s9 + $0xb8] sm:$0xff] %v7072_v62  ;;  %v15474_v62 = vld [vmem:[#allocation72_spill] sm:$0xff] }
 0x911   : > { %v6287_v22 = vadd.f32 %v6251_v59, %v5527_v13  ;;  %v4768_v17 = vadd.f32 %v15474_v62, %v15473_v57 }
 0x913   : > { %v6993_v33 = vpop.f32.mrf.mxu2 }
 0x914   : > { %v7041_v20 = vadd.f32 %v6993_v33, %v6281_v18  ;;  %v6254_v18 = vpop.f32.mrf.mxu3  ;;  %v5528_v33 = vadd.f32 %v14495_v48, %v4768_v17 }
 0x916   : > { %v7073_v14 = vmax.f32 %v7041_v20, 0.0  ;;  %v6288_v40 = vadd.f32 %v6254_v18, %v5528_v33 }
 0x918   : > { %7105 = vst [vmem:[%s14681_s9 + $0xc0] sm:$0xff] %v7073_v14 }
 0x91b   : > { %v6996_v25 = vpop.f32.mrf.mxu2 }
 0x91c   : > { %v7042_v27 = vadd.f32 %v6996_v25, %v6282_v37 }
 0x91e   : > { %v7074_v52 = vmax.f32 %v7042_v27, 0.0 }
 0x920   : > { %7106 = vst [vmem:[%s14681_s9 + $0xc8] sm:$0xff] %v7074_v52 }
 0x923   : > { %v6999_v16 = vpop.f32.mrf.mxu2 }
 0x924   : > { %v7043_v26 = vadd.f32 %v6999_v16, %v6283_v1 }
 0x926   : > { %v7075_v43 = vmax.f32 %v7043_v26, 0.0 }
 0x928   : > { %7107 = vst [vmem:[%s14681_s9 + $0xd0] sm:$0xff] %v7075_v43 }
 0x92b   : > { %v7002_v10 = vpop.f32.mrf.mxu2 }
 0x92c   : > { %v7044_v7 = vadd.f32 %v7002_v10, %v6284_v9 }
 0x92e   : > { %v7076_v11 = vmax.f32 %v7044_v7, 0.0 }
 0x930   : > { %7108 = vst [vmem:[%s14681_s9 + $0xd8] sm:$0xff] %v7076_v11 }
 0x933   : > { %v7005_v50 = vpop.f32.mrf.mxu2 }
 0x934   : > { %v7045_v8 = vadd.f32 %v7005_v50, %v6285_v63 }
 0x936   : > { %v7077_v60 = vmax.f32 %v7045_v8, 0.0 }
 0x938   : > { %7109 = vst [vmem:[%s14681_s9 + $0xe0] sm:$0xff] %v7077_v60 }
 0x93b   : > { %v7008_v45 = vpop.f32.mrf.mxu2 }
 0x93c   : > { %v7046_v53 = vadd.f32 %v7008_v45, %v6286_v4 }
 0x93e   : > { %v7078_v5 = vmax.f32 %v7046_v53, 0.0 }
 0x940   : > { %7110 = vst [vmem:[%s14681_s9 + $0xe8] sm:$0xff] %v7078_v5 }
 0x943   : > { %v7011_v2 = vpop.f32.mrf.mxu2 }
 0x944   : > { %v7047_v44 = vadd.f32 %v7011_v2, %v6287_v22 }
 0x946   : > { %v7079_v58 = vmax.f32 %v7047_v44, 0.0 }
 0x948   : > { %7111 = vst [vmem:[%s14681_s9 + $0xf0] sm:$0xff] %v7079_v58 }
 0x94b   : > { %v7014_v20 = vpop.f32.mrf.mxu2 }
 0x94c   : > { %v7048_v21 = vadd.f32 %v7014_v20, %v6288_v40 }
 0x94e   : > { %v7080_v51 = vmax.f32 %v7048_v21, 0.0 }
 0x950   : > { %7112 = vst [vmem:[%s14681_s9 + $0xf8] sm:$0xff] %v7080_v51 }
 0x951   : > { %9172 = shalt.err (!%p9169_p5)
}
 0x952   : > { %s9235_s6 = smov 128   ;;  %s9236_s7 = smov 8  }
 0x953   : > { %8755 = dma.vmem_to_hbm [thread:$0]  (%p9297_p4), %s7129_s21, 4096, %s7131_s23, %s7114_s15, %s9235_s6, %s9235_s6, %s9236_s7  }
 0x954 PF: > { %p8761_p6 = scmp.ge.s32.totalorder %s9223_s17, 2  ;;  %s7145_s8 = sand.u32 1, %s9203_s12  }
 0x955   : > { %s7146_s9 = scalar_lea.sflag [#allocation3], %s7145_s8 }
 0x956   : > { %p8758_p7 = pnand %p8761_p6, %p9304_p8 }
 0x958   : > { %p8759_p9 = pneg %p8758_p7 }
 0x95a   : > { %9198 = dma.done.wait (%p8759_p9), %s7146_s9, 4096  }
 0x95b   : > { %9200 = vsyncadd (%p8759_p9), %s7146_s9, 4294963200  ;;  %s16_s17 = sadd.s32 1, %s9223_s17   ;;  %s15475_s12 = smov %s9207_s13 }
 0x95c   : > { %p13_p10 = scmp.ge.s32.totalorder %s16_s17, 4   ;;  %s15476_s13 = smov %s9211_s14 }
 0x95d   : > { %s15477_s14 = smov %s9310_s25  ;;  %s15478_s15 = smov %s9219_s16 }
 0x95e   : > { %s15479_s16 = smov %s15481_s20  ;;  %15 = sbr.rel (!%p13_p10) target bundleno = 4 (0x4), region = 78 }
 0x963   :  { %7152 = vsyncpa [#allocation3], 1 }
 0x964   :  { %7154 = vsyncpa [#allocation3 + $0x1], 1 }

</bundles_post_ra>
